<compile_context>
chip_gen: v5e
topology: v5e:2x2
jax: 0.10.0
libtpu: 0.0.40
codegen_flags: <defaults>
</compile_context>

<pallas_src>
import functools

import jax
import jax.numpy as jnp
import numpy as np
from jax.experimental import pallas as pl
from jax.experimental.pallas import tpu as pltpu

_C = 128                          # channel padding target (one lane / MXU tile)
_VMEM_LIMIT = 48 * 1024 * 1024    # fits v7x's 64 MiB physical VMEM with headroom


# ----------------------------- in-kernel helpers -----------------------------------

def _relu_pool(acc, b, h, w, c):
    """acc: (b*h*w, c) f32 conv accumulator -> ReLU -> 2x2/stride-2 max-pool.
    Returns (b, h//2, w//2, c). Lane dim c stays dense throughout."""
    y = jnp.maximum(acc, 0.0).reshape(b, h // 2, 2, w, c)
    m = jnp.maximum(y[:, :, 0], y[:, :, 1])            # pool over window rows -> (b, h/2, w, c)
    m = m.reshape(b, h // 2, w // 2, 2 * c)            # pair adjacent cols along lanes
    return jnp.maximum(m[..., :c], m[..., c:])         # pool over window cols -> (b, h/2, w/2, c)


def _conv3x3_taps(xp_ref, w_ref, b, h, w, c):
    """3x3 'same' conv read from a zero-halo-padded VMEM ref xp_ref (b, h+2, w+2, c)
    with weights w_ref (9, c, c), k = ky*3 + kx.  Nine shifted MXU matmuls are
    accumulated in compiler-managed values (no scratch read-modify-write).  The W
    (sublane) shift is hoisted per dx so only two unaligned-slice relayouts occur."""
    acc = None
    for dx in range(3):
        x_dx = xp_ref[:, :, dx:dx + w, :]              # (b, h+2, w, c)
        for dy in range(3):
            xk = x_dx[:, dy:dy + h, :, :].reshape(b * h * w, c)
            contrib = jnp.dot(xk, w_ref[dy * 3 + dx],
                              preferred_element_type=jnp.float32)
            acc = contrib if acc is None else acc + contrib
    return acc                                         # (b*h*w, c) f32


# ------------------------------ fused whole-net kernel -----------------------------

def _fused_net_kernel(x1_ref, w1_ref, w2_ref, w3_ref,
                      fw1_ref, fb1_ref, fw2_ref, fb2_ref,
                      o_ref, xp2_ref, xp3_ref, *, bimg):
    """One batch-block per grid step.

    x1_ref : (bimg, 1024, 32)  im2col'ed conv1 input (K=27 padded to 32)
    w1_ref : (32, 128)         conv1 weight as a K=32 matmul
    w2_ref : (9, 128, 128)     conv2 3x3 weights (zero-padded channels)
    w3_ref : (9, 128, 128)     conv3 3x3 weights
    fw1_ref: (2048, 512)       fc1 weights, columns in NHWC-flatten order
    fb1_ref: (1, 512)          fc1 bias
    fw2_ref: (512, 128)        fc2 weights, output padded 10 -> 128
    fb2_ref: (1, 128)          fc2 bias (padded)
    o_ref  : (bimg, 1, 128)    padded logits
    xp2_ref: (bimg, 18, 18, 128) VMEM scratch, halo-padded conv2 input
    xp3_ref: (bimg, 10, 10, 128) VMEM scratch, halo-padded conv3 input
    """
    # Zero the halo scratch (borders never get written by the interior stores; the
    # interior is overwritten below). Cheap VPU work vs. the per-step matmuls.
    xp2_ref[...] = jnp.zeros_like(xp2_ref)
    xp3_ref[...] = jnp.zeros_like(xp3_ref)

    # ---- conv1: single K=32 matmul, then ReLU + pool -> (bimg, 16, 16, 128) ----
    x1 = x1_ref[...].reshape(bimg * 1024, 32)
    acc1 = jnp.dot(x1, w1_ref[...], preferred_element_type=jnp.float32)
    p1 = _relu_pool(acc1, bimg, 32, 32, _C)
    xp2_ref[:, 1:17, 1:17, :] = p1                     # write interior of halo buffer

    # ---- conv2: 9 shifted matmuls, ReLU + pool -> (bimg, 8, 8, 128) ----
    acc2 = _conv3x3_taps(xp2_ref, w2_ref, bimg, 16, 16, _C)
    p2 = _relu_pool(acc2, bimg, 16, 16, _C)
    xp3_ref[:, 1:9, 1:9, :] = p2

    # ---- conv3: 9 shifted matmuls, ReLU + pool -> (bimg, 4, 4, 128) ----
    acc3 = _conv3x3_taps(xp3_ref, w3_ref, bimg, 8, 8, _C)
    p3 = _relu_pool(acc3, bimg, 8, 8, _C)

    # ---- fc1 + ReLU + fc2 (output lane-padded to 128) ----
    flat = p3.reshape(bimg, 16, _C).reshape(bimg, 16 * _C)     # NHWC flatten
    h = jnp.dot(flat, fw1_ref[...], preferred_element_type=jnp.float32) + fb1_ref[...]
    h = jnp.maximum(h, 0.0)
    logits = jnp.dot(h, fw2_ref[...], preferred_element_type=jnp.float32) + fb2_ref[...]
    o_ref[:, 0, :] = logits.astype(o_ref.dtype)


def _pick_block_batch(batch):
    # Biggest batch-block (best MXU M for conv3) while keeping >= 2 grid steps so
    # v7x's two TensorCores both get work (dimension_semantics=("parallel",)).
    for cand in (4, 2):
        if batch % cand == 0 and batch // cand >= 2:
            return cand
    return 1


def cifar10_fused(x1, pp):
    """x1: (B, 1024, 32) im2col'ed conv1 input. Returns padded logits (B, 1, 128)."""
    B = x1.shape[0]
    bimg = _pick_block_batch(B)
    kernel = functools.partial(_fused_net_kernel, bimg=bimg)
    return pl.pallas_call(
        kernel,
        out_shape=jax.ShapeDtypeStruct((B, 1, _C), jnp.float32),
        grid=(B // bimg,),
        in_specs=[
            pl.BlockSpec((bimg, 1024, 32), lambda b: (b, 0, 0)),
            pl.BlockSpec((32, _C), lambda b: (0, 0)),
            pl.BlockSpec((9, _C, _C), lambda b: (0, 0, 0)),
            pl.BlockSpec((9, _C, _C), lambda b: (0, 0, 0)),
            pl.BlockSpec((16 * _C, 512), lambda b: (0, 0)),
            pl.BlockSpec((1, 512), lambda b: (0, 0)),
            pl.BlockSpec((512, _C), lambda b: (0, 0)),
            pl.BlockSpec((1, _C), lambda b: (0, 0)),
        ],
        out_specs=pl.BlockSpec((bimg, 1, _C), lambda b: (b, 0, 0)),
        scratch_shapes=[
            pltpu.VMEM((bimg, 18, 18, _C), jnp.float32),   # conv2 halo-padded input
            pltpu.VMEM((bimg, 10, 10, _C), jnp.float32),   # conv3 halo-padded input
        ],
        compiler_params=pltpu.CompilerParams(
            dimension_semantics=("parallel",),
            vmem_limit_bytes=_VMEM_LIMIT),
    )(x1, pp["conv1_w"], pp["conv2_w9"], pp["conv3_w9"],
      pp["fc1_w_t"], pp["fc1_b"], pp["fc2_w_t"], pp["fc2_b"])


# --------------------------------- weight prep --------------------------------------
# Called ONCE outside the jitted forward (review: hoist weight transposes/pads).

def _prep_conv_w9(w_oihw, cin_pad, cout_pad):
    """PyTorch OIHW -> (9, Cin_pad, Cout_pad), k = ky*3 + kx; padded channels are zero."""
    co, ci = w_oihw.shape[0], w_oihw.shape[1]
    w = jnp.transpose(w_oihw, (2, 3, 1, 0)).reshape(9, ci, co)
    return jnp.pad(w, ((0, 0), (0, cin_pad - ci), (0, cout_pad - co)))


def prepare_params(params):
    # conv1 as one (27 -> 32, 128) im2col matmul weight; row index = (ky*3+kx)*3 + ci.
    w1 = jnp.transpose(params["conv1_w"], (2, 3, 1, 0)).reshape(27, 32)
    w1 = jnp.pad(w1, ((0, 5), (0, _C - 32)))
    # fc1 was defined against an NCHW (C,H,W) flatten; permute its input columns once
    # so the in-kernel NHWC flatten feeds it directly (no hot-path transpose).
    fw1 = params["fc1_w"].reshape(512, 128, 4, 4).transpose(0, 2, 3, 1).reshape(512, 2048)
    # fc2 output padded 10 -> 128 for lane-dense stores; sliced back outside.
    fw2 = jnp.pad(params["fc2_w"].T, ((0, 0), (0, _C - 10)))
    fb2 = jnp.pad(params["fc2_b"], ((0, _C - 10),))
    return {
        "conv1_w": w1,                                        # (32, 128)
        "conv2_w9": _prep_conv_w9(params["conv2_w"], _C, _C),  # (9, 128, 128)
        "conv3_w9": _prep_conv_w9(params["conv3_w"], _C, _C),  # (9, 128, 128)
        "fc1_w_t": fw1.T,                                     # (2048, 512)
        "fc1_b": params["fc1_b"][None, :],                    # (1, 512)
        "fc2_w_t": fw2,                                       # (512, 128)
        "fc2_b": fb2[None, :],                                # (1, 128)
    }


# ------------------------------------ forward ---------------------------------------

def cifar10_forward(x_nchw, pp):
    """Full CIFAR10Model forward; pp = prepare_params(raw_params), prepared once."""
    B = x_nchw.shape[0]
    # Cheap one-time im2col of the 3-channel input (~108 KB/image) so conv1 runs as
    # a single K=32 MXU matmul inside the fused kernel instead of nine K=3 matmuls.
    x = jnp.transpose(x_nchw, (0, 2, 3, 1))                         # NCHW -> NHWC
    xp = jnp.pad(x, ((0, 0), (1, 1), (1, 1), (0, 0)))               # (B, 34, 34, 3)
    cols = [xp[:, dy:dy + 32, dx:dx + 32, :] for dy in range(3) for dx in range(3)]
    patches = jnp.concatenate(cols, axis=-1)                        # (B, 32, 32, 27)
    patches = jnp.pad(patches, ((0, 0), (0, 0), (0, 0), (0, 5)))    # K 27 -> 32
    x1 = patches.reshape(B, 32 * 32, 32)
    logits = cifar10_fused(x1, pp)                                  # (B, 1, 128)
    return logits[:, 0, :10]                                        # drop lane padding


# --------------------------- reference (pure JAX / XLA) ------------------------------

def reference_forward(x_nchw, params):
    x = x_nchw
    for wkey in ("conv1_w", "conv2_w", "conv3_w"):
        x = jax.lax.conv_general_dilated(
            x, params[wkey], window_strides=(1, 1),
            padding=((1, 1), (1, 1)),
            dimension_numbers=("NCHW", "OIHW", "NCHW"))
        x = jnp.maximum(x, 0.0)
        B, C, H, W = x.shape
        x = x.reshape(B, C, H // 2, 2, W // 2, 2).max(axis=(3, 5))
    B = x.shape[0]
    x = x.reshape(B, -1)
    x = jnp.maximum(x @ params["fc1_w"].T + params["fc1_b"], 0.0)
    x = x @ params["fc2_w"].T + params["fc2_b"]
    return x


# -------------------------------------- main -----------------------------------------

def init_params(key):
    ks = jax.random.split(key, 7)
    def nrm(k, shape, fan_in):
        return (jax.random.normal(k, shape, jnp.float32) / np.sqrt(fan_in)).astype(jnp.float32)
    return {
        "conv1_w": nrm(ks[0], (32, 3, 3, 3), 3 * 9),              # PyTorch OIHW, bias=False
        "conv2_w": nrm(ks[1], (64, 32, 3, 3), 32 * 9),
        "conv3_w": nrm(ks[2], (128, 64, 3, 3), 64 * 9),
        "fc1_w": nrm(ks[3], (512, 128 * 4 * 4), 128 * 4 * 4),      # PyTorch (out, in)
        "fc1_b": nrm(ks[4], (512,), 128 * 4 * 4),
        "fc2_w": nrm(ks[5], (10, 512), 512),
        "fc2_b": nrm(ks[6], (10,), 512),
    }


if __name__ == "__main__":
    key = jax.random.PRNGKey(0)
    kx, kp = jax.random.split(key)
    # CIFAR-10 geometry is required by the fixed 128*4*4 flatten: (B, 3, 32, 32).
    x = jax.random.normal(kx, (2, 3, 32, 32), jnp.float32)
    params = init_params(kp)

    pp = prepare_params(params)                     # one-time weight prep (hoisted)
    fwd = jax.jit(cifar10_forward)
    out = jax.block_until_ready(fwd(x, pp))
    assert out.shape == (2, 10), out.shape

    ref = jax.block_until_ready(jax.jit(reference_forward)(x, params))
    if not np.allclose(np.asarray(out), np.asarray(ref), rtol=1e-3, atol=1e-3):
        raise AssertionError(
            f"mismatch vs reference, max abs diff = "
            f"{np.abs(np.asarray(out) - np.asarray(ref)).max()}")

    print("KERNEL_OK")
</pallas_src>

<mosaic_0001>
module attributes {stable_mosaic.version = 11 : i64} {
  func.func @_fused_net_kernel(%arg0: i32, %arg1: memref<1x1024x32xf32, #tpu.memory_space<vmem>>, %arg2: memref<32x128xf32, #tpu.memory_space<vmem>>, %arg3: memref<9x128x128xf32, #tpu.memory_space<vmem>>, %arg4: memref<9x128x128xf32, #tpu.memory_space<vmem>>, %arg5: memref<2048x512xf32, #tpu.memory_space<vmem>>, %arg6: memref<1x512xf32, #tpu.memory_space<vmem>>, %arg7: memref<512x128xf32, #tpu.memory_space<vmem>>, %arg8: memref<1x128xf32, #tpu.memory_space<vmem>>, %arg9: memref<1x1x128xf32, #tpu.memory_space<vmem>>, %arg10: memref<1x18x18x128xf32, #tpu.memory_space<vmem>>, %arg11: memref<1x10x10x128xf32, #tpu.memory_space<vmem>>) attributes {dimension_semantics = [#tpu.dimension_semantics<parallel>], iteration_bounds = array<i64: 2>, scalar_prefetch = 0 : i64, scratch_operands = 2 : i64, tpu.core_type = #tpu.core_type<tc>, window_params = [{transform_indices = @transform_0, window_bounds = array<i64: 1, 1024, 32>}, {pipeline_mode = #tpu.pipeline_mode<synchronous>, transform_indices = @transform_1, window_bounds = array<i64: 32, 128>}, {pipeline_mode = #tpu.pipeline_mode<synchronous>, transform_indices = @transform_2, window_bounds = array<i64: 9, 128, 128>}, {pipeline_mode = #tpu.pipeline_mode<synchronous>, transform_indices = @transform_3, window_bounds = array<i64: 9, 128, 128>}, {pipeline_mode = #tpu.pipeline_mode<synchronous>, transform_indices = @transform_4, window_bounds = array<i64: 2048, 512>}, {pipeline_mode = #tpu.pipeline_mode<synchronous>, transform_indices = @transform_5, window_bounds = array<i64: 1, 512>}, {pipeline_mode = #tpu.pipeline_mode<synchronous>, transform_indices = @transform_6, window_bounds = array<i64: 512, 128>}, {pipeline_mode = #tpu.pipeline_mode<synchronous>, transform_indices = @transform_7, window_bounds = array<i64: 1, 128>}, {transform_indices = @transform_8, window_bounds = array<i64: 1, 1, 128>}]} {
    %cst = arith.constant 0.000000e+00 : f32
    %0 = vector.broadcast %cst : f32 to vector<1x18x18x128xf32>
    %c0 = arith.constant 0 : index
    %c0_0 = arith.constant 0 : index
    %c0_1 = arith.constant 0 : index
    %c0_2 = arith.constant 0 : index
    %1 = vector.load %arg10[%c0, %c0_0, %c0_1, %c0_2] : memref<1x18x18x128xf32, #tpu.memory_space<vmem>>, vector<1x18x18x128xf32>
    tpu.vector_store %arg10[%c0, %c0_0, %c0_1, %c0_2], %0 {strides = array<i32>} : memref<1x18x18x128xf32, #tpu.memory_space<vmem>>, vector<1x18x18x128xf32>,
    %cst_3 = arith.constant 0.000000e+00 : f32
    %2 = vector.broadcast %cst_3 : f32 to vector<1x10x10x128xf32>
    %c0_4 = arith.constant 0 : index
    %c0_5 = arith.constant 0 : index
    %c0_6 = arith.constant 0 : index
    %c0_7 = arith.constant 0 : index
    %3 = vector.load %arg11[%c0_4, %c0_5, %c0_6, %c0_7] : memref<1x10x10x128xf32, #tpu.memory_space<vmem>>, vector<1x10x10x128xf32>
    tpu.vector_store %arg11[%c0_4, %c0_5, %c0_6, %c0_7], %2 {strides = array<i32>} : memref<1x10x10x128xf32, #tpu.memory_space<vmem>>, vector<1x10x10x128xf32>,
    %c0_8 = arith.constant 0 : index
    %c0_9 = arith.constant 0 : index
    %c0_10 = arith.constant 0 : index
    %4 = vector.load %arg1[%c0_8, %c0_9, %c0_10] : memref<1x1024x32xf32, #tpu.memory_space<vmem>>, vector<1x1024x32xf32>
    %5 = vector.shape_cast %4 : vector<1x1024x32xf32> to vector<1024x32xf32>
    %c0_11 = arith.constant 0 : index
    %c0_12 = arith.constant 0 : index
    %6 = vector.load %arg2[%c0_11, %c0_12] : memref<32x128xf32, #tpu.memory_space<vmem>>, vector<32x128xf32>
    %cst_13 = arith.constant dense<0.000000e+00> : vector<1024x128xf32>
    %7 = tpu.matmul %5, %6, %cst_13 {dimension_numbers = #tpu.dot_dimension_numbers<[1], [0], [0], [1], [0, 0, 1, 1], [], []>} : vector<1024x32xf32>, vector<32x128xf32>, vector<1024x128xf32> -> vector<1024x128xf32>
    %cst_14 = arith.constant 0.000000e+00 : f32
    %8 = vector.broadcast %cst_14 : f32 to vector<1024x128xf32>
    %9 = arith.maximumf %7, %8 : vector<1024x128xf32>
    %10 = vector.shape_cast %9 : vector<1024x128xf32> to vector<1x16x2x32x128xf32>
    %11 = vector.extract_strided_slice %10 {offsets = [0, 0, 0, 0, 0], sizes = [1, 16, 1, 32, 128], strides = [1, 1, 1, 1, 1]} : vector<1x16x2x32x128xf32> to vector<1x16x1x32x128xf32>
    %12 = vector.shape_cast %11 : vector<1x16x1x32x128xf32> to vector<1x16x32x128xf32>
    %13 = vector.extract_strided_slice %10 {offsets = [0, 0, 1, 0, 0], sizes = [1, 16, 1, 32, 128], strides = [1, 1, 1, 1, 1]} : vector<1x16x2x32x128xf32> to vector<1x16x1x32x128xf32>
    %14 = vector.shape_cast %13 : vector<1x16x1x32x128xf32> to vector<1x16x32x128xf32>
    %15 = arith.maximumf %12, %14 : vector<1x16x32x128xf32>
    %16 = vector.shape_cast %15 : vector<1x16x32x128xf32> to vector<1x16x16x256xf32>
    %17 = vector.extract_strided_slice %16 {offsets = [0, 0, 0, 0], sizes = [1, 16, 16, 128], strides = [1, 1, 1, 1]} : vector<1x16x16x256xf32> to vector<1x16x16x128xf32>
    %18 = vector.extract_strided_slice %16 {offsets = [0, 0, 0, 128], sizes = [1, 16, 16, 128], strides = [1, 1, 1, 1]} : vector<1x16x16x256xf32> to vector<1x16x16x128xf32>
    %19 = arith.maximumf %17, %18 : vector<1x16x16x128xf32>
    %c0_15 = arith.constant 0 : index
    %c1 = arith.constant 1 : index
    %c1_16 = arith.constant 1 : index
    %c0_17 = arith.constant 0 : index
    %20 = vector.load %arg10[%c0_15, %c1, %c1_16, %c0_17] : memref<1x18x18x128xf32, #tpu.memory_space<vmem>>, vector<1x16x16x128xf32>
    tpu.vector_store %arg10[%c0_15, %c1, %c1_16, %c0_17], %19 {strides = array<i32>} : memref<1x18x18x128xf32, #tpu.memory_space<vmem>>, vector<1x16x16x128xf32>,
    %c0_18 = arith.constant 0 : index
    %c0_19 = arith.constant 0 : index
    %c0_20 = arith.constant 0 : index
    %c0_21 = arith.constant 0 : index
    %21 = vector.load %arg10[%c0_18, %c0_19, %c0_20, %c0_21] : memref<1x18x18x128xf32, #tpu.memory_space<vmem>>, vector<1x18x16x128xf32>
    %22 = vector.extract_strided_slice %21 {offsets = [0, 0, 0, 0], sizes = [1, 16, 16, 128], strides = [1, 1, 1, 1]} : vector<1x18x16x128xf32> to vector<1x16x16x128xf32>
    %23 = vector.shape_cast %22 : vector<1x16x16x128xf32> to vector<256x128xf32>
    %c0_22 = arith.constant 0 : index
    %c0_23 = arith.constant 0 : index
    %c0_24 = arith.constant 0 : index
    %24 = vector.load %arg3[%c0_22, %c0_23, %c0_24] : memref<9x128x128xf32, #tpu.memory_space<vmem>>, vector<1x128x128xf32>
    %25 = vector.shape_cast %24 : vector<1x128x128xf32> to vector<128x128xf32>
    %cst_25 = arith.constant dense<0.000000e+00> : vector<256x128xf32>
    %26 = tpu.matmul %23, %25, %cst_25 {dimension_numbers = #tpu.dot_dimension_numbers<[1], [0], [0], [1], [0, 0, 1, 1], [], []>} : vector<256x128xf32>, vector<128x128xf32>, vector<256x128xf32> -> vector<256x128xf32>
    %27 = vector.extract_strided_slice %21 {offsets = [0, 1, 0, 0], sizes = [1, 16, 16, 128], strides = [1, 1, 1, 1]} : vector<1x18x16x128xf32> to vector<1x16x16x128xf32>
    %28 = vector.shape_cast %27 : vector<1x16x16x128xf32> to vector<256x128xf32>
    %c3 = arith.constant 3 : index
    %c0_26 = arith.constant 0 : index
    %c0_27 = arith.constant 0 : index
    %29 = vector.load %arg3[%c3, %c0_26, %c0_27] : memref<9x128x128xf32, #tpu.memory_space<vmem>>, vector<1x128x128xf32>
    %30 = vector.shape_cast %29 : vector<1x128x128xf32> to vector<128x128xf32>
    %cst_28 = arith.constant dense<0.000000e+00> : vector<256x128xf32>
    %31 = tpu.matmul %28, %30, %cst_28 {dimension_numbers = #tpu.dot_dimension_numbers<[1], [0], [0], [1], [0, 0, 1, 1], [], []>} : vector<256x128xf32>, vector<128x128xf32>, vector<256x128xf32> -> vector<256x128xf32>
    %32 = arith.addf %26, %31 : vector<256x128xf32>
    %33 = vector.extract_strided_slice %21 {offsets = [0, 2, 0, 0], sizes = [1, 16, 16, 128], strides = [1, 1, 1, 1]} : vector<1x18x16x128xf32> to vector<1x16x16x128xf32>
    %34 = vector.shape_cast %33 : vector<1x16x16x128xf32> to vector<256x128xf32>
    %c6 = arith.constant 6 : index
    %c0_29 = arith.constant 0 : index
    %c0_30 = arith.constant 0 : index
    %35 = vector.load %arg3[%c6, %c0_29, %c0_30] : memref<9x128x128xf32, #tpu.memory_space<vmem>>, vector<1x128x128xf32>
    %36 = vector.shape_cast %35 : vector<1x128x128xf32> to vector<128x128xf32>
    %cst_31 = arith.constant dense<0.000000e+00> : vector<256x128xf32>
    %37 = tpu.matmul %34, %36, %cst_31 {dimension_numbers = #tpu.dot_dimension_numbers<[1], [0], [0], [1], [0, 0, 1, 1], [], []>} : vector<256x128xf32>, vector<128x128xf32>, vector<256x128xf32> -> vector<256x128xf32>
    %38 = arith.addf %32, %37 : vector<256x128xf32>
    %c0_32 = arith.constant 0 : index
    %c0_33 = arith.constant 0 : index
    %c1_34 = arith.constant 1 : index
    %c0_35 = arith.constant 0 : index
    %39 = vector.load %arg10[%c0_32, %c0_33, %c1_34, %c0_35] : memref<1x18x18x128xf32, #tpu.memory_space<vmem>>, vector<1x18x16x128xf32>
    %40 = vector.extract_strided_slice %39 {offsets = [0, 0, 0, 0], sizes = [1, 16, 16, 128], strides = [1, 1, 1, 1]} : vector<1x18x16x128xf32> to vector<1x16x16x128xf32>
    %41 = vector.shape_cast %40 : vector<1x16x16x128xf32> to vector<256x128xf32>
    %c1_36 = arith.constant 1 : index
    %c0_37 = arith.constant 0 : index
    %c0_38 = arith.constant 0 : index
    %42 = vector.load %arg3[%c1_36, %c0_37, %c0_38] : memref<9x128x128xf32, #tpu.memory_space<vmem>>, vector<1x128x128xf32>
    %43 = vector.shape_cast %42 : vector<1x128x128xf32> to vector<128x128xf32>
    %cst_39 = arith.constant dense<0.000000e+00> : vector<256x128xf32>
    %44 = tpu.matmul %41, %43, %cst_39 {dimension_numbers = #tpu.dot_dimension_numbers<[1], [0], [0], [1], [0, 0, 1, 1], [], []>} : vector<256x128xf32>, vector<128x128xf32>, vector<256x128xf32> -> vector<256x128xf32>
    %45 = arith.addf %38, %44 : vector<256x128xf32>
    %46 = vector.extract_strided_slice %39 {offsets = [0, 1, 0, 0], sizes = [1, 16, 16, 128], strides = [1, 1, 1, 1]} : vector<1x18x16x128xf32> to vector<1x16x16x128xf32>
    %47 = vector.shape_cast %46 : vector<1x16x16x128xf32> to vector<256x128xf32>
    %c4 = arith.constant 4 : index
    %c0_40 = arith.constant 0 : index
    %c0_41 = arith.constant 0 : index
    %48 = vector.load %arg3[%c4, %c0_40, %c0_41] : memref<9x128x128xf32, #tpu.memory_space<vmem>>, vector<1x128x128xf32>
    %49 = vector.shape_cast %48 : vector<1x128x128xf32> to vector<128x128xf32>
    %cst_42 = arith.constant dense<0.000000e+00> : vector<256x128xf32>
    %50 = tpu.matmul %47, %49, %cst_42 {dimension_numbers = #tpu.dot_dimension_numbers<[1], [0], [0], [1], [0, 0, 1, 1], [], []>} : vector<256x128xf32>, vector<128x128xf32>, vector<256x128xf32> -> vector<256x128xf32>
    %51 = arith.addf %45, %50 : vector<256x128xf32>
    %52 = vector.extract_strided_slice %39 {offsets = [0, 2, 0, 0], sizes = [1, 16, 16, 128], strides = [1, 1, 1, 1]} : vector<1x18x16x128xf32> to vector<1x16x16x128xf32>
    %53 = vector.shape_cast %52 : vector<1x16x16x128xf32> to vector<256x128xf32>
    %c7 = arith.constant 7 : index
    %c0_43 = arith.constant 0 : index
    %c0_44 = arith.constant 0 : index
    %54 = vector.load %arg3[%c7, %c0_43, %c0_44] : memref<9x128x128xf32, #tpu.memory_space<vmem>>, vector<1x128x128xf32>
    %55 = vector.shape_cast %54 : vector<1x128x128xf32> to vector<128x128xf32>
    %cst_45 = arith.constant dense<0.000000e+00> : vector<256x128xf32>
    %56 = tpu.matmul %53, %55, %cst_45 {dimension_numbers = #tpu.dot_dimension_numbers<[1], [0], [0], [1], [0, 0, 1, 1], [], []>} : vector<256x128xf32>, vector<128x128xf32>, vector<256x128xf32> -> vector<256x128xf32>
    %57 = arith.addf %51, %56 : vector<256x128xf32>
    %c0_46 = arith.constant 0 : index
    %c0_47 = arith.constant 0 : index
    %c2 = arith.constant 2 : index
    %c0_48 = arith.constant 0 : index
    %58 = vector.load %arg10[%c0_46, %c0_47, %c2, %c0_48] : memref<1x18x18x128xf32, #tpu.memory_space<vmem>>, vector<1x18x16x128xf32>
    %59 = vector.extract_strided_slice %58 {offsets = [0, 0, 0, 0], sizes = [1, 16, 16, 128], strides = [1, 1, 1, 1]} : vector<1x18x16x128xf32> to vector<1x16x16x128xf32>
    %60 = vector.shape_cast %59 : vector<1x16x16x128xf32> to vector<256x128xf32>
    %c2_49 = arith.constant 2 : index
    %c0_50 = arith.constant 0 : index
    %c0_51 = arith.constant 0 : index
    %61 = vector.load %arg3[%c2_49, %c0_50, %c0_51] : memref<9x128x128xf32, #tpu.memory_space<vmem>>, vector<1x128x128xf32>
    %62 = vector.shape_cast %61 : vector<1x128x128xf32> to vector<128x128xf32>
    %cst_52 = arith.constant dense<0.000000e+00> : vector<256x128xf32>
    %63 = tpu.matmul %60, %62, %cst_52 {dimension_numbers = #tpu.dot_dimension_numbers<[1], [0], [0], [1], [0, 0, 1, 1], [], []>} : vector<256x128xf32>, vector<128x128xf32>, vector<256x128xf32> -> vector<256x128xf32>
    %64 = arith.addf %57, %63 : vector<256x128xf32>
    %65 = vector.extract_strided_slice %58 {offsets = [0, 1, 0, 0], sizes = [1, 16, 16, 128], strides = [1, 1, 1, 1]} : vector<1x18x16x128xf32> to vector<1x16x16x128xf32>
    %66 = vector.shape_cast %65 : vector<1x16x16x128xf32> to vector<256x128xf32>
    %c5 = arith.constant 5 : index
    %c0_53 = arith.constant 0 : index
    %c0_54 = arith.constant 0 : index
    %67 = vector.load %arg3[%c5, %c0_53, %c0_54] : memref<9x128x128xf32, #tpu.memory_space<vmem>>, vector<1x128x128xf32>
    %68 = vector.shape_cast %67 : vector<1x128x128xf32> to vector<128x128xf32>
    %cst_55 = arith.constant dense<0.000000e+00> : vector<256x128xf32>
    %69 = tpu.matmul %66, %68, %cst_55 {dimension_numbers = #tpu.dot_dimension_numbers<[1], [0], [0], [1], [0, 0, 1, 1], [], []>} : vector<256x128xf32>, vector<128x128xf32>, vector<256x128xf32> -> vector<256x128xf32>
    %70 = arith.addf %64, %69 : vector<256x128xf32>
    %71 = vector.extract_strided_slice %58 {offsets = [0, 2, 0, 0], sizes = [1, 16, 16, 128], strides = [1, 1, 1, 1]} : vector<1x18x16x128xf32> to vector<1x16x16x128xf32>
    %72 = vector.shape_cast %71 : vector<1x16x16x128xf32> to vector<256x128xf32>
    %c8 = arith.constant 8 : index
    %c0_56 = arith.constant 0 : index
    %c0_57 = arith.constant 0 : index
    %73 = vector.load %arg3[%c8, %c0_56, %c0_57] : memref<9x128x128xf32, #tpu.memory_space<vmem>>, vector<1x128x128xf32>
    %74 = vector.shape_cast %73 : vector<1x128x128xf32> to vector<128x128xf32>
    %cst_58 = arith.constant dense<0.000000e+00> : vector<256x128xf32>
    %75 = tpu.matmul %72, %74, %cst_58 {dimension_numbers = #tpu.dot_dimension_numbers<[1], [0], [0], [1], [0, 0, 1, 1], [], []>} : vector<256x128xf32>, vector<128x128xf32>, vector<256x128xf32> -> vector<256x128xf32>
    %76 = arith.addf %70, %75 : vector<256x128xf32>
    %cst_59 = arith.constant 0.000000e+00 : f32
    %77 = vector.broadcast %cst_59 : f32 to vector<256x128xf32>
    %78 = arith.maximumf %76, %77 : vector<256x128xf32>
    %79 = vector.shape_cast %78 : vector<256x128xf32> to vector<1x8x2x16x128xf32>
    %80 = vector.extract_strided_slice %79 {offsets = [0, 0, 0, 0, 0], sizes = [1, 8, 1, 16, 128], strides = [1, 1, 1, 1, 1]} : vector<1x8x2x16x128xf32> to vector<1x8x1x16x128xf32>
    %81 = vector.shape_cast %80 : vector<1x8x1x16x128xf32> to vector<1x8x16x128xf32>
    %82 = vector.extract_strided_slice %79 {offsets = [0, 0, 1, 0, 0], sizes = [1, 8, 1, 16, 128], strides = [1, 1, 1, 1, 1]} : vector<1x8x2x16x128xf32> to vector<1x8x1x16x128xf32>
    %83 = vector.shape_cast %82 : vector<1x8x1x16x128xf32> to vector<1x8x16x128xf32>
    %84 = arith.maximumf %81, %83 : vector<1x8x16x128xf32>
    %85 = vector.shape_cast %84 : vector<1x8x16x128xf32> to vector<1x8x8x256xf32>
    %86 = vector.extract_strided_slice %85 {offsets = [0, 0, 0, 0], sizes = [1, 8, 8, 128], strides = [1, 1, 1, 1]} : vector<1x8x8x256xf32> to vector<1x8x8x128xf32>
    %87 = vector.extract_strided_slice %85 {offsets = [0, 0, 0, 128], sizes = [1, 8, 8, 128], strides = [1, 1, 1, 1]} : vector<1x8x8x256xf32> to vector<1x8x8x128xf32>
    %88 = arith.maximumf %86, %87 : vector<1x8x8x128xf32>
    %c0_60 = arith.constant 0 : index
    %c1_61 = arith.constant 1 : index
    %c1_62 = arith.constant 1 : index
    %c0_63 = arith.constant 0 : index
    %89 = vector.load %arg11[%c0_60, %c1_61, %c1_62, %c0_63] : memref<1x10x10x128xf32, #tpu.memory_space<vmem>>, vector<1x8x8x128xf32>
    tpu.vector_store %arg11[%c0_60, %c1_61, %c1_62, %c0_63], %88 {strides = array<i32>} : memref<1x10x10x128xf32, #tpu.memory_space<vmem>>, vector<1x8x8x128xf32>,
    %c0_64 = arith.constant 0 : index
    %c0_65 = arith.constant 0 : index
    %c0_66 = arith.constant 0 : index
    %c0_67 = arith.constant 0 : index
    %90 = vector.load %arg11[%c0_64, %c0_65, %c0_66, %c0_67] : memref<1x10x10x128xf32, #tpu.memory_space<vmem>>, vector<1x10x8x128xf32>
    %91 = vector.extract_strided_slice %90 {offsets = [0, 0, 0, 0], sizes = [1, 8, 8, 128], strides = [1, 1, 1, 1]} : vector<1x10x8x128xf32> to vector<1x8x8x128xf32>
    %92 = vector.shape_cast %91 : vector<1x8x8x128xf32> to vector<64x128xf32>
    %c0_68 = arith.constant 0 : index
    %c0_69 = arith.constant 0 : index
    %c0_70 = arith.constant 0 : index
    %93 = vector.load %arg4[%c0_68, %c0_69, %c0_70] : memref<9x128x128xf32, #tpu.memory_space<vmem>>, vector<1x128x128xf32>
    %94 = vector.shape_cast %93 : vector<1x128x128xf32> to vector<128x128xf32>
    %cst_71 = arith.constant dense<0.000000e+00> : vector<64x128xf32>
    %95 = tpu.matmul %92, %94, %cst_71 {dimension_numbers = #tpu.dot_dimension_numbers<[1], [0], [0], [1], [0, 0, 1, 1], [], []>} : vector<64x128xf32>, vector<128x128xf32>, vector<64x128xf32> -> vector<64x128xf32>
    %96 = vector.extract_strided_slice %90 {offsets = [0, 1, 0, 0], sizes = [1, 8, 8, 128], strides = [1, 1, 1, 1]} : vector<1x10x8x128xf32> to vector<1x8x8x128xf32>
    %97 = vector.shape_cast %96 : vector<1x8x8x128xf32> to vector<64x128xf32>
    %c3_72 = arith.constant 3 : index
    %c0_73 = arith.constant 0 : index
    %c0_74 = arith.constant 0 : index
    %98 = vector.load %arg4[%c3_72, %c0_73, %c0_74] : memref<9x128x128xf32, #tpu.memory_space<vmem>>, vector<1x128x128xf32>
    %99 = vector.shape_cast %98 : vector<1x128x128xf32> to vector<128x128xf32>
    %cst_75 = arith.constant dense<0.000000e+00> : vector<64x128xf32>
    %100 = tpu.matmul %97, %99, %cst_75 {dimension_numbers = #tpu.dot_dimension_numbers<[1], [0], [0], [1], [0, 0, 1, 1], [], []>} : vector<64x128xf32>, vector<128x128xf32>, vector<64x128xf32> -> vector<64x128xf32>
    %101 = arith.addf %95, %100 : vector<64x128xf32>
    %102 = vector.extract_strided_slice %90 {offsets = [0, 2, 0, 0], sizes = [1, 8, 8, 128], strides = [1, 1, 1, 1]} : vector<1x10x8x128xf32> to vector<1x8x8x128xf32>
    %103 = vector.shape_cast %102 : vector<1x8x8x128xf32> to vector<64x128xf32>
    %c6_76 = arith.constant 6 : index
    %c0_77 = arith.constant 0 : index
    %c0_78 = arith.constant 0 : index
    %104 = vector.load %arg4[%c6_76, %c0_77, %c0_78] : memref<9x128x128xf32, #tpu.memory_space<vmem>>, vector<1x128x128xf32>
    %105 = vector.shape_cast %104 : vector<1x128x128xf32> to vector<128x128xf32>
    %cst_79 = arith.constant dense<0.000000e+00> : vector<64x128xf32>
    %106 = tpu.matmul %103, %105, %cst_79 {dimension_numbers = #tpu.dot_dimension_numbers<[1], [0], [0], [1], [0, 0, 1, 1], [], []>} : vector<64x128xf32>, vector<128x128xf32>, vector<64x128xf32> -> vector<64x128xf32>
    %107 = arith.addf %101, %106 : vector<64x128xf32>
    %c0_80 = arith.constant 0 : index
    %c0_81 = arith.constant 0 : index
    %c1_82 = arith.constant 1 : index
    %c0_83 = arith.constant 0 : index
    %108 = vector.load %arg11[%c0_80, %c0_81, %c1_82, %c0_83] : memref<1x10x10x128xf32, #tpu.memory_space<vmem>>, vector<1x10x8x128xf32>
    %109 = vector.extract_strided_slice %108 {offsets = [0, 0, 0, 0], sizes = [1, 8, 8, 128], strides = [1, 1, 1, 1]} : vector<1x10x8x128xf32> to vector<1x8x8x128xf32>
    %110 = vector.shape_cast %109 : vector<1x8x8x128xf32> to vector<64x128xf32>
    %c1_84 = arith.constant 1 : index
    %c0_85 = arith.constant 0 : index
    %c0_86 = arith.constant 0 : index
    %111 = vector.load %arg4[%c1_84, %c0_85, %c0_86] : memref<9x128x128xf32, #tpu.memory_space<vmem>>, vector<1x128x128xf32>
    %112 = vector.shape_cast %111 : vector<1x128x128xf32> to vector<128x128xf32>
    %cst_87 = arith.constant dense<0.000000e+00> : vector<64x128xf32>
    %113 = tpu.matmul %110, %112, %cst_87 {dimension_numbers = #tpu.dot_dimension_numbers<[1], [0], [0], [1], [0, 0, 1, 1], [], []>} : vector<64x128xf32>, vector<128x128xf32>, vector<64x128xf32> -> vector<64x128xf32>
    %114 = arith.addf %107, %113 : vector<64x128xf32>
    %115 = vector.extract_strided_slice %108 {offsets = [0, 1, 0, 0], sizes = [1, 8, 8, 128], strides = [1, 1, 1, 1]} : vector<1x10x8x128xf32> to vector<1x8x8x128xf32>
    %116 = vector.shape_cast %115 : vector<1x8x8x128xf32> to vector<64x128xf32>
    %c4_88 = arith.constant 4 : index
    %c0_89 = arith.constant 0 : index
    %c0_90 = arith.constant 0 : index
    %117 = vector.load %arg4[%c4_88, %c0_89, %c0_90] : memref<9x128x128xf32, #tpu.memory_space<vmem>>, vector<1x128x128xf32>
    %118 = vector.shape_cast %117 : vector<1x128x128xf32> to vector<128x128xf32>
    %cst_91 = arith.constant dense<0.000000e+00> : vector<64x128xf32>
    %119 = tpu.matmul %116, %118, %cst_91 {dimension_numbers = #tpu.dot_dimension_numbers<[1], [0], [0], [1], [0, 0, 1, 1], [], []>} : vector<64x128xf32>, vector<128x128xf32>, vector<64x128xf32> -> vector<64x128xf32>
    %120 = arith.addf %114, %119 : vector<64x128xf32>
    %121 = vector.extract_strided_slice %108 {offsets = [0, 2, 0, 0], sizes = [1, 8, 8, 128], strides = [1, 1, 1, 1]} : vector<1x10x8x128xf32> to vector<1x8x8x128xf32>
    %122 = vector.shape_cast %121 : vector<1x8x8x128xf32> to vector<64x128xf32>
    %c7_92 = arith.constant 7 : index
    %c0_93 = arith.constant 0 : index
    %c0_94 = arith.constant 0 : index
    %123 = vector.load %arg4[%c7_92, %c0_93, %c0_94] : memref<9x128x128xf32, #tpu.memory_space<vmem>>, vector<1x128x128xf32>
    %124 = vector.shape_cast %123 : vector<1x128x128xf32> to vector<128x128xf32>
    %cst_95 = arith.constant dense<0.000000e+00> : vector<64x128xf32>
    %125 = tpu.matmul %122, %124, %cst_95 {dimension_numbers = #tpu.dot_dimension_numbers<[1], [0], [0], [1], [0, 0, 1, 1], [], []>} : vector<64x128xf32>, vector<128x128xf32>, vector<64x128xf32> -> vector<64x128xf32>
    %126 = arith.addf %120, %125 : vector<64x128xf32>
    %c0_96 = arith.constant 0 : index
    %c0_97 = arith.constant 0 : index
    %c2_98 = arith.constant 2 : index
    %c0_99 = arith.constant 0 : index
    %127 = vector.load %arg11[%c0_96, %c0_97, %c2_98, %c0_99] : memref<1x10x10x128xf32, #tpu.memory_space<vmem>>, vector<1x10x8x128xf32>
    %128 = vector.extract_strided_slice %127 {offsets = [0, 0, 0, 0], sizes = [1, 8, 8, 128], strides = [1, 1, 1, 1]} : vector<1x10x8x128xf32> to vector<1x8x8x128xf32>
    %129 = vector.shape_cast %128 : vector<1x8x8x128xf32> to vector<64x128xf32>
    %c2_100 = arith.constant 2 : index
    %c0_101 = arith.constant 0 : index
    %c0_102 = arith.constant 0 : index
    %130 = vector.load %arg4[%c2_100, %c0_101, %c0_102] : memref<9x128x128xf32, #tpu.memory_space<vmem>>, vector<1x128x128xf32>
    %131 = vector.shape_cast %130 : vector<1x128x128xf32> to vector<128x128xf32>
    %cst_103 = arith.constant dense<0.000000e+00> : vector<64x128xf32>
    %132 = tpu.matmul %129, %131, %cst_103 {dimension_numbers = #tpu.dot_dimension_numbers<[1], [0], [0], [1], [0, 0, 1, 1], [], []>} : vector<64x128xf32>, vector<128x128xf32>, vector<64x128xf32> -> vector<64x128xf32>
    %133 = arith.addf %126, %132 : vector<64x128xf32>
    %134 = vector.extract_strided_slice %127 {offsets = [0, 1, 0, 0], sizes = [1, 8, 8, 128], strides = [1, 1, 1, 1]} : vector<1x10x8x128xf32> to vector<1x8x8x128xf32>
    %135 = vector.shape_cast %134 : vector<1x8x8x128xf32> to vector<64x128xf32>
    %c5_104 = arith.constant 5 : index
    %c0_105 = arith.constant 0 : index
    %c0_106 = arith.constant 0 : index
    %136 = vector.load %arg4[%c5_104, %c0_105, %c0_106] : memref<9x128x128xf32, #tpu.memory_space<vmem>>, vector<1x128x128xf32>
    %137 = vector.shape_cast %136 : vector<1x128x128xf32> to vector<128x128xf32>
    %cst_107 = arith.constant dense<0.000000e+00> : vector<64x128xf32>
    %138 = tpu.matmul %135, %137, %cst_107 {dimension_numbers = #tpu.dot_dimension_numbers<[1], [0], [0], [1], [0, 0, 1, 1], [], []>} : vector<64x128xf32>, vector<128x128xf32>, vector<64x128xf32> -> vector<64x128xf32>
    %139 = arith.addf %133, %138 : vector<64x128xf32>
    %140 = vector.extract_strided_slice %127 {offsets = [0, 2, 0, 0], sizes = [1, 8, 8, 128], strides = [1, 1, 1, 1]} : vector<1x10x8x128xf32> to vector<1x8x8x128xf32>
    %141 = vector.shape_cast %140 : vector<1x8x8x128xf32> to vector<64x128xf32>
    %c8_108 = arith.constant 8 : index
    %c0_109 = arith.constant 0 : index
    %c0_110 = arith.constant 0 : index
    %142 = vector.load %arg4[%c8_108, %c0_109, %c0_110] : memref<9x128x128xf32, #tpu.memory_space<vmem>>, vector<1x128x128xf32>
    %143 = vector.shape_cast %142 : vector<1x128x128xf32> to vector<128x128xf32>
    %cst_111 = arith.constant dense<0.000000e+00> : vector<64x128xf32>
    %144 = tpu.matmul %141, %143, %cst_111 {dimension_numbers = #tpu.dot_dimension_numbers<[1], [0], [0], [1], [0, 0, 1, 1], [], []>} : vector<64x128xf32>, vector<128x128xf32>, vector<64x128xf32> -> vector<64x128xf32>
    %145 = arith.addf %139, %144 : vector<64x128xf32>
    %cst_112 = arith.constant 0.000000e+00 : f32
    %146 = vector.broadcast %cst_112 : f32 to vector<64x128xf32>
    %147 = arith.maximumf %145, %146 : vector<64x128xf32>
    %148 = vector.shape_cast %147 : vector<64x128xf32> to vector<1x4x2x8x128xf32>
    %149 = vector.extract_strided_slice %148 {offsets = [0, 0, 0, 0, 0], sizes = [1, 4, 1, 8, 128], strides = [1, 1, 1, 1, 1]} : vector<1x4x2x8x128xf32> to vector<1x4x1x8x128xf32>
    %150 = vector.shape_cast %149 : vector<1x4x1x8x128xf32> to vector<1x4x8x128xf32>
    %151 = vector.extract_strided_slice %148 {offsets = [0, 0, 1, 0, 0], sizes = [1, 4, 1, 8, 128], strides = [1, 1, 1, 1, 1]} : vector<1x4x2x8x128xf32> to vector<1x4x1x8x128xf32>
    %152 = vector.shape_cast %151 : vector<1x4x1x8x128xf32> to vector<1x4x8x128xf32>
    %153 = arith.maximumf %150, %152 : vector<1x4x8x128xf32>
    %154 = vector.shape_cast %153 : vector<1x4x8x128xf32> to vector<1x4x4x256xf32>
    %155 = vector.extract_strided_slice %154 {offsets = [0, 0, 0, 0], sizes = [1, 4, 4, 128], strides = [1, 1, 1, 1]} : vector<1x4x4x256xf32> to vector<1x4x4x128xf32>
    %156 = vector.extract_strided_slice %154 {offsets = [0, 0, 0, 128], sizes = [1, 4, 4, 128], strides = [1, 1, 1, 1]} : vector<1x4x4x256xf32> to vector<1x4x4x128xf32>
    %157 = arith.maximumf %155, %156 : vector<1x4x4x128xf32>
    %158 = vector.shape_cast %157 : vector<1x4x4x128xf32> to vector<1x16x128xf32>
    %159 = vector.shape_cast %158 : vector<1x16x128xf32> to vector<1x2048xf32>
    %c0_113 = arith.constant 0 : index
    %c0_114 = arith.constant 0 : index
    %160 = vector.load %arg5[%c0_113, %c0_114] : memref<2048x512xf32, #tpu.memory_space<vmem>>, vector<2048x512xf32>
    %cst_115 = arith.constant dense<0.000000e+00> : vector<1x512xf32>
    %161 = tpu.matmul %159, %160, %cst_115 {dimension_numbers = #tpu.dot_dimension_numbers<[1], [0], [0], [1], [0, 0, 1, 1], [], []>} : vector<1x2048xf32>, vector<2048x512xf32>, vector<1x512xf32> -> vector<1x512xf32>
    %c0_116 = arith.constant 0 : index
    %c0_117 = arith.constant 0 : index
    %162 = vector.load %arg6[%c0_116, %c0_117] : memref<1x512xf32, #tpu.memory_space<vmem>>, vector<1x512xf32>
    %163 = arith.addf %161, %162 : vector<1x512xf32>
    %cst_118 = arith.constant 0.000000e+00 : f32
    %164 = vector.broadcast %cst_118 : f32 to vector<1x512xf32>
    %165 = arith.maximumf %163, %164 : vector<1x512xf32>
    %c0_119 = arith.constant 0 : index
    %c0_120 = arith.constant 0 : index
    %166 = vector.load %arg7[%c0_119, %c0_120] : memref<512x128xf32, #tpu.memory_space<vmem>>, vector<512x128xf32>
    %cst_121 = arith.constant dense<0.000000e+00> : vector<1x128xf32>
    %167 = tpu.matmul %165, %166, %cst_121 {dimension_numbers = #tpu.dot_dimension_numbers<[1], [0], [0], [1], [0, 0, 1, 1], [], []>} : vector<1x512xf32>, vector<512x128xf32>, vector<1x128xf32> -> vector<1x128xf32>
    %c0_122 = arith.constant 0 : index
    %c0_123 = arith.constant 0 : index
    %168 = vector.load %arg8[%c0_122, %c0_123] : memref<1x128xf32, #tpu.memory_space<vmem>>, vector<1x128xf32>
    %169 = arith.addf %167, %168 : vector<1x128xf32>
    %c0_124 = arith.constant 0 : index
    %c0_125 = arith.constant 0 : index
    %c0_126 = arith.constant 0 : index
    %170 = vector.load %arg9[%c0_124, %c0_125, %c0_126] : memref<1x1x128xf32, #tpu.memory_space<vmem>>, vector<1x1x128xf32>
    %171 = vector.shape_cast %170 : vector<1x1x128xf32> to vector<1x128xf32>
    %172 = vector.shape_cast %169 : vector<1x128xf32> to vector<1x1x128xf32>
    tpu.vector_store %arg9[%c0_124, %c0_125, %c0_126], %172 {strides = array<i32>} : memref<1x1x128xf32, #tpu.memory_space<vmem>>, vector<1x1x128xf32>,
    return
  }
  func.func @transform_0(%arg0: i32) -> (i32, i32, i32) {
    %c0_i32 = arith.constant 0 : i32
    %c0_i32_0 = arith.constant 0 : i32
    %c0_i32_1 = arith.constant 0 : i32
    return %arg0, %c0_i32, %c0_i32_0 : i32, i32, i32
  }
  func.func @transform_1(%arg0: i32) -> (i32, i32) {
    %c0_i32 = arith.constant 0 : i32
    %c0_i32_0 = arith.constant 0 : i32
    %c0_i32_1 = arith.constant 0 : i32
    return %c0_i32, %c0_i32_0 : i32, i32
  }
  func.func @transform_2(%arg0: i32) -> (i32, i32, i32) {
    %c0_i32 = arith.constant 0 : i32
    %c0_i32_0 = arith.constant 0 : i32
    %c0_i32_1 = arith.constant 0 : i32
    %c0_i32_2 = arith.constant 0 : i32
    return %c0_i32, %c0_i32_0, %c0_i32_1 : i32, i32, i32
  }
  func.func @transform_3(%arg0: i32) -> (i32, i32, i32) {
    %c0_i32 = arith.constant 0 : i32
    %c0_i32_0 = arith.constant 0 : i32
    %c0_i32_1 = arith.constant 0 : i32
    %c0_i32_2 = arith.constant 0 : i32
    return %c0_i32, %c0_i32_0, %c0_i32_1 : i32, i32, i32
  }
  func.func @transform_4(%arg0: i32) -> (i32, i32) {
    %c0_i32 = arith.constant 0 : i32
    %c0_i32_0 = arith.constant 0 : i32
    %c0_i32_1 = arith.constant 0 : i32
    return %c0_i32, %c0_i32_0 : i32, i32
  }
  func.func @transform_5(%arg0: i32) -> (i32, i32) {
    %c0_i32 = arith.constant 0 : i32
    %c0_i32_0 = arith.constant 0 : i32
    %c0_i32_1 = arith.constant 0 : i32
    return %c0_i32, %c0_i32_0 : i32, i32
  }
  func.func @transform_6(%arg0: i32) -> (i32, i32) {
    %c0_i32 = arith.constant 0 : i32
    %c0_i32_0 = arith.constant 0 : i32
    %c0_i32_1 = arith.constant 0 : i32
    return %c0_i32, %c0_i32_0 : i32, i32
  }
  func.func @transform_7(%arg0: i32) -> (i32, i32) {
    %c0_i32 = arith.constant 0 : i32
    %c0_i32_0 = arith.constant 0 : i32
    %c0_i32_1 = arith.constant 0 : i32
    return %c0_i32, %c0_i32_0 : i32, i32
  }
  func.func @transform_8(%arg0: i32) -> (i32, i32, i32) {
    %c0_i32 = arith.constant 0 : i32
    %c0_i32_0 = arith.constant 0 : i32
    %c0_i32_1 = arith.constant 0 : i32
    return %arg0, %c0_i32, %c0_i32_0 : i32, i32, i32
  }
}

</mosaic_0001>

<bundles_post_ra>
// kernel: cifar10_forward.1
= control target key start
LH: loop header
LB: loop body
LE: loop exit
PB: predicated region body
PF: predicated region fallthrough
CT: control target
= control target key end

     0   :  { %13 = vsyncpa [#allocation5], 0  ;;  %s13788_s0 = inlined_call_operand.vmem [shape: f32[2,1024,32], index: 0, kind: input, shape index: {}]   ;;  %s13789_s1 = inlined_call_operand.vmem [shape: f32[32,128], index: 1, kind: input, shape index: {}]   ;;  %s13790_s2 = inlined_call_operand.vmem [shape: f32[9,128,128], index: 2, kind: input, shape index: {}]   ;;  %s13791_s3 = inlined_call_operand.vmem [shape: f32[9,128,128], index: 3, kind: input, shape index: {}]   ;;  %s13792_s4 = inlined_call_operand.vmem [shape: f32[2048,512], index: 4, kind: input, shape index: {}]   ;;  %s13793_s5 = inlined_call_operand.vmem [shape: f32[1,512], index: 5, kind: input, shape index: {}]   ;;  %s13794_s6 = inlined_call_operand.vmem [shape: f32[512,128], index: 6, kind: input, shape index: {}]   ;;  %s13795_s7 = inlined_call_operand.vmem [shape: f32[1,128], index: 7, kind: input, shape index: {}]   ;;  %s13796_s8 = inlined_call_operand.hbm [shape: f32[2,1,128], index: 8, kind: output, shape index: {}]  }
   0x1   :  { %15 = vsyncpa [#allocation5 + $0x1], 0  ;;  %s7806_s27 = smov 0   ;;  %s7808_s28 = smov 0  }
   0x2   :  { %s7810_s29 = smov 0   ;;  %s7812_s30 = smov 0  }
   0x3 LB: > { %s7827_s9 = sadd.s32 4294967295, %s7757_s30   ;;  %s7184_s10 = sadd.s32 4294967294, %s7757_s30   ;;  %s7757_s30 = sphi %s7812_s30, %s13932_s30   ;;  %s7753_s29 = sphi %s7810_s29, %s13931_s29   ;;  %s7749_s28 = sphi %s7808_s28, %s13930_s28   ;;  %s7745_s27 = sphi %s7806_s27, %s13929_s27  }
   0x4   : > { %s7831_s11 = sadd.s32 1, %s7757_s30   ;;  %s201_s12 = sadd.s32 1, %s7753_s29 }
   0x5   : > { %s198_s13 = ssub.s32 %s7757_s30, %s7831_s11  ;;  %p211_p0 = scmp.ne.s32.totalorder %s7753_s29, %s7749_s28 }
   0x6   : > { %p199_p1 = scmp.eq.s32.totalorder %s198_s13, 0  ;;  %p212_p2 = scmp.eq.s32.totalorder %s7827_s9, 1 }
   0x7   : > { %p217_p3 = scmp.ne.s32.totalorder %s7749_s28, %s7745_s27  ;;  %p218_p4 = scmp.eq.s32.totalorder %s7184_s10, 1 }
   0x8   : > { %s7842_s14 = scalar_select %p199_p1, %s7753_s29, %s201_s12  }
   0x9   : > { %p7844_p5 = por %p212_p2, %p211_p0  ;;  %p7848_p6 = por %p218_p4, %p217_p3 }
   0xa   : > { %p7187_p7 = scmp.ge.s32.totalorder %s7757_s30, 1  ;;  %p265_p8 = scmp.lt.s32.totalorder %s7757_s30, 3 }
   0xc   : > { %p266_p9 = pnand %p7187_p7, %p265_p8 }
   0xe   : > { %269 = sbr.rel (%p266_p9) target bundleno = 3098 (0xc1a), region = 52 }
  0x13   : > { %v508_v0 = vld [vmem:[%s13789_s1 + $0x18] sm:$0xff]  ;;  %v507_v1 = vld [vmem:[%s13789_s1 + $0x10] sm:$0xff]  ;;  %p298_p10 = scmp.lt.s32.totalorder %s7827_s9, 1  ;;  %v506_v2 = vld [vmem:[%s13789_s1 + $0x8] sm:$0xff]  ;;  %vm509_vm0 = vcmask 261120   ;;  %v7759_v50 = vmov 0.0  }
  0x14   : > { %906 = vmatpush.msra.mxu0 %v508_v0  ;;  %v505_v3 = vld [vmem:[%s13789_s1] sm:$0xff]  ;;  %v2282_v19 = vld [vmem:[%s13790_s2 + $0x78] sm:$0xff]  ;;  %v2281_v20 = vld [vmem:[%s13790_s2 + $0x70] sm:$0xff]  ;;  %303 = vst [vmem:[#allocation2] sm:$0xff] %v7759_v50  ;;  %v7760_v54 = vmov 1966171168  }
  0x15   : > { %s299_s23 = scalar_select %p298_p10, %s7827_s9, 1  ;;  %2413 = vmatpush.msra.mxu2 %v2282_v19  ;;  %v2280_v21 = vld [vmem:[%s13790_s2 + $0x68] sm:$0xff]  ;;  %v2279_v23 = vld [vmem:[%s13790_s2 + $0x60] sm:$0xff]  ;;  %v2278_v24 = vld [vmem:[%s13790_s2 + $0x58] sm:$0xff]  ;;  %304 = vst [vmem:[#allocation2 + $0x8] sm:$0xff] %v7759_v50  ;;  %v1488_v55 = vunpack.c.l.s4 %v7760_v54  ;;  %vm4623_vm1 = vcmask 1040384  }
  0x16   : > { %907 = vmatpush.msra.mxu0 %v507_v1  ;;  %v2277_v25 = vld [vmem:[%s13790_s2 + $0x50] sm:$0xff]  ;;  %v2276_v26 = vld [vmem:[%s13790_s2 + $0x48] sm:$0xff]  ;;  %v2275_v29 = vld [vmem:[%s13790_s2 + $0x40] sm:$0xff]  ;;  %305 = vst [vmem:[#allocation2 + $0x10] sm:$0x3] %v7759_v50  ;;  %s7715_s24 = scalar_lea.hbm %s13796_s8, 2 }
  0x17   : > { %s7640_s26 = sshll.u32 %s299_s23, 10  ;;  %2414 = vmatpush.msra.mxu2 %v2281_v20  ;;  %v7333_v30 = vld [vmem:[%s13790_s2 + $0x1f8] sm:$0xff]  ;;  %v7332_v32 = vld [vmem:[%s13790_s2 + $0x1f0] sm:$0xff]  ;;  %v7331_v34 = vld [vmem:[%s13790_s2 + $0x1e8] sm:$0xff]  ;;  %306 = vst [vmem:[#allocation2 + $0x18] sm:$0xff] %v7759_v50  ;;  %v8014_v60 = vunpack.c.0.s8 %v1488_v55 }
  0x18   : > { %908 = vmatpush.msra.mxu0 %v506_v2  ;;  %s7871_s13 = scalar_lea.vmem %s13788_s0, %s7640_s26  ;;  %v2274_v31 = vld [vmem:[%s13790_s2 + $0x38] sm:$0xff]  ;;  %2300 = vmatpush.msra.mxu1 %v7333_v30  ;;  %v2273_v33 = vld [vmem:[%s13790_s2 + $0x30] sm:$0xff]  ;;  %v2272_v35 = vld [vmem:[%s13790_s2 + $0x28] sm:$0xff]  ;;  %307 = vst [vmem:[#allocation2 + $0x20] sm:$0xff] %v7759_v50  ;;  %s296_s26 = sand.u32 1, %s7749_s28  }
  0x19   : > { %v377_v4 = vld [vmem:[%s7871_s13] sm:$0xff]  ;;  %v378_v5 = vld [vmem:[%s7871_s13 + $0x8] sm:$0xff]  ;;  %v379_v6 = vld [vmem:[%s7871_s13 + $0x10] sm:$0xff]  ;;  %2415 = vmatpush.msra.mxu2 %v2280_v21  ;;  %308 = vst [vmem:[#allocation2 + $0x28] sm:$0x3] %v7759_v50  ;;  %s297_s17 = scalar_lea.vmem [#allocation4], %s296_s26 }
  0x1a   : > { %909 = vmatpush.msra.mxu0 %v505_v3  ;;  %v380_v7 = vld [vmem:[%s7871_s13 + $0x18] sm:$0xff]  ;;  %v381_v8 = vld [vmem:[%s7871_s13 + $0x20] sm:$0xff]  ;;  %v382_v9 = vld [vmem:[%s7871_s13 + $0x28] sm:$0xff]  ;;  %2301 = vmatpush.msra.mxu1 %v7332_v32  ;;  %309 = vst [vmem:[#allocation2 + $0x30] sm:$0xff] %v7759_v50  ;;  %s7127_s18 = sshll.u32 %s297_s17, 4  ;;  %s7117_s20 = scalar_lea.sflag [#allocation5], %s296_s26  ;;  %s7128_s18 = int_to_ptr.vmem [resolvable:$true] %s7127_s18 }
  0x1b   : > { %7190 = vmatmul.msk.f32.vlgmr.msra.gmra.mxu0 %vm509_vm0, %v377_v4  ;;  %v383_v10 = vld [vmem:[%s7871_s13 + $0x30] sm:$0xff]  ;;  %v384_v11 = vld [vmem:[%s7871_s13 + $0x38] sm:$0xff]  ;;  %v385_v12 = vld [vmem:[%s7871_s13 + $0x40] sm:$0xff]  ;;  %2416 = vmatpush.msra.mxu2 %v2279_v23  ;;  %310 = vst [vmem:[#allocation2 + $0x38] sm:$0xff] %v7759_v50 }
  0x1c   : > { %v386_v13 = vld [vmem:[%s7871_s13 + $0x48] sm:$0xff]  ;;  %v387_v14 = vld [vmem:[%s7871_s13 + $0x50] sm:$0xff]  ;;  %v388_v15 = vld [vmem:[%s7871_s13 + $0x58] sm:$0xff]  ;;  %2302 = vmatpush.msra.mxu1 %v7331_v34  ;;  %311 = vst [vmem:[#allocation2 + $0x40] sm:$0x3] %v7759_v50 }
  0x1d   : > { %v389_v16 = vld [vmem:[%s7871_s13 + $0x60] sm:$0xff]  ;;  %v390_v17 = vld [vmem:[%s7871_s13 + $0x68] sm:$0xff]  ;;  %v391_v18 = vld [vmem:[%s7871_s13 + $0x70] sm:$0xff]  ;;  %2417 = vmatpush.msra.mxu2 %v2278_v24  ;;  %312 = vst [vmem:[#allocation2 + $0x48] sm:$0xff] %v7759_v50 }
  0x1e   : > { %v392_v22 = vld [vmem:[%s7871_s13 + $0x78] sm:$0xff]  ;;  %v393_v28 = vld [vmem:[%s7871_s13 + $0x80] sm:$0xff]  ;;  %v394_v37 = vld [vmem:[%s7871_s13 + $0x88] sm:$0xff]  ;;  %313 = vst [vmem:[#allocation2 + $0x50] sm:$0xff] %v7759_v50 }
  0x1f   : > { %2418 = vmatpush.msra.mxu2 %v2277_v25  ;;  %v7330_v38 = vld [vmem:[%s13790_s2 + $0x1e0] sm:$0xff]  ;;  %v7329_v40 = vld [vmem:[%s13790_s2 + $0x1d8] sm:$0xff]  ;;  %v7328_v42 = vld [vmem:[%s13790_s2 + $0x1d0] sm:$0xff]  ;;  %314 = vst [vmem:[#allocation2 + $0x58] sm:$0x3] %v7759_v50 }
  0x20   : > { %v2271_v39 = vld [vmem:[%s13790_s2 + $0x20] sm:$0xff]  ;;  %2303 = vmatpush.msra.mxu1 %v7330_v38  ;;  %v2270_v41 = vld [vmem:[%s13790_s2 + $0x18] sm:$0xff]  ;;  %v2269_v43 = vld [vmem:[%s13790_s2 + $0x10] sm:$0xff]  ;;  %315 = vst [vmem:[#allocation2 + $0x60] sm:$0xff] %v7759_v50 }
  0x21   : > { %2419 = vmatpush.msra.mxu2 %v2276_v26  ;;  %v7327_v44 = vld [vmem:[%s13790_s2 + $0x1c8] sm:$0xff]  ;;  %v395_v47 = vld [vmem:[%s7871_s13 + $0x90] sm:$0xff]  ;;  %v7326_v48 = vld [vmem:[%s13790_s2 + $0x1c0] sm:$0xff]  ;;  %316 = vst [vmem:[#allocation2 + $0x68] sm:$0xff] %v7759_v50 }
  0x22   : > { %2304 = vmatpush.msra.mxu1 %v7329_v40  ;;  %v2268_v45 = vld [vmem:[%s13790_s2 + $0x8] sm:$0xff]  ;;  %v2267_v49 = vld [vmem:[%s13790_s2] sm:$0xff]  ;;  %v7325_v51 = vld [vmem:[%s13790_s2 + $0x1b8] sm:$0xff]  ;;  %13801 = vst [vmem:[#allocation7_spill] sm:$0xff] %v8014_v60 }
  0x23   : > { %7191 = vmatmul.msk.f32.gmra.mxu0 %vm509_vm0, %v378_v5  ;;  %2420 = vmatpush.msra.mxu2 %v2275_v29  ;;  %v396_v53 = vld [vmem:[%s7871_s13 + $0x98] sm:$0xff]  ;;  %v397_v57 = vld [vmem:[%s7871_s13 + $0xa0] sm:$0xff]  ;;  %317 = vst [vmem:[#allocation2 + $0x70] sm:$0x3] %v7759_v50  ;;  %v398_v1 = vld [vmem:[%s7871_s13 + $0xa8] sm:$0xff] }
  0x24   : > { %2305 = vmatpush.msra.mxu1 %v7328_v42  ;;  %318 = vst [vmem:[#allocation2 + $0x78] sm:$0xff] %v7759_v50  ;;  %v7322_v20 = vld [vmem:[%s13790_s2 + $0x1a0] sm:$0xff]  ;;  %v400_v21 = vld [vmem:[%s7871_s13 + $0xb8] sm:$0xff]  ;;  %v7320_v23 = vld [vmem:[%s13790_s2 + $0x190] sm:$0xff] }
  0x25   : > { %2421 = vmatpush.msra.mxu2 %v2274_v31  ;;  %319 = vst [vmem:[#allocation2 + $0x80] sm:$0xff] %v7759_v50  ;;  %v7319_v24 = vld [vmem:[%s13790_s2 + $0x188] sm:$0xff]  ;;  %v7318_v26 = vld [vmem:[%s13790_s2 + $0x180] sm:$0xff]  ;;  %v7348_v34 = vld [vmem:[%s13790_s2 + $0x370] sm:$0xff] }
  0x26   : > { %2306 = vmatpush.msra.mxu1 %v7327_v44  ;;  %320 = vst [vmem:[#allocation2 + $0x88] sm:$0x3] %v7759_v50  ;;  %v402_v30 = vld [vmem:[%s7871_s13 + $0xc8] sm:$0xff]  ;;  %v404_v42 = vld [vmem:[%s7871_s13 + $0xd8] sm:$0xff]  ;;  %v7346_v44 = vld [vmem:[%s13790_s2 + $0x360] sm:$0xff] }
  0x27   : > { %2422 = vmatpush.msra.mxu2 %v2273_v33  ;;  %321 = vst [vmem:[#allocation2 + $0x90] sm:$0xff] %v7759_v50  ;;  %v7349_v33 = vld [vmem:[%s13790_s2 + $0x378] sm:$0xff]  ;;  %v7342_v55 = vld [vmem:[%s13790_s2 + $0x340] sm:$0xff] }
  0x28   : > { %2307 = vmatpush.msra.mxu1 %v7326_v48  ;;  %322 = vst [vmem:[#allocation2 + $0x98] sm:$0xff] %v7759_v50  ;;  %2543 = vmatpush.msra.mxu3 %v7349_v33 }
  0x29   : > { %2423 = vmatpush.msra.mxu2 %v2272_v35  ;;  %323 = vst [vmem:[#allocation2 + $0xa0] sm:$0x3] %v7759_v50 }
  0x2a   : > { %2308 = vmatpush.msra.mxu1 %v7325_v51  ;;  %324 = vst [vmem:[#allocation2 + $0xa8] sm:$0xff] %v7759_v50  ;;  %2544 = vmatpush.msra.mxu3 %v7348_v34  ;;  %v7343_v51 = vld [vmem:[%s13790_s2 + $0x348] sm:$0xff] }
  0x2b   : > { %7192 = vmatmul.msk.f32.gmra.mxu0 %vm509_vm0, %v379_v6  ;;  %2424 = vmatpush.msra.mxu2 %v2271_v39  ;;  %325 = vst [vmem:[#allocation2 + $0xb0] sm:$0xff] %v7759_v50 }
  0x2c   : > { %326 = vst [vmem:[#allocation2 + $0xb8] sm:$0x3] %v7759_v50 }
  0x2d   : > { %2425 = vmatpush.msra.mxu2 %v2270_v41  ;;  %327 = vst [vmem:[#allocation2 + $0xc0] sm:$0xff] %v7759_v50 }
  0x2e   : > { %328 = vst [vmem:[#allocation2 + $0xc8] sm:$0xff] %v7759_v50 }
  0x2f   : > { %2426 = vmatpush.msra.mxu2 %v2269_v43  ;;  %329 = vst [vmem:[#allocation2 + $0xd0] sm:$0x3] %v7759_v50  ;;  %v7347_v43 = vld [vmem:[%s13790_s2 + $0x368] sm:$0xff] }
  0x30   : > { %330 = vst [vmem:[#allocation2 + $0xd8] sm:$0xff] %v7759_v50  ;;  %2545 = vmatpush.msra.mxu3 %v7347_v43 }
  0x31   : > { %2427 = vmatpush.msra.mxu2 %v2268_v45  ;;  %331 = vst [vmem:[#allocation2 + $0xe0] sm:$0xff] %v7759_v50  ;;  %v7345_v45 = vld [vmem:[%s13790_s2 + $0x358] sm:$0xff] }
  0x32   : > { %332 = vst [vmem:[#allocation2 + $0xe8] sm:$0x3] %v7759_v50  ;;  %2546 = vmatpush.msra.mxu3 %v7346_v44  ;;  %v413_v44 = vld [vmem:[%s7871_s13 + $0x120] sm:$0xff] }
  0x33   : > { %7193 = vmatmul.msk.f32.gmra.mxu0 %vm509_vm0, %v380_v7  ;;  %2428 = vmatpush.msra.mxu2 %v2267_v49  ;;  %333 = vst [vmem:[#allocation2 + $0xf0] sm:$0xff] %v7759_v50 }
  0x34   : > { %2429 = vmatmul.f32.vlgmr.msra.gmra.mxu2 %v7759_v50  ;;  %334 = vst [vmem:[#allocation2 + $0xf8] sm:$0xff] %v7759_v50  ;;  %2547 = vmatpush.msra.mxu3 %v7345_v45 }
  0x35   : > { %335 = vst [vmem:[#allocation2 + $0x100] sm:$0x3] %v7759_v50 }
  0x36   : > { %336 = vst [vmem:[#allocation2 + $0x108] sm:$0xff] %v7759_v50 }
  0x37   : > { %337 = vst [vmem:[#allocation2 + $0x110] sm:$0xff] %v7759_v50 }
  0x38   : > { %338 = vst [vmem:[#allocation2 + $0x118] sm:$0x3] %v7759_v50 }
  0x39   : > { %339 = vst [vmem:[#allocation2 + $0x120] sm:$0xff] %v7759_v50 }
  0x3a   : > { %340 = vst [vmem:[#allocation2 + $0x128] sm:$0xff] %v7759_v50 }
  0x3b   : > { %7194 = vmatmul.msk.f32.gmra.mxu0 %vm509_vm0, %v381_v8  ;;  %341 = vst [vmem:[#allocation2 + $0x130] sm:$0x3] %v7759_v50 }
  0x3c   : > { %2432 = vmatmul.f32.gmra.mxu2 %v7759_v50  ;;  %342 = vst [vmem:[#allocation2 + $0x138] sm:$0xff] %v7759_v50 }
  0x3d   : > { %343 = vst [vmem:[#allocation2 + $0x140] sm:$0xff] %v7759_v50 }
  0x3e   : > { %344 = vst [vmem:[#allocation2 + $0x148] sm:$0x3] %v7759_v50 }
  0x3f   : > { %345 = vst [vmem:[#allocation2 + $0x150] sm:$0xff] %v7759_v50 }
  0x40   : > { %346 = vst [vmem:[#allocation2 + $0x158] sm:$0xff] %v7759_v50 }
  0x41   : > { %347 = vst [vmem:[#allocation2 + $0x160] sm:$0x3] %v7759_v50 }
  0x42   : > { %348 = vst [vmem:[#allocation2 + $0x168] sm:$0xff] %v7759_v50 }
  0x43   : > { %7195 = vmatmul.msk.f32.gmra.mxu0 %vm509_vm0, %v382_v9  ;;  %v399_v9 = vld [vmem:[%s7871_s13 + $0xb0] sm:$0xff]  ;;  %349 = vst [vmem:[#allocation2 + $0x170] sm:$0xff] %v7759_v50 }
  0x44   : > { %350 = vst [vmem:[#allocation2 + $0x178] sm:$0x3] %v7759_v50 }
  0x45   : > { %351 = vst [vmem:[#allocation2 + $0x180] sm:$0xff] %v7759_v50 }
  0x46   : > { %352 = vst [vmem:[#allocation2 + $0x188] sm:$0xff] %v7759_v50 }
  0x47   : > { %353 = vst [vmem:[#allocation2 + $0x190] sm:$0x3] %v7759_v50 }
  0x48   : > { %354 = vst [vmem:[#allocation2 + $0x198] sm:$0xff] %v7759_v50 }
  0x49   : > { %355 = vst [vmem:[#allocation2 + $0x1a0] sm:$0xff] %v7759_v50 }
  0x4a   : > { %356 = vst [vmem:[#allocation2 + $0x1a8] sm:$0x3] %v7759_v50 }
  0x4b   : > { %7196 = vmatmul.msk.f32.gmra.mxu0 %vm509_vm0, %v383_v10  ;;  %357 = vst [vmem:[#allocation3] sm:$0xff] %v7759_v50 }
  0x4c   : > { %358 = vst [vmem:[#allocation3 + $0x8] sm:$0x3] %v7759_v50 }
  0x4d   : > { %359 = vst [vmem:[#allocation3 + $0x10] sm:$0xff] %v7759_v50 }
  0x4e   : > { %360 = vst [vmem:[#allocation3 + $0x18] sm:$0x3] %v7759_v50 }
  0x4f   : > { %361 = vst [vmem:[#allocation3 + $0x20] sm:$0xff] %v7759_v50 }
  0x50   : > { %362 = vst [vmem:[#allocation3 + $0x28] sm:$0x3] %v7759_v50 }
  0x51   : > { %363 = vst [vmem:[#allocation3 + $0x30] sm:$0xff] %v7759_v50 }
  0x52   : > { %364 = vst [vmem:[#allocation3 + $0x38] sm:$0x3] %v7759_v50 }
  0x53   : > { %7197 = vmatmul.msk.f32.gmra.mxu0 %vm509_vm0, %v384_v11  ;;  %365 = vst [vmem:[#allocation3 + $0x40] sm:$0xff] %v7759_v50 }
  0x54   : > { %366 = vst [vmem:[#allocation3 + $0x48] sm:$0x3] %v7759_v50 }
  0x55   : > { %367 = vst [vmem:[#allocation3 + $0x50] sm:$0xff] %v7759_v50 }
  0x56   : > { %368 = vst [vmem:[#allocation3 + $0x58] sm:$0x3] %v7759_v50 }
  0x57   : > { %369 = vst [vmem:[#allocation3 + $0x60] sm:$0xff] %v7759_v50 }
  0x58   : > { %370 = vst [vmem:[#allocation3 + $0x68] sm:$0x3] %v7759_v50 }
  0x59   : > { %371 = vst [vmem:[#allocation3 + $0x70] sm:$0xff] %v7759_v50 }
  0x5a   : > { %372 = vst [vmem:[#allocation3 + $0x78] sm:$0x3] %v7759_v50 }
  0x5b   : > { %7198 = vmatmul.msk.f32.gmra.mxu0 %vm509_vm0, %v385_v12  ;;  %373 = vst [vmem:[#allocation3 + $0x80] sm:$0xff] %v7759_v50 }
  0x5c   : > { %374 = vst [vmem:[#allocation3 + $0x88] sm:$0x3] %v7759_v50 }
  0x5d   : > { %375 = vst [vmem:[#allocation3 + $0x90] sm:$0xff] %v7759_v50 }
  0x5e   : > { %376 = vst [vmem:[#allocation3 + $0x98] sm:$0x3] %v7759_v50  ;;  %v405_v50 = vld [vmem:[%s7871_s13 + $0xe0] sm:$0xff] }
  0x63   : > { %7199 = vmatmul.msk.f32.gmra.mxu0 %vm509_vm0, %v386_v13 }
  0x6b   : > { %7200 = vmatmul.msk.f32.gmra.mxu0 %vm509_vm0, %v387_v14 }
  0x73   : > { %7201 = vmatmul.msk.f32.gmra.mxu0 %vm509_vm0, %v388_v15 }
  0x7b   : > { %7202 = vmatmul.msk.f32.gmra.mxu0 %vm509_vm0, %v389_v16 }
  0x83   : > { %7203 = vmatmul.msk.f32.gmra.mxu0 %vm509_vm0, %v390_v17  ;;  %v7324_v17 = vld [vmem:[%s13790_s2 + $0x1b0] sm:$0xff] }
  0x84   : > { %2309 = vmatpush.msra.mxu1 %v7324_v17  ;;  %v7334_v17 = vld [vmem:[%s13790_s2 + $0x300] sm:$0xff] }
  0x8b   : > { %7204 = vmatmul.msk.f32.gmra.mxu0 %vm509_vm0, %v391_v18  ;;  %v7323_v18 = vld [vmem:[%s13790_s2 + $0x1a8] sm:$0xff] }
  0x8c   : > { %2310 = vmatpush.msra.mxu1 %v7323_v18 }
  0x8e   : > { %2311 = vmatpush.msra.mxu1 %v7322_v20 }
  0x93   : > { %7205 = vmatmul.msk.f32.gmra.mxu0 %vm509_vm0, %v392_v22  ;;  %v7321_v22 = vld [vmem:[%s13790_s2 + $0x198] sm:$0xff] }
  0x94   : > { %2312 = vmatpush.msra.mxu1 %v7321_v22 }
  0x96   : > { %2313 = vmatpush.msra.mxu1 %v7320_v23 }
  0x98   : > { %v7926_v27 = vpop.f32.mrf.mxu0  ;;  %2314 = vmatpush.msra.mxu1 %v7319_v24 }
  0x99   : > { %v1295_v58 = vmax.f32 %v7926_v27, 0.0  ;;  %v401_v27 = vld [vmem:[%s7871_s13 + $0xc0] sm:$0xff] }
  0x9a   : > { %2315 = vmatpush.msra.mxu1 %v7318_v26 }
  0x9b   : > { %7206 = vmatmul.msk.f32.gmra.mxu0 %vm509_vm0, %v393_v28 }
  0xa0   : > { %v7951_v36 = vpop.f32.mrf.mxu0 }
  0xa1   : > { %v1296_v2 = vmax.f32 %v7951_v36, 0.0 }
  0xa3   : > { %7207 = vmatmul.msk.f32.gmra.mxu0 %vm509_vm0, %v394_v37  ;;  %v403_v37 = vld [vmem:[%s7871_s13 + $0xd0] sm:$0xff] }
  0xa8   : > { %v7979_v46 = vpop.f32.mrf.mxu0 }
  0xa9   : > { %v1297_v10 = vmax.f32 %v7979_v46, 0.0  ;;  %v7344_v46 = vld [vmem:[%s13790_s2 + $0x350] sm:$0xff] }
  0xaa   : > { %2548 = vmatpush.msra.mxu3 %v7344_v46 }
  0xab   : > { %7208 = vmatmul.msk.f32.gmra.mxu0 %vm509_vm0, %v395_v47 }
  0xac   : > { %2549 = vmatpush.msra.mxu3 %v7343_v51 }
  0xae   : > { %2550 = vmatpush.msra.mxu3 %v7342_v55 }
  0xb0   : > { %v7998_v52 = vpop.f32.mrf.mxu0 }
  0xb1   : > { %v1298_v31 = vmax.f32 %v7998_v52, 0.0 }
  0xb3   : > { %7209 = vmatmul.msk.f32.gmra.mxu0 %vm509_vm0, %v396_v53 }
  0xb8   : > { %v923_v56 = vpop.f32.mrf.mxu0 }
  0xb9   : > { %v1299_v59 = vmax.f32 %v923_v56, 0.0 }
  0xbb   : > { %v1423_v61 = vmax.f32 %v1295_v58, %v1299_v59  ;;  %7210 = vmatmul.msk.f32.gmra.mxu0 %vm509_vm0, %v397_v57  ;;  %v7341_v57 = vld [vmem:[%s13790_s2 + $0x338] sm:$0xff]  ;;  %v7340_v59 = vld [vmem:[%s13790_s2 + $0x330] sm:$0xff] }
  0xbc   : > { %2551 = vmatpush.msra.mxu3 %v7341_v57 }
  0xbd   : > { %v1490_v62 = vperm.slane %v1423_v61, %v8014_v60 }
  0xbe   : > { %2552 = vmatpush.msra.mxu3 %v7340_v59 }
  0xbf   : > { %v1807_v63 = vrot.slane %v1490_v62, 4 }
  0xc0   : > { %v926_v0 = vpop.f32.mrf.mxu0 }
  0xc1   : > { %v1935_v3 = vmax.f32 %v1490_v62, %v1807_v63  ;;  %v1300_v4 = vmax.f32 %v926_v0, 0.0 }
  0xc3   : > { %2063 = vst [vmem:[#allocation1] ss:$2 sm:$0xff] %v1935_v3  ;;  %v1424_v5 = vmax.f32 %v1296_v2, %v1300_v4  ;;  %7211 = vmatmul.msk.f32.gmra.mxu0 %vm509_vm0, %v398_v1  ;;  %v406_v1 = vld [vmem:[%s7871_s13 + $0xe8] sm:$0xff] }
  0xc4   : > { %v7339_v4 = vld [vmem:[%s13790_s2 + $0x328] sm:$0xff] }
  0xc5   : > { %v1494_v6 = vperm.slane %v1424_v5, %v8014_v60  ;;  %v7338_v5 = vld [vmem:[%s13790_s2 + $0x320] sm:$0xff]  ;;  %2553 = vmatpush.msra.mxu3 %v7339_v4 }
  0xc7   : > { %v1808_v7 = vrot.slane %v1494_v6, 4  ;;  %2554 = vmatpush.msra.mxu3 %v7338_v5 }
  0xc8   : > { %v929_v8 = vpop.f32.mrf.mxu0 }
  0xc9   : > { %v1936_v11 = vmax.f32 %v1494_v6, %v1808_v7  ;;  %v1301_v12 = vmax.f32 %v929_v8, 0.0  ;;  %v7337_v7 = vld [vmem:[%s13790_s2 + $0x318] sm:$0xff] }
  0xca   : > { %2555 = vmatpush.msra.mxu3 %v7337_v7 }
  0xcb   : > { %2065 = vst [vmem:[#allocation1 + $0x1] ss:$2 sm:$0xff] %v1936_v11  ;;  %v1425_v13 = vmax.f32 %v1297_v10, %v1301_v12  ;;  %7212 = vmatmul.msk.f32.gmra.mxu0 %vm509_vm0, %v399_v9  ;;  %v7336_v10 = vld [vmem:[%s13790_s2 + $0x310] sm:$0xff] }
  0xcc   : > { %2556 = vmatpush.msra.mxu3 %v7336_v10 }
  0xcd   : > { %v1498_v14 = vperm.slane %v1425_v13, %v8014_v60 }
  0xcf   : > { %v1809_v15 = vrot.slane %v1498_v14, 4 }
  0xd0   : > { %v932_v19 = vpop.f32.mrf.mxu0 }
  0xd1   : > { %v1937_v16 = vmax.f32 %v1498_v14, %v1809_v15  ;;  %v1302_v28 = vmax.f32 %v932_v19, 0.0  ;;  %v407_v14 = vld [vmem:[%s7871_s13 + $0xf0] sm:$0xff]  ;;  %v7335_v15 = vld [vmem:[%s13790_s2 + $0x308] sm:$0xff] }
  0xd2   : > { %v2070_v39 = vld.sshfl [vmem:[#allocation1] sm:$0xff pattern:$0x75316420]  ;;  %2557 = vmatpush.msra.mxu3 %v7335_v15 }
  0xd3   : > { %2067 = vst [vmem:[#allocation1 + $0x10] ss:$2 sm:$0xff] %v1937_v16  ;;  %7213 = vmatmul.msk.f32.gmra.mxu0 %vm509_vm0, %v400_v21  ;;  %v1426_v32 = vmax.f32 %v1298_v31, %v1302_v28  ;;  %v409_v31 = vld [vmem:[%s7871_s13 + $0x100] sm:$0xff] }
  0xd4   : > { %2199 = vst [vmem:[#allocation2 + $0x19] sm:$0xff] %v2070_v39  ;;  %2558 = vmatpush.msra.mxu3 %v7334_v17 }
  0xd5   : > { %v1502_v35 = vperm.slane %v1426_v32, %v8014_v60 }
  0xd7   : > { %v1810_v38 = vrot.slane %v1502_v35, 4 }
  0xd8   : > { %v8080_v25 = vpop.f32.mrf.mxu0 }
  0xd9   : > { %v1938_v40 = vmax.f32 %v1502_v35, %v1810_v38  ;;  %v1303_v48 = vmax.f32 %v8080_v25, 0.0  ;;  %v408_v25 = vld [vmem:[%s7871_s13 + $0xf8] sm:$0xff]  ;;  %v410_v35 = vld [vmem:[%s7871_s13 + $0x108] sm:$0xff] }
  0xdb   : > { %7214 = vmatmul.msk.f32.gmra.mxu0 %vm509_vm0, %v401_v27  ;;  %2069 = vst [vmem:[#allocation1 + $0x11] ss:$2 sm:$0xff] %v1938_v40  ;;  %v2233_v52 = vld [vmem:[#allocation2 + $0x18] sm:$0xff]  ;;  %v412_v40 = vld [vmem:[%s7871_s13 + $0x118] sm:$0xff] }
  0xdc   : > { %2316 = vmatmul.f32.vlgmr.msra.gmra.mxu1 %v2233_v52  ;;  %2435 = vmatmul.f32.gmra.mxu2 %v2233_v52  ;;  %v414_v52 = vld [vmem:[%s7871_s13 + $0x128] sm:$0xff] }
  0xe0   : > { %v8095_v29 = vpop.f32.mrf.mxu0 }
  0xe1   : > { %v1304_v62 = vmax.f32 %v8095_v29, 0.0 }
  0xe2   : > { %v2071_v53 = vld.sshfl [vmem:[#allocation1 + $0x10] sm:$0xff pattern:$0x75316420] }
  0xe3   : > { %7215 = vmatmul.msk.f32.gmra.mxu0 %vm509_vm0, %v402_v30  ;;  %2200 = vst [vmem:[#allocation2 + $0x21] sm:$0xff] %v2071_v53 }
  0xe8   : > { %v8115_v36 = vpop.f32.mrf.mxu0 }
  0xe9   : > { %v1305_v11 = vmax.f32 %v8115_v36, 0.0 }
  0xea   : > { %v2234_v2 = vld [vmem:[#allocation2 + $0x20] sm:$0xff] }
  0xeb   : > { %7216 = vmatmul.msk.f32.gmra.mxu0 %vm509_vm0, %v403_v37  ;;  %2319 = vmatmul.f32.gmra.mxu1 %v2234_v2  ;;  %v411_v37 = vld [vmem:[%s7871_s13 + $0x110] sm:$0xff] }
  0xec   : > { %2438 = vmatmul.f32.gmra.mxu2 %v2234_v2 }
  0xf0   : > { %v8127_v41 = vpop.f32.mrf.mxu0 }
  0xf1   : > { %v1306_v21 = vmax.f32 %v8127_v41, 0.0 }
  0xf3   : > { %7217 = vmatmul.msk.f32.gmra.mxu0 %vm509_vm0, %v404_v42 }
  0xf8   : > { %v947_v47 = vpop.f32.mrf.mxu0 }
  0xf9   : > { %v1307_v49 = vmax.f32 %v947_v47, 0.0 }
  0xfb   : > { %v1427_v54 = vmax.f32 %v1303_v48, %v1307_v49  ;;  %7218 = vmatmul.msk.f32.gmra.mxu0 %vm509_vm0, %v405_v50 }
  0xfd   : > { %v1506_v56 = vperm.slane %v1427_v54, %v8014_v60 }
  0xff   : > { %v1811_v58 = vrot.slane %v1506_v56, 4 }
 0x100   : > { %v950_v61 = vpop.f32.mrf.mxu0 }
 0x101   : > { %v1939_v63 = vmax.f32 %v1506_v56, %v1811_v58  ;;  %v1308_v0 = vmax.f32 %v950_v61, 0.0  ;;  %v415_v61 = vld [vmem:[%s7871_s13 + $0x130] sm:$0xff] }
 0x103   : > { %2073 = vst [vmem:[#allocation1 + $0x20] ss:$2 sm:$0xff] %v1939_v63  ;;  %v1428_v3 = vmax.f32 %v1304_v62, %v1308_v0  ;;  %7219 = vmatmul.msk.f32.gmra.mxu0 %vm509_vm0, %v406_v1 }
 0x105   : > { %v1510_v6 = vperm.slane %v1428_v3, %v8014_v60 }
 0x107   : > { %v1812_v8 = vrot.slane %v1510_v6, 4 }
 0x108   : > { %v953_v9 = vpop.f32.mrf.mxu0 }
 0x109   : > { %v1940_v12 = vmax.f32 %v1510_v6, %v1812_v8  ;;  %v1309_v13 = vmax.f32 %v953_v9, 0.0  ;;  %v416_v6 = vld [vmem:[%s7871_s13 + $0x138] sm:$0xff] }
 0x10b   : > { %2075 = vst [vmem:[#allocation1 + $0x21] ss:$2 sm:$0xff] %v1940_v12  ;;  %v1429_v16 = vmax.f32 %v1305_v11, %v1309_v13  ;;  %7220 = vmatmul.msk.f32.gmra.mxu0 %vm509_vm0, %v407_v14  ;;  %v417_v12 = vld [vmem:[%s7871_s13 + $0x140] sm:$0xff] }
 0x10d   : > { %v1514_v18 = vperm.slane %v1429_v16, %v8014_v60  ;;  %v418_v16 = vld [vmem:[%s7871_s13 + $0x148] sm:$0xff] }
 0x10f   : > { %v1813_v19 = vrot.slane %v1514_v18, 4 }
 0x110   : > { %v956_v20 = vpop.f32.mrf.mxu0 }
 0x111   : > { %v1941_v22 = vmax.f32 %v1514_v18, %v1813_v19  ;;  %v1310_v23 = vmax.f32 %v956_v20, 0.0  ;;  %v419_v18 = vld [vmem:[%s7871_s13 + $0x150] sm:$0xff] }
 0x112   : > { %v2080_v24 = vld.sshfl [vmem:[#allocation1 + $0x20] sm:$0xff pattern:$0x75316420] }
 0x113   : > { %2201 = vst [vmem:[#allocation2 + $0x31] sm:$0xff] %v2080_v24  ;;  %v1430_v26 = vmax.f32 %v1306_v21, %v1310_v23  ;;  %7221 = vmatmul.msk.f32.gmra.mxu0 %vm509_vm0, %v408_v25  ;;  %v420_v21 = vld [vmem:[%s7871_s13 + $0x158] sm:$0xff]  ;;  %v421_v25 = vld [vmem:[%s7871_s13 + $0x160] sm:$0xff] }
 0x114   : > { %2077 = vst [vmem:[#allocation1 + $0x30] ss:$2 sm:$0xff] %v1941_v22 }
 0x115   : > { %v1518_v27 = vperm.slane %v1430_v26, %v8014_v60 }
 0x117   : > { %v1814_v28 = vrot.slane %v1518_v27, 4 }
 0x118   : > { %v959_v29 = vpop.f32.mrf.mxu0 }
 0x119   : > { %v1942_v30 = vmax.f32 %v1518_v27, %v1814_v28  ;;  %v1311_v42 = vmax.f32 %v959_v29, 0.0 }
 0x11a   : > { %v2235_v32 = vld [vmem:[#allocation2 + $0x30] sm:$0xff] }
 0x11b   : > { %2079 = vst [vmem:[#allocation1 + $0x31] ss:$2 sm:$0xff] %v1942_v30  ;;  %2322 = vmatmul.f32.gmra.mxu1 %v2235_v32  ;;  %2441 = vmatmul.f32.gmra.mxu2 %v2235_v32 }
 0x11c   : > { %2559 = vmatmul.f32.vlgmr.msra.gmra.mxu3 %v2235_v32  ;;  %7222 = vmatmul.msk.f32.gmra.mxu0 %vm509_vm0, %v409_v31  ;;  %v422_v31 = vld [vmem:[%s7871_s13 + $0x168] sm:$0xff] }
 0x120   : > { %v962_v33 = vpop.f32.mrf.mxu0 }
 0x121   : > { %v1312_v49 = vmax.f32 %v962_v33, 0.0 }
 0x122   : > { %v2081_v34 = vld.sshfl [vmem:[#allocation1 + $0x30] sm:$0xff pattern:$0x75316420] }
 0x123   : > { %2202 = vst [vmem:[#allocation2 + $0x39] sm:$0xff] %v2081_v34 }
 0x124   : > { %7223 = vmatmul.msk.f32.gmra.mxu0 %vm509_vm0, %v410_v35 }
 0x128   : > { %v965_v36 = vpop.f32.mrf.mxu0 }
 0x129   : > { %v1313_v57 = vmax.f32 %v965_v36, 0.0 }
 0x12a   : > { %v2236_v38 = vld [vmem:[#allocation2 + $0x38] sm:$0xff] }
 0x12b   : > { %2325 = vmatmul.f32.gmra.mxu1 %v2236_v38  ;;  %2444 = vmatmul.f32.gmra.mxu2 %v2236_v38 }
 0x12c   : > { %2562 = vmatmul.f32.gmra.mxu3 %v2236_v38  ;;  %7224 = vmatmul.msk.f32.gmra.mxu0 %vm509_vm0, %v411_v37  ;;  %v423_v38 = vld [vmem:[%s7871_s13 + $0x170] sm:$0xff] }
 0x130   : > { %v968_v39 = vpop.f32.mrf.mxu0 }
 0x131   : > { %v1314_v2 = vmax.f32 %v968_v39, 0.0 }
 0x134   : > { %7225 = vmatmul.msk.f32.gmra.mxu0 %vm509_vm0, %v412_v40 }
 0x138   : > { %v971_v41 = vpop.f32.mrf.mxu0 }
 0x139   : > { %v1315_v43 = vmax.f32 %v971_v41, 0.0 }
 0x13b   : > { %v1431_v45 = vmax.f32 %v1311_v42, %v1315_v43 }
 0x13c   : > { %7226 = vmatmul.msk.f32.gmra.mxu0 %vm509_vm0, %v413_v44 }
 0x13d   : > { %v1522_v46 = vperm.slane %v1431_v45, %v8014_v60 }
 0x13f   : > { %v1815_v47 = vrot.slane %v1522_v46, 4 }
 0x140   : > { %v974_v48 = vpop.f32.mrf.mxu0 }
 0x141   : > { %v1943_v50 = vmax.f32 %v1522_v46, %v1815_v47  ;;  %v1316_v51 = vmax.f32 %v974_v48, 0.0  ;;  %v424_v46 = vld [vmem:[%s7871_s13 + $0x178] sm:$0xff] }
 0x143   : > { %2082 = vst [vmem:[#allocation1] ss:$2 sm:$0xff] %v1943_v50  ;;  %v1432_v53 = vmax.f32 %v1312_v49, %v1316_v51 }
 0x144   : > { %7227 = vmatmul.msk.f32.gmra.mxu0 %vm509_vm0, %v414_v52 }
 0x145   : > { %v1526_v54 = vperm.slane %v1432_v53, %v8014_v60 }
 0x147   : > { %v1816_v55 = vrot.slane %v1526_v54, 4 }
 0x148   : > { %v977_v56 = vpop.f32.mrf.mxu0 }
 0x149   : > { %v1944_v58 = vmax.f32 %v1526_v54, %v1816_v55  ;;  %v1317_v59 = vmax.f32 %v977_v56, 0.0  ;;  %v425_v55 = vld [vmem:[%s7871_s13 + $0x180] sm:$0xff] }
 0x14b   : > { %2083 = vst [vmem:[#allocation1 + $0x1] ss:$2 sm:$0xff] %v1944_v58  ;;  %v1433_v62 = vmax.f32 %v1313_v57, %v1317_v59  ;;  %v426_v59 = vld [vmem:[%s7871_s13 + $0x188] sm:$0xff] }
 0x14c   : > { %7228 = vmatmul.msk.f32.gmra.mxu0 %vm509_vm0, %v415_v61 }
 0x14d   : > { %v1530_v63 = vperm.slane %v1433_v62, %v8014_v60 }
 0x14f   : > { %v1817_v0 = vrot.slane %v1530_v63, 4 }
 0x150   : > { %v980_v1 = vpop.f32.mrf.mxu0 }
 0x151   : > { %v1945_v3 = vmax.f32 %v1530_v63, %v1817_v0  ;;  %v1318_v4 = vmax.f32 %v980_v1, 0.0  ;;  %v427_v63 = vld [vmem:[%s7871_s13 + $0x190] sm:$0xff] }
 0x152   : > { %v2086_v5 = vld.sshfl [vmem:[#allocation1] sm:$0xff pattern:$0x75316420] }
 0x153   : > { %2203 = vst [vmem:[#allocation2 + $0x49] sm:$0xff] %v2086_v5  ;;  %v1434_v7 = vmax.f32 %v1314_v2, %v1318_v4  ;;  %v428_v2 = vld [vmem:[%s7871_s13 + $0x198] sm:$0xff]  ;;  %v429_v4 = vld [vmem:[%s7871_s13 + $0x1a0] sm:$0xff] }
 0x154   : > { %2084 = vst [vmem:[#allocation1 + $0x10] ss:$2 sm:$0xff] %v1945_v3  ;;  %7229 = vmatmul.msk.f32.gmra.mxu0 %vm509_vm0, %v416_v6 }
 0x155   : > { %v1534_v8 = vperm.slane %v1434_v7, %v8014_v60 }
 0x157   : > { %v1818_v9 = vrot.slane %v1534_v8, 4 }
 0x158   : > { %v983_v10 = vpop.f32.mrf.mxu0 }
 0x159   : > { %v1946_v11 = vmax.f32 %v1534_v8, %v1818_v9  ;;  %v1319_v23 = vmax.f32 %v983_v10, 0.0 }
 0x15a   : > { %v2237_v13 = vld [vmem:[#allocation2 + $0x48] sm:$0xff] }
 0x15b   : > { %2085 = vst [vmem:[#allocation1 + $0x11] ss:$2 sm:$0xff] %v1946_v11  ;;  %2328 = vmatmul.f32.gmra.mxu1 %v2237_v13  ;;  %2447 = vmatmul.f32.gmra.mxu2 %v2237_v13  ;;  %v430_v11 = vld [vmem:[%s7871_s13 + $0x1a8] sm:$0xff] }
 0x15c   : > { %2565 = vmatmul.f32.gmra.mxu3 %v2237_v13  ;;  %7230 = vmatmul.msk.f32.gmra.mxu0 %vm509_vm0, %v417_v12 }
 0x160   : > { %v986_v14 = vpop.f32.mrf.mxu0 }
 0x161   : > { %v1320_v32 = vmax.f32 %v986_v14, 0.0 }
 0x162   : > { %v2087_v15 = vld.sshfl [vmem:[#allocation1 + $0x10] sm:$0xff pattern:$0x75316420] }
 0x163   : > { %2204 = vst [vmem:[#allocation2 + $0x51] sm:$0xff] %v2087_v15 }
 0x164   : > { %7231 = vmatmul.msk.f32.gmra.mxu0 %vm509_vm0, %v418_v16 }
 0x168   : > { %v989_v17 = vpop.f32.mrf.mxu0 }
 0x169   : > { %v1321_v39 = vmax.f32 %v989_v17, 0.0 }
 0x16a   : > { %v2238_v19 = vld [vmem:[#allocation2 + $0x50] sm:$0xff] }
 0x16b   : > { %2331 = vmatmul.f32.gmra.mxu1 %v2238_v19  ;;  %2450 = vmatmul.f32.gmra.mxu2 %v2238_v19 }
 0x16c   : > { %2568 = vmatmul.f32.gmra.mxu3 %v2238_v19  ;;  %7232 = vmatmul.msk.f32.gmra.mxu0 %vm509_vm0, %v419_v18  ;;  %v431_v19 = vld [vmem:[%s7871_s13 + $0x1b0] sm:$0xff] }
 0x170   : > { %v992_v20 = vpop.f32.mrf.mxu0 }
 0x171   : > { %v1322_v47 = vmax.f32 %v992_v20, 0.0 }
 0x174   : > { %7233 = vmatmul.msk.f32.gmra.mxu0 %vm509_vm0, %v420_v21 }
 0x178   : > { %v995_v22 = vpop.f32.mrf.mxu0 }
 0x179   : > { %v1323_v24 = vmax.f32 %v995_v22, 0.0 }
 0x17b   : > { %v1435_v26 = vmax.f32 %v1319_v23, %v1323_v24 }
 0x17c   : > { %7234 = vmatmul.msk.f32.gmra.mxu0 %vm509_vm0, %v421_v25 }
 0x17d   : > { %v1538_v27 = vperm.slane %v1435_v26, %v8014_v60 }
 0x17f   : > { %v1819_v28 = vrot.slane %v1538_v27, 4 }
 0x180   : > { %v998_v30 = vpop.f32.mrf.mxu0 }
 0x181   : > { %v1947_v29 = vmax.f32 %v1538_v27, %v1819_v28  ;;  %v1324_v33 = vmax.f32 %v998_v30, 0.0  ;;  %v432_v27 = vld [vmem:[%s7871_s13 + $0x1b8] sm:$0xff] }
 0x183   : > { %2088 = vst [vmem:[#allocation1 + $0x20] ss:$2 sm:$0xff] %v1947_v29  ;;  %v1436_v34 = vmax.f32 %v1320_v32, %v1324_v33 }
 0x184   : > { %7235 = vmatmul.msk.f32.gmra.mxu0 %vm509_vm0, %v422_v31 }
 0x185   : > { %v1542_v35 = vperm.slane %v1436_v34, %v8014_v60 }
 0x187   : > { %v1820_v36 = vrot.slane %v1542_v35, 4 }
 0x188   : > { %v1001_v37 = vpop.f32.mrf.mxu0 }
 0x189   : > { %v1948_v40 = vmax.f32 %v1542_v35, %v1820_v36  ;;  %v1325_v41 = vmax.f32 %v1001_v37, 0.0  ;;  %v433_v36 = vld [vmem:[%s7871_s13 + $0x1c0] sm:$0xff] }
 0x18b   : > { %2089 = vst [vmem:[#allocation1 + $0x21] ss:$2 sm:$0xff] %v1948_v40  ;;  %v1437_v42 = vmax.f32 %v1321_v39, %v1325_v41  ;;  %v434_v40 = vld [vmem:[%s7871_s13 + $0x1c8] sm:$0xff] }
 0x18c   : > { %7236 = vmatmul.msk.f32.gmra.mxu0 %vm509_vm0, %v423_v38 }
 0x18d   : > { %v1546_v43 = vperm.slane %v1437_v42, %v8014_v60 }
 0x18f   : > { %v1821_v44 = vrot.slane %v1546_v43, 4 }
 0x190   : > { %v1004_v45 = vpop.f32.mrf.mxu0 }
 0x191   : > { %v1949_v48 = vmax.f32 %v1546_v43, %v1821_v44  ;;  %v1326_v49 = vmax.f32 %v1004_v45, 0.0  ;;  %v435_v43 = vld [vmem:[%s7871_s13 + $0x1d0] sm:$0xff] }
 0x192   : > { %v2092_v50 = vld.sshfl [vmem:[#allocation1 + $0x20] sm:$0xff pattern:$0x75316420] }
 0x193   : > { %2205 = vst [vmem:[#allocation2 + $0x61] sm:$0xff] %v2092_v50  ;;  %v1438_v51 = vmax.f32 %v1322_v47, %v1326_v49 }
 0x194   : > { %7237 = vmatmul.msk.f32.gmra.mxu0 %vm509_vm0, %v424_v46  ;;  %2090 = vst [vmem:[#allocation1 + $0x30] ss:$2 sm:$0xff] %v1949_v48  ;;  %v436_v46 = vld [vmem:[%s7871_s13 + $0x1d8] sm:$0xff]  ;;  %v437_v48 = vld [vmem:[%s7871_s13 + $0x1e0] sm:$0xff] }
 0x195   : > { %v1550_v52 = vperm.slane %v1438_v51, %v8014_v60 }
 0x197   : > { %v1822_v53 = vrot.slane %v1550_v52, 4 }
 0x199   : > { %v1007_v54 = vpop.f32.mrf.mxu0  ;;  %v1950_v56 = vmax.f32 %v1550_v52, %v1822_v53 }
 0x19a   : > { %v2239_v57 = vld [vmem:[#allocation2 + $0x60] sm:$0xff]  ;;  %v1327_v5 = vmax.f32 %v1007_v54, 0.0 }
 0x19b   : > { %2091 = vst [vmem:[#allocation1 + $0x31] ss:$2 sm:$0xff] %v1950_v56  ;;  %2334 = vmatmul.f32.gmra.mxu1 %v2239_v57  ;;  %2453 = vmatmul.f32.gmra.mxu2 %v2239_v57 }
 0x19c   : > { %7238 = vmatmul.msk.f32.gmra.mxu0 %vm509_vm0, %v425_v55  ;;  %2571 = vmatmul.f32.gmra.mxu3 %v2239_v57  ;;  %v438_v55 = vld [vmem:[%s7871_s13 + $0x1e8] sm:$0xff] }
 0x1a1   : > { %v1010_v58 = vpop.f32.mrf.mxu0 }
 0x1a2   : > { %v2093_v61 = vld.sshfl [vmem:[#allocation1 + $0x30] sm:$0xff pattern:$0x75316420]  ;;  %v1328_v12 = vmax.f32 %v1010_v58, 0.0 }
 0x1a3   : > { %2206 = vst [vmem:[#allocation2 + $0x69] sm:$0xff] %v2093_v61 }
 0x1a4   : > { %7239 = vmatmul.msk.f32.gmra.mxu0 %vm509_vm0, %v426_v59 }
 0x1a9   : > { %v1013_v62 = vpop.f32.mrf.mxu0 }
 0x1aa   : > { %v2240_v0 = vld [vmem:[#allocation2 + $0x68] sm:$0xff]  ;;  %v1329_v20 = vmax.f32 %v1013_v62, 0.0 }
 0x1ab   : > { %2337 = vmatmul.f32.gmra.mxu1 %v2240_v0  ;;  %2456 = vmatmul.f32.gmra.mxu2 %v2240_v0 }
 0x1ac   : > { %7240 = vmatmul.msk.f32.gmra.mxu0 %vm509_vm0, %v427_v63  ;;  %2574 = vmatmul.f32.gmra.mxu3 %v2240_v0  ;;  %v439_v0 = vld [vmem:[%s7871_s13 + $0x1f0] sm:$0xff] }
 0x1b1   : > { %v1016_v1 = vpop.f32.mrf.mxu0 }
 0x1b2   : > { %v1330_v28 = vmax.f32 %v1016_v1, 0.0 }
 0x1b4   : > { %7241 = vmatmul.msk.f32.gmra.mxu0 %vm509_vm0, %v428_v2 }
 0x1b9   : > { %v1019_v3 = vpop.f32.mrf.mxu0 }
 0x1ba   : > { %v1331_v6 = vmax.f32 %v1019_v3, 0.0 }
 0x1bc   : > { %v1439_v7 = vmax.f32 %v1327_v5, %v1331_v6  ;;  %7242 = vmatmul.msk.f32.gmra.mxu0 %vm509_vm0, %v429_v4 }
 0x1be   : > { %v1554_v8 = vperm.slane %v1439_v7, %v8014_v60 }
 0x1c0   : > { %v1823_v9 = vrot.slane %v1554_v8, 4 }
 0x1c1   : > { %v1022_v10 = vpop.f32.mrf.mxu0 }
 0x1c2   : > { %v1951_v13 = vmax.f32 %v1554_v8, %v1823_v9  ;;  %v1332_v14 = vmax.f32 %v1022_v10, 0.0  ;;  %v440_v8 = vld [vmem:[%s7871_s13 + $0x1f8] sm:$0xff] }
 0x1c4   : > { %2094 = vst [vmem:[#allocation1] ss:$2 sm:$0xff] %v1951_v13  ;;  %v1440_v15 = vmax.f32 %v1328_v12, %v1332_v14  ;;  %7243 = vmatmul.msk.f32.gmra.mxu0 %vm509_vm0, %v430_v11 }
 0x1c6   : > { %v1558_v16 = vperm.slane %v1440_v15, %v8014_v60 }
 0x1c8   : > { %v1824_v17 = vrot.slane %v1558_v16, 4 }
 0x1c9   : > { %v1025_v18 = vpop.f32.mrf.mxu0 }
 0x1ca   : > { %v1952_v21 = vmax.f32 %v1558_v16, %v1824_v17  ;;  %v1333_v22 = vmax.f32 %v1025_v18, 0.0  ;;  %v441_v17 = vld [vmem:[%s7871_s13 + $0x200] sm:$0xff] }
 0x1cc   : > { %2095 = vst [vmem:[#allocation1 + $0x1] ss:$2 sm:$0xff] %v1952_v21  ;;  %v1441_v23 = vmax.f32 %v1329_v20, %v1333_v22  ;;  %7244 = vmatmul.msk.f32.gmra.mxu0 %vm509_vm0, %v431_v19  ;;  %v442_v21 = vld [vmem:[%s7871_s13 + $0x208] sm:$0xff] }
 0x1ce   : > { %v1562_v24 = vperm.slane %v1441_v23, %v8014_v60 }
 0x1d0   : > { %v1825_v25 = vrot.slane %v1562_v24, 4 }
 0x1d1   : > { %v1028_v26 = vpop.f32.mrf.mxu0 }
 0x1d2   : > { %v1953_v29 = vmax.f32 %v1562_v24, %v1825_v25  ;;  %v1334_v30 = vmax.f32 %v1028_v26, 0.0  ;;  %v443_v24 = vld [vmem:[%s7871_s13 + $0x210] sm:$0xff] }
 0x1d3   : > { %v2098_v31 = vld.sshfl [vmem:[#allocation1] sm:$0xff pattern:$0x75316420] }
 0x1d4   : > { %2207 = vst [vmem:[#allocation2 + $0x79] sm:$0xff] %v2098_v31  ;;  %v1442_v32 = vmax.f32 %v1330_v28, %v1334_v30  ;;  %7245 = vmatmul.msk.f32.gmra.mxu0 %vm509_vm0, %v432_v27  ;;  %v444_v27 = vld [vmem:[%s7871_s13 + $0x218] sm:$0xff] }
 0x1d5   : > { %2096 = vst [vmem:[#allocation1 + $0x10] ss:$2 sm:$0xff] %v1953_v29  ;;  %v445_v29 = vld [vmem:[%s7871_s13 + $0x220] sm:$0xff] }
 0x1d6   : > { %v1566_v33 = vperm.slane %v1442_v32, %v8014_v60 }
 0x1d8   : > { %v1826_v34 = vrot.slane %v1566_v33, 4 }
 0x1d9   : > { %v1031_v35 = vpop.f32.mrf.mxu0 }
 0x1da   : > { %v1954_v37 = vmax.f32 %v1566_v33, %v1826_v34  ;;  %v1335_v49 = vmax.f32 %v1031_v35, 0.0 }
 0x1db   : > { %v2241_v38 = vld [vmem:[#allocation2 + $0x78] sm:$0xff] }
 0x1dc   : > { %2097 = vst [vmem:[#allocation1 + $0x11] ss:$2 sm:$0xff] %v1954_v37  ;;  %7246 = vmatmul.msk.f32.gmra.mxu0 %vm509_vm0, %v433_v36  ;;  %2340 = vmatmul.f32.gmra.mxu1 %v2241_v38  ;;  %v446_v36 = vld [vmem:[%s7871_s13 + $0x228] sm:$0xff] }
 0x1dd   : > { %2459 = vmatmul.f32.gmra.mxu2 %v2241_v38  ;;  %2577 = vmatmul.f32.gmra.mxu3 %v2241_v38 }
 0x1e1   : > { %v1034_v39 = vpop.f32.mrf.mxu0 }
 0x1e2   : > { %v1336_v56 = vmax.f32 %v1034_v39, 0.0 }
 0x1e3   : > { %v2099_v41 = vld.sshfl [vmem:[#allocation1 + $0x10] sm:$0xff pattern:$0x75316420] }
 0x1e4   : > { %2208 = vst [vmem:[#allocation2 + $0x81] sm:$0xff] %v2099_v41  ;;  %7247 = vmatmul.msk.f32.gmra.mxu0 %vm509_vm0, %v434_v40 }
 0x1e9   : > { %v1037_v42 = vpop.f32.mrf.mxu0 }
 0x1ea   : > { %v1337_v1 = vmax.f32 %v1037_v42, 0.0 }
 0x1eb   : > { %v2242_v44 = vld [vmem:[#allocation2 + $0x80] sm:$0xff] }
 0x1ec   : > { %7248 = vmatmul.msk.f32.gmra.mxu0 %vm509_vm0, %v435_v43  ;;  %2343 = vmatmul.f32.gmra.mxu1 %v2242_v44 }
 0x1ed   : > { %2462 = vmatmul.f32.gmra.mxu2 %v2242_v44  ;;  %2580 = vmatmul.f32.gmra.mxu3 %v2242_v44  ;;  %v447_v44 = vld [vmem:[%s7871_s13 + $0x230] sm:$0xff] }
 0x1f1   : > { %v1040_v45 = vpop.f32.mrf.mxu0 }
 0x1f2   : > { %v1338_v9 = vmax.f32 %v1040_v45, 0.0 }
 0x1f4   : > { %7249 = vmatmul.msk.f32.gmra.mxu0 %vm509_vm0, %v436_v46 }
 0x1f9   : > { %v1043_v47 = vpop.f32.mrf.mxu0 }
 0x1fa   : > { %v1339_v50 = vmax.f32 %v1043_v47, 0.0 }
 0x1fc   : > { %v1443_v51 = vmax.f32 %v1335_v49, %v1339_v50  ;;  %7250 = vmatmul.msk.f32.gmra.mxu0 %vm509_vm0, %v437_v48 }
 0x1fe   : > { %v1570_v52 = vperm.slane %v1443_v51, %v8014_v60 }
 0x200   : > { %v1827_v53 = vrot.slane %v1570_v52, 4 }
 0x201   : > { %v1046_v54 = vpop.f32.mrf.mxu0 }
 0x202   : > { %v1955_v57 = vmax.f32 %v1570_v52, %v1827_v53  ;;  %v1340_v58 = vmax.f32 %v1046_v54, 0.0  ;;  %v448_v52 = vld [vmem:[%s7871_s13 + $0x238] sm:$0xff] }
 0x204   : > { %2100 = vst [vmem:[#allocation1 + $0x20] ss:$2 sm:$0xff] %v1955_v57  ;;  %v1444_v59 = vmax.f32 %v1336_v56, %v1340_v58  ;;  %7251 = vmatmul.msk.f32.gmra.mxu0 %vm509_vm0, %v438_v55 }
 0x206   : > { %v1574_v61 = vperm.slane %v1444_v59, %v8014_v60 }
 0x208   : > { %v1828_v62 = vrot.slane %v1574_v61, 4 }
 0x209   : > { %v1049_v63 = vpop.f32.mrf.mxu0 }
 0x20a   : > { %v1956_v2 = vmax.f32 %v1574_v61, %v1828_v62  ;;  %v1341_v3 = vmax.f32 %v1049_v63, 0.0  ;;  %v449_v62 = vld [vmem:[%s7871_s13 + $0x240] sm:$0xff] }
 0x20c   : > { %2101 = vst [vmem:[#allocation1 + $0x21] ss:$2 sm:$0xff] %v1956_v2  ;;  %v1445_v4 = vmax.f32 %v1337_v1, %v1341_v3  ;;  %7252 = vmatmul.msk.f32.gmra.mxu0 %vm509_vm0, %v439_v0  ;;  %v450_v2 = vld [vmem:[%s7871_s13 + $0x248] sm:$0xff] }
 0x20e   : > { %v1578_v5 = vperm.slane %v1445_v4, %v8014_v60 }
 0x210   : > { %v1829_v6 = vrot.slane %v1578_v5, 4 }
 0x211   : > { %v1052_v7 = vpop.f32.mrf.mxu0 }
 0x212   : > { %v1957_v10 = vmax.f32 %v1578_v5, %v1829_v6  ;;  %v1342_v11 = vmax.f32 %v1052_v7, 0.0  ;;  %v451_v5 = vld [vmem:[%s7871_s13 + $0x250] sm:$0xff] }
 0x213   : > { %v2104_v12 = vld.sshfl [vmem:[#allocation1 + $0x20] sm:$0xff pattern:$0x75316420] }
 0x214   : > { %2209 = vst [vmem:[#allocation2 + $0x91] sm:$0xff] %v2104_v12  ;;  %v1446_v13 = vmax.f32 %v1338_v9, %v1342_v11  ;;  %7253 = vmatmul.msk.f32.gmra.mxu0 %vm509_vm0, %v440_v8  ;;  %v452_v8 = vld [vmem:[%s7871_s13 + $0x258] sm:$0xff] }
 0x215   : > { %2102 = vst [vmem:[#allocation1 + $0x30] ss:$2 sm:$0xff] %v1957_v10  ;;  %v453_v10 = vld [vmem:[%s7871_s13 + $0x260] sm:$0xff] }
 0x216   : > { %v1582_v14 = vperm.slane %v1446_v13, %v8014_v60 }
 0x218   : > { %v1830_v15 = vrot.slane %v1582_v14, 4 }
 0x219   : > { %v1055_v16 = vpop.f32.mrf.mxu0 }
 0x21a   : > { %v1958_v18 = vmax.f32 %v1582_v14, %v1830_v15  ;;  %v1343_v30 = vmax.f32 %v1055_v16, 0.0 }
 0x21b   : > { %v2243_v19 = vld [vmem:[#allocation2 + $0x90] sm:$0xff] }
 0x21c   : > { %2103 = vst [vmem:[#allocation1 + $0x31] ss:$2 sm:$0xff] %v1958_v18  ;;  %7254 = vmatmul.msk.f32.gmra.mxu0 %vm509_vm0, %v441_v17  ;;  %2346 = vmatmul.f32.gmra.mxu1 %v2243_v19  ;;  %v454_v17 = vld [vmem:[%s7871_s13 + $0x268] sm:$0xff] }
 0x21d   : > { %2465 = vmatmul.f32.gmra.mxu2 %v2243_v19  ;;  %2583 = vmatmul.f32.gmra.mxu3 %v2243_v19 }
 0x221   : > { %v1058_v20 = vpop.f32.mrf.mxu0 }
 0x222   : > { %v1344_v37 = vmax.f32 %v1058_v20, 0.0 }
 0x223   : > { %v2105_v22 = vld.sshfl [vmem:[#allocation1 + $0x30] sm:$0xff pattern:$0x75316420] }
 0x224   : > { %2210 = vst [vmem:[#allocation2 + $0x99] sm:$0xff] %v2105_v22  ;;  %7255 = vmatmul.msk.f32.gmra.mxu0 %vm509_vm0, %v442_v21 }
 0x229   : > { %v1061_v23 = vpop.f32.mrf.mxu0 }
 0x22a   : > { %v1345_v45 = vmax.f32 %v1061_v23, 0.0 }
 0x22b   : > { %v2244_v25 = vld [vmem:[#allocation2 + $0x98] sm:$0xff] }
 0x22c   : > { %7256 = vmatmul.msk.f32.gmra.mxu0 %vm509_vm0, %v443_v24  ;;  %2349 = vmatmul.f32.gmra.mxu1 %v2244_v25 }
 0x22d   : > { %2468 = vmatmul.f32.gmra.mxu2 %v2244_v25  ;;  %2586 = vmatmul.f32.gmra.mxu3 %v2244_v25  ;;  %v455_v25 = vld [vmem:[%s7871_s13 + $0x270] sm:$0xff] }
 0x231   : > { %v1064_v26 = vpop.f32.mrf.mxu0 }
 0x232   : > { %v1346_v53 = vmax.f32 %v1064_v26, 0.0 }
 0x234   : > { %7257 = vmatmul.msk.f32.gmra.mxu0 %vm509_vm0, %v444_v27 }
 0x239   : > { %v1067_v28 = vpop.f32.mrf.mxu0 }
 0x23a   : > { %v1347_v31 = vmax.f32 %v1067_v28, 0.0 }
 0x23c   : > { %v1447_v32 = vmax.f32 %v1343_v30, %v1347_v31  ;;  %7258 = vmatmul.msk.f32.gmra.mxu0 %vm509_vm0, %v445_v29 }
 0x23e   : > { %v1586_v33 = vperm.slane %v1447_v32, %v8014_v60 }
 0x240   : > { %v1831_v34 = vrot.slane %v1586_v33, 4 }
 0x241   : > { %v1070_v35 = vpop.f32.mrf.mxu0 }
 0x242   : > { %v1959_v38 = vmax.f32 %v1586_v33, %v1831_v34  ;;  %v1348_v39 = vmax.f32 %v1070_v35, 0.0  ;;  %v456_v33 = vld [vmem:[%s7871_s13 + $0x278] sm:$0xff] }
 0x244   : > { %2106 = vst [vmem:[#allocation1] ss:$2 sm:$0xff] %v1959_v38  ;;  %v1448_v40 = vmax.f32 %v1344_v37, %v1348_v39  ;;  %7259 = vmatmul.msk.f32.gmra.mxu0 %vm509_vm0, %v446_v36 }
 0x246   : > { %v1590_v41 = vperm.slane %v1448_v40, %v8014_v60 }
 0x248   : > { %v1832_v42 = vrot.slane %v1590_v41, 4 }
 0x249   : > { %v1073_v43 = vpop.f32.mrf.mxu0 }
 0x24a   : > { %v1960_v46 = vmax.f32 %v1590_v41, %v1832_v42  ;;  %v1349_v47 = vmax.f32 %v1073_v43, 0.0  ;;  %v457_v42 = vld [vmem:[%s7871_s13 + $0x280] sm:$0xff] }
 0x24c   : > { %2107 = vst [vmem:[#allocation1 + $0x1] ss:$2 sm:$0xff] %v1960_v46  ;;  %v1449_v48 = vmax.f32 %v1345_v45, %v1349_v47  ;;  %7260 = vmatmul.msk.f32.gmra.mxu0 %vm509_vm0, %v447_v44  ;;  %v458_v46 = vld [vmem:[%s7871_s13 + $0x288] sm:$0xff] }
 0x24e   : > { %v1594_v49 = vperm.slane %v1449_v48, %v8014_v60 }
 0x250   : > { %v1833_v50 = vrot.slane %v1594_v49, 4 }
 0x251   : > { %v1076_v51 = vpop.f32.mrf.mxu0 }
 0x252   : > { %v1961_v54 = vmax.f32 %v1594_v49, %v1833_v50  ;;  %v1350_v55 = vmax.f32 %v1076_v51, 0.0  ;;  %v459_v49 = vld [vmem:[%s7871_s13 + $0x290] sm:$0xff] }
 0x253   : > { %v2110_v56 = vld.sshfl [vmem:[#allocation1] sm:$0xff pattern:$0x75316420] }
 0x254   : > { %2211 = vst [vmem:[#allocation2 + $0xa9] sm:$0xff] %v2110_v56  ;;  %v1450_v57 = vmax.f32 %v1346_v53, %v1350_v55  ;;  %7261 = vmatmul.msk.f32.gmra.mxu0 %vm509_vm0, %v448_v52  ;;  %v460_v52 = vld [vmem:[%s7871_s13 + $0x298] sm:$0xff] }
 0x255   : > { %2108 = vst [vmem:[#allocation1 + $0x10] ss:$2 sm:$0xff] %v1961_v54  ;;  %v461_v54 = vld [vmem:[%s7871_s13 + $0x2a0] sm:$0xff] }
 0x256   : > { %v1598_v58 = vperm.slane %v1450_v57, %v8014_v60 }
 0x258   : > { %v1834_v59 = vrot.slane %v1598_v58, 4 }
 0x259   : > { %v1079_v61 = vpop.f32.mrf.mxu0 }
 0x25a   : > { %v1962_v63 = vmax.f32 %v1598_v58, %v1834_v59  ;;  %v1351_v11 = vmax.f32 %v1079_v61, 0.0 }
 0x25b   : > { %v2245_v0 = vld [vmem:[#allocation2 + $0xa8] sm:$0xff] }
 0x25c   : > { %2109 = vst [vmem:[#allocation1 + $0x11] ss:$2 sm:$0xff] %v1962_v63  ;;  %7262 = vmatmul.msk.f32.gmra.mxu0 %vm509_vm0, %v449_v62  ;;  %2352 = vmatmul.f32.gmra.mxu1 %v2245_v0  ;;  %v462_v62 = vld [vmem:[%s7871_s13 + $0x2a8] sm:$0xff] }
 0x25d   : > { %2471 = vmatmul.f32.gmra.mxu2 %v2245_v0  ;;  %2589 = vmatmul.f32.gmra.mxu3 %v2245_v0 }
 0x261   : > { %v1082_v1 = vpop.f32.mrf.mxu0 }
 0x262   : > { %v1352_v18 = vmax.f32 %v1082_v1, 0.0 }
 0x263   : > { %v2111_v3 = vld.sshfl [vmem:[#allocation1 + $0x10] sm:$0xff pattern:$0x75316420] }
 0x264   : > { %2212 = vst [vmem:[#allocation2 + $0xb1] sm:$0xff] %v2111_v3  ;;  %7263 = vmatmul.msk.f32.gmra.mxu0 %vm509_vm0, %v450_v2 }
 0x269   : > { %v1085_v4 = vpop.f32.mrf.mxu0 }
 0x26a   : > { %v1353_v26 = vmax.f32 %v1085_v4, 0.0 }
 0x26b   : > { %v2246_v6 = vld [vmem:[#allocation2 + $0xb0] sm:$0xff] }
 0x26c   : > { %7264 = vmatmul.msk.f32.gmra.mxu0 %vm509_vm0, %v451_v5  ;;  %2355 = vmatmul.f32.gmra.mxu1 %v2246_v6 }
 0x26d   : > { %2474 = vmatmul.f32.gmra.mxu2 %v2246_v6  ;;  %2592 = vmatmul.f32.gmra.mxu3 %v2246_v6  ;;  %v463_v6 = vld [vmem:[%s7871_s13 + $0x2b0] sm:$0xff] }
 0x271   : > { %v1088_v7 = vpop.f32.mrf.mxu0 }
 0x272   : > { %v1354_v34 = vmax.f32 %v1088_v7, 0.0 }
 0x274   : > { %7265 = vmatmul.msk.f32.gmra.mxu0 %vm509_vm0, %v452_v8 }
 0x279   : > { %v1091_v9 = vpop.f32.mrf.mxu0 }
 0x27a   : > { %v1355_v12 = vmax.f32 %v1091_v9, 0.0 }
 0x27c   : > { %v1451_v13 = vmax.f32 %v1351_v11, %v1355_v12  ;;  %7266 = vmatmul.msk.f32.gmra.mxu0 %vm509_vm0, %v453_v10 }
 0x27e   : > { %v1602_v14 = vperm.slane %v1451_v13, %v8014_v60 }
 0x280   : > { %v1835_v15 = vrot.slane %v1602_v14, 4 }
 0x281   : > { %v1094_v16 = vpop.f32.mrf.mxu0 }
 0x282   : > { %v1963_v19 = vmax.f32 %v1602_v14, %v1835_v15  ;;  %v1356_v20 = vmax.f32 %v1094_v16, 0.0  ;;  %v464_v14 = vld [vmem:[%s7871_s13 + $0x2b8] sm:$0xff] }
 0x284   : > { %2112 = vst [vmem:[#allocation1 + $0x20] ss:$2 sm:$0xff] %v1963_v19  ;;  %v1452_v21 = vmax.f32 %v1352_v18, %v1356_v20  ;;  %7267 = vmatmul.msk.f32.gmra.mxu0 %vm509_vm0, %v454_v17 }
 0x286   : > { %v1606_v22 = vperm.slane %v1452_v21, %v8014_v60 }
 0x288   : > { %v1836_v23 = vrot.slane %v1606_v22, 4 }
 0x289   : > { %v1097_v24 = vpop.f32.mrf.mxu0 }
 0x28a   : > { %v1964_v27 = vmax.f32 %v1606_v22, %v1836_v23  ;;  %v1357_v28 = vmax.f32 %v1097_v24, 0.0  ;;  %v465_v23 = vld [vmem:[%s7871_s13 + $0x2c0] sm:$0xff] }
 0x28c   : > { %2113 = vst [vmem:[#allocation1 + $0x21] ss:$2 sm:$0xff] %v1964_v27  ;;  %v1453_v29 = vmax.f32 %v1353_v26, %v1357_v28  ;;  %7268 = vmatmul.msk.f32.gmra.mxu0 %vm509_vm0, %v455_v25  ;;  %v466_v27 = vld [vmem:[%s7871_s13 + $0x2c8] sm:$0xff] }
 0x28e   : > { %v1610_v30 = vperm.slane %v1453_v29, %v8014_v60 }
 0x290   : > { %v1837_v31 = vrot.slane %v1610_v30, 4 }
 0x291   : > { %v1100_v32 = vpop.f32.mrf.mxu0 }
 0x292   : > { %v1965_v35 = vmax.f32 %v1610_v30, %v1837_v31  ;;  %v1358_v36 = vmax.f32 %v1100_v32, 0.0  ;;  %v467_v30 = vld [vmem:[%s7871_s13 + $0x2d0] sm:$0xff] }
 0x293   : > { %v2116_v37 = vld.sshfl [vmem:[#allocation1 + $0x20] sm:$0xff pattern:$0x75316420] }
 0x294   : > { %2213 = vst [vmem:[#allocation2 + $0xc1] sm:$0xff] %v2116_v37  ;;  %v1454_v38 = vmax.f32 %v1354_v34, %v1358_v36  ;;  %7269 = vmatmul.msk.f32.gmra.mxu0 %vm509_vm0, %v456_v33  ;;  %v468_v33 = vld [vmem:[%s7871_s13 + $0x2d8] sm:$0xff] }
 0x295   : > { %2114 = vst [vmem:[#allocation1 + $0x30] ss:$2 sm:$0xff] %v1965_v35  ;;  %v469_v35 = vld [vmem:[%s7871_s13 + $0x2e0] sm:$0xff] }
 0x296   : > { %v1614_v39 = vperm.slane %v1454_v38, %v8014_v60 }
 0x298   : > { %v1838_v40 = vrot.slane %v1614_v39, 4 }
 0x299   : > { %v1103_v41 = vpop.f32.mrf.mxu0 }
 0x29a   : > { %v1966_v43 = vmax.f32 %v1614_v39, %v1838_v40  ;;  %v1359_v55 = vmax.f32 %v1103_v41, 0.0 }
 0x29b   : > { %v2247_v44 = vld [vmem:[#allocation2 + $0xc0] sm:$0xff] }
 0x29c   : > { %2115 = vst [vmem:[#allocation1 + $0x31] ss:$2 sm:$0xff] %v1966_v43  ;;  %7270 = vmatmul.msk.f32.gmra.mxu0 %vm509_vm0, %v457_v42  ;;  %2358 = vmatmul.f32.gmra.mxu1 %v2247_v44  ;;  %v470_v42 = vld [vmem:[%s7871_s13 + $0x2e8] sm:$0xff] }
 0x29d   : > { %2477 = vmatmul.f32.gmra.mxu2 %v2247_v44  ;;  %2595 = vmatmul.f32.gmra.mxu3 %v2247_v44 }
 0x2a1   : > { %v1106_v45 = vpop.f32.mrf.mxu0 }
 0x2a2   : > { %v1360_v63 = vmax.f32 %v1106_v45, 0.0 }
 0x2a3   : > { %v2117_v47 = vld.sshfl [vmem:[#allocation1 + $0x30] sm:$0xff pattern:$0x75316420] }
 0x2a4   : > { %2214 = vst [vmem:[#allocation2 + $0xc9] sm:$0xff] %v2117_v47  ;;  %7271 = vmatmul.msk.f32.gmra.mxu0 %vm509_vm0, %v458_v46 }
 0x2a9   : > { %v1109_v48 = vpop.f32.mrf.mxu0 }
 0x2aa   : > { %v1361_v7 = vmax.f32 %v1109_v48, 0.0 }
 0x2ab   : > { %v2248_v50 = vld [vmem:[#allocation2 + $0xc8] sm:$0xff] }
 0x2ac   : > { %7272 = vmatmul.msk.f32.gmra.mxu0 %vm509_vm0, %v459_v49  ;;  %2361 = vmatmul.f32.gmra.mxu1 %v2248_v50 }
 0x2ad   : > { %2480 = vmatmul.f32.gmra.mxu2 %v2248_v50  ;;  %2598 = vmatmul.f32.gmra.mxu3 %v2248_v50  ;;  %v471_v50 = vld [vmem:[%s7871_s13 + $0x2f0] sm:$0xff] }
 0x2b1   : > { %v1112_v51 = vpop.f32.mrf.mxu0 }
 0x2b2   : > { %v1362_v15 = vmax.f32 %v1112_v51, 0.0 }
 0x2b4   : > { %7273 = vmatmul.msk.f32.gmra.mxu0 %vm509_vm0, %v460_v52 }
 0x2b9   : > { %v1115_v53 = vpop.f32.mrf.mxu0 }
 0x2ba   : > { %v1363_v56 = vmax.f32 %v1115_v53, 0.0 }
 0x2bc   : > { %v1455_v57 = vmax.f32 %v1359_v55, %v1363_v56  ;;  %7274 = vmatmul.msk.f32.gmra.mxu0 %vm509_vm0, %v461_v54 }
 0x2be   : > { %v1618_v58 = vperm.slane %v1455_v57, %v8014_v60 }
 0x2c0   : > { %v1839_v59 = vrot.slane %v1618_v58, 4 }
 0x2c1   : > { %v1118_v61 = vpop.f32.mrf.mxu0 }
 0x2c2   : > { %v1967_v0 = vmax.f32 %v1618_v58, %v1839_v59  ;;  %v1364_v1 = vmax.f32 %v1118_v61, 0.0  ;;  %v472_v58 = vld [vmem:[%s7871_s13 + $0x2f8] sm:$0xff] }
 0x2c4   : > { %2118 = vst [vmem:[#allocation1] ss:$2 sm:$0xff] %v1967_v0  ;;  %v1456_v2 = vmax.f32 %v1360_v63, %v1364_v1  ;;  %7275 = vmatmul.msk.f32.gmra.mxu0 %vm509_vm0, %v462_v62 }
 0x2c6   : > { %v1622_v3 = vperm.slane %v1456_v2, %v8014_v60 }
 0x2c8   : > { %v1840_v4 = vrot.slane %v1622_v3, 4 }
 0x2c9   : > { %v1121_v5 = vpop.f32.mrf.mxu0 }
 0x2ca   : > { %v1968_v8 = vmax.f32 %v1622_v3, %v1840_v4  ;;  %v1365_v9 = vmax.f32 %v1121_v5, 0.0  ;;  %v473_v4 = vld [vmem:[%s7871_s13 + $0x300] sm:$0xff] }
 0x2cc   : > { %2119 = vst [vmem:[#allocation1 + $0x1] ss:$2 sm:$0xff] %v1968_v8  ;;  %v1457_v10 = vmax.f32 %v1361_v7, %v1365_v9  ;;  %7276 = vmatmul.msk.f32.gmra.mxu0 %vm509_vm0, %v463_v6  ;;  %v474_v8 = vld [vmem:[%s7871_s13 + $0x308] sm:$0xff] }
 0x2ce   : > { %v1626_v11 = vperm.slane %v1457_v10, %v8014_v60 }
 0x2d0   : > { %v1841_v12 = vrot.slane %v1626_v11, 4 }
 0x2d1   : > { %v1124_v13 = vpop.f32.mrf.mxu0 }
 0x2d2   : > { %v1969_v16 = vmax.f32 %v1626_v11, %v1841_v12  ;;  %v1366_v17 = vmax.f32 %v1124_v13, 0.0  ;;  %v475_v11 = vld [vmem:[%s7871_s13 + $0x310] sm:$0xff] }
 0x2d3   : > { %v2122_v18 = vld.sshfl [vmem:[#allocation1] sm:$0xff pattern:$0x75316420] }
 0x2d4   : > { %2215 = vst [vmem:[#allocation2 + $0xd9] sm:$0xff] %v2122_v18  ;;  %v1458_v19 = vmax.f32 %v1362_v15, %v1366_v17  ;;  %7277 = vmatmul.msk.f32.gmra.mxu0 %vm509_vm0, %v464_v14  ;;  %v476_v14 = vld [vmem:[%s7871_s13 + $0x318] sm:$0xff] }
 0x2d5   : > { %2120 = vst [vmem:[#allocation1 + $0x10] ss:$2 sm:$0xff] %v1969_v16  ;;  %v477_v16 = vld [vmem:[%s7871_s13 + $0x320] sm:$0xff] }
 0x2d6   : > { %v1630_v20 = vperm.slane %v1458_v19, %v8014_v60 }
 0x2d8   : > { %v1842_v21 = vrot.slane %v1630_v20, 4 }
 0x2d9   : > { %v1127_v22 = vpop.f32.mrf.mxu0 }
 0x2da   : > { %v1970_v24 = vmax.f32 %v1630_v20, %v1842_v21  ;;  %v1367_v36 = vmax.f32 %v1127_v22, 0.0 }
 0x2db   : > { %v2249_v25 = vld [vmem:[#allocation2 + $0xd8] sm:$0xff] }
 0x2dc   : > { %2121 = vst [vmem:[#allocation1 + $0x11] ss:$2 sm:$0xff] %v1970_v24  ;;  %7278 = vmatmul.msk.f32.gmra.mxu0 %vm509_vm0, %v465_v23  ;;  %2364 = vmatmul.f32.gmra.mxu1 %v2249_v25  ;;  %v478_v23 = vld [vmem:[%s7871_s13 + $0x328] sm:$0xff] }
 0x2dd   : > { %2483 = vmatmul.f32.gmra.mxu2 %v2249_v25  ;;  %2601 = vmatmul.f32.gmra.mxu3 %v2249_v25 }
 0x2e1   : > { %v1130_v26 = vpop.f32.mrf.mxu0 }
 0x2e2   : > { %v1368_v43 = vmax.f32 %v1130_v26, 0.0 }
 0x2e3   : > { %v2123_v28 = vld.sshfl [vmem:[#allocation1 + $0x10] sm:$0xff pattern:$0x75316420] }
 0x2e4   : > { %2216 = vst [vmem:[#allocation2 + $0xe1] sm:$0xff] %v2123_v28  ;;  %7279 = vmatmul.msk.f32.gmra.mxu0 %vm509_vm0, %v466_v27 }
 0x2e9   : > { %v1133_v29 = vpop.f32.mrf.mxu0 }
 0x2ea   : > { %v1369_v51 = vmax.f32 %v1133_v29, 0.0 }
 0x2eb   : > { %v2250_v31 = vld [vmem:[#allocation2 + $0xe0] sm:$0xff] }
 0x2ec   : > { %7280 = vmatmul.msk.f32.gmra.mxu0 %vm509_vm0, %v467_v30  ;;  %2367 = vmatmul.f32.gmra.mxu1 %v2250_v31 }
 0x2ed   : > { %2486 = vmatmul.f32.gmra.mxu2 %v2250_v31  ;;  %2604 = vmatmul.f32.gmra.mxu3 %v2250_v31  ;;  %v479_v31 = vld [vmem:[%s7871_s13 + $0x330] sm:$0xff] }
 0x2f1   : > { %v1136_v32 = vpop.f32.mrf.mxu0 }
 0x2f2   : > { %v1370_v59 = vmax.f32 %v1136_v32, 0.0 }
 0x2f4   : > { %7281 = vmatmul.msk.f32.gmra.mxu0 %vm509_vm0, %v468_v33 }
 0x2f9   : > { %v1139_v34 = vpop.f32.mrf.mxu0 }
 0x2fa   : > { %v1371_v37 = vmax.f32 %v1139_v34, 0.0 }
 0x2fc   : > { %v1459_v38 = vmax.f32 %v1367_v36, %v1371_v37  ;;  %7282 = vmatmul.msk.f32.gmra.mxu0 %vm509_vm0, %v469_v35 }
 0x2fe   : > { %v1634_v39 = vperm.slane %v1459_v38, %v8014_v60 }
 0x300   : > { %v1843_v40 = vrot.slane %v1634_v39, 4 }
 0x301   : > { %v1142_v41 = vpop.f32.mrf.mxu0 }
 0x302   : > { %v1971_v44 = vmax.f32 %v1634_v39, %v1843_v40  ;;  %v1372_v45 = vmax.f32 %v1142_v41, 0.0  ;;  %v480_v39 = vld [vmem:[%s7871_s13 + $0x338] sm:$0xff] }
 0x304   : > { %2124 = vst [vmem:[#allocation1 + $0x20] ss:$2 sm:$0xff] %v1971_v44  ;;  %v1460_v46 = vmax.f32 %v1368_v43, %v1372_v45  ;;  %7283 = vmatmul.msk.f32.gmra.mxu0 %vm509_vm0, %v470_v42 }
 0x306   : > { %v1638_v47 = vperm.slane %v1460_v46, %v8014_v60 }
 0x308   : > { %v1844_v48 = vrot.slane %v1638_v47, 4 }
 0x309   : > { %v1145_v49 = vpop.f32.mrf.mxu0 }
 0x30a   : > { %v1972_v52 = vmax.f32 %v1638_v47, %v1844_v48  ;;  %v1373_v53 = vmax.f32 %v1145_v49, 0.0  ;;  %v481_v48 = vld [vmem:[%s7871_s13 + $0x340] sm:$0xff] }
 0x30c   : > { %2125 = vst [vmem:[#allocation1 + $0x21] ss:$2 sm:$0xff] %v1972_v52  ;;  %v1461_v54 = vmax.f32 %v1369_v51, %v1373_v53  ;;  %7284 = vmatmul.msk.f32.gmra.mxu0 %vm509_vm0, %v471_v50  ;;  %v482_v52 = vld [vmem:[%s7871_s13 + $0x348] sm:$0xff] }
 0x30e   : > { %v1642_v55 = vperm.slane %v1461_v54, %v8014_v60 }
 0x310   : > { %v1845_v56 = vrot.slane %v1642_v55, 4 }
 0x311   : > { %v1148_v57 = vpop.f32.mrf.mxu0 }
 0x312   : > { %v1973_v61 = vmax.f32 %v1642_v55, %v1845_v56  ;;  %v1374_v62 = vmax.f32 %v1148_v57, 0.0  ;;  %v483_v55 = vld [vmem:[%s7871_s13 + $0x350] sm:$0xff] }
 0x313   : > { %v2128_v63 = vld.sshfl [vmem:[#allocation1 + $0x20] sm:$0xff pattern:$0x75316420] }
 0x314   : > { %2217 = vst [vmem:[#allocation2 + $0xf1] sm:$0xff] %v2128_v63  ;;  %v1462_v0 = vmax.f32 %v1370_v59, %v1374_v62  ;;  %7285 = vmatmul.msk.f32.gmra.mxu0 %vm509_vm0, %v472_v58  ;;  %v484_v58 = vld [vmem:[%s7871_s13 + $0x358] sm:$0xff] }
 0x315   : > { %2126 = vst [vmem:[#allocation1 + $0x30] ss:$2 sm:$0xff] %v1973_v61  ;;  %v485_v61 = vld [vmem:[%s7871_s13 + $0x360] sm:$0xff] }
 0x316   : > { %v1646_v1 = vperm.slane %v1462_v0, %v8014_v60 }
 0x318   : > { %v1846_v2 = vrot.slane %v1646_v1, 4 }
 0x319   : > { %v1151_v3 = vpop.f32.mrf.mxu0 }
 0x31a   : > { %v1974_v5 = vmax.f32 %v1646_v1, %v1846_v2  ;;  %v1375_v17 = vmax.f32 %v1151_v3, 0.0 }
 0x31b   : > { %v2251_v6 = vld [vmem:[#allocation2 + $0xf0] sm:$0xff] }
 0x31c   : > { %2127 = vst [vmem:[#allocation1 + $0x31] ss:$2 sm:$0xff] %v1974_v5  ;;  %7286 = vmatmul.msk.f32.gmra.mxu0 %vm509_vm0, %v473_v4  ;;  %2370 = vmatmul.f32.gmra.mxu1 %v2251_v6  ;;  %v486_v4 = vld [vmem:[%s7871_s13 + $0x368] sm:$0xff] }
 0x31d   : > { %2489 = vmatmul.f32.gmra.mxu2 %v2251_v6  ;;  %2607 = vmatmul.f32.gmra.mxu3 %v2251_v6 }
 0x321   : > { %v1154_v7 = vpop.f32.mrf.mxu0 }
 0x322   : > { %v1376_v24 = vmax.f32 %v1154_v7, 0.0 }
 0x323   : > { %v2129_v9 = vld.sshfl [vmem:[#allocation1 + $0x30] sm:$0xff pattern:$0x75316420] }
 0x324   : > { %2218 = vst [vmem:[#allocation2 + $0xf9] sm:$0xff] %v2129_v9  ;;  %7287 = vmatmul.msk.f32.gmra.mxu0 %vm509_vm0, %v474_v8 }
 0x329   : > { %v1157_v10 = vpop.f32.mrf.mxu0 }
 0x32a   : > { %v1377_v32 = vmax.f32 %v1157_v10, 0.0 }
 0x32b   : > { %v2252_v12 = vld [vmem:[#allocation2 + $0xf8] sm:$0xff] }
 0x32c   : > { %7288 = vmatmul.msk.f32.gmra.mxu0 %vm509_vm0, %v475_v11  ;;  %2373 = vmatmul.f32.gmra.mxu1 %v2252_v12 }
 0x32d   : > { %2492 = vmatmul.f32.gmra.mxu2 %v2252_v12  ;;  %2610 = vmatmul.f32.gmra.mxu3 %v2252_v12  ;;  %v487_v12 = vld [vmem:[%s7871_s13 + $0x370] sm:$0xff] }
 0x331   : > { %v1160_v13 = vpop.f32.mrf.mxu0 }
 0x332   : > { %v1378_v40 = vmax.f32 %v1160_v13, 0.0 }
 0x334   : > { %7289 = vmatmul.msk.f32.gmra.mxu0 %vm509_vm0, %v476_v14 }
 0x339   : > { %v1163_v15 = vpop.f32.mrf.mxu0 }
 0x33a   : > { %v1379_v18 = vmax.f32 %v1163_v15, 0.0 }
 0x33c   : > { %v1463_v19 = vmax.f32 %v1375_v17, %v1379_v18  ;;  %7290 = vmatmul.msk.f32.gmra.mxu0 %vm509_vm0, %v477_v16 }
 0x33e   : > { %v1650_v20 = vperm.slane %v1463_v19, %v8014_v60 }
 0x340   : > { %v1847_v21 = vrot.slane %v1650_v20, 4 }
 0x341   : > { %v1166_v22 = vpop.f32.mrf.mxu0 }
 0x342   : > { %v1975_v25 = vmax.f32 %v1650_v20, %v1847_v21  ;;  %v1380_v26 = vmax.f32 %v1166_v22, 0.0  ;;  %v488_v20 = vld [vmem:[%s7871_s13 + $0x378] sm:$0xff] }
 0x344   : > { %2130 = vst [vmem:[#allocation1] ss:$2 sm:$0xff] %v1975_v25  ;;  %v1464_v27 = vmax.f32 %v1376_v24, %v1380_v26  ;;  %7291 = vmatmul.msk.f32.gmra.mxu0 %vm509_vm0, %v478_v23 }
 0x346   : > { %v1654_v28 = vperm.slane %v1464_v27, %v8014_v60 }
 0x348   : > { %v1848_v29 = vrot.slane %v1654_v28, 4 }
 0x349   : > { %v1169_v30 = vpop.f32.mrf.mxu0 }
 0x34a   : > { %v1976_v33 = vmax.f32 %v1654_v28, %v1848_v29  ;;  %v1381_v34 = vmax.f32 %v1169_v30, 0.0  ;;  %v489_v29 = vld [vmem:[%s7871_s13 + $0x380] sm:$0xff] }
 0x34c   : > { %2131 = vst [vmem:[#allocation1 + $0x1] ss:$2 sm:$0xff] %v1976_v33  ;;  %v1465_v35 = vmax.f32 %v1377_v32, %v1381_v34  ;;  %7292 = vmatmul.msk.f32.gmra.mxu0 %vm509_vm0, %v479_v31  ;;  %v8396_v32 = vpop.f32.mrf.mxu2  ;;  %v490_v34 = vld [vmem:[%s7871_s13 + $0x388] sm:$0xff] }
 0x34e   : > { %v1658_v36 = vperm.slane %v1465_v35, %v8014_v60 }
 0x350   : > { %v1849_v37 = vrot.slane %v1658_v36, 4 }
 0x351   : > { %v1172_v38 = vpop.f32.mrf.mxu0 }
 0x352   : > { %v1977_v41 = vmax.f32 %v1658_v36, %v1849_v37  ;;  %v1382_v42 = vmax.f32 %v1172_v38, 0.0  ;;  %v491_v37 = vld [vmem:[%s7871_s13 + $0x390] sm:$0xff] }
 0x353   : > { %v2134_v43 = vld.sshfl [vmem:[#allocation1] sm:$0xff pattern:$0x75316420] }
 0x354   : > { %2132 = vst [vmem:[#allocation1 + $0x10] ss:$2 sm:$0xff] %v1977_v41  ;;  %v1466_v44 = vmax.f32 %v1378_v40, %v1382_v42  ;;  %7293 = vmatmul.msk.f32.gmra.mxu0 %vm509_vm0, %v480_v39  ;;  %v8405_v39 = vpop.f32.mrf.mxu2  ;;  %v492_v41 = vld [vmem:[%s7871_s13 + $0x398] sm:$0xff] }
 0x355   : > { %2219 = vst [vmem:[#allocation2 + $0x109] sm:$0xff] %v2134_v43  ;;  %v493_v43 = vld [vmem:[%s7871_s13 + $0x3a0] sm:$0xff] }
 0x356   : > { %v1662_v45 = vperm.slane %v1466_v44, %v8014_v60 }
 0x358   : > { %v1850_v46 = vrot.slane %v1662_v45, 4 }
 0x359   : > { %v1175_v47 = vpop.f32.mrf.mxu0 }
 0x35a   : > { %v1978_v49 = vmax.f32 %v1662_v45, %v1850_v46  ;;  %v1383_v62 = vmax.f32 %v1175_v47, 0.0 }
 0x35c   : > { %2133 = vst [vmem:[#allocation1 + $0x11] ss:$2 sm:$0xff] %v1978_v49  ;;  %7294 = vmatmul.msk.f32.gmra.mxu0 %vm509_vm0, %v481_v48  ;;  %v2253_v50 = vld [vmem:[#allocation2 + $0x108] sm:$0xff] }
 0x35d   : > { %2376 = vmatmul.f32.gmra.mxu1 %v2253_v50  ;;  %2495 = vmatmul.f32.gmra.mxu2 %v2253_v50 }
 0x35e   : > { %2613 = vmatmul.f32.gmra.mxu3 %v2253_v50  ;;  %v494_v50 = vld [vmem:[%s7871_s13 + $0x3a8] sm:$0xff] }
 0x361   : > { %v1178_v51 = vpop.f32.mrf.mxu0 }
 0x362   : > { %v1384_v5 = vmax.f32 %v1178_v51, 0.0 }
 0x363   : > { %v2135_v53 = vld.sshfl [vmem:[#allocation1 + $0x10] sm:$0xff pattern:$0x75316420] }
 0x364   : > { %7295 = vmatmul.msk.f32.gmra.mxu0 %vm509_vm0, %v482_v52  ;;  %2220 = vst [vmem:[#allocation2 + $0x111] sm:$0xff] %v2135_v53 }
 0x369   : > { %v1181_v54 = vpop.f32.mrf.mxu0 }
 0x36a   : > { %v1385_v13 = vmax.f32 %v1181_v54, 0.0 }
 0x36b   : > { %v2254_v56 = vld [vmem:[#allocation2 + $0x110] sm:$0xff] }
 0x36c   : > { %7296 = vmatmul.msk.f32.gmra.mxu0 %vm509_vm0, %v483_v55  ;;  %2379 = vmatmul.f32.gmra.mxu1 %v2254_v56 }
 0x36d   : > { %2498 = vmatmul.f32.gmra.mxu2 %v2254_v56  ;;  %2616 = vmatmul.f32.gmra.mxu3 %v2254_v56 }
 0x371   : > { %v1184_v57 = vpop.f32.mrf.mxu0 }
 0x372   : > { %v1386_v21 = vmax.f32 %v1184_v57, 0.0 }
 0x374   : > { %7297 = vmatmul.msk.f32.gmra.mxu0 %vm509_vm0, %v484_v58  ;;  %v495_v58 = vld [vmem:[%s7871_s13 + $0x3b0] sm:$0xff] }
 0x379   : > { %v1187_v59 = vpop.f32.mrf.mxu0 }
 0x37a   : > { %v1387_v63 = vmax.f32 %v1187_v59, 0.0 }
 0x37c   : > { %v1467_v0 = vmax.f32 %v1383_v62, %v1387_v63  ;;  %7298 = vmatmul.msk.f32.gmra.mxu0 %vm509_vm0, %v485_v61 }
 0x37e   : > { %v1666_v1 = vperm.slane %v1467_v0, %v8014_v60 }
 0x380   : > { %v1851_v2 = vrot.slane %v1666_v1, 4 }
 0x381   : > { %v1190_v3 = vpop.f32.mrf.mxu0 }
 0x382   : > { %v1979_v6 = vmax.f32 %v1666_v1, %v1851_v2  ;;  %v1388_v7 = vmax.f32 %v1190_v3, 0.0  ;;  %v496_v3 = vld [vmem:[%s7871_s13 + $0x3b8] sm:$0xff] }
 0x384   : > { %2136 = vst [vmem:[#allocation1 + $0x20] ss:$2 sm:$0xff] %v1979_v6  ;;  %v1468_v8 = vmax.f32 %v1384_v5, %v1388_v7  ;;  %7299 = vmatmul.msk.f32.gmra.mxu0 %vm509_vm0, %v486_v4 }
 0x386   : > { %v1670_v9 = vperm.slane %v1468_v8, %v8014_v60 }
 0x388   : > { %v1852_v10 = vrot.slane %v1670_v9, 4 }
 0x389   : > { %v1193_v11 = vpop.f32.mrf.mxu0 }
 0x38a   : > { %v1980_v14 = vmax.f32 %v1670_v9, %v1852_v10  ;;  %v1389_v15 = vmax.f32 %v1193_v11, 0.0 }
 0x38c   : > { %2137 = vst [vmem:[#allocation1 + $0x21] ss:$2 sm:$0xff] %v1980_v14  ;;  %v1469_v16 = vmax.f32 %v1385_v13, %v1389_v15  ;;  %7300 = vmatmul.msk.f32.gmra.mxu0 %vm509_vm0, %v487_v12  ;;  %v497_v12 = vld [vmem:[%s7871_s13 + $0x3c0] sm:$0xff]  ;;  %v8426_v15 = vpop.f32.mrf.mxu1 }
 0x38e   : > { %v1674_v17 = vperm.slane %v1469_v16, %v8014_v60  ;;  %v8428_v16 = vpop.f32.mrf.mxu2 }
 0x390   : > { %v1853_v18 = vrot.slane %v1674_v17, 4 }
 0x391   : > { %v1196_v19 = vpop.f32.mrf.mxu0 }
 0x392   : > { %v1981_v22 = vmax.f32 %v1674_v17, %v1853_v18  ;;  %v1390_v23 = vmax.f32 %v1196_v19, 0.0  ;;  %v498_v18 = vld [vmem:[%s7871_s13 + $0x3c8] sm:$0xff] }
 0x393   : > { %v8389_v24 = vld.sshfl [vmem:[#allocation1 + $0x20] sm:$0xff pattern:$0x75316420] }
 0x394   : > { %2138 = vst [vmem:[#allocation1 + $0x30] ss:$2 sm:$0xff] %v1981_v22  ;;  %v1470_v25 = vmax.f32 %v1386_v21, %v1390_v23  ;;  %7301 = vmatmul.msk.f32.gmra.mxu0 %vm509_vm0, %v488_v20  ;;  %v499_v21 = vld [vmem:[%s7871_s13 + $0x3d0] sm:$0xff]  ;;  %v8436_v23 = vpop.f32.mrf.mxu1 }
 0x395   : > { %2221 = vst [vmem:[#allocation2 + $0x121] sm:$0xff] %v8389_v24 }
 0x396   : > { %v1678_v26 = vperm.slane %v1470_v25, %v8014_v60  ;;  %v8439_v25 = vpop.f32.mrf.mxu2 }
 0x398   : > { %v1854_v27 = vrot.slane %v1678_v26, 4 }
 0x399   : > { %v1199_v28 = vpop.f32.mrf.mxu0 }
 0x39a   : > { %v1982_v30 = vmax.f32 %v1678_v26, %v1854_v27  ;;  %v1391_v44 = vmax.f32 %v1199_v28, 0.0  ;;  %v500_v27 = vld [vmem:[%s7871_s13 + $0x3d8] sm:$0xff] }
 0x39c   : > { %2139 = vst [vmem:[#allocation1 + $0x31] ss:$2 sm:$0xff] %v1982_v30  ;;  %7302 = vmatmul.msk.f32.gmra.mxu0 %vm509_vm0, %v489_v29  ;;  %v2255_v31 = vld [vmem:[#allocation2 + $0x120] sm:$0xff]  ;;  %v501_v29 = vld [vmem:[%s7871_s13 + $0x3e0] sm:$0xff] }
 0x39d   : > { %2382 = vmatmul.f32.gmra.mxu1 %v2255_v31  ;;  %2501 = vmatmul.f32.gmra.mxu2 %v2255_v31 }
 0x39e   : > { %2619 = vmatmul.f32.gmra.mxu3 %v2255_v31 }
 0x3a1   : > { %v1202_v33 = vpop.f32.mrf.mxu0 }
 0x3a2   : > { %v1392_v51 = vmax.f32 %v1202_v33, 0.0 }
 0x3a3   : > { %v8399_v35 = vld.sshfl [vmem:[#allocation1 + $0x30] sm:$0xff pattern:$0x75316420] }
 0x3a4   : > { %7303 = vmatmul.msk.f32.gmra.mxu0 %vm509_vm0, %v490_v34  ;;  %2222 = vst [vmem:[#allocation2 + $0x129] sm:$0xff] %v8399_v35 }
 0x3a9   : > { %v1205_v36 = vpop.f32.mrf.mxu0 }
 0x3aa   : > { %v1393_v59 = vmax.f32 %v1205_v36, 0.0 }
 0x3ab   : > { %v2256_v38 = vld [vmem:[#allocation2 + $0x128] sm:$0xff] }
 0x3ac   : > { %7304 = vmatmul.msk.f32.gmra.mxu0 %vm509_vm0, %v491_v37  ;;  %2385 = vmatmul.f32.gmra.mxu1 %v2256_v38 }
 0x3ad   : > { %2504 = vmatmul.f32.gmra.mxu2 %v2256_v38  ;;  %2622 = vmatmul.f32.gmra.mxu3 %v2256_v38  ;;  %v502_v38 = vld [vmem:[%s7871_s13 + $0x3e8] sm:$0xff] }
 0x3b1   : > { %v1208_v40 = vpop.f32.mrf.mxu0 }
 0x3b2   : > { %v1394_v4 = vmax.f32 %v1208_v40, 0.0 }
 0x3b4   : > { %7305 = vmatmul.msk.f32.gmra.mxu0 %vm509_vm0, %v492_v41 }
 0x3b9   : > { %v1211_v42 = vpop.f32.mrf.mxu0 }
 0x3ba   : > { %v1395_v45 = vmax.f32 %v1211_v42, 0.0 }
 0x3bc   : > { %v1471_v46 = vmax.f32 %v1391_v44, %v1395_v45  ;;  %7306 = vmatmul.msk.f32.gmra.mxu0 %vm509_vm0, %v493_v43 }
 0x3be   : > { %v1682_v47 = vperm.slane %v1471_v46, %v8014_v60 }
 0x3c0   : > { %v1855_v48 = vrot.slane %v1682_v47, 4 }
 0x3c1   : > { %v1214_v49 = vpop.f32.mrf.mxu0 }
 0x3c2   : > { %v1983_v52 = vmax.f32 %v1682_v47, %v1855_v48  ;;  %v1396_v53 = vmax.f32 %v1214_v49, 0.0  ;;  %v503_v47 = vld [vmem:[%s7871_s13 + $0x3f0] sm:$0xff] }
 0x3c4   : > { %2142 = vst [vmem:[#allocation1] ss:$2 sm:$0xff] %v1983_v52  ;;  %v1472_v54 = vmax.f32 %v1392_v51, %v1396_v53  ;;  %7307 = vmatmul.msk.f32.gmra.mxu0 %vm509_vm0, %v494_v50 }
 0x3c6   : > { %v1686_v55 = vperm.slane %v1472_v54, %v8014_v60 }
 0x3c8   : > { %v1856_v56 = vrot.slane %v1686_v55, 4 }
 0x3c9   : > { %v1217_v57 = vpop.f32.mrf.mxu0 }
 0x3ca   : > { %v1984_v61 = vmax.f32 %v1686_v55, %v1856_v56  ;;  %v1397_v62 = vmax.f32 %v1217_v57, 0.0  ;;  %v504_v55 = vld [vmem:[%s7871_s13 + $0x3f8] sm:$0xff]  ;;  %s7125_s13 = scalar_lea.hbm %s13796_s8, %s7827_s9 }
 0x3cb   : > { %s7129_s19 = sshll.u32 %s7125_s13, 4  ;;  %s7130_s19 = int_to_ptr.hbm [resolvable:$true] %s7129_s19 }
 0x3cc   : > { %2143 = vst [vmem:[#allocation1 + $0x1] ss:$2 sm:$0xff] %v1984_v61  ;;  %v1473_v63 = vmax.f32 %v1393_v59, %v1397_v62  ;;  %7308 = vmatmul.msk.f32.gmra.mxu0 %vm509_vm0, %v495_v58  ;;  %s7709_s21 = sshra.s32 %s7130_s19, 4  ;;  %s7710_s21 = int_to_ptr.hbm [resolvable:$true] %s7709_s21 }
 0x3cd   : > { %s7711_s22 = scalar_lea.hbm %s7710_s21, 1  ;;  %p7716_p0 = scmp.lt.s32.totalorder %s7710_s21, %s13796_s8 }
 0x3ce   : > { %v1690_v0 = vperm.slane %v1473_v63, %v8014_v60  ;;  %v8458_v63 = vpop.f32.mrf.mxu2  ;;  %p7712_p11 = scmp.ne.s32.totalorder %s7710_s21, %s7711_s22  ;;  %p7717_p1 = scmp.lt.s32.totalorder %s7715_s24, %s7711_s22 }
 0x3d0   : > { %v1857_v1 = vrot.slane %v1690_v0, 4  ;;  %p7713_p12 = pnand %p7712_p11, %p7844_p5  ;;  %p7718_p2 = por %p7717_p1, %p7716_p0 }
 0x3d1   : > { %v1220_v2 = vpop.f32.mrf.mxu0 }
 0x3d2   : > { %v1985_v5 = vmax.f32 %v1690_v0, %v1857_v1  ;;  %v1398_v6 = vmax.f32 %v1220_v2, 0.0  ;;  %p7714_p13 = pneg %p7713_p12 }
 0x3d3   : > { %v8419_v7 = vld.sshfl [vmem:[#allocation1] sm:$0xff pattern:$0x75316420] }
 0x3d4   : > { %2144 = vst [vmem:[#allocation1 + $0x10] ss:$2 sm:$0xff] %v1985_v5  ;;  %v1474_v8 = vmax.f32 %v1394_v4, %v1398_v6  ;;  %7309 = vmatmul.msk.f32.gmra.mxu0 %vm509_vm0, %v496_v3  ;;  %v8460_v4 = vpop.f32.mrf.mxu1  ;;  %v8462_v5 = vpop.f32.mrf.mxu3  ;;  %p7719_p3 = pnand %p7718_p2, %p7714_p13 }
 0x3d5   : > { %2223 = vst [vmem:[#allocation2 + $0x139] sm:$0xff] %v8419_v7 }
 0x3d6   : > { %v1694_v9 = vperm.slane %v1474_v8, %v8014_v60  ;;  %v8464_v6 = vpop.f32.mrf.mxu2 }
 0x3d8   : > { %v1858_v10 = vrot.slane %v1694_v9, 4 }
 0x3d9   : > { %v1223_v11 = vpop.f32.mrf.mxu0 }
 0x3da   : > { %v1986_v13 = vmax.f32 %v1694_v9, %v1858_v10  ;;  %v1399_v30 = vmax.f32 %v1223_v11, 0.0 }
 0x3dc   : > { %2145 = vst [vmem:[#allocation1 + $0x11] ss:$2 sm:$0xff] %v1986_v13  ;;  %7310 = vmatmul.msk.f32.gmra.mxu0 %vm509_vm0, %v497_v12  ;;  %v2257_v14 = vld [vmem:[#allocation2 + $0x138] sm:$0xff]  ;;  %v8471_v13 = vpop.f32.mrf.mxu1 }
 0x3dd   : > { %2388 = vmatmul.f32.gmra.mxu1 %v2257_v14  ;;  %2507 = vmatmul.f32.gmra.mxu2 %v2257_v14 }
 0x3de   : > { %2625 = vmatmul.f32.gmra.mxu3 %v2257_v14  ;;  %v8469_v10 = vpop.f32.mrf.mxu2  ;;  %v8473_v14 = vpop.f32.mrf.mxu3 }
 0x3e1   : > { %v1226_v17 = vpop.f32.mrf.mxu0 }
 0x3e2   : > { %v1400_v40 = vmax.f32 %v1226_v17, 0.0 }
 0x3e3   : > { %v8431_v19 = vld.sshfl [vmem:[#allocation1 + $0x10] sm:$0xff pattern:$0x75316420] }
 0x3e4   : > { %7311 = vmatmul.msk.f32.gmra.mxu0 %vm509_vm0, %v498_v18  ;;  %2224 = vst [vmem:[#allocation2 + $0x141] sm:$0xff] %v8431_v19 }
 0x3e6   : > { %v8475_v17 = vpop.f32.mrf.mxu2 }
 0x3e9   : > { %v1229_v20 = vpop.f32.mrf.mxu0 }
 0x3ea   : > { %v1401_v48 = vmax.f32 %v1229_v20, 0.0 }
 0x3eb   : > { %v2258_v22 = vld [vmem:[#allocation2 + $0x140] sm:$0xff] }
 0x3ec   : > { %7312 = vmatmul.msk.f32.gmra.mxu0 %vm509_vm0, %v499_v21  ;;  %2391 = vmatmul.f32.gmra.mxu1 %v2258_v22 }
 0x3ed   : > { %2510 = vmatmul.f32.gmra.mxu2 %v2258_v22  ;;  %2628 = vmatmul.f32.gmra.mxu3 %v2258_v22 }
 0x3ee   : > { %v8477_v20 = vpop.f32.mrf.mxu2 }
 0x3f1   : > { %v1232_v26 = vpop.f32.mrf.mxu0 }
 0x3f2   : > { %v1402_v56 = vmax.f32 %v1232_v26, 0.0 }
 0x3f4   : > { %7313 = vmatmul.msk.f32.gmra.mxu0 %vm509_vm0, %v500_v27 }
 0x3f9   : > { %v1235_v28 = vpop.f32.mrf.mxu0 }
 0x3fa   : > { %v1403_v31 = vmax.f32 %v1235_v28, 0.0  ;;  %v7381_v28 = vld [vmem:[%s13790_s2 + $0x278] sm:$0xff] }
 0x3fb   : > { %2903 = vmatpush.msrb.mxu2 %v7381_v28  ;;  %v8539_v28 = vpop.f32.mrf.mxu3 }
 0x3fc   : > { %v1475_v33 = vmax.f32 %v1399_v30, %v1403_v31  ;;  %7314 = vmatmul.msk.f32.gmra.mxu0 %vm509_vm0, %v501_v29  ;;  %v7380_v29 = vld [vmem:[%s13790_s2 + $0x270] sm:$0xff]  ;;  %v7379_v31 = vld [vmem:[%s13790_s2 + $0x268] sm:$0xff] }
 0x3fd   : > { %2904 = vmatpush.msrb.mxu2 %v7380_v29 }
 0x3fe   : > { %v1698_v34 = vperm.slane %v1475_v33, %v8014_v60  ;;  %v8489_v33 = vpop.f32.mrf.mxu2 }
 0x3ff   : > { %13802 = vst [vmem:[#allocation8_spill] sm:$0xff] %v8489_v33  ;;  %2905 = vmatpush.msrb.mxu2 %v7379_v31  ;;  %v7366_v31 = vld [vmem:[%s13790_s2 + $0x200] sm:$0xff] }
 0x400   : > { %v1859_v36 = vrot.slane %v1698_v34, 4 }
 0x401   : > { %v1238_v37 = vpop.f32.mrf.mxu0 }
 0x402   : > { %v1987_v41 = vmax.f32 %v1698_v34, %v1859_v36  ;;  %v1404_v42 = vmax.f32 %v1238_v37, 0.0  ;;  %v7378_v36 = vld [vmem:[%s13790_s2 + $0x260] sm:$0xff] }
 0x403   : > { %2906 = vmatpush.msrb.mxu2 %v7378_v36 }
 0x404   : > { %2148 = vst [vmem:[#allocation1 + $0x20] ss:$2 sm:$0xff] %v1987_v41  ;;  %v1476_v43 = vmax.f32 %v1400_v40, %v1404_v42  ;;  %7315 = vmatmul.msk.f32.gmra.mxu0 %vm509_vm0, %v502_v38  ;;  %v7377_v42 = vld [vmem:[%s13790_s2 + $0x258] sm:$0xff] }
 0x405   : > { %2907 = vmatpush.msrb.mxu2 %v7377_v42 }
 0x406   : > { %v1702_v44 = vperm.slane %v1476_v43, %v8014_v60 }
 0x408   : > { %v1860_v45 = vrot.slane %v1702_v44, 4 }
 0x409   : > { %v1241_v46 = vpop.f32.mrf.mxu0 }
 0x40a   : > { %v1988_v49 = vmax.f32 %v1702_v44, %v1860_v45  ;;  %v1405_v50 = vmax.f32 %v1241_v46, 0.0  ;;  %v7376_v44 = vld [vmem:[%s13790_s2 + $0x250] sm:$0xff]  ;;  %v7375_v46 = vld [vmem:[%s13790_s2 + $0x248] sm:$0xff] }
 0x40b   : > { %2908 = vmatpush.msrb.mxu2 %v7376_v44 }
 0x40c   : > { %2149 = vst [vmem:[#allocation1 + $0x21] ss:$2 sm:$0xff] %v1988_v49  ;;  %v1477_v51 = vmax.f32 %v1401_v48, %v1405_v50  ;;  %7316 = vmatmul.msk.f32.gmra.mxu0 %vm509_vm0, %v503_v47  ;;  %v8504_v47 = vpop.f32.mrf.mxu2  ;;  %v7374_v49 = vld [vmem:[%s13790_s2 + $0x240] sm:$0xff] }
 0x40d   : > { %13803 = vst [vmem:[#allocation9_spill] sm:$0xff] %v8504_v47  ;;  %2909 = vmatpush.msrb.mxu2 %v7375_v46 }
 0x40e   : > { %v1706_v52 = vperm.slane %v1477_v51, %v8014_v60 }
 0x40f   : > { %2910 = vmatpush.msrb.mxu2 %v7374_v49 }
 0x410   : > { %v1861_v53 = vrot.slane %v1706_v52, 4 }
 0x411   : > { %v1244_v54 = vpop.f32.mrf.mxu0 }
 0x412   : > { %v1989_v57 = vmax.f32 %v1706_v52, %v1861_v53  ;;  %v1406_v58 = vmax.f32 %v1244_v54, 0.0  ;;  %v7373_v54 = vld [vmem:[%s13790_s2 + $0x238] sm:$0xff] }
 0x413   : > { %v8453_v59 = vld.sshfl [vmem:[#allocation1 + $0x20] sm:$0xff pattern:$0x75316420]  ;;  %2911 = vmatpush.msrb.mxu2 %v7373_v54 }
 0x414   : > { %2150 = vst [vmem:[#allocation1 + $0x30] ss:$2 sm:$0xff] %v1989_v57  ;;  %v1478_v61 = vmax.f32 %v1402_v56, %v1406_v58  ;;  %7317 = vmatmul.msk.f32.gmra.mxu0 %vm509_vm0, %v504_v55  ;;  %v7372_v56 = vld [vmem:[%s13790_s2 + $0x230] sm:$0xff]  ;;  %v7371_v58 = vld [vmem:[%s13790_s2 + $0x228] sm:$0xff] }
 0x415   : > { %2225 = vst [vmem:[#allocation2 + $0x151] sm:$0xff] %v8453_v59  ;;  %2912 = vmatpush.msrb.mxu2 %v7372_v56 }
 0x416   : > { %v1710_v62 = vperm.slane %v1478_v61, %v8014_v60  ;;  %v8519_v61 = vpop.f32.mrf.mxu2 }
 0x417   : > { %13804 = vst [vmem:[#allocation10_spill] sm:$0xff] %v8519_v61  ;;  %2913 = vmatpush.msrb.mxu2 %v7371_v58 }
 0x418   : > { %v1862_v0 = vrot.slane %v1710_v62, 4 }
 0x419   : > { %v1247_v1 = vpop.f32.mrf.mxu0 }
 0x41a   : > { %v1990_v2 = vmax.f32 %v1710_v62, %v1862_v0  ;;  %v1407_v22 = vmax.f32 %v1247_v1, 0.0  ;;  %v7370_v0 = vld [vmem:[%s13790_s2 + $0x220] sm:$0xff]  ;;  %v8524_v1 = vpop.f32.mrf.mxu1 }
 0x41b   : > { %2914 = vmatpush.msrb.mxu2 %v7370_v0 }
 0x41c   : > { %2151 = vst [vmem:[#allocation1 + $0x31] ss:$2 sm:$0xff] %v1990_v2  ;;  %v2259_v3 = vld [vmem:[#allocation2 + $0x150] sm:$0xff] }
 0x41d   : > { %2394 = vmatmul.f32.gmra.mxu1 %v2259_v3  ;;  %2513 = vmatmul.f32.gmra.mxu2 %v2259_v3 }
 0x41e   : > { %2631 = vmatmul.f32.gmra.mxu3 %v2259_v3  ;;  %v8541_v29 = vpop.f32.mrf.mxu2 }
 0x41f   : > { %13805 = vst [vmem:[#allocation11_spill] sm:$0xff] %v8541_v29 }
 0x421   : > { %v1250_v8 = vpop.f32.mrf.mxu0 }
 0x422   : > { %v1408_v38 = vmax.f32 %v1250_v8, 0.0 }
 0x423   : > { %v8466_v9 = vld.sshfl [vmem:[#allocation1 + $0x30] sm:$0xff pattern:$0x75316420] }
 0x424   : > { %2226 = vst [vmem:[#allocation2 + $0x159] sm:$0xff] %v8466_v9 }
 0x429   : > { %v1253_v11 = vpop.f32.mrf.mxu0 }
 0x42a   : > { %v1409_v51 = vmax.f32 %v1253_v11, 0.0 }
 0x42b   : > { %v2260_v12 = vld [vmem:[#allocation2 + $0x158] sm:$0xff] }
 0x42c   : > { %2397 = vmatmul.f32.gmra.mxu1 %v2260_v12  ;;  %2516 = vmatmul.f32.gmra.mxu2 %v2260_v12 }
 0x42d   : > { %2634 = vmatmul.f32.gmra.mxu3 %v2260_v12  ;;  %v7369_v12 = vld [vmem:[%s13790_s2 + $0x218] sm:$0xff] }
 0x42e   : > { %2915 = vmatpush.msrb.mxu2 %v7369_v12  ;;  %v7397_v12 = vld [vmem:[%s13790_s2 + $0x3f8] sm:$0xff] }
 0x42f   : > { %3065 = vmatpush.msrb.mxu3 %v7397_v12  ;;  %v7360_v12 = vld [vmem:[%s13790_s2 + $0xd0] sm:$0xff] }
 0x431   : > { %v1256_v18 = vpop.f32.mrf.mxu0 }
 0x432   : > { %v1410_v3 = vmax.f32 %v1256_v18, 0.0 }
 0x439   : > { %v1259_v21 = vpop.f32.mrf.mxu0 }
 0x43a   : > { %v1411_v26 = vmax.f32 %v1259_v21, 0.0 }
 0x43c   : > { %v1479_v27 = vmax.f32 %v1407_v22, %v1411_v26  ;;  %v7368_v26 = vld [vmem:[%s13790_s2 + $0x210] sm:$0xff] }
 0x43d   : > { %2916 = vmatpush.msrb.mxu2 %v7368_v26 }
 0x43e   : > { %v1714_v30 = vperm.slane %v1479_v27, %v8014_v60  ;;  %v7367_v27 = vld [vmem:[%s13790_s2 + $0x208] sm:$0xff] }
 0x43f   : > { %2917 = vmatpush.msrb.mxu2 %v7367_v27 }
 0x440   : > { %v1863_v34 = vrot.slane %v1714_v30, 4 }
 0x441   : > { %v1262_v37 = vpop.f32.mrf.mxu0  ;;  %2918 = vmatpush.msrb.mxu2 %v7366_v31 }
 0x442   : > { %v1991_v40 = vmax.f32 %v1714_v30, %v1863_v34  ;;  %v1412_v41 = vmax.f32 %v1262_v37, 0.0  ;;  %v8546_v34 = vpop.f32.mrf.mxu1 }
 0x444   : > { %2154 = vst [vmem:[#allocation1] ss:$2 sm:$0xff] %v1991_v40  ;;  %v1480_v43 = vmax.f32 %v1408_v38, %v1412_v41  ;;  %v8548_v40 = vpop.f32.mrf.mxu3  ;;  %v8550_v41 = vpop.f32.mrf.mxu2 }
 0x445   : > { %13806 = vst [vmem:[#allocation12_spill] sm:$0xff] %v8550_v41 }
 0x446   : > { %v1718_v45 = vperm.slane %v1480_v43, %v8014_v60 }
 0x448   : > { %v1864_v48 = vrot.slane %v1718_v45, 4 }
 0x449   : > { %v1265_v50 = vpop.f32.mrf.mxu0 }
 0x44a   : > { %v1992_v52 = vmax.f32 %v1718_v45, %v1864_v48  ;;  %v1413_v53 = vmax.f32 %v1265_v50, 0.0  ;;  %v8552_v42 = vpop.f32.mrf.mxu1 }
 0x44c   : > { %2155 = vst [vmem:[#allocation1 + $0x1] ss:$2 sm:$0xff] %v1992_v52  ;;  %v1481_v55 = vmax.f32 %v1409_v51, %v1413_v53  ;;  %v8557_v45 = vpop.f32.mrf.mxu3  ;;  %v8559_v46 = vpop.f32.mrf.mxu2 }
 0x44d   : > { %13807 = vst [vmem:[#allocation13_spill] sm:$0xff] %v8559_v46 }
 0x44e   : > { %v1722_v57 = vperm.slane %v1481_v55, %v8014_v60  ;;  %v8573_v55 = vld [vmem:[#allocation2 + $0x19] sm:$0xff] }
 0x450   : > { %v1865_v62 = vrot.slane %v1722_v57, 4 }
 0x451   : > { %v1268_v2 = vpop.f32.mrf.mxu0 }
 0x452   : > { %v1993_v8 = vmax.f32 %v1722_v57, %v1865_v62  ;;  %v1414_v11 = vmax.f32 %v1268_v2, 0.0  ;;  %v8561_v48 = vpop.f32.mrf.mxu1 }
 0x453   : > { %v8529_v21 = vld.sshfl [vmem:[#allocation1] sm:$0xff pattern:$0x75316420] }
 0x454   : > { %2156 = vst [vmem:[#allocation1 + $0x10] ss:$2 sm:$0xff] %v1993_v8  ;;  %v1482_v22 = vmax.f32 %v1410_v3, %v1414_v11  ;;  %v8565_v51 = vpop.f32.mrf.mxu3  ;;  %v8567_v52 = vpop.f32.mrf.mxu2  ;;  %v8582_v3 = vld [vmem:[#allocation2 + $0x21] sm:$0xff]  ;;  %v7365_v11 = vld [vmem:[%s13790_s2 + $0xf8] sm:$0xff] }
 0x455   : > { %2227 = vst [vmem:[#allocation2 + $0x169] sm:$0xff] %v8529_v21  ;;  %2741 = vmatpush.msrb.mxu1 %v7365_v11 }
 0x456   : > { %v1726_v18 = vperm.slane %v1482_v22, %v8014_v60  ;;  %13808 = vst [vmem:[#allocation14_spill] sm:$0xff] %v8567_v52  ;;  %v7364_v22 = vld [vmem:[%s13790_s2 + $0xf0] sm:$0xff] }
 0x457   : > { %2742 = vmatpush.msrb.mxu1 %v7364_v22 }
 0x458   : > { %v1866_v30 = vrot.slane %v1726_v18, 4 }
 0x459   : > { %v1271_v36 = vpop.f32.mrf.mxu0 }
 0x45a   : > { %v1994_v37 = vmax.f32 %v1726_v18, %v1866_v30  ;;  %v8569_v53 = vpop.f32.mrf.mxu1  ;;  %v1415_v0 = vmax.f32 %v1271_v36, 0.0  ;;  %v7363_v18 = vld [vmem:[%s13790_s2 + $0xe8] sm:$0xff]  ;;  %v7362_v36 = vld [vmem:[%s13790_s2 + $0xe0] sm:$0xff] }
 0x45b   : > { %2743 = vmatpush.msrb.mxu1 %v7363_v18 }
 0x45c   : > { %2157 = vst [vmem:[#allocation1 + $0x11] ss:$2 sm:$0xff] %v1994_v37  ;;  %v2261_v38 = vld [vmem:[#allocation2 + $0x168] sm:$0xff]  ;;  %v8576_v56 = vpop.f32.mrf.mxu3  ;;  %v8578_v57 = vpop.f32.mrf.mxu2 }
 0x45d   : > { %2400 = vmatmul.f32.gmra.mxu1 %v2261_v38  ;;  %2519 = vmatmul.f32.gmra.mxu2 %v2261_v38  ;;  %13809 = vst [vmem:[#allocation15_spill] sm:$0xff] %v8578_v57 }
 0x45e   : > { %2637 = vmatmul.f32.gmra.mxu3 %v2261_v38  ;;  %2744 = vmatpush.msrb.mxu1 %v7362_v36 }
 0x461   : > { %v1274_v43 = vpop.f32.mrf.mxu0 }
 0x462   : > { %v8580_v58 = vpop.f32.mrf.mxu1 }
 0x463   : > { %v8554_v44 = vld.sshfl [vmem:[#allocation1 + $0x10] sm:$0xff pattern:$0x75316420]  ;;  %13810 = vst [vmem:[#allocation16_spill] sm:$0xff] %v8580_v58 }
 0x464   : > { %2228 = vst [vmem:[#allocation2 + $0x171] sm:$0xff] %v8554_v44  ;;  %v8598_v27 = vpop.f32.mrf.mxu3  ;;  %v8600_v30 = vpop.f32.mrf.mxu2 }
 0x465   : > { %13811 = vst [vmem:[#allocation17_spill] sm:$0xff] %v8600_v30 }
 0x469   : > { %v8563_v49 = vpop.f32.mrf.mxu0 }
 0x46a   : > { %v8605_v37 = vpop.f32.mrf.mxu1 }
 0x46b   : > { %v2262_v50 = vld [vmem:[#allocation2 + $0x170] sm:$0xff]  ;;  %13812 = vst [vmem:[#allocation18_spill] sm:$0xff] %v8605_v37 }
 0x46c   : > { %2403 = vmatmul.f32.gmra.mxu1 %v2262_v50  ;;  %2522 = vmatmul.f32.gmra.mxu2 %v2262_v50  ;;  %v8623_v18 = vpop.f32.mrf.mxu3 }
 0x46d   : > { %2640 = vmatmul.f32.gmra.mxu3 %v2262_v50  ;;  %v1416_v50 = vmax.f32 %v1274_v43, 0.0  ;;  %v7396_v43 = vld [vmem:[%s13790_s2 + $0x3f0] sm:$0xff]  ;;  %13813 = vst [vmem:[#allocation19_spill] sm:$0xff] %v8623_v18 }
 0x46e   : > { %3066 = vmatpush.msrb.mxu3 %v7396_v43  ;;  %v7357_v43 = vld [vmem:[%s13790_s2 + $0xb8] sm:$0xff] }
 0x471   : > { %v8571_v54 = vpop.f32.mrf.mxu0 }
 0x472   : > { %v1418_v30 = vmax.f32 %v8571_v54, 0.0  ;;  %v7390_v54 = vld [vmem:[%s13790_s2 + $0x3c0] sm:$0xff] }
 0x474   : > { %2919 = vmatmul.f32.vlgmr.msrb.gmra.mxu2 %v8573_v55 }
 0x479   : > { %v1283_v62 = vpop.f32.mrf.mxu0 }
 0x47a   : > { %v1419_v2 = vmax.f32 %v1283_v62, 0.0 }
 0x47c   : > { %v1483_v8 = vmax.f32 %v1415_v0, %v1419_v2  ;;  %2922 = vmatmul.f32.gmra.mxu2 %v8582_v3  ;;  %v7361_v2 = vld [vmem:[%s13790_s2 + $0xd8] sm:$0xff] }
 0x47d   : > { %2745 = vmatpush.msrb.mxu1 %v7361_v2 }
 0x47e   : > { %v1730_v26 = vperm.slane %v1483_v8, %v8014_v60  ;;  %v8610_v8 = vld [vmem:[#allocation2 + $0x31] sm:$0xff] }
 0x47f   : > { %2746 = vmatpush.msrb.mxu1 %v7360_v12  ;;  %v7395_v12 = vld [vmem:[%s13790_s2 + $0x3e8] sm:$0xff] }
 0x480   : > { %v1867_v31 = vrot.slane %v1730_v26, 4  ;;  %3067 = vmatpush.msrb.mxu3 %v7395_v12 }
 0x481   : > { %v1286_v38 = vpop.f32.mrf.mxu0 }
 0x482   : > { %v1995_v62 = vmax.f32 %v1730_v26, %v1867_v31  ;;  %v1420_v0 = vmax.f32 %v1286_v38, 0.0  ;;  %v7359_v26 = vld [vmem:[%s13790_s2 + $0xc8] sm:$0xff]  ;;  %v8625_v31 = vpop.f32.mrf.mxu2  ;;  %v7358_v38 = vld [vmem:[%s13790_s2 + $0xc0] sm:$0xff] }
 0x483   : > { %13814 = vst [vmem:[#allocation20_spill] sm:$0xff] %v8625_v31  ;;  %2747 = vmatpush.msrb.mxu1 %v7359_v26  ;;  %v8639_v31 = vld [vmem:[#allocation2 + $0x39] sm:$0xff] }
 0x484   : > { %2160 = vst [vmem:[#allocation1 + $0x20] ss:$2 sm:$0xff] %v1995_v62  ;;  %v1484_v11 = vmax.f32 %v1416_v50, %v1420_v0  ;;  %2925 = vmatmul.f32.gmra.mxu2 %v8610_v8  ;;  %v8630_v50 = vpop.f32.mrf.mxu1  ;;  %v1417_v0 = vmax.f32 %v8563_v49, 0.0  ;;  %v7394_v26 = vld [vmem:[%s13790_s2 + $0x3e0] sm:$0xff] }
 0x485   : > { %13815 = vst [vmem:[#allocation21_spill] sm:$0xff] %v8630_v50  ;;  %2748 = vmatpush.msrb.mxu1 %v7358_v38  ;;  %3068 = vmatpush.msrb.mxu3 %v7394_v26 }
 0x486   : > { %v1734_v22 = vperm.slane %v1484_v11, %v8014_v60 }
 0x487   : > { %2749 = vmatpush.msrb.mxu1 %v7357_v43  ;;  %v7354_v43 = vld [vmem:[%s13790_s2 + $0xa0] sm:$0xff] }
 0x488   : > { %v1868_v36 = vrot.slane %v1734_v22, 4 }
 0x489   : > { %v1289_v62 = vpop.f32.mrf.mxu0 }
 0x48a   : > { %v1996_v2 = vmax.f32 %v1734_v22, %v1868_v36  ;;  %v1421_v11 = vmax.f32 %v1289_v62, 0.0  ;;  %v7356_v22 = vld [vmem:[%s13790_s2 + $0xb0] sm:$0xff]  ;;  %v7393_v36 = vld [vmem:[%s13790_s2 + $0x3d8] sm:$0xff]  ;;  %v7355_v62 = vld [vmem:[%s13790_s2 + $0xa8] sm:$0xff] }
 0x48b   : > { %2750 = vmatpush.msrb.mxu1 %v7356_v22  ;;  %3069 = vmatpush.msrb.mxu3 %v7393_v36  ;;  %v7353_v22 = vld [vmem:[%s13790_s2 + $0x98] sm:$0xff]  ;;  %v7391_v36 = vld [vmem:[%s13790_s2 + $0x3c8] sm:$0xff] }
 0x48c   : > { %2161 = vst [vmem:[#allocation1 + $0x21] ss:$2 sm:$0xff] %v1996_v2  ;;  %v1485_v49 = vmax.f32 %v1417_v0, %v1421_v11  ;;  %2928 = vmatmul.f32.gmra.mxu2 %v8639_v31  ;;  %v8655_v2 = vpop.f32.mrf.mxu3  ;;  %v8657_v0 = vpop.f32.mrf.mxu2 }
 0x48d   : > { %13816 = vst [vmem:[#allocation22_spill] sm:$0xff] %v8655_v2  ;;  %v8662_v12 = vpop.f32.mrf.mxu1  ;;  %2751 = vmatpush.msrb.mxu1 %v7355_v62 }
 0x48e   : > { %v1738_v38 = vperm.slane %v1485_v49, %v8014_v60  ;;  %13817 = vst [vmem:[#allocation23_spill] sm:$0xff] %v8657_v0  ;;  %v7392_v49 = vld [vmem:[%s13790_s2 + $0x3d0] sm:$0xff] }
 0x48f   : > { %13818 = vst [vmem:[#allocation24_spill] sm:$0xff] %v8662_v12  ;;  %3070 = vmatpush.msrb.mxu3 %v7392_v49  ;;  %v8674_v0 = vld [vmem:[#allocation2 + $0x49] sm:$0xff]  ;;  %2752 = vmatpush.msrb.mxu1 %v7354_v43 }
 0x490   : > { %v1869_v11 = vrot.slane %v1738_v38, 4  ;;  %v7389_v43 = vld [vmem:[%s13790_s2 + $0x3b8] sm:$0xff]  ;;  %v7388_v49 = vld [vmem:[%s13790_s2 + $0x3b0] sm:$0xff] }
 0x491   : > { %v1292_v26 = vpop.f32.mrf.mxu0  ;;  %3071 = vmatpush.msrb.mxu3 %v7391_v36  ;;  %2753 = vmatpush.msrb.mxu1 %v7353_v22  ;;  %v7350_v36 = vld [vmem:[%s13790_s2 + $0x80] sm:$0xff]  ;;  %v2689_v12 = vld [vmem:[#allocation2 + $0x9] sm:$0xff] }
 0x492   : > { %v1997_v57 = vmax.f32 %v1738_v38, %v1869_v11  ;;  %v1422_v52 = vmax.f32 %v1292_v26, 0.0  ;;  %v7352_v11 = vld [vmem:[%s13790_s2 + $0x90] sm:$0xff] }
 0x493   : > { %v8676_v62 = vld.sshfl [vmem:[#allocation1 + $0x20] sm:$0xff pattern:$0x75316420]  ;;  %3072 = vmatpush.msrb.mxu3 %v7390_v54  ;;  %2754 = vmatpush.msrb.mxu1 %v7352_v11  ;;  %v7387_v54 = vld [vmem:[%s13790_s2 + $0x3a8] sm:$0xff] }
 0x494   : > { %2162 = vst [vmem:[#allocation1 + $0x30] ss:$2 sm:$0xff] %v1997_v57  ;;  %v1486_v38 = vmax.f32 %v1418_v30, %v1422_v52  ;;  %2931 = vmatmul.f32.gmra.mxu2 %v8674_v0  ;;  %v7351_v52 = vld [vmem:[%s13790_s2 + $0x88] sm:$0xff]  ;;  %v8693_v57 = vpop.f32.mrf.mxu3  ;;  %v8695_v30 = vpop.f32.mrf.mxu2  ;;  %v8708_v11 = vld [vmem:[#allocation2 + $0x51] sm:$0xff] }
 0x495   : > { %2229 = vst [vmem:[#allocation2 + $0x181] sm:$0xff] %v8676_v62  ;;  %3073 = vmatpush.msrb.mxu3 %v7389_v43  ;;  %2755 = vmatpush.msrb.mxu1 %v7351_v52  ;;  %v7385_v43 = vld [vmem:[%s13790_s2 + $0x398] sm:$0xff] }
 0x496   : > { %v1742_v26 = vperm.slane %v1486_v38, %v8014_v60  ;;  %13819 = vst [vmem:[#allocation25_spill] sm:$0xff] %v8693_v57  ;;  %v8703_v38 = vpop.f32.mrf.mxu1 }
 0x497   : > { %13820 = vst [vmem:[#allocation26_spill] sm:$0xff] %v8695_v30  ;;  %3074 = vmatpush.msrb.mxu3 %v7388_v49  ;;  %2756 = vmatpush.msrb.mxu1 %v7350_v36  ;;  %v7386_v30 = vld [vmem:[%s13790_s2 + $0x3a0] sm:$0xff]  ;;  %v7384_v49 = vld [vmem:[%s13790_s2 + $0x390] sm:$0xff] }
 0x498   : > { %v1870_v22 = vrot.slane %v1742_v26, 4  ;;  %13821 = vst [vmem:[#allocation27_spill] sm:$0xff] %v8703_v38 }
 0x499   : > { %3075 = vmatpush.msrb.mxu3 %v7387_v54 }
 0x49a   : > { %v1998_v60 = vmax.f32 %v1742_v26, %v1870_v22  ;;  %v8729_v22 = vld [vmem:[#allocation2 + $0x61] sm:$0xff] }
 0x49b   : > { %3076 = vmatpush.msrb.mxu3 %v7386_v30  ;;  %v7382_v30 = vld [vmem:[%s13790_s2 + $0x380] sm:$0xff] }
 0x49c   : > { %2163 = vst [vmem:[#allocation1 + $0x31] ss:$2 sm:$0xff] %v1998_v60  ;;  %v2263_v46 = vld [vmem:[#allocation2 + $0x180] sm:$0xff]  ;;  %2934 = vmatmul.f32.gmra.mxu2 %v8708_v11  ;;  %v8717_v26 = vpop.f32.mrf.mxu3  ;;  %v8719_v52 = vpop.f32.mrf.mxu2 }
 0x49d   : > { %2406 = vmatmul.f32.gmra.mxu1 %v2263_v46  ;;  %2643 = vmatmul.f32.gmra.mxu3 %v2263_v46  ;;  %13822 = vst [vmem:[#allocation28_spill] sm:$0xff] %v8717_v26  ;;  %v7383_v46 = vld [vmem:[%s13790_s2 + $0x388] sm:$0xff] }
 0x49e   : > { %13823 = vst [vmem:[#allocation29_spill] sm:$0xff] %v8719_v52  ;;  %3077 = vmatpush.msrb.mxu3 %v7385_v43  ;;  %v8724_v60 = vpop.f32.mrf.mxu1 }
 0x49f   : > { %13824 = vst [vmem:[#allocation30_spill] sm:$0xff] %v8724_v60  ;;  %v8744_v60 = vld [vmem:[#allocation2 + $0x69] sm:$0xff] }
 0x4a0   : > { %3078 = vmatpush.msrb.mxu3 %v7384_v49 }
 0x4a2   : > { %3079 = vmatpush.msrb.mxu3 %v7383_v46  ;;  %v2688_v46 = vld [vmem:[#allocation2 + $0x1] sm:$0xff] }
 0x4a3   : > { %v8731_v36 = vld.sshfl [vmem:[#allocation1 + $0x30] sm:$0xff pattern:$0x75316420] }
 0x4a4   : > { %2937 = vmatmul.f32.gmra.mxu2 %v8729_v22  ;;  %2230 = vst [vmem:[#allocation2 + $0x189] sm:$0xff] %v8731_v36  ;;  %3080 = vmatpush.msrb.mxu3 %v7382_v30  ;;  %v8738_v54 = vpop.f32.mrf.mxu3  ;;  %v8740_v43 = vpop.f32.mrf.mxu2  ;;  %v7682_v30 = vld [vmem:[#allocation2] sm:$0xff] }
 0x4a5   : > { %13825 = vst [vmem:[#allocation31_spill] sm:$0xff] %v8738_v54 }
 0x4a6   : > { %13826 = vst [vmem:[#allocation32_spill] sm:$0xff] %v8740_v43  ;;  %v8742_v52 = vpop.f32.mrf.mxu1  ;;  %v8753_v43 = vld [vmem:[#allocation2 + $0x79] sm:$0xff] }
 0x4a7   : > { %13827 = vst [vmem:[#allocation33_spill] sm:$0xff] %v8742_v52 }
 0x4ab   : > { %v2264_v49 = vld [vmem:[#allocation2 + $0x188] sm:$0xff] }
 0x4ac   : > { %2409 = vmatmul.f32.gmra.mxu1 %v2264_v49  ;;  %2646 = vmatmul.f32.gmra.mxu3 %v2264_v49  ;;  %v8747_v41 = vpop.f32.mrf.mxu3  ;;  %v8749_v38 = vpop.f32.mrf.mxu2 }
 0x4ad   : > { %2940 = vmatmul.f32.gmra.mxu2 %v8744_v60  ;;  %13828 = vst [vmem:[#allocation34_spill] sm:$0xff] %v8747_v41 }
 0x4ae   : > { %13829 = vst [vmem:[#allocation35_spill] sm:$0xff] %v8749_v38  ;;  %v8751_v29 = vpop.f32.mrf.mxu1  ;;  %v8762_v38 = vld [vmem:[#allocation2 + $0x81] sm:$0xff] }
 0x4af   : > { %13830 = vst [vmem:[#allocation36_spill] sm:$0xff] %v8751_v29 }
 0x4b4   : > { %2649 = vmatmul.f32.gmra.mxu3 %v7682_v30  ;;  %2757 = vmatmul.f32.vlgmr.msrb.gmra.mxu1 %v2688_v46  ;;  %v8756_v52 = vpop.f32.mrf.mxu3  ;;  %v8758_v49 = vpop.f32.mrf.mxu2 }
 0x4b5   : > { %2943 = vmatmul.f32.gmra.mxu2 %v8753_v43  ;;  %13831 = vst [vmem:[#allocation37_spill] sm:$0xff] %v8756_v52  ;;  %v8772_v52 = vld [vmem:[#allocation2 + $0x91] sm:$0xff] }
 0x4b6   : > { %13832 = vst [vmem:[#allocation38_spill] sm:$0xff] %v8758_v49  ;;  %v8760_v54 = vpop.f32.mrf.mxu1 }
 0x4b7   : > { %13833 = vst [vmem:[#allocation39_spill] sm:$0xff] %v8760_v54  ;;  %v8783_v54 = vld [vmem:[#allocation2 + $0x99] sm:$0xff] }
 0x4bc   : > { %2652 = vmatmul.f32.gmra.mxu3 %v7682_v30  ;;  %2760 = vmatmul.f32.gmra.mxu1 %v2689_v12  ;;  %v8765_v29 = vpop.f32.mrf.mxu3  ;;  %v8767_v46 = vpop.f32.mrf.mxu2 }
 0x4bd   : > { %2946 = vmatmul.f32.gmra.mxu2 %v8762_v38  ;;  %13834 = vst [vmem:[#allocation40_spill] sm:$0xff] %v8765_v29 }
 0x4be   : > { %13835 = vst [vmem:[#allocation41_spill] sm:$0xff] %v8767_v46  ;;  %v8769_v41 = vpop.f32.mrf.mxu1 }
 0x4bf   : > { %13836 = vst [vmem:[#allocation42_spill] sm:$0xff] %v8769_v41 }
 0x4c4   : > { %2763 = vmatmul.f32.gmra.mxu1 %v8573_v55  ;;  %3081 = vmatmul.f32.vlgmr.msrb.gmra.mxu3 %v8610_v8  ;;  %v8776_v30 = vpop.f32.mrf.mxu3  ;;  %v8778_v12 = vpop.f32.mrf.mxu2 }
 0x4c5   : > { %2949 = vmatmul.f32.gmra.mxu2 %v8772_v52  ;;  %13837 = vst [vmem:[#allocation43_spill] sm:$0xff] %v8776_v30  ;;  %v8794_v30 = vld [vmem:[#allocation2 + $0xa9] sm:$0xff] }
 0x4c6   : > { %13838 = vst [vmem:[#allocation44_spill] sm:$0xff] %v8778_v12  ;;  %v8780_v49 = vpop.f32.mrf.mxu1 }
 0x4c7   : > { %13839 = vst [vmem:[#allocation45_spill] sm:$0xff] %v8780_v49 }
 0x4cc   : > { %2766 = vmatmul.f32.gmra.mxu1 %v8582_v3  ;;  %3084 = vmatmul.f32.gmra.mxu3 %v8639_v31  ;;  %v8787_v55 = vpop.f32.mrf.mxu3  ;;  %v8789_v46 = vpop.f32.mrf.mxu2 }
 0x4cd   : > { %2952 = vmatmul.f32.gmra.mxu2 %v8783_v54  ;;  %13840 = vst [vmem:[#allocation46_spill] sm:$0xff] %v8787_v55  ;;  %v8805_v55 = vld [vmem:[#allocation2 + $0xb1] sm:$0xff] }
 0x4ce   : > { %13841 = vst [vmem:[#allocation47_spill] sm:$0xff] %v8789_v46  ;;  %v8791_v41 = vpop.f32.mrf.mxu1 }
 0x4cf   : > { %13842 = vst [vmem:[#allocation48_spill] sm:$0xff] %v8791_v41 }
 0x4d4   : > { %2769 = vmatmul.f32.gmra.mxu1 %v8610_v8  ;;  %3087 = vmatmul.f32.gmra.mxu3 %v8674_v0  ;;  %v8798_v3 = vpop.f32.mrf.mxu3  ;;  %v8800_v12 = vpop.f32.mrf.mxu2 }
 0x4d5   : > { %2955 = vmatmul.f32.gmra.mxu2 %v8794_v30  ;;  %13843 = vst [vmem:[#allocation49_spill] sm:$0xff] %v8798_v3  ;;  %v8816_v3 = vld [vmem:[#allocation2 + $0xc1] sm:$0xff] }
 0x4d6   : > { %13844 = vst [vmem:[#allocation50_spill] sm:$0xff] %v8800_v12  ;;  %v8802_v49 = vpop.f32.mrf.mxu1 }
 0x4d7   : > { %13845 = vst [vmem:[#allocation51_spill] sm:$0xff] %v8802_v49 }
 0x4dc   : > { %2772 = vmatmul.f32.gmra.mxu1 %v8639_v31  ;;  %3090 = vmatmul.f32.gmra.mxu3 %v8708_v11  ;;  %v8809_v8 = vpop.f32.mrf.mxu3  ;;  %v8811_v46 = vpop.f32.mrf.mxu2 }
 0x4dd   : > { %2958 = vmatmul.f32.gmra.mxu2 %v8805_v55  ;;  %13846 = vst [vmem:[#allocation52_spill] sm:$0xff] %v8809_v8  ;;  %v8827_v8 = vld [vmem:[#allocation2 + $0xc9] sm:$0xff] }
 0x4de   : > { %v8813_v41 = vpop.f32.mrf.mxu1 }
 0x4df   : > { %13847 = vst [vmem:[#allocation53_spill] sm:$0xff] %v8813_v41 }
 0x4e4   : > { %2775 = vmatmul.f32.gmra.mxu1 %v8674_v0  ;;  %3093 = vmatmul.f32.gmra.mxu3 %v8729_v22  ;;  %v8820_v31 = vpop.f32.mrf.mxu3  ;;  %v8822_v12 = vpop.f32.mrf.mxu2 }
 0x4e5   : > { %2961 = vmatmul.f32.gmra.mxu2 %v8816_v3  ;;  %13848 = vst [vmem:[#allocation54_spill] sm:$0xff] %v8820_v31  ;;  %v8838_v31 = vld [vmem:[#allocation2 + $0xd9] sm:$0xff] }
 0x4e6   : > { %v8824_v49 = vpop.f32.mrf.mxu1 }
 0x4e7   : > { %13849 = vst [vmem:[#allocation55_spill] sm:$0xff] %v8824_v49 }
 0x4ec   : > { %2778 = vmatmul.f32.gmra.mxu1 %v8708_v11  ;;  %3096 = vmatmul.f32.gmra.mxu3 %v8744_v60  ;;  %v8831_v0 = vpop.f32.mrf.mxu3 }
 0x4ed   : > { %2964 = vmatmul.f32.gmra.mxu2 %v8827_v8  ;;  %13850 = vst [vmem:[#allocation56_spill] sm:$0xff] %v8831_v0  ;;  %v8849_v0 = vld [vmem:[#allocation2 + $0xe1] sm:$0xff] }
 0x4ee   : > { %v8835_v29 = vpop.f32.mrf.mxu1 }
 0x4ef   : > { %v8833_v41 = vpop.f32.mrf.mxu2  ;;  %13851 = vst [vmem:[#allocation57_spill] sm:$0xff] %v8835_v29 }
 0x4f4   : > { %2781 = vmatmul.f32.gmra.mxu1 %v8729_v22  ;;  %3099 = vmatmul.f32.gmra.mxu3 %v8753_v43  ;;  %v8842_v11 = vpop.f32.mrf.mxu3 }
 0x4f5   : > { %2967 = vmatmul.f32.gmra.mxu2 %v8838_v31  ;;  %13852 = vst [vmem:[#allocation58_spill] sm:$0xff] %v8842_v11  ;;  %v8860_v11 = vld [vmem:[#allocation2 + $0xf1] sm:$0xff] }
 0x4f6   : > { %v8846_v26 = vpop.f32.mrf.mxu1 }
 0x4f7   : > { %v8844_v49 = vpop.f32.mrf.mxu2  ;;  %13853 = vst [vmem:[#allocation59_spill] sm:$0xff] %v8846_v26 }
 0x4fc   : > { %2784 = vmatmul.f32.gmra.mxu1 %v8744_v60  ;;  %3102 = vmatmul.f32.gmra.mxu3 %v8762_v38  ;;  %v8853_v22 = vpop.f32.mrf.mxu3 }
 0x4fd   : > { %2970 = vmatmul.f32.gmra.mxu2 %v8849_v0  ;;  %13854 = vst [vmem:[#allocation60_spill] sm:$0xff] %v8853_v22  ;;  %v8871_v22 = vld [vmem:[#allocation2 + $0xf9] sm:$0xff] }
 0x4fe   : > { %v8857_v61 = vpop.f32.mrf.mxu1 }
 0x4ff   : > { %v8855_v29 = vpop.f32.mrf.mxu2  ;;  %13855 = vst [vmem:[#allocation61_spill] sm:$0xff] %v8857_v61 }
 0x504   : > { %2787 = vmatmul.f32.gmra.mxu1 %v8753_v43  ;;  %3105 = vmatmul.f32.gmra.mxu3 %v8772_v52  ;;  %v8864_v60 = vpop.f32.mrf.mxu3 }
 0x505   : > { %2973 = vmatmul.f32.gmra.mxu2 %v8860_v11  ;;  %13856 = vst [vmem:[#allocation62_spill] sm:$0xff] %v8864_v60  ;;  %v8882_v60 = vld [vmem:[#allocation2 + $0x109] sm:$0xff] }
 0x506   : > { %v8868_v50 = vpop.f32.mrf.mxu1 }
 0x507   : > { %v8866_v26 = vpop.f32.mrf.mxu2  ;;  %13857 = vst [vmem:[#allocation63_spill] sm:$0xff] %v8868_v50 }
 0x50c   : > { %2790 = vmatmul.f32.gmra.mxu1 %v8762_v38  ;;  %3108 = vmatmul.f32.gmra.mxu3 %v8783_v54  ;;  %v8875_v43 = vpop.f32.mrf.mxu3  ;;  %v5096_v38 = vld [vmem:[%s13792_s4 + $0xde0] sm:$0xff] }
 0x50d   : > { %2976 = vmatmul.f32.gmra.mxu2 %v8871_v22  ;;  %13858 = vst [vmem:[#allocation64_spill] sm:$0xff] %v8875_v43  ;;  %5806 = vmatpush.msrb.mxu0 %v5096_v38 }
 0x50e   : > { %v8879_v57 = vpop.f32.mrf.mxu1 }
 0x50f   : > { %v8877_v61 = vpop.f32.mrf.mxu2  ;;  %13859 = vst [vmem:[#allocation65_spill] sm:$0xff] %v8879_v57  ;;  %v8894_v57 = vld [vmem:[#allocation2 + $0x111] sm:$0xff] }
 0x514   : > { %2793 = vmatmul.f32.gmra.mxu1 %v8772_v52  ;;  %3111 = vmatmul.f32.gmra.mxu3 %v8794_v30  ;;  %v8889_v50 = vpop.f32.mrf.mxu3 }
 0x515   : > { %2979 = vmatmul.f32.gmra.mxu2 %v8882_v60  ;;  %13860 = vst [vmem:[#allocation66_spill] sm:$0xff] %v8889_v50 }
 0x516   : > { %v2404_v47 = vpop.f32.mrf.mxu1 }
 0x517   : > { %v8891_v43 = vpop.f32.mrf.mxu2 }
 0x51c   : > { %2796 = vmatmul.f32.gmra.mxu1 %v8783_v54  ;;  %3114 = vmatmul.f32.gmra.mxu3 %v8805_v55  ;;  %v8898_v52 = vpop.f32.mrf.mxu3 }
 0x51d   : > { %2982 = vmatmul.f32.gmra.mxu2 %v8894_v57  ;;  %13861 = vst [vmem:[#allocation67_spill] sm:$0xff] %v8898_v52  ;;  %v2518_v52 = vadd.f32 %v8811_v46, %v2404_v47 }
 0x51e   : > { %v2407_v2 = vpop.f32.mrf.mxu1 }
 0x51f   : > { %v8900_v37 = vpop.f32.mrf.mxu2 }
 0x524   : > { %2799 = vmatmul.f32.gmra.mxu1 %v8794_v30  ;;  %3117 = vmatmul.f32.gmra.mxu3 %v8816_v3  ;;  %v8905_v38 = vpop.f32.mrf.mxu3 }
 0x525   : > { %2985 = vmatmul.f32.gmra.mxu2 %v8389_v24  ;;  %v7429_v24 = vld [vmem:[%s13790_s2 + $0x2f8] sm:$0xff] }
 0x526   : > { %3425 = vmatpush.msra.mxu2 %v7429_v24 }
 0x527   : > { %v8907_v54 = vpop.f32.mrf.mxu2 }
 0x529   : > { %v2410_v50 = vpop.f32.mrf.mxu1 }
 0x52a   : > { %v2524_v24 = vadd.f32 %v8833_v41, %v2410_v50  ;;  %v7421_v50 = vld [vmem:[%s13790_s2 + $0x2b8] sm:$0xff] }
 0x52c   : > { %2802 = vmatmul.f32.gmra.mxu1 %v8805_v55  ;;  %3120 = vmatmul.f32.gmra.mxu3 %v8827_v8  ;;  %v7428_v55 = vld [vmem:[%s13790_s2 + $0x2f0] sm:$0xff] }
 0x52d   : > { %2988 = vmatmul.f32.gmra.mxu2 %v8399_v35  ;;  %v2521_v35 = vadd.f32 %v8822_v12, %v2407_v2  ;;  %v7426_v2 = vld [vmem:[%s13790_s2 + $0x2e0] sm:$0xff]  ;;  %v7425_v12 = vld [vmem:[%s13790_s2 + $0x2d8] sm:$0xff] }
 0x52e   : > { %3426 = vmatpush.msra.mxu2 %v7428_v55 }
 0x52f   : > { %v2647_v33 = vpop.f32.mrf.mxu3 }
 0x530   : > { %v8913_v58 = vadd.f32 %v2647_v33, %v2518_v52  ;;  %v8915_v30 = vpop.f32.mrf.mxu2  ;;  %v2431_v52 = vadd.f32 %v8396_v32, %v8426_v15  ;;  %v7423_v32 = vld [vmem:[%s13790_s2 + $0x2c8] sm:$0xff]  ;;  %v7422_v15 = vld [vmem:[%s13790_s2 + $0x2c0] sm:$0xff] }
 0x531   : > { %v2758_v18 = vpop.f32.mrf.mxu1 }
 0x534   : > { %2805 = vmatmul.f32.gmra.mxu1 %v8816_v3  ;;  %3123 = vmatmul.f32.gmra.mxu3 %v8838_v31 }
 0x535   : > { %2991 = vmatmul.f32.gmra.mxu2 %v8419_v7  ;;  %v7427_v7 = vld [vmem:[%s13790_s2 + $0x2e8] sm:$0xff] }
 0x536   : > { %3427 = vmatpush.msra.mxu2 %v7427_v7 }
 0x537   : > { %v2650_v47 = vpop.f32.mrf.mxu3 }
 0x538   : > { %v8924_v46 = vadd.f32 %v2650_v47, %v2521_v35  ;;  %v8926_v33 = vpop.f32.mrf.mxu2  ;;  %3428 = vmatpush.msra.mxu2 %v7426_v2  ;;  %v2656_v47 = vadd.f32 %v8462_v5, %v2431_v52  ;;  %v2434_v5 = vadd.f32 %v8405_v39, %v8436_v23  ;;  %v7420_v39 = vld [vmem:[%s13790_s2 + $0x2b0] sm:$0xff]  ;;  %v7419_v23 = vld [vmem:[%s13790_s2 + $0x2a8] sm:$0xff] }
 0x539   : > { %v2761_v3 = vpop.f32.mrf.mxu1 }
 0x53a   : > { %13862 = vst [vmem:[#allocation68_spill] sm:$0xff] %v8924_v46  ;;  %3429 = vmatpush.msra.mxu2 %v7425_v12  ;;  %v2854_v46 = vadd.f32 %v2758_v18, %v2656_v47 }
 0x53c   : > { %2808 = vmatmul.f32.gmra.mxu1 %v8827_v8  ;;  %3126 = vmatmul.f32.gmra.mxu3 %v8849_v0  ;;  %v3016_v41 = vadd.f32 %v8844_v49, %v2854_v46 }
 0x53d   : > { %2994 = vmatmul.f32.gmra.mxu2 %v8431_v19  ;;  %v7424_v19 = vld [vmem:[%s13790_s2 + $0x2d0] sm:$0xff] }
 0x53e   : > { %3430 = vmatpush.msra.mxu2 %v7424_v19 }
 0x53f   : > { %v2653_v35 = vpop.f32.mrf.mxu3 }
 0x540   : > { %v8947_v55 = vadd.f32 %v2653_v35, %v2524_v24  ;;  %v8949_v8 = vpop.f32.mrf.mxu2  ;;  %3431 = vmatpush.msra.mxu2 %v7423_v32 }
 0x541   : > { %v2764_v7 = vpop.f32.mrf.mxu1 }
 0x542   : > { %3432 = vmatpush.msra.mxu2 %v7422_v15 }
 0x544   : > { %2811 = vmatmul.f32.gmra.mxu1 %v8838_v31  ;;  %3129 = vmatmul.f32.gmra.mxu3 %v8860_v11  ;;  %v2657_v31 = vadd.f32 %v8473_v14, %v2434_v5  ;;  %v2437_v14 = vadd.f32 %v8428_v16, %v8460_v4  ;;  %v7417_v16 = vld [vmem:[%s13790_s2 + $0x298] sm:$0xff]  ;;  %v7416_v4 = vld [vmem:[%s13790_s2 + $0x290] sm:$0xff] }
 0x545   : > { %2997 = vmatmul.f32.gmra.mxu2 %v8453_v59 }
 0x546   : > { %v2855_v52 = vadd.f32 %v2761_v3, %v2657_v31  ;;  %3433 = vmatpush.msra.mxu2 %v7421_v50  ;;  %v7418_v3 = vld [vmem:[%s13790_s2 + $0x2a0] sm:$0xff] }
 0x547   : > { %v3082_v18 = vpop.f32.mrf.mxu3 }
 0x548   : > { %v8970_v2 = vpop.f32.mrf.mxu2  ;;  %v8972_v59 = vadd.f32 %v3082_v18, %v3016_v41  ;;  %v3017_v49 = vadd.f32 %v8855_v29, %v2855_v52  ;;  %3434 = vmatpush.msra.mxu2 %v7420_v39  ;;  %v2440_v29 = vadd.f32 %v8439_v25, %v8471_v13  ;;  %v7414_v25 = vld [vmem:[%s13790_s2 + $0x280] sm:$0xff]  ;;  %v2443_v13 = vadd.f32 %v8458_v63, %v8524_v1 }
 0x549   : > { %v2767_v12 = vpop.f32.mrf.mxu1  ;;  %v2446_v63 = vadd.f32 %v8464_v6, %v8546_v34  ;;  %v2449_v6 = vadd.f32 %v8469_v10, %v8552_v42  ;;  %v7413_v10 = vld [vmem:[%s13790_s2 + $0x178] sm:$0xff] }
 0x54a   : > { %3435 = vmatpush.msra.mxu2 %v7419_v23  ;;  %v2659_v32 = vadd.f32 %v8548_v40, %v2440_v29  ;;  %v2660_v50 = vadd.f32 %v8557_v45, %v2443_v13  ;;  %v7445_v42 = vld [vmem:[%s13790_s2 + $0x478] sm:$0xff]  ;;  %3263 = vmatpush.msra.mxu1 %v7413_v10 }
 0x54b   : > { %v2661_v45 = vadd.f32 %v8565_v51, %v2446_v63  ;;  %v2662_v51 = vadd.f32 %v8576_v56, %v2449_v6  ;;  %v2452_v56 = vadd.f32 %v8475_v17, %v8561_v48  ;;  %3587 = vmatpush.msra.mxu3 %v7445_v42  ;;  %v7411_v17 = vld [vmem:[%s13790_s2 + $0x168] sm:$0xff]  ;;  %v7410_v48 = vld [vmem:[%s13790_s2 + $0x160] sm:$0xff] }
 0x54c   : > { %2814 = vmatmul.f32.gmra.mxu1 %v8849_v0  ;;  %3132 = vmatmul.f32.gmra.mxu3 %v8871_v22  ;;  %v2658_v0 = vadd.f32 %v8539_v28, %v2437_v14  ;;  %v5092_v28 = vld [vmem:[%s13792_s4 + $0xdc0] sm:$0xff]  ;;  %v2857_v18 = vadd.f32 %v2767_v12, %v2659_v32 }
 0x54d   : > { %3000 = vmatmul.f32.gmra.mxu2 %v8466_v9  ;;  %5807 = vmatpush.msrb.mxu0 %v5092_v28  ;;  %v2663_v28 = vadd.f32 %v8598_v27, %v2452_v56  ;;  %v7686_v27 = vld [vmem:[#allocation2 + $0x141] sm:$0xff] }
 0x54e   : > { %v2856_v47 = vadd.f32 %v2764_v7, %v2658_v0  ;;  %3436 = vmatpush.msra.mxu2 %v7418_v3  ;;  %v7415_v7 = vld [vmem:[%s13790_s2 + $0x288] sm:$0xff]  ;;  %v3019_v40 = vadd.f32 %v8877_v61, %v2857_v18  ;;  %v2455_v18 = vadd.f32 %v8477_v20, %v8569_v53  ;;  %v7406_v53 = vld [vmem:[%s13790_s2 + $0x140] sm:$0xff] }
 0x54f   : > { %v3085_v46 = vpop.f32.mrf.mxu3  ;;  %v7407_v20 = vld [vmem:[%s13790_s2 + $0x148] sm:$0xff] }
 0x550   : > { %v8990_v24 = vpop.f32.mrf.mxu2  ;;  %v8992_v9 = vadd.f32 %v3085_v46, %v3017_v49  ;;  %v3018_v19 = vadd.f32 %v8866_v26, %v2856_v47  ;;  %3437 = vmatpush.msra.mxu2 %v7417_v16  ;;  %v9051_v16 = vld [vmem:[#allocation2 + $0x1a] sm:$0xff] }
 0x551   : > { %v2770_v35 = vpop.f32.mrf.mxu1  ;;  %v7443_v56 = vld [vmem:[%s13790_s2 + $0x468] sm:$0xff] }
 0x552   : > { %3438 = vmatpush.msra.mxu2 %v7416_v4  ;;  %v2858_v39 = vadd.f32 %v2770_v35, %v2660_v50 }
 0x554   : > { %2817 = vmatmul.f32.gmra.mxu1 %v8860_v11  ;;  %3135 = vmatmul.f32.gmra.mxu3 %v8882_v60  ;;  %v3020_v61 = vadd.f32 %v8891_v43, %v2858_v39  ;;  %v7408_v39 = vld [vmem:[%s13790_s2 + $0x150] sm:$0xff] }
 0x555   : > { %3003 = vmatmul.f32.gmra.mxu2 %v8529_v21 }
 0x556   : > { %3439 = vmatpush.msra.mxu2 %v7415_v7 }
 0x557   : > { %v3088_v11 = vpop.f32.mrf.mxu3 }
 0x558   : > { %v9013_v15 = vpop.f32.mrf.mxu2  ;;  %v9015_v5 = vadd.f32 %v3088_v11, %v3018_v19  ;;  %3440 = vmatpush.msra.mxu2 %v7414_v25  ;;  %v7412_v11 = vld [vmem:[%s13790_s2 + $0x170] sm:$0xff] }
 0x559   : > { %v2773_v41 = vpop.f32.mrf.mxu1  ;;  %3264 = vmatpush.msra.mxu1 %v7412_v11  ;;  %v9132_v11 = vld [vmem:[#allocation2 + $0x3a] sm:$0xff] }
 0x55a   : > { %v2859_v46 = vadd.f32 %v2773_v41, %v2661_v45  ;;  %v7409_v41 = vld [vmem:[%s13790_s2 + $0x158] sm:$0xff]  ;;  %v7444_v45 = vld [vmem:[%s13790_s2 + $0x470] sm:$0xff] }
 0x55b   : > { %3265 = vmatpush.msra.mxu1 %v7411_v17  ;;  %3588 = vmatpush.msra.mxu3 %v7444_v45  ;;  %v13867_v17 = vld [vmem:[#allocation18_spill] sm:$0xff]  ;;  %v7398_v45 = vld [vmem:[%s13790_s2 + $0x100] sm:$0xff] }
 0x55c   : > { %2820 = vmatmul.f32.gmra.mxu1 %v8871_v22  ;;  %3138 = vmatmul.f32.gmra.mxu3 %v8894_v57  ;;  %v7683_v22 = vld [vmem:[#allocation2 + $0x121] sm:$0xff]  ;;  %v3021_v34 = vadd.f32 %v8900_v37, %v2859_v46 }
 0x55d   : > { %3006 = vmatmul.f32.gmra.mxu2 %v8554_v44  ;;  %3266 = vmatpush.msra.mxu1 %v7410_v48  ;;  %v13865_v46 = vld [vmem:[#allocation8_spill] sm:$0xff]  ;;  %v13868_v48 = vld [vmem:[#allocation9_spill] sm:$0xff] }
 0x55e   : > { %3589 = vmatpush.msra.mxu3 %v7443_v56  ;;  %v7436_v56 = vld [vmem:[%s13790_s2 + $0x430] sm:$0xff] }
 0x55f   : > { %v3091_v26 = vpop.f32.mrf.mxu3  ;;  %3267 = vmatpush.msra.mxu1 %v7409_v41  ;;  %v2461_v41 = vadd.f32 %v13868_v48, %v13867_v17  ;;  %v13873_v17 = vld [vmem:[#allocation24_spill] sm:$0xff]  ;;  %v13874_v48 = vld [vmem:[#allocation11_spill] sm:$0xff] }
 0x560   : > { %v9027_v31 = vpop.f32.mrf.mxu2  ;;  %v9029_v12 = vadd.f32 %v3091_v26, %v3019_v40  ;;  %v13863_v40 = vld [vmem:[#allocation19_spill] sm:$0xff] }
 0x561   : > { %v2776_v52 = vpop.f32.mrf.mxu1  ;;  %v2664_v26 = vadd.f32 %v13863_v40, %v2455_v18  ;;  %3268 = vmatpush.msra.mxu1 %v7408_v39  ;;  %v7400_v39 = vld [vmem:[%s13790_s2 + $0x110] sm:$0xff] }
 0x562   : > { %v2860_v47 = vadd.f32 %v2776_v52, %v2662_v51 }
 0x563   : > { %3269 = vmatpush.msra.mxu1 %v7407_v20 }
 0x564   : > { %2823 = vmatmul.f32.gmra.mxu1 %v8882_v60  ;;  %3141 = vmatmul.f32.gmra.mxu3 %v7683_v22  ;;  %v7684_v60 = vld [vmem:[#allocation2 + $0x129] sm:$0xff]  ;;  %v3022_v37 = vadd.f32 %v8907_v54, %v2860_v47 }
 0x565   : > { %3009 = vmatmul.f32.gmra.mxu2 %v8676_v62  ;;  %v9077_v54 = vld [vmem:[#allocation2 + $0x22] sm:$0xff]  ;;  %3270 = vmatpush.msra.mxu1 %v7406_v53 }
 0x566   : > { %v7399_v53 = vld [vmem:[%s13790_s2 + $0x108] sm:$0xff] }
 0x567   : > { %v3094_v1 = vpop.f32.mrf.mxu3 }
 0x568   : > { %v9037_v23 = vpop.f32.mrf.mxu2  ;;  %v9039_v14 = vadd.f32 %v3094_v1, %v3020_v61  ;;  %v9100_v61 = vld [vmem:[#allocation2 + $0x32] sm:$0xff] }
 0x569   : > { %v2779_v49 = vpop.f32.mrf.mxu1  ;;  %v7405_v1 = vld [vmem:[%s13790_s2 + $0x138] sm:$0xff] }
 0x56a   : > { %v2861_v32 = vadd.f32 %v2779_v49, %v2663_v28  ;;  %v13864_v49 = vld [vmem:[#allocation16_spill] sm:$0xff]  ;;  %3271 = vmatpush.msra.mxu1 %v7405_v1 }
 0x56b   : > { %v7688_v28 = vld [vmem:[#allocation2 + $0x159] sm:$0xff] }
 0x56c   : > { %2826 = vmatmul.f32.gmra.mxu1 %v8894_v57  ;;  %3144 = vmatmul.f32.gmra.mxu3 %v7684_v60  ;;  %v7685_v57 = vld [vmem:[#allocation2 + $0x139] sm:$0xff]  ;;  %v3023_v25 = vadd.f32 %v8915_v30, %v2861_v32  ;;  %v7687_v30 = vld [vmem:[#allocation2 + $0x151] sm:$0xff] }
 0x56d   : > { %3012 = vmatmul.f32.gmra.mxu2 %v8731_v36  ;;  %v7441_v32 = vld [vmem:[%s13790_s2 + $0x458] sm:$0xff]  ;;  %v7439_v1 = vld [vmem:[%s13790_s2 + $0x448] sm:$0xff] }
 0x56f   : > { %v3097_v43 = vpop.f32.mrf.mxu3 }
 0x570   : > { %v9047_v3 = vpop.f32.mrf.mxu2  ;;  %v9049_v0 = vadd.f32 %v3097_v43, %v3021_v34  ;;  %v13866_v43 = vld [vmem:[#allocation22_spill] sm:$0xff] }
 0x571   : > { %v2782_v35 = vpop.f32.mrf.mxu1 }
 0x572   : > { %v2862_v63 = vadd.f32 %v2782_v35, %v2664_v26 }
 0x574   : > { %2829 = vmatmul.f32.gmra.mxu1 %v7683_v22  ;;  %3147 = vmatmul.f32.gmra.mxu3 %v7685_v57  ;;  %v3024_v6 = vadd.f32 %v8926_v33, %v2862_v63  ;;  %v7403_v33 = vld [vmem:[%s13790_s2 + $0x128] sm:$0xff]  ;;  %v7440_v63 = vld [vmem:[%s13790_s2 + $0x450] sm:$0xff] }
 0x575   : > { %3441 = vmatmul.f32.vlgmr.msra.gmra.mxu2 %v9051_v16 }
 0x577   : > { %v3100_v4 = vpop.f32.mrf.mxu3 }
 0x578   : > { %v9064_v29 = vpop.f32.mrf.mxu2  ;;  %v9066_v19 = vadd.f32 %v3100_v4, %v3022_v37  ;;  %v7402_v37 = vld [vmem:[%s13790_s2 + $0x120] sm:$0xff] }
 0x579   : > { %v2785_v7 = vpop.f32.mrf.mxu1  ;;  %v7442_v4 = vld [vmem:[%s13790_s2 + $0x460] sm:$0xff] }
 0x57a   : > { %3590 = vmatpush.msra.mxu3 %v7442_v4  ;;  %v7435_v4 = vld [vmem:[%s13790_s2 + $0x428] sm:$0xff] }
 0x57c   : > { %2832 = vmatmul.f32.gmra.mxu1 %v7684_v60  ;;  %3150 = vmatmul.f32.gmra.mxu3 %v7686_v27  ;;  %v2458_v60 = vadd.f32 %v13865_v46, %v13864_v49  ;;  %v9165_v49 = vld [vmem:[#allocation2 + $0x4a] sm:$0xff]  ;;  %v5088_v46 = vld [vmem:[%s13792_s4 + $0xda0] sm:$0xff] }
 0x57d   : > { %3444 = vmatmul.f32.gmra.mxu2 %v9077_v54  ;;  %3591 = vmatpush.msra.mxu3 %v7441_v32  ;;  %v7434_v32 = vld [vmem:[%s13790_s2 + $0x420] sm:$0xff] }
 0x57e   : > { %v2665_v51 = vadd.f32 %v13866_v43, %v2458_v60  ;;  %v13870_v60 = vld [vmem:[#allocation21_spill] sm:$0xff]  ;;  %5808 = vmatpush.msrb.mxu0 %v5088_v46 }
 0x57f   : > { %v3103_v13 = vpop.f32.mrf.mxu3  ;;  %3592 = vmatpush.msra.mxu3 %v7440_v63 }
 0x580   : > { %v9087_v50 = vpop.f32.mrf.mxu2  ;;  %v9089_v52 = vadd.f32 %v3103_v13, %v3023_v25  ;;  %v2863_v42 = vadd.f32 %v2785_v7, %v2665_v51  ;;  %v7401_v7 = vld [vmem:[%s13790_s2 + $0x118] sm:$0xff]  ;;  %v13869_v25 = vld [vmem:[#allocation25_spill] sm:$0xff]  ;;  %v13872_v51 = vld [vmem:[#allocation28_spill] sm:$0xff] }
 0x581   : > { %v2788_v22 = vpop.f32.mrf.mxu1  ;;  %v2666_v13 = vadd.f32 %v13869_v25, %v2461_v41  ;;  %3593 = vmatpush.msra.mxu3 %v7439_v1  ;;  %v9216_v1 = vld [vmem:[#allocation2 + $0x62] sm:$0xff] }
 0x584   : > { %2835 = vmatmul.f32.gmra.mxu1 %v7685_v57  ;;  %3153 = vmatmul.f32.gmra.mxu3 %v7687_v30  ;;  %v7404_v57 = vld [vmem:[%s13790_s2 + $0x130] sm:$0xff] }
 0x585   : > { %3447 = vmatmul.f32.gmra.mxu2 %v9100_v61  ;;  %3272 = vmatpush.msra.mxu1 %v7404_v57 }
 0x587   : > { %v3106_v34 = vpop.f32.mrf.mxu3  ;;  %3273 = vmatpush.msra.mxu1 %v7403_v33 }
 0x588   : > { %v9113_v35 = vpop.f32.mrf.mxu2  ;;  %v9115_v47 = vadd.f32 %v3106_v34, %v3024_v6  ;;  %v13871_v6 = vld [vmem:[#allocation10_spill] sm:$0xff] }
 0x589   : > { %v2791_v10 = vpop.f32.mrf.mxu1  ;;  %3274 = vmatpush.msra.mxu1 %v7402_v37  ;;  %v2464_v34 = vadd.f32 %v13871_v6, %v13870_v60 }
 0x58b   : > { %3275 = vmatpush.msra.mxu1 %v7401_v7  ;;  %v2667_v57 = vadd.f32 %v13872_v51, %v2464_v34  ;;  %v9192_v7 = vld [vmem:[#allocation2 + $0x52] sm:$0xff]  ;;  %v13878_v34 = vld [vmem:[#allocation34_spill] sm:$0xff] }
 0x58c   : > { %2838 = vmatmul.f32.gmra.mxu1 %v7686_v27  ;;  %3156 = vmatmul.f32.gmra.mxu3 %v7688_v28  ;;  %v3025_v27 = vadd.f32 %v8949_v8, %v2863_v42  ;;  %v2864_v8 = vadd.f32 %v2788_v22, %v2666_v13  ;;  %v7438_v22 = vld [vmem:[%s13790_s2 + $0x440] sm:$0xff] }
 0x58d   : > { %3450 = vmatmul.f32.gmra.mxu2 %v9132_v11  ;;  %3276 = vmatpush.msra.mxu1 %v7400_v39  ;;  %v7432_v39 = vld [vmem:[%s13790_s2 + $0x410] sm:$0xff] }
 0x58e   : > { %3594 = vmatpush.msra.mxu3 %v7438_v22  ;;  %v13876_v22 = vld [vmem:[#allocation27_spill] sm:$0xff] }
 0x58f   : > { %v3109_v18 = vpop.f32.mrf.mxu3  ;;  %3277 = vmatpush.msra.mxu1 %v7399_v53  ;;  %v7689_v53 = vld [vmem:[#allocation2 + $0x169] sm:$0xff] }
 0x590   : > { %v9145_v40 = vpop.f32.mrf.mxu2  ;;  %v9147_v26 = vadd.f32 %v3109_v18, %v3025_v27 }
 0x591   : > { %v2794_v20 = vpop.f32.mrf.mxu1  ;;  %3278 = vmatpush.msra.mxu1 %v7398_v45  ;;  %v7430_v45 = vld [vmem:[%s13790_s2 + $0x400] sm:$0xff] }
 0x594   : > { %2841 = vmatmul.f32.gmra.mxu1 %v7687_v30  ;;  %3159 = vmatmul.f32.gmra.mxu3 %v8529_v21  ;;  %v3026_v30 = vadd.f32 %v8970_v2, %v2864_v8  ;;  %v7437_v21 = vld [vmem:[%s13790_s2 + $0x438] sm:$0xff]  ;;  %v2865_v2 = vadd.f32 %v2791_v10, %v2667_v57  ;;  %v2467_v10 = vadd.f32 %v13874_v48, %v13873_v17  ;;  %v13881_v48 = vld [vmem:[#allocation37_spill] sm:$0xff] }
 0x595   : > { %3453 = vmatmul.f32.gmra.mxu2 %v9165_v49  ;;  %3595 = vmatpush.msra.mxu3 %v7437_v21  ;;  %v7690_v57 = vld [vmem:[#allocation2 + $0x171] sm:$0xff] }
 0x596   : > { %v3027_v41 = vadd.f32 %v8990_v24, %v2865_v2  ;;  %v7431_v24 = vld [vmem:[%s13790_s2 + $0x408] sm:$0xff]  ;;  %v13879_v2 = vld [vmem:[#allocation30_spill] sm:$0xff] }
 0x597   : > { %v3112_v43 = vpop.f32.mrf.mxu3  ;;  %3596 = vmatpush.msra.mxu3 %v7436_v56  ;;  %v9231_v56 = vld [vmem:[#allocation2 + $0x6a] sm:$0xff] }
 0x598   : > { %v9181_v42 = vpop.f32.mrf.mxu2  ;;  %v9183_v33 = vadd.f32 %v3112_v43, %v3026_v30 }
 0x599   : > { %v2797_v37 = vpop.f32.mrf.mxu1  ;;  %3597 = vmatpush.msra.mxu3 %v7435_v4 }
 0x59b   : > { %3598 = vmatpush.msra.mxu3 %v7434_v32 }
 0x59c   : > { %2844 = vmatmul.f32.gmra.mxu1 %v7688_v28  ;;  %3162 = vmatmul.f32.gmra.mxu3 %v8554_v44  ;;  %v7433_v28 = vld [vmem:[%s13790_s2 + $0x418] sm:$0xff] }
 0x59d   : > { %3456 = vmatmul.f32.gmra.mxu2 %v9192_v7  ;;  %v13875_v44 = vld [vmem:[#allocation31_spill] sm:$0xff]  ;;  %3599 = vmatpush.msra.mxu3 %v7433_v28 }
 0x59e   : > { %v2668_v18 = vadd.f32 %v13875_v44, %v2467_v10  ;;  %v3210_v44 = vld [vmem:[#allocation2 + $0x2] sm:$0xff] }
 0x59f   : > { %v3115_v27 = vpop.f32.mrf.mxu3  ;;  %3600 = vmatpush.msra.mxu3 %v7432_v39  ;;  %v13882_v39 = vld [vmem:[#allocation33_spill] sm:$0xff] }
 0x5a0   : > { %v9205_v25 = vpop.f32.mrf.mxu2  ;;  %v9207_v13 = vadd.f32 %v3115_v27, %v3027_v41  ;;  %v2866_v8 = vadd.f32 %v2794_v20, %v2668_v18  ;;  %v13877_v20 = vld [vmem:[#allocation12_spill] sm:$0xff] }
 0x5a1   : > { %v2800_v63 = vpop.f32.mrf.mxu1  ;;  %3601 = vmatpush.msra.mxu3 %v7431_v24  ;;  %v2470_v46 = vadd.f32 %v13877_v20, %v13876_v22  ;;  %v2722_v27 = vld [vmem:[#allocation2 + $0x199] sm:$0xff] }
 0x5a2   : > { %v3028_v60 = vadd.f32 %v9013_v15, %v2866_v8  ;;  %v13880_v15 = vld [vmem:[#allocation13_spill] sm:$0xff]  ;;  %v9242_v18 = vld [vmem:[#allocation2 + $0x7a] sm:$0xff]  ;;  %v13883_v8 = vld [vmem:[#allocation14_spill] sm:$0xff] }
 0x5a3   : > { %3602 = vmatpush.msra.mxu3 %v7430_v45  ;;  %v2669_v30 = vadd.f32 %v13878_v34, %v2470_v46  ;;  %v2473_v4 = vadd.f32 %v13880_v15, %v13879_v2  ;;  %v13884_v45 = vld [vmem:[#allocation40_spill] sm:$0xff] }
 0x5a4   : > { %2847 = vmatmul.f32.gmra.mxu1 %v7689_v53  ;;  %3165 = vmatmul.f32.gmra.mxu3 %v8676_v62 }
 0x5a5   : > { %3459 = vmatmul.f32.gmra.mxu2 %v9216_v1  ;;  %v2867_v51 = vadd.f32 %v2797_v37, %v2669_v30  ;;  %v2670_v10 = vadd.f32 %v13881_v48, %v2473_v4  ;;  %v9253_v30 = vld [vmem:[#allocation2 + $0x82] sm:$0xff]  ;;  %v13887_v4 = vld [vmem:[#allocation43_spill] sm:$0xff] }
 0x5a7   : > { %v3118_v6 = vpop.f32.mrf.mxu3  ;;  %v3029_v32 = vadd.f32 %v9027_v31, %v2867_v51  ;;  %v2476_v31 = vadd.f32 %v13883_v8, %v13882_v39  ;;  %v13885_v51 = vld [vmem:[#allocation36_spill] sm:$0xff] }
 0x5a8   : > { %v9226_v21 = vpop.f32.mrf.mxu2  ;;  %v9228_v62 = vadd.f32 %v3118_v6, %v3028_v60  ;;  %v3211_v6 = vld [vmem:[#allocation2 + $0xa] sm:$0xff] }
 0x5a9   : > { %v2803_v43 = vpop.f32.mrf.mxu1  ;;  %v2671_v22 = vadd.f32 %v13884_v45, %v2476_v31  ;;  %v13890_v31 = vld [vmem:[#allocation46_spill] sm:$0xff] }
 0x5ab   : > { %v2869_v34 = vadd.f32 %v2803_v43, %v2671_v22 }
 0x5ac   : > { %2850 = vmatmul.f32.gmra.mxu1 %v7690_v57  ;;  %3168 = vmatmul.f32.gmra.mxu3 %v8731_v36  ;;  %v2868_v36 = vadd.f32 %v2800_v63, %v2670_v10  ;;  %v2723_v63 = vld [vmem:[#allocation2 + $0x1a1] sm:$0xff]  ;;  %v13886_v57 = vld [vmem:[#allocation15_spill] sm:$0xff] }
 0x5ad   : > { %3462 = vmatmul.f32.gmra.mxu2 %v9231_v56  ;;  %v3031_v2 = vadd.f32 %v9047_v3, %v2869_v34 }
 0x5ae   : > { %v3030_v24 = vadd.f32 %v9037_v23, %v2868_v36  ;;  %v2479_v23 = vadd.f32 %v13886_v57, %v13885_v51  ;;  %v13889_v36 = vld [vmem:[#allocation17_spill] sm:$0xff] }
 0x5af   : > { %v3121_v17 = vpop.f32.mrf.mxu3  ;;  %v13893_v57 = vld [vmem:[#allocation49_spill] sm:$0xff] }
 0x5b0   : > { %v9238_v41 = vpop.f32.mrf.mxu2  ;;  %v9240_v28 = vadd.f32 %v3121_v17, %v3029_v32  ;;  %v2672_v32 = vadd.f32 %v13887_v4, %v2479_v23 }
 0x5b1   : > { %v2806_v37 = vpop.f32.mrf.mxu1 }
 0x5b2   : > { %v2870_v43 = vadd.f32 %v2806_v37, %v2672_v32  ;;  %v13894_v32 = vld [vmem:[#allocation45_spill] sm:$0xff] }
 0x5b4   : > { %3171 = vmatmul.f32.gmra.mxu3 %v2722_v27  ;;  %3279 = vmatmul.f32.vlgmr.msra.gmra.mxu1 %v3210_v44  ;;  %v9265_v27 = vld [vmem:[#allocation2 + $0x92] sm:$0xff]  ;;  %v3032_v39 = vadd.f32 %v9064_v29, %v2870_v43 }
 0x5b5   : > { %3465 = vmatmul.f32.gmra.mxu2 %v9242_v18  ;;  %v13888_v44 = vld [vmem:[#allocation39_spill] sm:$0xff] }
 0x5b6   : > { %v2482_v3 = vadd.f32 %v13889_v36, %v13888_v44  ;;  %v13895_v43 = vld [vmem:[#allocation23_spill] sm:$0xff] }
 0x5b7   : > { %v3124_v53 = vpop.f32.mrf.mxu3  ;;  %v2488_v44 = vadd.f32 %v13895_v43, %v13894_v32  ;;  %v13901_v32 = vld [vmem:[#allocation29_spill] sm:$0xff] }
 0x5b8   : > { %v9249_v20 = vpop.f32.mrf.mxu2  ;;  %v9251_v46 = vadd.f32 %v3124_v53, %v3030_v24  ;;  %v2673_v24 = vadd.f32 %v13890_v31, %v2482_v3 }
 0x5b9   : > { %v2809_v60 = vpop.f32.mrf.mxu1 }
 0x5ba   : > { %v2871_v37 = vadd.f32 %v2809_v60, %v2673_v24  ;;  %v9305_v24 = vld [vmem:[#allocation2 + $0xb2] sm:$0xff] }
 0x5bc   : > { %3174 = vmatmul.f32.gmra.mxu3 %v2723_v63  ;;  %3282 = vmatmul.f32.gmra.mxu1 %v3211_v6  ;;  %v13891_v63 = vld [vmem:[#allocation42_spill] sm:$0xff]  ;;  %v13892_v6 = vld [vmem:[#allocation20_spill] sm:$0xff]  ;;  %v3033_v34 = vadd.f32 %v9087_v50, %v2871_v37 }
 0x5bd   : > { %3468 = vmatmul.f32.gmra.mxu2 %v9253_v30  ;;  %v2485_v29 = vadd.f32 %v13892_v6, %v13891_v63  ;;  %v5084_v50 = vld [vmem:[%s13792_s4 + $0xd80] sm:$0xff]  ;;  %v13898_v63 = vld [vmem:[#allocation26_spill] sm:$0xff] }
 0x5be   : > { %5809 = vmatpush.msrb.mxu0 %v5084_v50  ;;  %v13897_v37 = vld [vmem:[#allocation48_spill] sm:$0xff]  ;;  %v13900_v50 = vld [vmem:[#allocation51_spill] sm:$0xff] }
 0x5bf   : > { %v3127_v15 = vpop.f32.mrf.mxu3  ;;  %v2674_v23 = vadd.f32 %v13893_v57, %v2485_v29  ;;  %v2491_v6 = vadd.f32 %v13898_v63, %v13897_v37  ;;  %v13903_v37 = vld [vmem:[#allocation53_spill] sm:$0xff]  ;;  %v13904_v63 = vld [vmem:[#allocation32_spill] sm:$0xff] }
 0x5c0   : > { %v9260_v17 = vadd.f32 %v3127_v15, %v3031_v2  ;;  %v9262_v48 = vpop.f32.mrf.mxu2 }
 0x5c1   : > { %v2812_v10 = vpop.f32.mrf.mxu1 }
 0x5c2   : > { %v2872_v15 = vadd.f32 %v2812_v10, %v2674_v23 }
 0x5c4   : > { %3285 = vmatmul.f32.gmra.mxu1 %v9051_v16  ;;  %3603 = vmatmul.f32.vlgmr.msra.gmra.mxu3 %v9100_v61  ;;  %v9278_v16 = vld [vmem:[#allocation2 + $0x9a] sm:$0xff]  ;;  %v3034_v36 = vadd.f32 %v9113_v35, %v2872_v15  ;;  %v9318_v15 = vld [vmem:[#allocation2 + $0xc2] sm:$0xff] }
 0x5c5   : > { %3471 = vmatmul.f32.gmra.mxu2 %v9265_v27 }
 0x5c7   : > { %v3130_v8 = vpop.f32.mrf.mxu3 }
 0x5c8   : > { %v9273_v53 = vadd.f32 %v3130_v8, %v3032_v39  ;;  %v9275_v22 = vpop.f32.mrf.mxu2 }
 0x5c9   : > { %v2815_v45 = vpop.f32.mrf.mxu1 }
 0x5cc   : > { %3288 = vmatmul.f32.gmra.mxu1 %v9077_v54  ;;  %3606 = vmatmul.f32.gmra.mxu3 %v9132_v11  ;;  %v9289_v54 = vld [vmem:[#allocation2 + $0xaa] sm:$0xff] }
 0x5cd   : > { %3474 = vmatmul.f32.gmra.mxu2 %v9278_v16 }
 0x5cf   : > { %v3133_v51 = vpop.f32.mrf.mxu3 }
 0x5d0   : > { %v9286_v2 = vadd.f32 %v3133_v51, %v3033_v34  ;;  %v9292_v4 = vpop.f32.mrf.mxu2  ;;  %v13899_v51 = vld [vmem:[#allocation54_spill] sm:$0xff] }
 0x5d1   : > { %v2818_v60 = vpop.f32.mrf.mxu1  ;;  %v2676_v57 = vadd.f32 %v13899_v51, %v2491_v6 }
 0x5d4   : > { %3291 = vmatmul.f32.gmra.mxu1 %v9100_v61  ;;  %3609 = vmatmul.f32.gmra.mxu3 %v9165_v49  ;;  %v13896_v61 = vld [vmem:[#allocation52_spill] sm:$0xff] }
 0x5d5   : > { %3477 = vmatmul.f32.gmra.mxu2 %v9289_v54  ;;  %v2675_v3 = vadd.f32 %v13896_v61, %v2488_v44 }
 0x5d7   : > { %v3136_v10 = vpop.f32.mrf.mxu3  ;;  %v2873_v31 = vadd.f32 %v2815_v45, %v2675_v3 }
 0x5d8   : > { %v9302_v39 = vadd.f32 %v3136_v10, %v3034_v36  ;;  %v9312_v29 = vpop.f32.mrf.mxu2  ;;  %v13902_v36 = vld [vmem:[#allocation56_spill] sm:$0xff] }
 0x5d9   : > { %v2821_v8 = vpop.f32.mrf.mxu1  ;;  %v3035_v35 = vadd.f32 %v9145_v40, %v2873_v31  ;;  %v2494_v40 = vadd.f32 %v13901_v32, %v13900_v50  ;;  %v9331_v31 = vld [vmem:[#allocation2 + $0xca] sm:$0xff]  ;;  %v13906_v32 = vld [vmem:[#allocation55_spill] sm:$0xff] }
 0x5db   : > { %v2677_v10 = vadd.f32 %v13902_v36, %v2494_v40  ;;  %v13907_v40 = vld [vmem:[#allocation35_spill] sm:$0xff]  ;;  %v13908_v36 = vld [vmem:[#allocation60_spill] sm:$0xff] }
 0x5dc   : > { %3294 = vmatmul.f32.gmra.mxu1 %v9132_v11  ;;  %3612 = vmatmul.f32.gmra.mxu3 %v9192_v7  ;;  %v2874_v11 = vadd.f32 %v2818_v60, %v2676_v57 }
 0x5dd   : > { %3480 = vmatmul.f32.gmra.mxu2 %v9305_v24 }
 0x5de   : > { %v3036_v43 = vadd.f32 %v9181_v42, %v2874_v11  ;;  %v2497_v42 = vadd.f32 %v13904_v63, %v13903_v37 }
 0x5df   : > { %v3139_v34 = vpop.f32.mrf.mxu3 }
 0x5e0   : > { %v9315_v23 = vadd.f32 %v3139_v34, %v3035_v35  ;;  %v9328_v3 = vpop.f32.mrf.mxu2  ;;  %v13905_v34 = vld [vmem:[#allocation58_spill] sm:$0xff] }
 0x5e1   : > { %v2824_v45 = vpop.f32.mrf.mxu1  ;;  %v2678_v51 = vadd.f32 %v13905_v34, %v2497_v42  ;;  %v13909_v42 = vld [vmem:[#allocation57_spill] sm:$0xff] }
 0x5e4   : > { %3297 = vmatmul.f32.gmra.mxu1 %v9165_v49  ;;  %3615 = vmatmul.f32.gmra.mxu3 %v9216_v1  ;;  %v2875_v49 = vadd.f32 %v2821_v8, %v2677_v10  ;;  %v2876_v8 = vadd.f32 %v2824_v45, %v2678_v51  ;;  %v13911_v51 = vld [vmem:[#allocation62_spill] sm:$0xff] }
 0x5e5   : > { %3483 = vmatmul.f32.gmra.mxu2 %v9318_v15 }
 0x5e6   : > { %v3037_v6 = vadd.f32 %v9205_v25, %v2875_v49  ;;  %v2500_v25 = vadd.f32 %v13907_v40, %v13906_v32  ;;  %v9368_v40 = vld [vmem:[#allocation2 + $0xf2] sm:$0xff] }
 0x5e7   : > { %v3142_v44 = vpop.f32.mrf.mxu3 }
 0x5e8   : > { %v9326_v61 = vadd.f32 %v3142_v44, %v3036_v43  ;;  %v9341_v50 = vpop.f32.mrf.mxu2  ;;  %v3038_v43 = vadd.f32 %v9226_v21, %v2876_v8  ;;  %v2679_v10 = vadd.f32 %v13908_v36, %v2500_v25  ;;  %v13912_v25 = vld [vmem:[#allocation59_spill] sm:$0xff] }
 0x5e9   : > { %v2827_v60 = vpop.f32.mrf.mxu1 }
 0x5ea   : > { %v2877_v37 = vadd.f32 %v2827_v60, %v2679_v10 }
 0x5ec   : > { %3300 = vmatmul.f32.gmra.mxu1 %v9192_v7  ;;  %3618 = vmatmul.f32.gmra.mxu3 %v9231_v56  ;;  %v9344_v7 = vld [vmem:[#allocation2 + $0xda] sm:$0xff] }
 0x5ed   : > { %3486 = vmatmul.f32.gmra.mxu2 %v9331_v31 }
 0x5ef   : > { %v3145_v35 = vpop.f32.mrf.mxu3 }
 0x5f0   : > { %v9339_v57 = vadd.f32 %v3145_v35, %v3037_v6  ;;  %v9358_v63 = vpop.f32.mrf.mxu2  ;;  %v13910_v6 = vld [vmem:[#allocation38_spill] sm:$0xff]  ;;  %v3039_v35 = vadd.f32 %v9238_v41, %v2877_v37  ;;  %v13914_v37 = vld [vmem:[#allocation64_spill] sm:$0xff] }
 0x5f1   : > { %v2830_v11 = vpop.f32.mrf.mxu1  ;;  %v2503_v21 = vadd.f32 %v13910_v6, %v13909_v42 }
 0x5f3   : > { %v2680_v8 = vadd.f32 %v13911_v51, %v2503_v21  ;;  %v9381_v21 = vld [vmem:[#allocation2 + $0xfa] sm:$0xff] }
 0x5f4   : > { %3303 = vmatmul.f32.gmra.mxu1 %v9216_v1  ;;  %3621 = vmatmul.f32.gmra.mxu3 %v9242_v18  ;;  %v9355_v1 = vld [vmem:[#allocation2 + $0xe2] sm:$0xff] }
 0x5f5   : > { %3489 = vmatmul.f32.gmra.mxu2 %v9344_v7 }
 0x5f7   : > { %v3148_v44 = vpop.f32.mrf.mxu3 }
 0x5f8   : > { %v9352_v49 = vadd.f32 %v3148_v44, %v3038_v43  ;;  %v13913_v43 = vld [vmem:[#allocation41_spill] sm:$0xff]  ;;  %v9375_v36 = vpop.f32.mrf.mxu2 }
 0x5f9   : > { %v2833_v45 = vpop.f32.mrf.mxu1  ;;  %v2506_v44 = vadd.f32 %v13913_v43, %v13912_v25 }
 0x5fb   : > { %v2681_v42 = vadd.f32 %v13914_v37, %v2506_v44  ;;  %v13919_v37 = vld [vmem:[#allocation47_spill] sm:$0xff] }
 0x5fc   : > { %3306 = vmatmul.f32.gmra.mxu1 %v9231_v56  ;;  %3624 = vmatmul.f32.gmra.mxu3 %v9253_v30  ;;  %v2878_v56 = vadd.f32 %v2830_v11, %v2680_v8 }
 0x5fd   : > { %3492 = vmatmul.f32.gmra.mxu2 %v9355_v1 }
 0x5fe   : > { %v3040_v41 = vadd.f32 %v9249_v20, %v2878_v56  ;;  %v13917_v56 = vld [vmem:[#allocation66_spill] sm:$0xff] }
 0x5ff   : > { %v3151_v34 = vpop.f32.mrf.mxu3 }
 0x600   : > { %v9365_v32 = vadd.f32 %v3151_v34, %v3039_v35  ;;  %v13915_v35 = vld [vmem:[#allocation61_spill] sm:$0xff]  ;;  %v13916_v34 = vld [vmem:[#allocation44_spill] sm:$0xff]  ;;  %v9391_v44 = vpop.f32.mrf.mxu2 }
 0x601   : > { %v2836_v60 = vpop.f32.mrf.mxu1  ;;  %v2509_v20 = vadd.f32 %v13916_v34, %v13915_v35 }
 0x603   : > { %v2682_v25 = vadd.f32 %v13917_v56, %v2509_v20 }
 0x604   : > { %3309 = vmatmul.f32.gmra.mxu1 %v9242_v18  ;;  %3627 = vmatmul.f32.gmra.mxu3 %v9265_v27  ;;  %v2879_v18 = vadd.f32 %v2833_v45, %v2681_v42 }
 0x605   : > { %3495 = vmatmul.f32.gmra.mxu2 %v9368_v40 }
 0x606   : > { %v3041_v51 = vadd.f32 %v9262_v48, %v2879_v18  ;;  %v5080_v48 = vld [vmem:[%s13792_s4 + $0xd60] sm:$0xff] }
 0x607   : > { %v3154_v10 = vpop.f32.mrf.mxu3  ;;  %5810 = vmatpush.msrb.mxu0 %v5080_v48  ;;  %v13922_v48 = vld [vmem:[#allocation50_spill] sm:$0xff] }
 0x608   : > { %v9378_v6 = vadd.f32 %v3154_v10, %v3040_v41  ;;  %v9394_v41 = vld [vmem:[#allocation2 + $0x10a] sm:$0xff]  ;;  %v13918_v10 = vld [vmem:[#allocation63_spill] sm:$0xff]  ;;  %v9408_v56 = vpop.f32.mrf.mxu2 }
 0x609   : > { %v2839_v11 = vpop.f32.mrf.mxu1  ;;  %v2512_v42 = vadd.f32 %v13919_v37, %v13918_v10 }
 0x60c   : > { %3312 = vmatmul.f32.gmra.mxu1 %v9253_v30  ;;  %3630 = vmatmul.f32.gmra.mxu3 %v9278_v16  ;;  %v2880_v30 = vadd.f32 %v2836_v60, %v2682_v25  ;;  %v13920_v60 = vld [vmem:[#allocation67_spill] sm:$0xff] }
 0x60d   : > { %3498 = vmatmul.f32.gmra.mxu2 %v9381_v21  ;;  %v2683_v34 = vadd.f32 %v13920_v60, %v2512_v42  ;;  %v9411_v25 = vld [vmem:[#allocation2 + $0x112] sm:$0xff] }
 0x60e   : > { %v3042_v18 = vadd.f32 %v9275_v22, %v2880_v30  ;;  %v13921_v30 = vld [vmem:[#allocation65_spill] sm:$0xff] }
 0x60f   : > { %v3157_v8 = vpop.f32.mrf.mxu3  ;;  %v2515_v10 = vadd.f32 %v13922_v48, %v13921_v30 }
 0x610   : > { %v9389_v43 = vadd.f32 %v3157_v8, %v3041_v51  ;;  %v2881_v51 = vadd.f32 %v2839_v11, %v2683_v34  ;;  %v9424_v34 = vld [vmem:[#allocation2 + $0x122] sm:$0xff] }
 0x611   : > { %v2842_v45 = vpop.f32.mrf.mxu1 }
 0x612   : > { %v3043_v37 = vadd.f32 %v9292_v4, %v2881_v51 }
 0x614   : > { %3315 = vmatmul.f32.gmra.mxu1 %v9265_v27  ;;  %3633 = vmatmul.f32.gmra.mxu3 %v9289_v54 }
 0x615   : > { %3501 = vmatmul.f32.gmra.mxu2 %v9394_v41 }
 0x617   : > { %v3160_v35 = vpop.f32.mrf.mxu3 }
 0x618   : > { %v9405_v27 = vadd.f32 %v3160_v35, %v3042_v18  ;;  %v13923_v35 = vld [vmem:[#allocation68_spill] sm:$0xff] }
 0x619   : > { %v2845_v20 = vpop.f32.mrf.mxu1 }
 0x61a   : > { %v2883_v8 = vadd.f32 %v2845_v20, %v8913_v58  ;;  %v2684_v58 = vadd.f32 %v8905_v38, %v2515_v10  ;;  %v9428_v20 = vpop.f32.mrf.mxu2 }
 0x61c   : > { %3318 = vmatmul.f32.gmra.mxu1 %v9278_v16  ;;  %3636 = vmatmul.f32.gmra.mxu3 %v9305_v24  ;;  %v3045_v22 = vadd.f32 %v9328_v3, %v2883_v8  ;;  %v2882_v16 = vadd.f32 %v2842_v45, %v2684_v58 }
 0x61d   : > { %3504 = vmatmul.f32.gmra.mxu2 %v9411_v25 }
 0x61e   : > { %v3044_v38 = vadd.f32 %v9312_v29, %v2882_v16 }
 0x61f   : > { %v3163_v11 = vpop.f32.mrf.mxu3 }
 0x620   : > { %v9420_v42 = vadd.f32 %v3163_v11, %v3043_v37  ;;  %v9446_v37 = vld [vmem:[#allocation2 + $0x13a] sm:$0xff] }
 0x621   : > { %v2848_v18 = vpop.f32.mrf.mxu1 }
 0x622   : > { %v2884_v60 = vadd.f32 %v2848_v18, %v13923_v35  ;;  %v9441_v30 = vpop.f32.mrf.mxu2 }
 0x624   : > { %3321 = vmatmul.f32.gmra.mxu1 %v9289_v54  ;;  %3639 = vmatmul.f32.gmra.mxu3 %v9318_v15  ;;  %v3046_v3 = vadd.f32 %v9341_v50, %v2884_v60  ;;  %v9436_v54 = vld [vmem:[#allocation2 + $0x12a] sm:$0xff]  ;;  %v9467_v60 = vld [vmem:[#allocation2 + $0x152] sm:$0xff] }
 0x625   : > { %3507 = vmatmul.f32.gmra.mxu2 %v9424_v34 }
 0x627   : > { %v3166_v4 = vpop.f32.mrf.mxu3 }
 0x628   : > { %v9432_v51 = vadd.f32 %v3166_v4, %v3044_v38 }
 0x629   : > { %v2851_v45 = vpop.f32.mrf.mxu1 }
 0x62a   : > { %v2885_v8 = vadd.f32 %v2851_v45, %v8947_v55  ;;  %v3997_v55 = vld [vmem:[%s13791_s3 + $0x78] sm:$0xff]  ;;  %v9455_v11 = vpop.f32.mrf.mxu2 }
 0x62b   : > { %4056 = vmatpush.msrb.mxu2 %v3997_v55  ;;  %v3993_v45 = vld [vmem:[%s13791_s3 + $0x58] sm:$0xff] }
 0x62c   : > { %3324 = vmatmul.f32.gmra.mxu1 %v9305_v24  ;;  %3642 = vmatmul.f32.gmra.mxu3 %v9331_v31  ;;  %v3047_v50 = vadd.f32 %v9358_v63, %v2885_v8  ;;  %v9484_v8 = vld [vmem:[#allocation2 + $0x15a] sm:$0xff] }
 0x62d   : > { %3510 = vmatmul.f32.gmra.mxu2 %v9436_v54 }
 0x62f   : > { %v3169_v48 = vpop.f32.mrf.mxu3 }
 0x630   : > { %v9443_v29 = vadd.f32 %v3169_v48, %v3045_v22  ;;  %v3992_v48 = vld [vmem:[%s13791_s3 + $0x50] sm:$0xff] }
 0x631   : > { %v3280_v10 = vpop.f32.mrf.mxu1 }
 0x632   : > { %13924 = vst [vmem:[#allocation19_spill] sm:$0xff] %v9443_v29  ;;  %v9464_v35 = vpop.f32.mrf.mxu2 }
 0x634   : > { %3327 = vmatmul.f32.gmra.mxu1 %v9318_v15  ;;  %3645 = vmatmul.f32.gmra.mxu3 %v9344_v7  ;;  %v9458_v15 = vld [vmem:[#allocation2 + $0x142] sm:$0xff] }
 0x635   : > { %3513 = vmatmul.f32.gmra.mxu2 %v9446_v37 }
 0x637   : > { %v3172_v24 = vpop.f32.mrf.mxu3 }
 0x638   : > { %v9453_v63 = vadd.f32 %v3172_v24, %v3046_v3  ;;  %v3995_v3 = vld [vmem:[%s13791_s3 + $0x68] sm:$0xff] }
 0x639   : > { %v3283_v22 = vpop.f32.mrf.mxu1  ;;  %v3991_v24 = vld [vmem:[%s13791_s3 + $0x48] sm:$0xff] }
 0x63c   : > { %3330 = vmatmul.f32.gmra.mxu1 %v9331_v31  ;;  %3648 = vmatmul.f32.gmra.mxu3 %v9355_v1  ;;  %v3996_v31 = vld [vmem:[%s13791_s3 + $0x70] sm:$0xff] }
 0x63d   : > { %3516 = vmatmul.f32.gmra.mxu2 %v9458_v15 }
 0x63e   : > { %4057 = vmatpush.msrb.mxu2 %v3996_v31 }
 0x63f   : > { %v3175_v58 = vpop.f32.mrf.mxu3 }
 0x640   : > { %v9462_v18 = vadd.f32 %v3175_v58, %v3047_v50  ;;  %4058 = vmatpush.msrb.mxu2 %v3995_v3  ;;  %v9487_v50 = vpop.f32.mrf.mxu2  ;;  %v3990_v3 = vld [vmem:[%s13791_s3 + $0x40] sm:$0xff] }
 0x641   : > { %v3286_v16 = vpop.f32.mrf.mxu1 }
 0x642   : > { %13925 = vst [vmem:[#allocation16_spill] sm:$0xff] %v9462_v18  ;;  %v3378_v31 = vadd.f32 %v3286_v16, %v9015_v5  ;;  %v5076_v5 = vld [vmem:[%s13792_s4 + $0xd40] sm:$0xff] }
 0x643   : > { %5811 = vmatpush.msrb.mxu0 %v5076_v5  ;;  %v9530_v5 = vld [vmem:[#allocation2 + $0x172] sm:$0xff] }
 0x644   : > { %3333 = vmatmul.f32.gmra.mxu1 %v9344_v7  ;;  %3651 = vmatmul.f32.gmra.mxu3 %v9368_v40  ;;  %v3994_v7 = vld [vmem:[%s13791_s3 + $0x60] sm:$0xff]  ;;  %v3540_v16 = vadd.f32 %v9408_v56, %v3378_v31  ;;  %v3987_v56 = vld [vmem:[%s13791_s3 + $0x28] sm:$0xff] }
 0x645   : > { %3519 = vmatmul.f32.gmra.mxu2 %v9467_v60 }
 0x646   : > { %4059 = vmatpush.msrb.mxu2 %v3994_v7 }
 0x647   : > { %v3604_v38 = vpop.f32.mrf.mxu3 }
 0x648   : > { %4060 = vmatpush.msrb.mxu2 %v3993_v45  ;;  %v9505_v45 = vld [vmem:[#allocation2 + $0x16a] sm:$0xff] }
 0x649   : > { %v3289_v4 = vpop.f32.mrf.mxu1 }
 0x64a   : > { %4061 = vmatpush.msrb.mxu2 %v3992_v48  ;;  %v3988_v48 = vld [vmem:[%s13791_s3 + $0x30] sm:$0xff] }
 0x64c   : > { %3336 = vmatmul.f32.gmra.mxu1 %v9355_v1  ;;  %3654 = vmatmul.f32.gmra.mxu3 %v9381_v21  ;;  %v3376_v1 = vadd.f32 %v3280_v10, %v8972_v59  ;;  %v3989_v59 = vld [vmem:[%s13791_s3 + $0x38] sm:$0xff] }
 0x64d   : > { %3522 = vmatmul.f32.gmra.mxu2 %v9484_v8 }
 0x64e   : > { %4062 = vmatpush.msrb.mxu2 %v3991_v24  ;;  %v3538_v7 = vadd.f32 %v9375_v36, %v3376_v1  ;;  %v3377_v24 = vadd.f32 %v3283_v22, %v8992_v9  ;;  %v3986_v9 = vld [vmem:[%s13791_s3 + $0x20] sm:$0xff] }
 0x64f   : > { %v3607_v55 = vpop.f32.mrf.mxu3  ;;  %v13926_v22 = vld [vmem:[#allocation7_spill] sm:$0xff] }
 0x650   : > { %v3700_v10 = vadd.f32 %v3604_v38, %v3538_v7  ;;  %4063 = vmatpush.msrb.mxu2 %v3990_v3  ;;  %v3379_v38 = vadd.f32 %v3289_v4, %v9029_v12  ;;  %v3539_v31 = vadd.f32 %v9391_v44, %v3377_v24 }
 0x651   : > { %v9497_v58 = vpop.f32.mrf.mxu1 }
 0x652   : > { %4064 = vmatpush.msrb.mxu2 %v3989_v59  ;;  %v3732_v29 = vmax.f32 %v3700_v10, 0.0  ;;  %v3701_v12 = vadd.f32 %v3607_v55, %v3539_v31  ;;  %v3541_v59 = vadd.f32 %v9428_v20, %v3379_v38  ;;  %v3984_v20 = vld [vmem:[%s13791_s3 + $0x10] sm:$0xff] }
 0x653   : > { %v9548_v38 = vld [vmem:[#allocation2 + $0x182] sm:$0xff] }
 0x654   : > { %3339 = vmatmul.f32.gmra.mxu1 %v9368_v40  ;;  %3657 = vmatmul.f32.gmra.mxu3 %v9394_v41  ;;  %v9516_v40 = vpop.f32.mrf.mxu2 }
 0x655   : > { %3525 = vmatmul.f32.gmra.mxu2 %v9505_v45 }
 0x656   : > { %4065 = vmatpush.msrb.mxu2 %v3988_v48  ;;  %v3733_v48 = vmax.f32 %v3701_v12, 0.0 }
 0x657   : > { %v3610_v36 = vpop.f32.mrf.mxu3 }
 0x658   : > { %v3702_v1 = vadd.f32 %v3610_v36, %v3540_v16  ;;  %4066 = vmatpush.msrb.mxu2 %v3987_v56 }
 0x659   : > { %v9522_v18 = vpop.f32.mrf.mxu1 }
 0x65a   : > { %v3734_v7 = vmax.f32 %v3702_v1, 0.0  ;;  %4067 = vmatpush.msrb.mxu2 %v3986_v9 }
 0x65c   : > { %v3764_v3 = vmax.f32 %v3732_v29, %v3734_v7  ;;  %3342 = vmatmul.f32.gmra.mxu1 %v9381_v21  ;;  %3660 = vmatmul.f32.gmra.mxu3 %v9411_v25  ;;  %v3985_v21 = vld [vmem:[%s13791_s3 + $0x18] sm:$0xff]  ;;  %v9542_v16 = vpop.f32.mrf.mxu2  ;;  %v3983_v7 = vld [vmem:[%s13791_s3 + $0x8] sm:$0xff] }
 0x65d   : > { %3528 = vmatmul.f32.gmra.mxu2 %v9530_v5 }
 0x65e   : > { %v3783_v4 = vperm.slane %v3764_v3, %v13926_v22  ;;  %4068 = vmatpush.msrb.mxu2 %v3985_v21  ;;  %v3982_v3 = vld [vmem:[%s13791_s3] sm:$0xff]  ;;  %v3380_v21 = vadd.f32 %v9497_v58, %v9039_v14  ;;  %v7691_v14 = vld [vmem:[#allocation2] sm:$0xff] }
 0x65f   : > { %v3613_v44 = vpop.f32.mrf.mxu3 }
 0x660   : > { %v3860_v29 = vrot.slane %v3783_v4, 4  ;;  %v3703_v10 = vadd.f32 %v3613_v44, %v3541_v59  ;;  %4069 = vmatpush.msrb.mxu2 %v3984_v20  ;;  %v9562_v59 = vld [vmem:[#allocation2 + $0x18a] sm:$0xff] }
 0x661   : > { %v3298_v36 = vpop.f32.mrf.mxu1 }
 0x662   : > { %v3892_v24 = vmax.f32 %v3783_v4, %v3860_v29  ;;  %v3735_v1 = vmax.f32 %v3703_v10, 0.0  ;;  %4070 = vmatpush.msrb.mxu2 %v3983_v7  ;;  %v3382_v10 = vadd.f32 %v3298_v36, %v9066_v19 }
 0x664   : > { %3924 = vst [vmem:[#allocation1] ss:$2 sm:$0xff] %v3892_v24  ;;  %v3765_v55 = vmax.f32 %v3733_v48, %v3735_v1  ;;  %3345 = vmatmul.f32.gmra.mxu1 %v9394_v41  ;;  %3663 = vmatmul.f32.gmra.mxu3 %v9424_v34  ;;  %v9559_v4 = vpop.f32.mrf.mxu2  ;;  %v3542_v24 = vadd.f32 %v9441_v30, %v3380_v21 }
 0x665   : > { %3531 = vmatmul.f32.gmra.mxu2 %v9548_v38  ;;  %v3544_v58 = vadd.f32 %v9464_v35, %v3382_v10 }
 0x666   : > { %v3787_v56 = vperm.slane %v3765_v55, %v13926_v22  ;;  %4071 = vmatpush.msrb.mxu2 %v3982_v3 }
 0x667   : > { %v3616_v31 = vpop.f32.mrf.mxu3 }
 0x668   : > { %v3861_v9 = vrot.slane %v3787_v56, 4  ;;  %v3704_v19 = vadd.f32 %v3616_v31, %v3542_v24 }
 0x669   : > { %v3301_v41 = vpop.f32.mrf.mxu1 }
 0x66a   : > { %v3893_v12 = vmax.f32 %v3787_v56, %v3861_v9  ;;  %v3736_v55 = vmax.f32 %v3704_v19, 0.0  ;;  %v3383_v7 = vadd.f32 %v3301_v41, %v9089_v52  ;;  %v7458_v19 = vld [vmem:[%s13791_s3 + $0x1e0] sm:$0xff] }
 0x66c   : > { %3926 = vst [vmem:[#allocation1 + $0x1] ss:$2 sm:$0xff] %v3893_v12  ;;  %3348 = vmatmul.f32.gmra.mxu1 %v9411_v25  ;;  %3666 = vmatmul.f32.gmra.mxu3 %v9436_v54  ;;  %v7461_v25 = vld [vmem:[%s13791_s3 + $0x1f8] sm:$0xff]  ;;  %v9580_v1 = vpop.f32.mrf.mxu2 }
 0x66d   : > { %3534 = vmatmul.f32.gmra.mxu2 %v9562_v59  ;;  %4015 = vmatpush.msrb.mxu1 %v7461_v25 }
 0x66f   : > { %v3619_v44 = vpop.f32.mrf.mxu3 }
 0x671   : > { %v9568_v29 = vpop.f32.mrf.mxu1 }
 0x673   : > { %v9571_v48 = vld.sshfl [vmem:[#allocation1] sm:$0xff pattern:$0x75316420] }
 0x674   : > { %3351 = vmatmul.f32.gmra.mxu1 %v9424_v34  ;;  %3669 = vmatmul.f32.gmra.mxu3 %v9446_v37  ;;  %3964 = vst [vmem:[#allocation3 + $0x11] sm:$0xff] %v9571_v48  ;;  %v3381_v34 = vadd.f32 %v9522_v18, %v9049_v0  ;;  %v3545_v18 = vadd.f32 %v9487_v50, %v3383_v7  ;;  %v9596_v31 = vpop.f32.mrf.mxu2  ;;  %v7459_v50 = vld [vmem:[%s13791_s3 + $0x1e8] sm:$0xff]  ;;  %v7456_v7 = vld [vmem:[%s13791_s3 + $0x1d0] sm:$0xff] }
 0x675   : > { %4072 = vmatmul.f32.vlgmr.msrb.gmra.mxu2 %v7691_v14 }
 0x676   : > { %v3543_v9 = vadd.f32 %v9455_v11, %v3381_v34 }
 0x677   : > { %v3622_v36 = vpop.f32.mrf.mxu3 }
 0x678   : > { %v3706_v30 = vadd.f32 %v3622_v36, %v3544_v58  ;;  %v3705_v35 = vadd.f32 %v3619_v44, %v3543_v9  ;;  %v7460_v44 = vld [vmem:[%s13791_s3 + $0x1f0] sm:$0xff]  ;;  %v7457_v36 = vld [vmem:[%s13791_s3 + $0x1d8] sm:$0xff] }
 0x679   : > { %v9585_v20 = vpop.f32.mrf.mxu1  ;;  %4016 = vmatpush.msrb.mxu1 %v7460_v44  ;;  %v7477_v9 = vld [vmem:[%s13791_s3 + $0x378] sm:$0xff]  ;;  %v7450_v44 = vld [vmem:[%s13791_s3 + $0x1a0] sm:$0xff] }
 0x67a   : > { %v3738_v56 = vmax.f32 %v3706_v30, 0.0  ;;  %v3737_v24 = vmax.f32 %v3705_v35, 0.0  ;;  %4114 = vmatpush.msrb.mxu3 %v7477_v9  ;;  %v7470_v9 = vld [vmem:[%s13791_s3 + $0x340] sm:$0xff] }
 0x67b   : > { %v9588_v3 = vld [vmem:[#allocation3 + $0x10] sm:$0xff]  ;;  %4017 = vmatpush.msrb.mxu1 %v7459_v50  ;;  %v7472_v50 = vld [vmem:[%s13791_s3 + $0x350] sm:$0xff] }
 0x67c   : > { %v3766_v12 = vmax.f32 %v3736_v55, %v3738_v56  ;;  %3354 = vmatmul.f32.gmra.mxu1 %v9436_v54  ;;  %3672 = vmatmul.f32.gmra.mxu3 %v9458_v15  ;;  %v9613_v34 = vpop.f32.mrf.mxu2  ;;  %v7455_v56 = vld [vmem:[%s13791_s3 + $0x1c8] sm:$0xff] }
 0x67d   : > { %4075 = vmatmul.f32.gmra.mxu2 %v9588_v3  ;;  %4018 = vmatpush.msrb.mxu1 %v7458_v19  ;;  %v3385_v19 = vadd.f32 %v9585_v20, %v9147_v26  ;;  %v7448_v26 = vld [vmem:[%s13791_s3 + $0x190] sm:$0xff] }
 0x67e   : > { %v3791_v0 = vperm.slane %v3766_v12, %v13926_v22  ;;  %v7454_v12 = vld [vmem:[%s13791_s3 + $0x1c0] sm:$0xff] }
 0x67f   : > { %v3625_v52 = vpop.f32.mrf.mxu3  ;;  %4019 = vmatpush.msrb.mxu1 %v7457_v36 }
 0x680   : > { %v3862_v41 = vrot.slane %v3791_v0, 4  ;;  %v3707_v21 = vadd.f32 %v3625_v52, %v3545_v18  ;;  %v3384_v18 = vadd.f32 %v9568_v29, %v9115_v47  ;;  %v7453_v52 = vld [vmem:[%s13791_s3 + $0x1b8] sm:$0xff] }
 0x681   : > { %v3310_v10 = vpop.f32.mrf.mxu1  ;;  %4020 = vmatpush.msrb.mxu1 %v7456_v7 }
 0x682   : > { %v3894_v11 = vmax.f32 %v3791_v0, %v3862_v41  ;;  %v3739_v25 = vmax.f32 %v3707_v21, 0.0  ;;  %v7475_v0 = vld [vmem:[%s13791_s3 + $0x368] sm:$0xff]  ;;  %v3386_v21 = vadd.f32 %v3310_v10, %v9183_v33  ;;  %v7473_v10 = vld [vmem:[%s13791_s3 + $0x358] sm:$0xff] }
 0x683   : > { %4021 = vmatpush.msrb.mxu1 %v7455_v56  ;;  %v7451_v33 = vld [vmem:[%s13791_s3 + $0x1a8] sm:$0xff] }
 0x684   : > { %3929 = vst [vmem:[#allocation1 + $0x10] ss:$2 sm:$0xff] %v3894_v11  ;;  %v3767_v54 = vmax.f32 %v3737_v24, %v3739_v25  ;;  %3357 = vmatmul.f32.gmra.mxu1 %v9446_v37  ;;  %3675 = vmatmul.f32.gmra.mxu3 %v9467_v60  ;;  %v7452_v24 = vld [vmem:[%s13791_s3 + $0x1b0] sm:$0xff]  ;;  %v7474_v11 = vld [vmem:[%s13791_s3 + $0x360] sm:$0xff]  ;;  %v9649_v47 = vpop.f32.mrf.mxu2  ;;  %v3546_v25 = vadd.f32 %v9516_v40, %v3384_v18 }
 0x685   : > { %4022 = vmatpush.msrb.mxu1 %v7454_v12  ;;  %v3547_v12 = vadd.f32 %v9542_v16, %v3385_v19 }
 0x686   : > { %v3795_v14 = vperm.slane %v3767_v54, %v13926_v22  ;;  %v5072_v54 = vld [vmem:[%s13792_s4 + $0xd20] sm:$0xff] }
 0x687   : > { %v3628_v58 = vpop.f32.mrf.mxu3  ;;  %4023 = vmatpush.msrb.mxu1 %v7453_v52  ;;  %5812 = vmatpush.msrb.mxu0 %v5072_v54  ;;  %v7446_v52 = vld [vmem:[%s13791_s3 + $0x180] sm:$0xff] }
 0x688   : > { %v3863_v37 = vrot.slane %v3795_v14, 4  ;;  %v3708_v40 = vadd.f32 %v3628_v58, %v3546_v25  ;;  %v7471_v58 = vld [vmem:[%s13791_s3 + $0x348] sm:$0xff] }
 0x689   : > { %v3313_v30 = vpop.f32.mrf.mxu1  ;;  %4024 = vmatpush.msrb.mxu1 %v7452_v24 }
 0x68a   : > { %v3895_v55 = vmax.f32 %v3795_v14, %v3863_v37  ;;  %v3387_v7 = vadd.f32 %v3313_v30, %v9207_v13  ;;  %v7447_v13 = vld [vmem:[%s13791_s3 + $0x188] sm:$0xff] }
 0x68b   : > { %4025 = vmatpush.msrb.mxu1 %v7451_v33 }
 0x68c   : > { %3931 = vst [vmem:[#allocation1 + $0x11] ss:$2 sm:$0xff] %v3895_v55  ;;  %3360 = vmatmul.f32.gmra.mxu1 %v9458_v15  ;;  %3678 = vmatmul.f32.gmra.mxu3 %v9484_v8  ;;  %v7476_v15 = vld [vmem:[%s13791_s3 + $0x370] sm:$0xff]  ;;  %v3740_v55 = vmax.f32 %v3708_v40, 0.0  ;;  %v9698_v30 = vpop.f32.mrf.mxu2  ;;  %v7467_v40 = vld [vmem:[%s13791_s3 + $0x328] sm:$0xff] }
 0x68d   : > { %4115 = vmatpush.msrb.mxu3 %v7476_v15  ;;  %4026 = vmatpush.msrb.mxu1 %v7450_v44  ;;  %v7466_v44 = vld [vmem:[%s13791_s3 + $0x320] sm:$0xff] }
 0x68f   : > { %v3631_v35 = vpop.f32.mrf.mxu3  ;;  %4116 = vmatpush.msrb.mxu3 %v7475_v0  ;;  %v7469_v0 = vld [vmem:[%s13791_s3 + $0x338] sm:$0xff] }
 0x690   : > { %v3709_v18 = vadd.f32 %v3631_v35, %v3547_v12 }
 0x691   : > { %v9640_v41 = vpop.f32.mrf.mxu1  ;;  %4117 = vmatpush.msrb.mxu3 %v7474_v11 }
 0x692   : > { %v3741_v33 = vmax.f32 %v3709_v18, 0.0 }
 0x693   : > { %v9651_v29 = vld.sshfl [vmem:[#allocation1 + $0x10] sm:$0xff pattern:$0x75316420]  ;;  %4118 = vmatpush.msrb.mxu3 %v7473_v10 }
 0x694   : > { %3363 = vmatmul.f32.gmra.mxu1 %v9467_v60  ;;  %3681 = vmatmul.f32.gmra.mxu3 %v9505_v45  ;;  %3965 = vst [vmem:[#allocation3 + $0x21] sm:$0xff] %v9651_v29  ;;  %v3548_v60 = vadd.f32 %v9559_v4, %v3386_v21  ;;  %v7449_v4 = vld [vmem:[%s13791_s3 + $0x198] sm:$0xff] }
 0x695   : > { %4119 = vmatpush.msrb.mxu3 %v7472_v50  ;;  %4027 = vmatpush.msrb.mxu1 %v7449_v4  ;;  %v9721_v50 = vpop.f32.mrf.mxu2  ;;  %v7464_v4 = vld [vmem:[%s13791_s3 + $0x310] sm:$0xff] }
 0x697   : > { %v3634_v14 = vpop.f32.mrf.mxu3  ;;  %4120 = vmatpush.msrb.mxu3 %v7471_v58  ;;  %4028 = vmatpush.msrb.mxu1 %v7448_v26  ;;  %v7463_v58 = vld [vmem:[%s13791_s3 + $0x308] sm:$0xff] }
 0x698   : > { %v3710_v37 = vadd.f32 %v3634_v14, %v3548_v60  ;;  %v7465_v14 = vld [vmem:[%s13791_s3 + $0x318] sm:$0xff]  ;;  %v3244_v26 = vld [vmem:[#allocation2 + $0x19a] sm:$0xff] }
 0x699   : > { %v9681_v36 = vpop.f32.mrf.mxu1  ;;  %4121 = vmatpush.msrb.mxu3 %v7470_v9  ;;  %4029 = vmatpush.msrb.mxu1 %v7447_v13 }
 0x69a   : > { %v3742_v56 = vmax.f32 %v3710_v37, 0.0 }
 0x69b   : > { %v9687_v20 = vld [vmem:[#allocation3 + $0x20] sm:$0xff]  ;;  %4122 = vmatpush.msrb.mxu3 %v7469_v0  ;;  %4030 = vmatpush.msrb.mxu1 %v7446_v52 }
 0x69c   : > { %v3768_v15 = vmax.f32 %v3740_v55, %v3742_v56  ;;  %3366 = vmatmul.f32.gmra.mxu1 %v9484_v8  ;;  %3684 = vmatmul.f32.gmra.mxu3 %v9530_v5  ;;  %v3549_v8 = vadd.f32 %v9580_v1, %v3387_v7  ;;  %v7468_v1 = vld [vmem:[%s13791_s3 + $0x330] sm:$0xff]  ;;  %v7462_v55 = vld [vmem:[%s13791_s3 + $0x300] sm:$0xff] }
 0x69d   : > { %4078 = vmatmul.f32.gmra.mxu2 %v9687_v20  ;;  %4123 = vmatpush.msrb.mxu3 %v7468_v1  ;;  %v9739_v56 = vpop.f32.mrf.mxu2 }
 0x69e   : > { %v3799_v16 = vperm.slane %v3768_v15, %v13926_v22 }
 0x69f   : > { %v3637_v21 = vpop.f32.mrf.mxu3  ;;  %4124 = vmatpush.msrb.mxu3 %v7467_v40 }
 0x6a0   : > { %v3864_v24 = vrot.slane %v3799_v16, 4  ;;  %v3711_v11 = vadd.f32 %v3637_v21, %v3549_v8  ;;  %v3245_v8 = vld [vmem:[#allocation2 + $0x1a2] sm:$0xff] }
 0x6a1   : > { %v3322_v25 = vpop.f32.mrf.mxu1  ;;  %4125 = vmatpush.msrb.mxu3 %v7466_v44 }
 0x6a2   : > { %v3896_v10 = vmax.f32 %v3799_v16, %v3864_v24  ;;  %v3743_v54 = vmax.f32 %v3711_v11, 0.0  ;;  %v3390_v9 = vadd.f32 %v3322_v25, %v9251_v46 }
 0x6a3   : > { %4126 = vmatpush.msrb.mxu3 %v7465_v14 }
 0x6a4   : > { %3934 = vst [vmem:[#allocation1 + $0x20] ss:$2 sm:$0xff] %v3896_v10  ;;  %v3769_v35 = vmax.f32 %v3741_v33, %v3743_v54  ;;  %3369 = vmatmul.f32.gmra.mxu1 %v9505_v45  ;;  %3687 = vmatmul.f32.gmra.mxu3 %v9548_v38  ;;  %v3552_v0 = vadd.f32 %v9649_v47, %v3390_v9 }
 0x6a5   : > { %4127 = vmatpush.msrb.mxu3 %v7464_v4 }
 0x6a6   : > { %v3803_v60 = vperm.slane %v3769_v35, %v13926_v22 }
 0x6a7   : > { %v3640_v45 = vpop.f32.mrf.mxu3  ;;  %4128 = vmatpush.msrb.mxu3 %v7463_v58 }
 0x6a8   : > { %v3865_v38 = vrot.slane %v3803_v60, 4 }
 0x6a9   : > { %v3325_v19 = vpop.f32.mrf.mxu1  ;;  %4129 = vmatpush.msrb.mxu3 %v7462_v55 }
 0x6aa   : > { %v3897_v37 = vmax.f32 %v3803_v60, %v3865_v38  ;;  %v3391_v52 = vadd.f32 %v3325_v19, %v9260_v17 }
 0x6ac   : > { %3936 = vst [vmem:[#allocation1 + $0x21] ss:$2 sm:$0xff] %v3897_v37  ;;  %3372 = vmatmul.f32.gmra.mxu1 %v9530_v5  ;;  %3690 = vmatmul.f32.gmra.mxu3 %v9562_v59  ;;  %v3388_v5 = vadd.f32 %v9640_v41, %v9228_v62  ;;  %v3389_v41 = vadd.f32 %v9681_v36, %v9240_v28 }
 0x6ad   : > { %v3553_v28 = vadd.f32 %v9698_v30, %v3391_v52 }
 0x6ae   : > { %v3550_v15 = vadd.f32 %v9596_v31, %v3388_v5  ;;  %v3496_v31 = vpop.f32.mrf.mxu2 }
 0x6af   : > { %v3643_v7 = vpop.f32.mrf.mxu3 }
 0x6b0   : > { %v3712_v13 = vadd.f32 %v3640_v45, %v3550_v15 }
 0x6b1   : > { %v3328_v59 = vpop.f32.mrf.mxu1 }
 0x6b2   : > { %v3744_v46 = vmax.f32 %v3712_v13, 0.0  ;;  %v3392_v37 = vadd.f32 %v3328_v59, %v9273_v53 }
 0x6b3   : > { %v9742_v12 = vld.sshfl [vmem:[#allocation1 + $0x20] sm:$0xff pattern:$0x75316420] }
 0x6b4   : > { %3693 = vmatmul.f32.gmra.mxu3 %v3244_v26  ;;  %4031 = vmatmul.f32.vlgmr.msrb.gmra.mxu1 %v9588_v3  ;;  %3966 = vst [vmem:[#allocation3 + $0x31] sm:$0xff] %v9742_v12  ;;  %v3551_v3 = vadd.f32 %v9613_v34, %v3389_v41 }
 0x6b6   : > { %v3713_v47 = vadd.f32 %v3643_v7, %v3551_v3  ;;  %v3499_v34 = vpop.f32.mrf.mxu2  ;;  %v3554_v7 = vadd.f32 %v9721_v50, %v3392_v37 }
 0x6b7   : > { %v3646_v62 = vpop.f32.mrf.mxu3 }
 0x6b8   : > { %v3714_v18 = vadd.f32 %v3646_v62, %v3552_v0  ;;  %v3745_v17 = vmax.f32 %v3713_v47, 0.0 }
 0x6b9   : > { %v3331_v16 = vpop.f32.mrf.mxu1 }
 0x6ba   : > { %v3746_v21 = vmax.f32 %v3714_v18, 0.0  ;;  %v3393_v15 = vadd.f32 %v3331_v16, %v9286_v2 }
 0x6bb   : > { %v3975_v24 = vld [vmem:[#allocation3 + $0x30] sm:$0xff] }
 0x6bc   : > { %v3770_v11 = vmax.f32 %v3744_v46, %v3746_v21  ;;  %3696 = vmatmul.f32.gmra.mxu3 %v3245_v8  ;;  %4034 = vmatmul.f32.gmra.mxu1 %v9687_v20  ;;  %v3555_v18 = vadd.f32 %v9739_v56, %v3393_v15 }
 0x6bd   : > { %4081 = vmatmul.f32.gmra.mxu2 %v3975_v24 }
 0x6be   : > { %v3807_v25 = vperm.slane %v3770_v11, %v13926_v22  ;;  %v3502_v30 = vpop.f32.mrf.mxu2 }
 0x6bf   : > { %v3649_v36 = vpop.f32.mrf.mxu3 }
 0x6c0   : > { %v3866_v33 = vrot.slane %v3807_v25, 4  ;;  %v3715_v10 = vadd.f32 %v3649_v36, %v3553_v28 }
 0x6c1   : > { %v3334_v54 = vpop.f32.mrf.mxu1 }
 0x6c2   : > { %v3898_v35 = vmax.f32 %v3807_v25, %v3866_v33  ;;  %v3747_v1 = vmax.f32 %v3715_v10, 0.0  ;;  %v3394_v58 = vadd.f32 %v3334_v54, %v9302_v39 }
 0x6c4   : > { %3939 = vst [vmem:[#allocation1 + $0x30] ss:$2 sm:$0xff] %v3898_v35  ;;  %v3771_v40 = vmax.f32 %v3745_v17, %v3747_v1  ;;  %4037 = vmatmul.f32.gmra.mxu1 %v3975_v24  ;;  %4130 = vmatmul.f32.vlgmr.msrb.gmra.mxu3 %v9687_v20  ;;  %v5068_v20 = vld [vmem:[%s13792_s4 + $0xd00] sm:$0xff]  ;;  %v3556_v26 = vadd.f32 %v3496_v31, %v3394_v58 }
 0x6c5   : > { %5813 = vmatpush.msrb.mxu0 %v5068_v20 }
 0x6c6   : > { %v3811_v60 = vperm.slane %v3771_v40, %v13926_v22  ;;  %v3505_v59 = vpop.f32.mrf.mxu2 }
 0x6c7   : > { %v3652_v44 = vpop.f32.mrf.mxu3 }
 0x6c8   : > { %v3867_v45 = vrot.slane %v3811_v60, 4  ;;  %v3716_v5 = vadd.f32 %v3652_v44, %v3554_v7 }
 0x6c9   : > { %v3337_v38 = vpop.f32.mrf.mxu1 }
 0x6ca   : > { %v3899_v14 = vmax.f32 %v3811_v60, %v3867_v45  ;;  %v3748_v39 = vmax.f32 %v3716_v5, 0.0  ;;  %v3395_v0 = vadd.f32 %v3337_v38, %v9315_v23 }
 0x6cc   : > { %3941 = vst [vmem:[#allocation1 + $0x31] ss:$2 sm:$0xff] %v3899_v14  ;;  %4133 = vmatmul.f32.gmra.mxu3 %v3975_v24  ;;  %v3557_v52 = vadd.f32 %v3499_v34, %v3395_v0 }
 0x6ce   : > { %v3508_v23 = vpop.f32.mrf.mxu2 }
 0x6cf   : > { %v3655_v19 = vpop.f32.mrf.mxu3 }
 0x6d0   : > { %v3717_v50 = vadd.f32 %v3655_v19, %v3555_v18 }
 0x6d1   : > { %v3340_v4 = vpop.f32.mrf.mxu1 }
 0x6d2   : > { %v3749_v24 = vmax.f32 %v3717_v50, 0.0  ;;  %v3396_v17 = vadd.f32 %v3340_v4, %v9326_v61 }
 0x6d3   : > { %v9762_v55 = vld.sshfl [vmem:[#allocation1 + $0x30] sm:$0xff pattern:$0x75316420] }
 0x6d4   : > { %3967 = vst [vmem:[#allocation3 + $0x41] sm:$0xff] %v9762_v55  ;;  %v3558_v34 = vadd.f32 %v3502_v30, %v3396_v17  ;;  %v7502_v17 = vld [vmem:[%s13791_s3 + $0x240] sm:$0xff] }
 0x6d6   : > { %v3511_v10 = vpop.f32.mrf.mxu2 }
 0x6d7   : > { %v3658_v9 = vpop.f32.mrf.mxu3 }
 0x6d8   : > { %v3718_v53 = vadd.f32 %v3658_v9, %v3556_v26 }
 0x6d9   : > { %v3343_v13 = vpop.f32.mrf.mxu1 }
 0x6da   : > { %v3750_v62 = vmax.f32 %v3718_v53, 0.0  ;;  %v3397_v14 = vadd.f32 %v3343_v13, %v9339_v57 }
 0x6db   : > { %v3976_v41 = vld [vmem:[#allocation3 + $0x40] sm:$0xff] }
 0x6dc   : > { %v3772_v8 = vmax.f32 %v3748_v39, %v3750_v62  ;;  %4040 = vmatmul.f32.gmra.mxu1 %v3976_v41  ;;  %4084 = vmatmul.f32.gmra.mxu2 %v3976_v41  ;;  %v3559_v7 = vadd.f32 %v3505_v59, %v3397_v14 }
 0x6dd   : > { %4136 = vmatmul.f32.gmra.mxu3 %v3976_v41 }
 0x6de   : > { %v3815_v46 = vperm.slane %v3772_v8, %v13926_v22  ;;  %v3514_v45 = vpop.f32.mrf.mxu2 }
 0x6df   : > { %v3661_v21 = vpop.f32.mrf.mxu3 }
 0x6e0   : > { %v3868_v2 = vrot.slane %v3815_v46, 4  ;;  %v3719_v16 = vadd.f32 %v3661_v21, %v3557_v52  ;;  %v7508_v52 = vld [vmem:[%s13791_s3 + $0x270] sm:$0xff]  ;;  %v7507_v21 = vld [vmem:[%s13791_s3 + $0x268] sm:$0xff] }
 0x6e1   : > { %v3346_v31 = vpop.f32.mrf.mxu1 }
 0x6e2   : > { %v3900_v3 = vmax.f32 %v3815_v46, %v3868_v2  ;;  %v3751_v11 = vmax.f32 %v3719_v16, 0.0  ;;  %v3398_v1 = vadd.f32 %v3346_v31, %v9352_v49  ;;  %v7509_v46 = vld [vmem:[%s13791_s3 + $0x278] sm:$0xff] }
 0x6e3   : > { %4256 = vmatpush.msra.mxu2 %v7509_v46  ;;  %v7525_v46 = vld [vmem:[%s13791_s3 + $0x3f8] sm:$0xff] }
 0x6e4   : > { %3943 = vst [vmem:[#allocation1] ss:$2 sm:$0xff] %v3900_v3  ;;  %v3773_v47 = vmax.f32 %v3749_v24, %v3751_v11  ;;  %v3560_v44 = vadd.f32 %v3508_v23, %v3398_v1  ;;  %v7506_v24 = vld [vmem:[%s13791_s3 + $0x260] sm:$0xff]  ;;  %v7505_v11 = vld [vmem:[%s13791_s3 + $0x258] sm:$0xff]  ;;  %4322 = vmatpush.msra.mxu3 %v7525_v46  ;;  %v7556_v46 = vld [vmem:[%s13791_s3 + $0x2f0] sm:$0xff] }
 0x6e5   : > { %4257 = vmatpush.msra.mxu2 %v7508_v52 }
 0x6e6   : > { %v3819_v56 = vperm.slane %v3773_v47, %v13926_v22  ;;  %v3517_v57 = vpop.f32.mrf.mxu2  ;;  %v5064_v47 = vld [vmem:[%s13792_s4 + $0xce0] sm:$0xff] }
 0x6e7   : > { %v3664_v25 = vpop.f32.mrf.mxu3  ;;  %4258 = vmatpush.msra.mxu2 %v7507_v21  ;;  %5814 = vmatpush.msrb.mxu0 %v5064_v47  ;;  %v7491_v21 = vld [vmem:[%s13791_s3 + $0xe8] sm:$0xff] }
 0x6e8   : > { %v3869_v28 = vrot.slane %v3819_v56, 4  ;;  %v3720_v60 = vadd.f32 %v3664_v25, %v3558_v34 }
 0x6e9   : > { %v3349_v36 = vpop.f32.mrf.mxu1  ;;  %4259 = vmatpush.msra.mxu2 %v7506_v24  ;;  %v7523_v24 = vld [vmem:[%s13791_s3 + $0x3e8] sm:$0xff] }
 0x6ea   : > { %v3901_v33 = vmax.f32 %v3819_v56, %v3869_v28  ;;  %v3752_v37 = vmax.f32 %v3720_v60, 0.0  ;;  %v3399_v58 = vadd.f32 %v3349_v36, %v9365_v32  ;;  %v7503_v36 = vld [vmem:[%s13791_s3 + $0x248] sm:$0xff] }
 0x6eb   : > { %4260 = vmatpush.msra.mxu2 %v7505_v11 }
 0x6ec   : > { %3944 = vst [vmem:[#allocation1 + $0x1] ss:$2 sm:$0xff] %v3901_v33  ;;  %v3561_v26 = vadd.f32 %v3511_v10, %v3399_v58 }
 0x6ee   : > { %v3520_v50 = vpop.f32.mrf.mxu2 }
 0x6ef   : > { %v3667_v54 = vpop.f32.mrf.mxu3 }
 0x6f0   : > { %v3721_v30 = vadd.f32 %v3667_v54, %v3559_v7 }
 0x6f1   : > { %v3352_v35 = vpop.f32.mrf.mxu1 }
 0x6f2   : > { %v3753_v13 = vmax.f32 %v3721_v30, 0.0  ;;  %v3400_v31 = vadd.f32 %v3352_v35, %v9378_v6  ;;  %v7504_v6 = vld [vmem:[%s13791_s3 + $0x250] sm:$0xff] }
 0x6f3   : > { %v9773_v40 = vld.sshfl [vmem:[#allocation1] sm:$0xff pattern:$0x75316420]  ;;  %4261 = vmatpush.msra.mxu2 %v7504_v6 }
 0x6f4   : > { %3968 = vst [vmem:[#allocation3 + $0x51] sm:$0xff] %v9773_v40  ;;  %v3562_v56 = vadd.f32 %v3514_v45, %v3400_v31  ;;  %v7490_v31 = vld [vmem:[%s13791_s3 + $0xe0] sm:$0xff] }
 0x6f5   : > { %4262 = vmatpush.msra.mxu2 %v7503_v36  ;;  %v7520_v36 = vld [vmem:[%s13791_s3 + $0x3d0] sm:$0xff] }
 0x6f7   : > { %v3670_v38 = vpop.f32.mrf.mxu3  ;;  %4263 = vmatpush.msra.mxu2 %v7502_v17  ;;  %v13927_v17 = vld [vmem:[#allocation19_spill] sm:$0xff] }
 0x6f8   : > { %v3722_v19 = vadd.f32 %v3670_v38, %v3560_v44  ;;  %v7501_v44 = vld [vmem:[%s13791_s3 + $0x238] sm:$0xff] }
 0x6f9   : > { %v3355_v61 = vpop.f32.mrf.mxu1  ;;  %4264 = vmatpush.msra.mxu2 %v7501_v44 }
 0x6fa   : > { %v3754_v20 = vmax.f32 %v3722_v19, 0.0  ;;  %v3401_v10 = vadd.f32 %v3355_v61, %v9389_v43 }
 0x6fb   : > { %v3977_v4 = vld [vmem:[#allocation3 + $0x50] sm:$0xff] }
 0x6fc   : > { %v3774_v49 = vmax.f32 %v3752_v37, %v3754_v20  ;;  %4043 = vmatmul.f32.gmra.mxu1 %v3977_v4  ;;  %4087 = vmatmul.f32.gmra.mxu2 %v3977_v4  ;;  %v3563_v38 = vadd.f32 %v3517_v57, %v3401_v10 }
 0x6fd   : > { %4139 = vmatmul.f32.gmra.mxu3 %v3977_v4 }
 0x6fe   : > { %v3823_v5 = vperm.slane %v3774_v49, %v13926_v22 }
 0x6ff   : > { %v3673_v9 = vpop.f32.mrf.mxu3 }
 0x700   : > { %v3870_v15 = vrot.slane %v3823_v5, 4  ;;  %v3723_v53 = vadd.f32 %v3673_v9, %v3561_v26  ;;  %v7500_v26 = vld [vmem:[%s13791_s3 + $0x230] sm:$0xff]  ;;  %v7499_v9 = vld [vmem:[%s13791_s3 + $0x228] sm:$0xff] }
 0x701   : > { %v3358_v62 = vpop.f32.mrf.mxu1  ;;  %4265 = vmatpush.msra.mxu2 %v7500_v26 }
 0x702   : > { %v3902_v39 = vmax.f32 %v3823_v5, %v3870_v15  ;;  %v3755_v0 = vmax.f32 %v3723_v53, 0.0  ;;  %v3402_v3 = vadd.f32 %v3358_v62, %v9405_v27  ;;  %v3523_v27 = vpop.f32.mrf.mxu2  ;;  %v7498_v53 = vld [vmem:[%s13791_s3 + $0x220] sm:$0xff]  ;;  %v7496_v62 = vld [vmem:[%s13791_s3 + $0x210] sm:$0xff] }
 0x703   : > { %4266 = vmatpush.msra.mxu2 %v7499_v9 }
 0x704   : > { %3946 = vst [vmem:[#allocation1 + $0x10] ss:$2 sm:$0xff] %v3902_v39  ;;  %v3775_v32 = vmax.f32 %v3753_v13, %v3755_v0  ;;  %v3564_v28 = vadd.f32 %v3520_v50, %v3402_v3  ;;  %v7497_v39 = vld [vmem:[%s13791_s3 + $0x218] sm:$0xff]  ;;  %v7494_v50 = vld [vmem:[%s13791_s3 + $0x200] sm:$0xff] }
 0x705   : > { %4267 = vmatpush.msra.mxu2 %v7498_v53  ;;  %v7516_v53 = vld [vmem:[%s13791_s3 + $0x3b0] sm:$0xff] }
 0x706   : > { %v3827_v59 = vperm.slane %v3775_v32, %v13926_v22 }
 0x707   : > { %v3676_v41 = vpop.f32.mrf.mxu3  ;;  %4268 = vmatpush.msra.mxu2 %v7497_v39 }
 0x708   : > { %v3871_v18 = vrot.slane %v3827_v59, 4  ;;  %v3724_v25 = vadd.f32 %v3676_v41, %v3562_v56  ;;  %v7489_v56 = vld [vmem:[%s13791_s3 + $0xd8] sm:$0xff] }
 0x709   : > { %v3361_v2 = vpop.f32.mrf.mxu1  ;;  %4269 = vmatpush.msra.mxu2 %v7496_v62  ;;  %v7514_v62 = vld [vmem:[%s13791_s3 + $0x3a0] sm:$0xff] }
 0x70a   : > { %v3903_v8 = vmax.f32 %v3827_v59, %v3871_v18  ;;  %v3756_v1 = vmax.f32 %v3724_v25, 0.0  ;;  %v3403_v34 = vadd.f32 %v3361_v2, %v9420_v42  ;;  %v3526_v58 = vpop.f32.mrf.mxu2  ;;  %v7495_v59 = vld [vmem:[%s13791_s3 + $0x208] sm:$0xff]  ;;  %v7493_v18 = vld [vmem:[%s13791_s3 + $0xf8] sm:$0xff] }
 0x70b   : > { %4190 = vmatpush.msra.mxu1 %v7493_v18  ;;  %4270 = vmatpush.msra.mxu2 %v7495_v59  ;;  %v7513_v18 = vld [vmem:[%s13791_s3 + $0x398] sm:$0xff] }
 0x70c   : > { %3947 = vst [vmem:[#allocation1 + $0x11] ss:$2 sm:$0xff] %v3903_v8  ;;  %v3565_v37 = vadd.f32 %v3523_v27, %v3403_v34  ;;  %v7492_v8 = vld [vmem:[%s13791_s3 + $0xf0] sm:$0xff] }
 0x70d   : > { %4191 = vmatpush.msra.mxu1 %v7492_v8  ;;  %4271 = vmatpush.msra.mxu2 %v7494_v50  ;;  %v7488_v27 = vld [vmem:[%s13791_s3 + $0xd0] sm:$0xff]  ;;  %v7557_v8 = vld [vmem:[%s13791_s3 + $0x2f8] sm:$0xff] }
 0x70f   : > { %v3679_v16 = vpop.f32.mrf.mxu3  ;;  %4192 = vmatpush.msra.mxu1 %v7491_v21  ;;  %4464 = vmatpush.msrb.mxu2 %v7557_v8  ;;  %v7555_v21 = vld [vmem:[%s13791_s3 + $0x2e8] sm:$0xff]  ;;  %v7562_v8 = vld [vmem:[%s13791_s3 + $0x420] sm:$0xff] }
 0x710   : > { %v3725_v43 = vadd.f32 %v3679_v16, %v3563_v38  ;;  %v7524_v16 = vld [vmem:[%s13791_s3 + $0x3f0] sm:$0xff]  ;;  %v7486_v38 = vld [vmem:[%s13791_s3 + $0xc0] sm:$0xff] }
 0x711   : > { %v3364_v35 = vpop.f32.mrf.mxu1  ;;  %4323 = vmatpush.msra.mxu3 %v7524_v16  ;;  %4193 = vmatpush.msra.mxu1 %v7490_v31  ;;  %v7479_v16 = vld [vmem:[%s13791_s3 + $0x88] sm:$0xff] }
 0x712   : > { %v3757_v4 = vmax.f32 %v3725_v43, 0.0  ;;  %v3529_v0 = vpop.f32.mrf.mxu2  ;;  %v3404_v2 = vadd.f32 %v3364_v35, %v9432_v51  ;;  %v7522_v51 = vld [vmem:[%s13791_s3 + $0x3e0] sm:$0xff]  ;;  %4465 = vmatpush.msrb.mxu2 %v7556_v46  ;;  %v7511_v31 = vld [vmem:[%s13791_s3 + $0x388] sm:$0xff] }
 0x713   : > { %v9797_v23 = vld.sshfl [vmem:[#allocation1 + $0x10] sm:$0xff pattern:$0x75316420]  ;;  %4324 = vmatpush.msra.mxu3 %v7523_v24  ;;  %4194 = vmatpush.msra.mxu1 %v7489_v56  ;;  %v7553_v56 = vld [vmem:[%s13791_s3 + $0x2d8] sm:$0xff] }
 0x714   : > { %3969 = vst [vmem:[#allocation3 + $0x61] sm:$0xff] %v9797_v23  ;;  %v3566_v6 = vadd.f32 %v3526_v58, %v3404_v2  ;;  %4466 = vmatpush.msrb.mxu2 %v7555_v21  ;;  %v4373_v46 = vld [vmem:[#allocation3 + $0x22] sm:$0xff] }
 0x715   : > { %4325 = vmatpush.msra.mxu3 %v7522_v51  ;;  %4195 = vmatpush.msra.mxu1 %v7488_v27  ;;  %v7554_v51 = vld [vmem:[%s13791_s3 + $0x2e0] sm:$0xff] }
 0x716   : > { %4467 = vmatpush.msrb.mxu2 %v7554_v51  ;;  %v7550_v27 = vld [vmem:[%s13791_s3 + $0x2c0] sm:$0xff] }
 0x717   : > { %v3682_v33 = vpop.f32.mrf.mxu3  ;;  %v7558_v21 = vld [vmem:[%s13791_s3 + $0x400] sm:$0xff] }
 0x718   : > { %v3726_v54 = vadd.f32 %v3682_v33, %v3564_v28  ;;  %4468 = vmatpush.msrb.mxu2 %v7553_v56  ;;  %v4371_v51 = vld [vmem:[#allocation3 + $0x2] sm:$0xff] }
 0x719   : > { %v3367_v30 = vpop.f32.mrf.mxu1 }
 0x71a   : > { %v3758_v60 = vmax.f32 %v3726_v54, 0.0  ;;  %v3532_v11 = vpop.f32.mrf.mxu2  ;;  %v7487_v54 = vld [vmem:[%s13791_s3 + $0xc8] sm:$0xff]  ;;  %v3405_v35 = vadd.f32 %v3367_v30, %v13927_v17  ;;  %v7484_v30 = vld [vmem:[%s13791_s3 + $0xb0] sm:$0xff]  ;;  %v7546_v17 = vld [vmem:[%s13791_s3 + $0x2a0] sm:$0xff] }
 0x71b   : > { %v3978_v45 = vld [vmem:[#allocation3 + $0x60] sm:$0xff]  ;;  %4196 = vmatpush.msra.mxu1 %v7487_v54 }
 0x71c   : > { %v3776_v14 = vmax.f32 %v3756_v1, %v3758_v60  ;;  %4046 = vmatmul.f32.gmra.mxu1 %v3978_v45  ;;  %4090 = vmatmul.f32.gmra.mxu2 %v3978_v45  ;;  %v13928_v60 = vld [vmem:[#allocation16_spill] sm:$0xff] }
 0x71d   : > { %4142 = vmatmul.f32.gmra.mxu3 %v3978_v45  ;;  %4197 = vmatpush.msra.mxu1 %v7486_v38  ;;  %v7541_v38 = vld [vmem:[%s13791_s3 + $0x178] sm:$0xff] }
 0x71e   : > { %v3831_v19 = vperm.slane %v3776_v14, %v13926_v22  ;;  %v7519_v14 = vld [vmem:[%s13791_s3 + $0x3c8] sm:$0xff] }
 0x71f   : > { %v3685_v20 = vpop.f32.mrf.mxu3 }
 0x720   : > { %v3872_v42 = vrot.slane %v3831_v19, 4  ;;  %v3727_v61 = vadd.f32 %v3685_v20, %v3565_v37  ;;  %v3567_v37 = vadd.f32 %v3529_v0, %v3405_v35  ;;  %v7485_v20 = vld [vmem:[%s13791_s3 + $0xb8] sm:$0xff]  ;;  %v7482_v0 = vld [vmem:[%s13791_s3 + $0xa0] sm:$0xff] }
 0x721   : > { %v3370_v41 = vpop.f32.mrf.mxu1  ;;  %4198 = vmatpush.msra.mxu1 %v7485_v20  ;;  %v7545_v35 = vld [vmem:[%s13791_s3 + $0x298] sm:$0xff] }
 0x722   : > { %v3904_v7 = vmax.f32 %v3831_v19, %v3872_v42  ;;  %v3759_v49 = vmax.f32 %v3727_v61, 0.0  ;;  %v3406_v3 = vadd.f32 %v3370_v41, %v9453_v63  ;;  %v7521_v63 = vld [vmem:[%s13791_s3 + $0x3d8] sm:$0xff]  ;;  %v7518_v19 = vld [vmem:[%s13791_s3 + $0x3c0] sm:$0xff]  ;;  %v3535_v42 = vpop.f32.mrf.mxu2 }
 0x723   : > { %4326 = vmatpush.msra.mxu3 %v7521_v63  ;;  %v7517_v61 = vld [vmem:[%s13791_s3 + $0x3b8] sm:$0xff]  ;;  %4199 = vmatpush.msra.mxu1 %v7484_v30  ;;  %v7551_v63 = vld [vmem:[%s13791_s3 + $0x2c8] sm:$0xff]  ;;  %v7570_v30 = vld [vmem:[%s13791_s3 + $0x460] sm:$0xff] }
 0x724   : > { %3949 = vst [vmem:[#allocation1 + $0x20] ss:$2 sm:$0xff] %v3904_v7  ;;  %v3777_v5 = vmax.f32 %v3757_v4, %v3759_v49  ;;  %v3568_v28 = vadd.f32 %v3532_v11, %v3406_v3  ;;  %v7481_v41 = vld [vmem:[%s13791_s3 + $0x98] sm:$0xff]  ;;  %v7478_v3 = vld [vmem:[%s13791_s3 + $0x80] sm:$0xff] }
 0x725   : > { %4327 = vmatpush.msra.mxu3 %v7520_v36  ;;  %v7510_v11 = vld [vmem:[%s13791_s3 + $0x380] sm:$0xff]  ;;  %v7549_v36 = vld [vmem:[%s13791_s3 + $0x2b8] sm:$0xff] }
 0x726   : > { %v3835_v15 = vperm.slane %v3777_v5, %v13926_v22  ;;  %v7573_v20 = vld [vmem:[%s13791_s3 + $0x478] sm:$0xff] }
 0x727   : > { %v3688_v57 = vpop.f32.mrf.mxu3  ;;  %4328 = vmatpush.msra.mxu3 %v7519_v14  ;;  %v7540_v14 = vld [vmem:[%s13791_s3 + $0x170] sm:$0xff] }
 0x728   : > { %v3873_v13 = vrot.slane %v3835_v15, 4  ;;  %v3728_v25 = vadd.f32 %v3688_v57, %v3566_v6  ;;  %v7552_v6 = vld [vmem:[%s13791_s3 + $0x2d0] sm:$0xff] }
 0x729   : > { %v3373_v33 = vpop.f32.mrf.mxu1  ;;  %4329 = vmatpush.msra.mxu3 %v7518_v19  ;;  %4469 = vmatpush.msrb.mxu2 %v7552_v6  ;;  %v7538_v19 = vld [vmem:[%s13791_s3 + $0x160] sm:$0xff] }
 0x72a   : > { %v3905_v32 = vmax.f32 %v3835_v15, %v3873_v13  ;;  %v3760_v34 = vmax.f32 %v3728_v25, 0.0  ;;  %v3407_v44 = vadd.f32 %v3373_v33, %v13928_v60  ;;  %v7483_v15 = vld [vmem:[%s13791_s3 + $0xa8] sm:$0xff]  ;;  %v7548_v33 = vld [vmem:[%s13791_s3 + $0x2b0] sm:$0xff] }
 0x72b   : > { %4330 = vmatpush.msra.mxu3 %v7517_v61  ;;  %4200 = vmatpush.msra.mxu1 %v7483_v15  ;;  %v7543_v60 = vld [vmem:[%s13791_s3 + $0x288] sm:$0xff]  ;;  %v7572_v61 = vld [vmem:[%s13791_s3 + $0x470] sm:$0xff] }
 0x72c   : > { %3950 = vst [vmem:[#allocation1 + $0x21] ss:$2 sm:$0xff] %v3905_v32  ;;  %v3569_v49 = vadd.f32 %v3535_v42, %v3407_v44  ;;  %v7515_v32 = vld [vmem:[%s13791_s3 + $0x3a8] sm:$0xff]  ;;  %4470 = vmatpush.msrb.mxu2 %v7551_v63  ;;  %v7536_v42 = vld [vmem:[%s13791_s3 + $0x150] sm:$0xff] }
 0x72d   : > { %4331 = vmatpush.msra.mxu3 %v7516_v53  ;;  %4201 = vmatpush.msra.mxu1 %v7482_v0  ;;  %v7692_v44 = vld [vmem:[#allocation2] sm:$0xff]  ;;  %v7565_v0 = vld [vmem:[%s13791_s3 + $0x438] sm:$0xff] }
 0x72e   : > { %4471 = vmatpush.msrb.mxu2 %v7550_v27  ;;  %v7531_v15 = vld [vmem:[%s13791_s3 + $0x128] sm:$0xff] }
 0x72f   : > { %v3691_v52 = vpop.f32.mrf.mxu3  ;;  %4332 = vmatpush.msra.mxu3 %v7515_v32  ;;  %4202 = vmatpush.msra.mxu1 %v7481_v41  ;;  %v7567_v53 = vld [vmem:[%s13791_s3 + $0x448] sm:$0xff]  ;;  %v7564_v32 = vld [vmem:[%s13791_s3 + $0x430] sm:$0xff] }
 0x730   : > { %v3729_v4 = vadd.f32 %v3691_v52, %v3567_v37  ;;  %v7512_v52 = vld [vmem:[%s13791_s3 + $0x390] sm:$0xff]  ;;  %4472 = vmatpush.msrb.mxu2 %v7549_v36 }
 0x731   : > { %4333 = vmatpush.msra.mxu3 %v7514_v62  ;;  %v7693_v37 = vld [vmem:[#allocation3 + $0x11] sm:$0xff] }
 0x732   : > { %v3761_v57 = vmax.f32 %v3729_v4, 0.0  ;;  %4473 = vmatpush.msrb.mxu2 %v7548_v33  ;;  %v7571_v4 = vld [vmem:[%s13791_s3 + $0x468] sm:$0xff] }
 0x733   : > { %v9866_v47 = vld.sshfl [vmem:[#allocation1 + $0x20] sm:$0xff pattern:$0x75316420]  ;;  %4334 = vmatpush.msra.mxu3 %v7513_v18  ;;  %v7527_v62 = vld [vmem:[%s13791_s3 + $0x108] sm:$0xff] }
 0x734   : > { %3970 = vst [vmem:[#allocation3 + $0x71] sm:$0xff] %v9866_v47  ;;  %v4372_v41 = vld [vmem:[#allocation3 + $0x12] sm:$0xff]  ;;  %v7526_v18 = vld [vmem:[%s13791_s3 + $0x100] sm:$0xff] }
 0x735   : > { %4335 = vmatpush.msra.mxu3 %v7512_v52  ;;  %v7559_v52 = vld [vmem:[%s13791_s3 + $0x408] sm:$0xff] }
 0x737   : > { %v3694_v10 = vpop.f32.mrf.mxu3  ;;  %4336 = vmatpush.msra.mxu3 %v7511_v31  ;;  %v4375_v31 = vld [vmem:[#allocation3 + $0x42] sm:$0xff] }
 0x738   : > { %v3730_v1 = vadd.f32 %v3694_v10, %v3568_v28  ;;  %v5060_v28 = vld [vmem:[%s13792_s4 + $0xcc0] sm:$0xff]  ;;  %v7547_v10 = vld [vmem:[%s13791_s3 + $0x2a8] sm:$0xff] }
 0x739   : > { %4337 = vmatpush.msra.mxu3 %v7510_v11  ;;  %5815 = vmatpush.msrb.mxu0 %v5060_v28  ;;  %v4376_v11 = vld [vmem:[#allocation3 + $0x52] sm:$0xff] }
 0x73a   : > { %v3762_v45 = vmax.f32 %v3730_v1, 0.0  ;;  %4474 = vmatpush.msrb.mxu2 %v7547_v10  ;;  %v4163_v1 = vld [vmem:[#allocation3 + $0x1] sm:$0xff] }
 0x73b   : > { %v3979_v43 = vld [vmem:[#allocation3 + $0x70] sm:$0xff]  ;;  %4530 = vmatpush.msrb.mxu3 %v7573_v20 }
 0x73c   : > { %v3778_v58 = vmax.f32 %v3760_v34, %v3762_v45  ;;  %4049 = vmatmul.f32.gmra.mxu1 %v3979_v43  ;;  %4093 = vmatmul.f32.gmra.mxu2 %v3979_v43  ;;  %v7544_v34 = vld [vmem:[%s13791_s3 + $0x290] sm:$0xff]  ;;  %v7542_v45 = vld [vmem:[%s13791_s3 + $0x280] sm:$0xff] }
 0x73d   : > { %4145 = vmatmul.f32.gmra.mxu3 %v3979_v43  ;;  %4475 = vmatpush.msrb.mxu2 %v7546_v17  ;;  %v7539_v43 = vld [vmem:[%s13791_s3 + $0x168] sm:$0xff] }
 0x73e   : > { %v3839_v7 = vperm.slane %v3778_v58, %v13926_v22  ;;  %v7537_v58 = vld [vmem:[%s13791_s3 + $0x158] sm:$0xff]  ;;  %4531 = vmatpush.msrb.mxu3 %v7572_v61  ;;  %v4378_v28 = vld [vmem:[#allocation3 + $0x72] sm:$0xff] }
 0x73f   : > { %v3697_v5 = vpop.f32.mrf.mxu3  ;;  %4476 = vmatpush.msrb.mxu2 %v7545_v35  ;;  %v4380_v61 = vld [vmem:[#allocation3 + $0x92] sm:$0xff] }
 0x740   : > { %v3874_v26 = vrot.slane %v3839_v7, 4  ;;  %v3731_v9 = vadd.f32 %v3697_v5, %v3569_v49  ;;  %4532 = vmatpush.msrb.mxu3 %v7571_v4  ;;  %v7534_v49 = vld [vmem:[%s13791_s3 + $0x140] sm:$0xff]  ;;  %v7533_v5 = vld [vmem:[%s13791_s3 + $0x138] sm:$0xff] }
 0x741   : > { %4477 = vmatpush.msrb.mxu2 %v7544_v34  ;;  %v4712_v4 = vld [vmem:[%s13792_s4 + $0x1e0] sm:$0xff] }
 0x742   : > { %v3906_v13 = vmax.f32 %v3839_v7, %v3874_v26  ;;  %v3763_v39 = vmax.f32 %v3731_v9, 0.0  ;;  %v7535_v7 = vld [vmem:[%s13791_s3 + $0x148] sm:$0xff]  ;;  %v7569_v26 = vld [vmem:[%s13791_s3 + $0x458] sm:$0xff]  ;;  %4533 = vmatpush.msrb.mxu3 %v7570_v30  ;;  %v7532_v9 = vld [vmem:[%s13791_s3 + $0x130] sm:$0xff] }
 0x743   : > { %4478 = vmatpush.msrb.mxu2 %v7543_v60  ;;  %v4708_v30 = vld [vmem:[%s13792_s4 + $0x1c0] sm:$0xff] }
 0x744   : > { %3952 = vst [vmem:[#allocation1 + $0x30] ss:$2 sm:$0xff] %v3906_v13  ;;  %v3779_v59 = vmax.f32 %v3761_v57, %v3763_v39  ;;  %4272 = vmatmul.f32.vlgmr.msra.gmra.mxu2 %v9571_v48  ;;  %v7480_v48 = vld [vmem:[%s13791_s3 + $0x90] sm:$0xff]  ;;  %4534 = vmatpush.msrb.mxu3 %v7569_v26  ;;  %v7530_v57 = vld [vmem:[%s13791_s3 + $0x120] sm:$0xff]  ;;  %v7529_v39 = vld [vmem:[%s13791_s3 + $0x118] sm:$0xff] }
 0x745   : > { %4203 = vmatpush.msra.mxu1 %v7480_v48  ;;  %4479 = vmatpush.msrb.mxu2 %v7542_v45  ;;  %v7566_v13 = vld [vmem:[%s13791_s3 + $0x440] sm:$0xff]  ;;  %v10104_v48 = vpop.f32.mrf.mxu2 }
 0x746   : > { %v3843_v50 = vperm.slane %v3779_v59, %v13926_v22  ;;  %v7563_v59 = vld [vmem:[%s13791_s3 + $0x428] sm:$0xff]  ;;  %v4840_v26 = vld [vmem:[%s13792_s4 + $0x5e0] sm:$0xff] }
 0x747   : > { %4204 = vmatpush.msra.mxu1 %v7479_v16  ;;  %v5056_v16 = vld [vmem:[%s13792_s4 + $0xca0] sm:$0xff]  ;;  %v10131_v63 = vpop.f32.mrf.mxu3 }
 0x748   : > { %v3875_v2 = vrot.slane %v3843_v50, 4  ;;  %5816 = vmatpush.msrb.mxu0 %v5056_v16  ;;  %v4816_v16 = vld [vmem:[%s13792_s4 + $0x520] sm:$0xff] }
 0x749   : > { %4205 = vmatpush.msra.mxu1 %v7478_v3  ;;  %v10125_v3 = vpop.f32.mrf.mxu1 }
 0x74a   : > { %v3907_v24 = vmax.f32 %v3843_v50, %v3875_v2  ;;  %v7561_v50 = vld [vmem:[%s13791_s3 + $0x418] sm:$0xff] }
 0x74b   : > { %4398 = vmatpush.msrb.mxu1 %v7541_v38 }
 0x74c   : > { %3953 = vst [vmem:[#allocation1 + $0x31] ss:$2 sm:$0xff] %v3907_v24  ;;  %4275 = vmatmul.f32.gmra.mxu2 %v9651_v29 }
 0x74d   : > { %4399 = vmatpush.msrb.mxu1 %v7540_v14  ;;  %v10116_v2 = vpop.f32.mrf.mxu2 }
 0x74f   : > { %4400 = vmatpush.msrb.mxu1 %v7539_v43  ;;  %v10139_v33 = vpop.f32.mrf.mxu3  ;;  %v5052_v43 = vld [vmem:[%s13792_s4 + $0xc80] sm:$0xff] }
 0x750   : > { %5817 = vmatpush.msrb.mxu0 %v5052_v43  ;;  %v4808_v43 = vld [vmem:[%s13792_s4 + $0x4e0] sm:$0xff] }
 0x751   : > { %4401 = vmatpush.msrb.mxu1 %v7538_v19  ;;  %v10129_v6 = vpop.f32.mrf.mxu1 }
 0x753   : > { %v9971_v25 = vld.sshfl [vmem:[#allocation1 + $0x30] sm:$0xff pattern:$0x75316420]  ;;  %4402 = vmatpush.msrb.mxu1 %v7537_v58 }
 0x754   : > { %4278 = vmatmul.f32.gmra.mxu2 %v9742_v12  ;;  %3971 = vst [vmem:[#allocation3 + $0x81] sm:$0xff] %v9971_v25 }
 0x755   : > { %4403 = vmatpush.msrb.mxu1 %v7536_v42  ;;  %v10123_v24 = vpop.f32.mrf.mxu2 }
 0x757   : > { %4404 = vmatpush.msrb.mxu1 %v7535_v7 }
 0x759   : > { %4405 = vmatpush.msrb.mxu1 %v7534_v49 }
 0x75b   : > { %v3980_v54 = vld [vmem:[#allocation3 + $0x80] sm:$0xff]  ;;  %4406 = vmatpush.msrb.mxu1 %v7533_v5  ;;  %v4776_v5 = vld [vmem:[%s13792_s4 + $0x3e0] sm:$0xff] }
 0x75c   : > { %4052 = vmatmul.f32.gmra.mxu1 %v3980_v54  ;;  %4148 = vmatmul.f32.gmra.mxu3 %v3980_v54  ;;  %v4379_v54 = vld [vmem:[#allocation3 + $0x82] sm:$0xff] }
 0x75d   : > { %4281 = vmatmul.f32.gmra.mxu2 %v9762_v55  ;;  %4407 = vmatpush.msrb.mxu1 %v7532_v9  ;;  %v10127_v56 = vpop.f32.mrf.mxu2 }
 0x75e   : > { %5706 = vmatpush.msra.mxu2 %v4776_v5  ;;  %v4804_v5 = vld [vmem:[%s13792_s4 + $0x4c0] sm:$0xff] }
 0x75f   : > { %4408 = vmatpush.msrb.mxu1 %v7531_v15  ;;  %v4772_v15 = vld [vmem:[%s13792_s4 + $0x3c0] sm:$0xff] }
 0x760   : > { %v10145_v35 = vpop.f32.mrf.mxu3  ;;  %5707 = vmatpush.msra.mxu2 %v4772_v15  ;;  %v4800_v15 = vld [vmem:[%s13792_s4 + $0x4a0] sm:$0xff] }
 0x761   : > { %4409 = vmatpush.msrb.mxu1 %v7530_v57  ;;  %v4700_v57 = vld [vmem:[%s13792_s4 + $0x180] sm:$0xff] }
 0x763   : > { %4410 = vmatpush.msrb.mxu1 %v7529_v39  ;;  %v4832_v39 = vld [vmem:[%s13792_s4 + $0x5a0] sm:$0xff] }
 0x764   : > { %4151 = vmatmul.f32.gmra.mxu3 %v7692_v44  ;;  %4206 = vmatmul.f32.vlgmr.msra.gmra.mxu1 %v4163_v1 }
 0x765   : > { %4284 = vmatmul.f32.gmra.mxu2 %v9773_v40  ;;  %v10133_v27 = vpop.f32.mrf.mxu2 }
 0x76c   : > { %4209 = vmatmul.f32.gmra.mxu1 %v7693_v37  ;;  %4338 = vmatmul.f32.vlgmr.msra.gmra.mxu3 %v9651_v29 }
 0x76d   : > { %4287 = vmatmul.f32.gmra.mxu2 %v9797_v23 }
 0x774   : > { %4212 = vmatmul.f32.gmra.mxu1 %v9651_v29  ;;  %4341 = vmatmul.f32.gmra.mxu3 %v9742_v12  ;;  %v7568_v29 = vld [vmem:[%s13791_s3 + $0x450] sm:$0xff] }
 0x775   : > { %4290 = vmatmul.f32.gmra.mxu2 %v9866_v47  ;;  %4535 = vmatpush.msrb.mxu3 %v7568_v29  ;;  %v4704_v29 = vld [vmem:[%s13792_s4 + $0x1a0] sm:$0xff] }
 0x777   : > { %4536 = vmatpush.msrb.mxu3 %v7567_v53  ;;  %v4836_v53 = vld [vmem:[%s13792_s4 + $0x5c0] sm:$0xff] }
 0x779   : > { %4537 = vmatpush.msrb.mxu3 %v7566_v13  ;;  %v4768_v13 = vld [vmem:[%s13792_s4 + $0x3a0] sm:$0xff] }
 0x77a   : > { %5708 = vmatpush.msra.mxu2 %v4768_v13  ;;  %v4796_v13 = vld [vmem:[%s13792_s4 + $0x480] sm:$0xff] }
 0x77b   : > { %4538 = vmatpush.msrb.mxu3 %v7565_v0  ;;  %v4696_v0 = vld [vmem:[%s13792_s4 + $0x160] sm:$0xff] }
 0x77c   : > { %4215 = vmatmul.f32.gmra.mxu1 %v9742_v12  ;;  %4344 = vmatmul.f32.gmra.mxu3 %v9762_v55  ;;  %v7528_v12 = vld [vmem:[%s13791_s3 + $0x110] sm:$0xff] }
 0x77d   : > { %4293 = vmatmul.f32.gmra.mxu2 %v9971_v25  ;;  %4411 = vmatpush.msrb.mxu1 %v7528_v12  ;;  %v4764_v12 = vld [vmem:[%s13792_s4 + $0x380] sm:$0xff] }
 0x77e   : > { %4539 = vmatpush.msrb.mxu3 %v7564_v32  ;;  %5709 = vmatpush.msra.mxu2 %v4764_v12  ;;  %v4728_v12 = vld [vmem:[%s13792_s4 + $0x260] sm:$0xff] }
 0x77f   : > { %4412 = vmatpush.msrb.mxu1 %v7527_v62  ;;  %v10137_v36 = vpop.f32.mrf.mxu2  ;;  %v4828_v62 = vld [vmem:[%s13792_s4 + $0x580] sm:$0xff] }
 0x780   : > { %4540 = vmatpush.msrb.mxu3 %v7563_v59  ;;  %v10151_v60 = vpop.f32.mrf.mxu3 }
 0x781   : > { %4413 = vmatpush.msrb.mxu1 %v7526_v18  ;;  %v4760_v18 = vld [vmem:[%s13792_s4 + $0x360] sm:$0xff] }
 0x782   : > { %4541 = vmatpush.msrb.mxu3 %v7562_v8  ;;  %v4824_v8 = vld [vmem:[%s13792_s4 + $0x560] sm:$0xff]  ;;  %5710 = vmatpush.msra.mxu2 %v4760_v18 }
 0x783   : > { %5686 = vmatpush.msra.mxu1 %v4712_v4  ;;  %v4672_v4 = vld [vmem:[%s13792_s4 + $0xa0] sm:$0xff] }
 0x784   : > { %4218 = vmatmul.f32.gmra.mxu1 %v9762_v55  ;;  %4347 = vmatmul.f32.gmra.mxu3 %v9773_v40  ;;  %v7560_v55 = vld [vmem:[%s13791_s3 + $0x410] sm:$0xff] }
 0x785   : > { %4480 = vmatmul.f32.vlgmr.msrb.gmra.mxu2 %v4372_v41  ;;  %4542 = vmatpush.msrb.mxu3 %v7561_v50 }
 0x786   : > { %5687 = vmatpush.msra.mxu1 %v4708_v30  ;;  %v4740_v30 = vld [vmem:[%s13792_s4 + $0x2c0] sm:$0xff] }
 0x787   : > { %4543 = vmatpush.msrb.mxu3 %v7560_v55  ;;  %v4688_v55 = vld [vmem:[%s13792_s4 + $0x120] sm:$0xff] }
 0x788   : > { %5688 = vmatpush.msra.mxu1 %v4704_v29  ;;  %v4736_v29 = vld [vmem:[%s13792_s4 + $0x2a0] sm:$0xff] }
 0x789   : > { %4544 = vmatpush.msrb.mxu3 %v7559_v52  ;;  %v4820_v52 = vld [vmem:[%s13792_s4 + $0x540] sm:$0xff] }
 0x78a   : > { %5689 = vmatpush.msra.mxu1 %v4700_v57  ;;  %v4732_v57 = vld [vmem:[%s13792_s4 + $0x280] sm:$0xff] }
 0x78b   : > { %4545 = vmatpush.msrb.mxu3 %v7558_v21  ;;  %v4684_v21 = vld [vmem:[%s13792_s4 + $0x100] sm:$0xff] }
 0x78c   : > { %4221 = vmatmul.f32.gmra.mxu1 %v9773_v40  ;;  %4350 = vmatmul.f32.gmra.mxu3 %v9797_v23  ;;  %v4374_v40 = vld [vmem:[#allocation3 + $0x32] sm:$0xff] }
 0x78d   : > { %4483 = vmatmul.f32.gmra.mxu2 %v4373_v46  ;;  %5726 = vmatpush.msra.mxu3 %v4840_v26  ;;  %v4668_v26 = vld [vmem:[%s13792_s4 + $0x80] sm:$0xff] }
 0x78e   : > { %5690 = vmatpush.msra.mxu1 %v4696_v0  ;;  %v4660_v0 = vld [vmem:[%s13792_s4 + $0x40] sm:$0xff] }
 0x78f   : > { %5727 = vmatpush.msra.mxu3 %v4836_v53  ;;  %v4664_v53 = vld [vmem:[%s13792_s4 + $0x60] sm:$0xff] }
 0x791   : > { %5728 = vmatpush.msra.mxu3 %v4832_v39 }
 0x793   : > { %5729 = vmatpush.msra.mxu3 %v4828_v62  ;;  %v4792_v62 = vld [vmem:[%s13792_s4 + $0x460] sm:$0xff] }
 0x794   : > { %4224 = vmatmul.f32.gmra.mxu1 %v9797_v23  ;;  %4353 = vmatmul.f32.gmra.mxu3 %v9866_v47  ;;  %v4172_v23 = vld [vmem:[#allocation3 + $0x91] sm:$0xff] }
 0x795   : > { %4486 = vmatmul.f32.gmra.mxu2 %v4374_v40  ;;  %5730 = vmatpush.msra.mxu3 %v4824_v8  ;;  %v4656_v8 = vld [vmem:[%s13792_s4 + $0x20] sm:$0xff] }
 0x797   : > { %5731 = vmatpush.msra.mxu3 %v4820_v52  ;;  %v4652_v52 = vld [vmem:[%s13792_s4] sm:$0xff] }
 0x799   : > { %5732 = vmatpush.msra.mxu3 %v4816_v16  ;;  %v4904_v16 = vld [vmem:[%s13792_s4 + $0x7e0] sm:$0xff] }
 0x79c   : > { %4227 = vmatmul.f32.gmra.mxu1 %v9866_v47  ;;  %4356 = vmatmul.f32.gmra.mxu3 %v9971_v25  ;;  %v4377_v47 = vld [vmem:[#allocation3 + $0x62] sm:$0xff]  ;;  %v10135_v25 = vpop.f32.mrf.mxu1 }
 0x79d   : > { %4489 = vmatmul.f32.gmra.mxu2 %v4375_v31 }
 0x79f   : > { %v10143_v17 = vpop.f32.mrf.mxu2 }
 0x7a0   : > { %v10155_v45 = vpop.f32.mrf.mxu3 }
 0x7a4   : > { %4359 = vmatmul.f32.gmra.mxu3 %v4172_v23  ;;  %4414 = vmatmul.f32.vlgmr.msrb.gmra.mxu1 %v4371_v51  ;;  %v10141_v10 = vpop.f32.mrf.mxu1  ;;  %v4748_v23 = vld [vmem:[%s13792_s4 + $0x300] sm:$0xff] }
 0x7a5   : > { %4492 = vmatmul.f32.gmra.mxu2 %v4376_v11  ;;  %v4812_v51 = vld [vmem:[%s13792_s4 + $0x500] sm:$0xff] }
 0x7a6   : > { %5733 = vmatpush.msra.mxu3 %v4812_v51 }
 0x7a8   : > { %5734 = vmatpush.msra.mxu3 %v4808_v43  ;;  %v5032_v43 = vld [vmem:[%s13792_s4 + $0xbe0] sm:$0xff] }
 0x7aa   : > { %5735 = vmatpush.msra.mxu3 %v4804_v5  ;;  %v4964_v5 = vld [vmem:[%s13792_s4 + $0x9c0] sm:$0xff] }
 0x7ac   : > { %4417 = vmatmul.f32.gmra.mxu1 %v4372_v41  ;;  %4546 = vmatmul.f32.vlgmr.msrb.gmra.mxu3 %v4373_v46  ;;  %v10147_v1 = vpop.f32.mrf.mxu1  ;;  %v4692_v41 = vld [vmem:[%s13792_s4 + $0x140] sm:$0xff] }
 0x7ad   : > { %4495 = vmatmul.f32.gmra.mxu2 %v4377_v47  ;;  %5691 = vmatpush.msra.mxu1 %v4692_v41 }
 0x7ae   : > { %5736 = vmatpush.msra.mxu3 %v4800_v15  ;;  %v4892_v15 = vld [vmem:[%s13792_s4 + $0x780] sm:$0xff] }
 0x7af   : > { %5692 = vmatpush.msra.mxu1 %v4688_v55  ;;  %v4724_v55 = vld [vmem:[%s13792_s4 + $0x240] sm:$0xff] }
 0x7b0   : > { %5737 = vmatpush.msra.mxu3 %v4796_v13  ;;  %v4888_v13 = vld [vmem:[%s13792_s4 + $0x760] sm:$0xff] }
 0x7b1   : > { %5693 = vmatpush.msra.mxu1 %v4684_v21  ;;  %v4720_v21 = vld [vmem:[%s13792_s4 + $0x220] sm:$0xff] }
 0x7b2   : > { %5738 = vmatpush.msra.mxu3 %v4792_v62 }
 0x7b4   : > { %4420 = vmatmul.f32.gmra.mxu1 %v4373_v46  ;;  %4549 = vmatmul.f32.gmra.mxu3 %v4374_v40  ;;  %v10153_v44 = vpop.f32.mrf.mxu1  ;;  %v4756_v46 = vld [vmem:[%s13792_s4 + $0x340] sm:$0xff] }
 0x7b5   : > { %4498 = vmatmul.f32.gmra.mxu2 %v4378_v28 }
 0x7b6   : > { %5711 = vmatpush.msra.mxu2 %v4756_v46  ;;  %v4788_v46 = vld [vmem:[%s13792_s4 + $0x440] sm:$0xff] }
 0x7b7   : > { %5739 = vmatpush.msra.mxu3 %v4788_v46  ;;  %v4952_v46 = vld [vmem:[%s13792_s4 + $0x960] sm:$0xff] }
 0x7bc   : > { %4423 = vmatmul.f32.gmra.mxu1 %v4374_v40  ;;  %4552 = vmatmul.f32.gmra.mxu3 %v4375_v31  ;;  %v10159_v14 = vpop.f32.mrf.mxu1  ;;  %v4752_v40 = vld [vmem:[%s13792_s4 + $0x320] sm:$0xff] }
 0x7bd   : > { %4501 = vmatmul.f32.gmra.mxu2 %v4379_v54 }
 0x7be   : > { %5712 = vmatpush.msra.mxu2 %v4752_v40  ;;  %v4784_v40 = vld [vmem:[%s13792_s4 + $0x420] sm:$0xff] }
 0x7bf   : > { %v10149_v34 = vpop.f32.mrf.mxu2  ;;  %5740 = vmatpush.msra.mxu3 %v4784_v40  ;;  %v4880_v40 = vld [vmem:[%s13792_s4 + $0x720] sm:$0xff] }
 0x7c0   : > { %v10164_v19 = vpop.f32.mrf.mxu3  ;;  %5713 = vmatpush.msra.mxu2 %v4748_v23  ;;  %v4780_v23 = vld [vmem:[%s13792_s4 + $0x400] sm:$0xff] }
 0x7c1   : > { %5741 = vmatpush.msra.mxu3 %v4780_v23  ;;  %v5044_v23 = vld [vmem:[%s13792_s4 + $0xc40] sm:$0xff] }
 0x7c3   : > { %5786 = vmatpush.msrb.mxu3 %v5032_v43  ;;  %v4944_v43 = vld [vmem:[%s13792_s4 + $0x920] sm:$0xff] }
 0x7c4   : > { %4426 = vmatmul.f32.gmra.mxu1 %v4375_v31  ;;  %4555 = vmatmul.f32.gmra.mxu3 %v4376_v11  ;;  %v4680_v31 = vld [vmem:[%s13792_s4 + $0xe0] sm:$0xff] }
 0x7c5   : > { %5694 = vmatpush.msra.mxu1 %v4680_v31  ;;  %v4716_v31 = vld [vmem:[%s13792_s4 + $0x200] sm:$0xff] }
 0x7c7   : > { %v10157_v38 = vpop.f32.mrf.mxu2 }
 0x7cc   : > { %4429 = vmatmul.f32.gmra.mxu1 %v4376_v11  ;;  %4558 = vmatmul.f32.gmra.mxu3 %v4377_v47 }
 0x7cf   : > { %v10166_v37 = vpop.f32.mrf.mxu2 }
 0x7d4   : > { %4432 = vmatmul.f32.gmra.mxu1 %v4377_v47  ;;  %4561 = vmatmul.f32.gmra.mxu3 %v4378_v28 }
 0x7d7   : > { %v10177_v7 = vpop.f32.mrf.mxu2 }
 0x7d9   : > { %v10168_v58 = vpop.f32.mrf.mxu1 }
 0x7dc   : > { %4435 = vmatmul.f32.gmra.mxu1 %v4378_v28  ;;  %4564 = vmatmul.f32.gmra.mxu3 %v4379_v54  ;;  %v4676_v28 = vld [vmem:[%s13792_s4 + $0xc0] sm:$0xff] }
 0x7dd   : > { %v4744_v54 = vld [vmem:[%s13792_s4 + $0x2e0] sm:$0xff]  ;;  %5695 = vmatpush.msra.mxu1 %v4676_v28 }
 0x7de   : > { %5714 = vmatpush.msra.mxu2 %v4744_v54  ;;  %v4900_v28 = vld [vmem:[%s13792_s4 + $0x7c0] sm:$0xff] }
 0x7df   : > { %v10170_v20 = vpop.f32.mrf.mxu3  ;;  %5696 = vmatpush.msra.mxu1 %v4672_v4  ;;  %v4968_v54 = vld [vmem:[%s13792_s4 + $0x9e0] sm:$0xff] }
 0x7e0   : > { %v10216_v32 = vpop.f32.mrf.mxu2  ;;  %5715 = vmatpush.msra.mxu2 %v4740_v30  ;;  %v4896_v30 = vld [vmem:[%s13792_s4 + $0x7a0] sm:$0xff] }
 0x7e1   : > { %v10172_v42 = vpop.f32.mrf.mxu1  ;;  %5697 = vmatpush.msra.mxu1 %v4668_v26  ;;  %v5028_v26 = vld [vmem:[%s13792_s4 + $0xbc0] sm:$0xff] }
 0x7e2   : > { %5716 = vmatpush.msra.mxu2 %v4736_v29  ;;  %5787 = vmatpush.msrb.mxu3 %v5028_v26  ;;  %v4872_v26 = vld [vmem:[%s13792_s4 + $0x6e0] sm:$0xff] }
 0x7e3   : > { %5698 = vmatpush.msra.mxu1 %v4664_v53  ;;  %v4960_v53 = vld [vmem:[%s13792_s4 + $0x9a0] sm:$0xff] }
 0x7e4   : > { %4567 = vmatmul.f32.gmra.mxu3 %v4380_v61  ;;  %5717 = vmatpush.msra.mxu2 %v4732_v57  ;;  %v5024_v57 = vld [vmem:[%s13792_s4 + $0xba0] sm:$0xff] }
 0x7e5   : > { %5699 = vmatpush.msra.mxu1 %v4660_v0  ;;  %v4956_v0 = vld [vmem:[%s13792_s4 + $0x980] sm:$0xff]  ;;  %5788 = vmatpush.msrb.mxu3 %v5024_v57 }
 0x7e6   : > { %5718 = vmatpush.msra.mxu2 %v4728_v12  ;;  %v5020_v12 = vld [vmem:[%s13792_s4 + $0xb80] sm:$0xff] }
 0x7e7   : > { %v10179_v49 = vpop.f32.mrf.mxu3  ;;  %5700 = vmatpush.msra.mxu1 %v4656_v8  ;;  %5789 = vmatpush.msrb.mxu3 %v5020_v12  ;;  %v5004_v57 = vld [vmem:[%s13792_s4 + $0xb00] sm:$0xff] }
 0x7e8   : > { %v10261_v11 = vpop.f32.mrf.mxu2  ;;  %5719 = vmatpush.msra.mxu2 %v4724_v55  ;;  %v4884_v55 = vld [vmem:[%s13792_s4 + $0x740] sm:$0xff] }
 0x7e9   : > { %v10190_v9 = vpop.f32.mrf.mxu1  ;;  %5701 = vmatpush.msra.mxu1 %v4652_v52  ;;  %v5016_v52 = vld [vmem:[%s13792_s4 + $0xb60] sm:$0xff] }
 0x7ea   : > { %5720 = vmatpush.msra.mxu2 %v4720_v21  ;;  %v5048_v21 = vld [vmem:[%s13792_s4 + $0xc60] sm:$0xff]  ;;  %5790 = vmatpush.msrb.mxu3 %v5016_v52 }
 0x7eb   : > { %5746 = vmatpush.msrb.mxu1 %v4904_v16  ;;  %v4948_v16 = vld [vmem:[%s13792_s4 + $0x940] sm:$0xff]  ;;  %5818 = vmatpush.msrb.mxu0 %v5048_v21 }
 0x7ec   : > { %5721 = vmatpush.msra.mxu2 %v4716_v31  ;;  %v5012_v31 = vld [vmem:[%s13792_s4 + $0xb40] sm:$0xff] }
 0x7ed   : > { %5747 = vmatpush.msrb.mxu1 %v4900_v28  ;;  %v4876_v28 = vld [vmem:[%s13792_s4 + $0x700] sm:$0xff]  ;;  %5791 = vmatpush.msrb.mxu3 %v5012_v31 }
 0x7ee   : > { %5766 = vmatpush.msrb.mxu2 %v4968_v54  ;;  %5819 = vmatpush.msrb.mxu0 %v5044_v23  ;;  %v4868_v52 = vld [vmem:[%s13792_s4 + $0x6c0] sm:$0xff] }
 0x7ef   : > { %v10221_v59 = vpop.f32.mrf.mxu3  ;;  %5748 = vmatpush.msrb.mxu1 %v4896_v30  ;;  %v5008_v30 = vld [vmem:[%s13792_s4 + $0xb20] sm:$0xff] }
 0x7f0   : > { %v10314_v41 = vpop.f32.mrf.mxu2  ;;  %5767 = vmatpush.msrb.mxu2 %v4964_v5  ;;  %v5040_v5 = vld [vmem:[%s13792_s4 + $0xc20] sm:$0xff]  ;;  %5792 = vmatpush.msrb.mxu3 %v5008_v30 }
 0x7f1   : > { %v10232_v50 = vpop.f32.mrf.mxu1  ;;  %5749 = vmatpush.msrb.mxu1 %v4892_v15  ;;  %v4940_v15 = vld [vmem:[%s13792_s4 + $0x900] sm:$0xff]  ;;  %5820 = vmatpush.msrb.mxu0 %v5040_v5 }
 0x7f2   : > { %5768 = vmatpush.msrb.mxu2 %v4960_v53  ;;  %5793 = vmatpush.msrb.mxu3 %v5004_v57  ;;  %v4936_v21 = vld [vmem:[%s13792_s4 + $0x8e0] sm:$0xff] }
 0x7f3   : > { %5750 = vmatpush.msrb.mxu1 %v4888_v13  ;;  %v5036_v13 = vld [vmem:[%s13792_s4 + $0xc00] sm:$0xff] }
 0x7f4   : > { %5769 = vmatpush.msrb.mxu2 %v4956_v0  ;;  %5821 = vmatpush.msrb.mxu0 %v5036_v13  ;;  %v4864_v31 = vld [vmem:[%s13792_s4 + $0x6a0] sm:$0xff] }
 0x7f5   : > { %5751 = vmatpush.msrb.mxu1 %v4884_v55  ;;  %v4932_v23 = vld [vmem:[%s13792_s4 + $0x8c0] sm:$0xff] }
 0x7f6   : > { %5770 = vmatpush.msrb.mxu2 %v4952_v46  ;;  %v5348_v30 = vld [vmem:[%s13792_s4 + $0x15c0] sm:$0xff] }
 0x7f7   : > { %v10263_v47 = vpop.f32.mrf.mxu3  ;;  %5752 = vmatpush.msrb.mxu1 %v4880_v40  ;;  %v5000_v40 = vld [vmem:[%s13792_s4 + $0xae0] sm:$0xff] }
 0x7f8   : > { %v10367_v29 = vpop.f32.mrf.mxu2  ;;  %5771 = vmatpush.msrb.mxu2 %v4948_v16  ;;  %v5352_v16 = vld [vmem:[%s13792_s4 + $0x15e0] sm:$0xff]  ;;  %5794 = vmatpush.msrb.mxu3 %v5000_v40 }
 0x7f9   : > { %v10274_v61 = vpop.f32.mrf.mxu1  ;;  %5753 = vmatpush.msrb.mxu1 %v4876_v28  ;;  %v4074_v28 = vadd.f32 %v10104_v48, %v10125_v3  ;;  %5886 = vmatpush.msra.mxu0 %v5352_v16  ;;  %v4860_v5 = vld [vmem:[%s13792_s4 + $0x680] sm:$0xff] }
 0x7fa   : > { %5772 = vmatpush.msrb.mxu2 %v4944_v43  ;;  %v4996_v43 = vld [vmem:[%s13792_s4 + $0xac0] sm:$0xff] }
 0x7fb   : > { %5754 = vmatpush.msrb.mxu1 %v4872_v26  ;;  %v4928_v48 = vld [vmem:[%s13792_s4 + $0x8a0] sm:$0xff]  ;;  %v4155_v57 = vadd.f32 %v10131_v63, %v4074_v28  ;;  %5795 = vmatpush.msrb.mxu3 %v4996_v43 }
 0x7fc   : > { %5773 = vmatpush.msrb.mxu2 %v4940_v15  ;;  %v4992_v3 = vld [vmem:[%s13792_s4 + $0xaa0] sm:$0xff]  ;;  %v4077_v15 = vadd.f32 %v10116_v2, %v10129_v6  ;;  %5887 = vmatpush.msra.mxu0 %v5348_v30 }
 0x7fd   : > { %5755 = vmatpush.msrb.mxu1 %v4868_v52  ;;  %v5344_v26 = vld [vmem:[%s13792_s4 + $0x15a0] sm:$0xff]  ;;  %v4231_v40 = vadd.f32 %v10172_v42, %v4155_v57  ;;  %5796 = vmatpush.msrb.mxu3 %v4992_v3 }
 0x7fe   : > { %5774 = vmatpush.msrb.mxu2 %v4936_v21  ;;  %v4856_v13 = vld [vmem:[%s13792_s4 + $0x660] sm:$0xff]  ;;  %v4156_v63 = vadd.f32 %v10139_v33, %v4077_v15  ;;  %5888 = vmatpush.msra.mxu0 %v5344_v26 }
 0x7ff   : > { %v10303_v39 = vpop.f32.mrf.mxu3  ;;  %5756 = vmatpush.msrb.mxu1 %v4864_v31  ;;  %v4924_v52 = vld [vmem:[%s13792_s4 + $0x880] sm:$0xff]  ;;  %v4297_v3 = vadd.f32 %v10157_v38, %v4231_v40 }
 0x800   : > { %v10418_v54 = vpop.f32.mrf.mxu2  ;;  %5775 = vmatpush.msrb.mxu2 %v4932_v23  ;;  %v4988_v2 = vld [vmem:[%s13792_s4 + $0xa80] sm:$0xff]  ;;  %v4232_v43 = vadd.f32 %v10190_v9, %v4156_v63 }
 0x801   : > { %v10316_v18 = vpop.f32.mrf.mxu1  ;;  %5757 = vmatpush.msrb.mxu1 %v4860_v5  ;;  %v5340_v6 = vld [vmem:[%s13792_s4 + $0x1580] sm:$0xff]  ;;  %5797 = vmatpush.msrb.mxu3 %v4988_v2 }
 0x802   : > { %5776 = vmatpush.msrb.mxu2 %v4928_v48  ;;  %v4852_v16 = vld [vmem:[%s13792_s4 + $0x640] sm:$0xff]  ;;  %5889 = vmatpush.msra.mxu0 %v5340_v6 }
 0x803   : > { %v4920_v31 = vld [vmem:[%s13792_s4 + $0x860] sm:$0xff]  ;;  %5758 = vmatpush.msrb.mxu1 %v4856_v13  ;;  %v4363_v13 = vadd.f32 %v10221_v59, %v4297_v3 }
 0x804   : > { %5777 = vmatpush.msrb.mxu2 %v4924_v52  ;;  %v4984_v33 = vld [vmem:[%s13792_s4 + $0xa60] sm:$0xff]  ;;  %v4298_v52 = vadd.f32 %v10166_v37, %v4232_v43 }
 0x805   : > { %v5336_v42 = vld [vmem:[%s13792_s4 + $0x1560] sm:$0xff]  ;;  %5759 = vmatpush.msrb.mxu1 %v4852_v16  ;;  %5798 = vmatpush.msrb.mxu3 %v4984_v33 }
 0x806   : > { %v4848_v30 = vld [vmem:[%s13792_s4 + $0x620] sm:$0xff]  ;;  %5778 = vmatpush.msrb.mxu2 %v4920_v31  ;;  %5890 = vmatpush.msra.mxu0 %v5336_v42  ;;  %v4364_v59 = vadd.f32 %v10263_v47, %v4298_v52  ;;  %v4080_v47 = vadd.f32 %v10123_v24, %v10135_v25 }
 0x807   : > { %v10345_v51 = vpop.f32.mrf.mxu3  ;;  %v4916_v5 = vld [vmem:[%s13792_s4 + $0x840] sm:$0xff]  ;;  %5760 = vmatpush.msrb.mxu1 %v4848_v30  ;;  %v4083_v30 = vadd.f32 %v10127_v56, %v10141_v10 }
 0x808   : > { %v10445_v12 = vpop.f32.mrf.mxu2  ;;  %v4980_v48 = vld [vmem:[%s13792_s4 + $0xa40] sm:$0xff]  ;;  %5779 = vmatpush.msrb.mxu2 %v4916_v5  ;;  %v4157_v5 = vadd.f32 %v10145_v35, %v4080_v47 }
 0x809   : > { %v10356_v4 = vpop.f32.mrf.mxu1  ;;  %v5332_v9 = vld [vmem:[%s13792_s4 + $0x1540] sm:$0xff]  ;;  %5799 = vmatpush.msrb.mxu3 %v4980_v48  ;;  %v4158_v25 = vadd.f32 %v10151_v60, %v4083_v30 }
 0x80a   : > { %v4844_v26 = vld [vmem:[%s13792_s4 + $0x600] sm:$0xff]  ;;  %5891 = vmatpush.msra.mxu0 %v5332_v9 }
 0x80b   : > { %v4912_v15 = vld [vmem:[%s13792_s4 + $0x820] sm:$0xff]  ;;  %5761 = vmatpush.msrb.mxu1 %v4844_v26  ;;  %v4234_v10 = vadd.f32 %v10274_v61, %v4158_v25 }
 0x80c   : > { %v4976_v57 = vld [vmem:[%s13792_s4 + $0xa20] sm:$0xff]  ;;  %5780 = vmatpush.msrb.mxu2 %v4912_v15 }
 0x80d   : > { %v5328_v38 = vld [vmem:[%s13792_s4 + $0x1520] sm:$0xff]  ;;  %5800 = vmatpush.msrb.mxu3 %v4976_v57  ;;  %v4300_v61 = vadd.f32 %v10216_v32, %v4234_v10 }
 0x80e   : > { %v4908_v2 = vld [vmem:[%s13792_s4 + $0x800] sm:$0xff]  ;;  %5892 = vmatpush.msra.mxu0 %v5328_v38 }
 0x80f   : > { %v10387_v62 = vpop.f32.mrf.mxu3  ;;  %v4972_v63 = vld [vmem:[%s13792_s4 + $0xa00] sm:$0xff]  ;;  %5781 = vmatpush.msrb.mxu2 %v4908_v2 }
 0x810   : > { %v4484_v23 = vpop.f32.mrf.mxu2  ;;  %v5324_v40 = vld [vmem:[%s13792_s4 + $0x1500] sm:$0xff]  ;;  %5801 = vmatpush.msrb.mxu3 %v4972_v63 }
 0x811   : > { %v10389_v8 = vpop.f32.mrf.mxu1  ;;  %5893 = vmatpush.msra.mxu0 %v5324_v40  ;;  %v5320_v33 = vld [vmem:[%s13792_s4 + $0x14e0] sm:$0xff] }
 0x812   : > { %v5316_v43 = vld [vmem:[%s13792_s4 + $0x14c0] sm:$0xff] }
 0x813   : > { %5894 = vmatpush.msra.mxu0 %v5320_v33  ;;  %v5308_v24 = vld [vmem:[%s13792_s4 + $0x1480] sm:$0xff]  ;;  %v4086_v33 = vadd.f32 %v10133_v27, %v10147_v1  ;;  %v4089_v27 = vadd.f32 %v10137_v36, %v10153_v44 }
 0x814   : > { %v5304_v56 = vld [vmem:[%s13792_s4 + $0x1460] sm:$0xff] }
 0x815   : > { %5895 = vmatpush.msra.mxu0 %v5316_v43  ;;  %v5300_v57 = vld [vmem:[%s13792_s4 + $0x1440] sm:$0xff] }
 0x816   : > { %v5292_v63 = vld [vmem:[%s13792_s4 + $0x1400] sm:$0xff] }
 0x817   : > { %v10435_v53 = vpop.f32.mrf.mxu3  ;;  %v5160_v32 = vld [vmem:[%s13792_s4 + $0xfe0] sm:$0xff] }
 0x818   : > { %v4487_v42 = vpop.f32.mrf.mxu2  ;;  %v5156_v47 = vld [vmem:[%s13792_s4 + $0xfc0] sm:$0xff] }
 0x819   : > { %v10443_v0 = vpop.f32.mrf.mxu1  ;;  %v5288_v1 = vld [vmem:[%s13792_s4 + $0x13e0] sm:$0xff] }
 0x81a   : > { %v5220_v36 = vld [vmem:[%s13792_s4 + $0x11c0] sm:$0xff] }
 0x81b   : > { %v5148_v25 = vld [vmem:[%s13792_s4 + $0xf80] sm:$0xff] }
 0x81c   : > { %v5144_v10 = vld [vmem:[%s13792_s4 + $0xf60] sm:$0xff] }
 0x81f   : > { %v10447_v55 = vpop.f32.mrf.mxu3 }
 0x821   : > { %v10449_v46 = vpop.f32.mrf.mxu1 }
 0x822   : > { %v4439_v37 = vadd.f32 %v10449_v46, %v4363_v13  ;;  %v5296_v13 = vld [vmem:[%s13792_s4 + $0x1420] sm:$0xff] }
 0x824   : > { %v4505_v46 = vadd.f32 %v10445_v12, %v4439_v37  ;;  %v4233_v12 = vadd.f32 %v10232_v50, %v4157_v5  ;;  %v4490_v50 = vpop.f32.mrf.mxu2  ;;  %v5152_v5 = vld [vmem:[%s13792_s4 + $0xfa0] sm:$0xff] }
 0x826   : > { %v4299_v60 = vadd.f32 %v10177_v7, %v4233_v12  ;;  %v4366_v7 = vadd.f32 %v10345_v51, %v4300_v61  ;;  %v5216_v12 = vld [vmem:[%s13792_s4 + $0x11a0] sm:$0xff] }
 0x827   : > { %v10498_v21 = vpop.f32.mrf.mxu3 }
 0x828   : > { %v4365_v52 = vadd.f32 %v10303_v39, %v4299_v60 }
 0x829   : > { %v4418_v28 = vpop.f32.mrf.mxu1 }
 0x82a   : > { %v4440_v31 = vadd.f32 %v4418_v28, %v4364_v59  ;;  %v5312_v28 = vld [vmem:[%s13792_s4 + $0x14a0] sm:$0xff] }
 0x82b   : > { %5896 = vmatpush.msra.mxu0 %v5312_v28 }
 0x82c   : > { %v4506_v9 = vadd.f32 %v4484_v23, %v4440_v31  ;;  %v10636_v44 = vpop.f32.mrf.mxu2 }
 0x82d   : > { %5897 = vmatpush.msra.mxu0 %v5308_v24 }
 0x82f   : > { %v4547_v6 = vpop.f32.mrf.mxu3  ;;  %5898 = vmatpush.msra.mxu0 %v5304_v56 }
 0x830   : > { %v4571_v48 = vadd.f32 %v4547_v6, %v4505_v46  ;;  %v5224_v46 = vld [vmem:[%s13792_s4 + $0x11e0] sm:$0xff] }
 0x831   : > { %v4421_v16 = vpop.f32.mrf.mxu1  ;;  %5899 = vmatpush.msra.mxu0 %v5300_v57 }
 0x832   : > { %v4579_v35 = vmax.f32 %v4571_v48, 0.0  ;;  %v4441_v40 = vadd.f32 %v4421_v16, %v4365_v52  ;;  %v5284_v48 = vld [vmem:[%s13792_s4 + $0x13c0] sm:$0xff] }
 0x833   : > { %5900 = vmatpush.msra.mxu0 %v5296_v13  ;;  %v5272_v13 = vld [vmem:[%s13792_s4 + $0x1360] sm:$0xff] }
 0x834   : > { %v4507_v43 = vadd.f32 %v4487_v42, %v4441_v40  ;;  %v4159_v42 = vadd.f32 %v10155_v45, %v4086_v33  ;;  %v5264_v33 = vld [vmem:[%s13792_s4 + $0x1320] sm:$0xff] }
 0x835   : > { %5901 = vmatpush.msra.mxu0 %v5292_v63 }
 0x837   : > { %v4550_v3 = vpop.f32.mrf.mxu3 }
 0x838   : > { %v4572_v26 = vadd.f32 %v4550_v3, %v4506_v9  ;;  %v4160_v9 = vadd.f32 %v10164_v19, %v4089_v27  ;;  %v4235_v3 = vadd.f32 %v10316_v18, %v4159_v42  ;;  %v4092_v27 = vadd.f32 %v10143_v17, %v10159_v14  ;;  %v5192_v14 = vld [vmem:[%s13792_s4 + $0x10e0] sm:$0xff] }
 0x839   : > { %v4424_v15 = vpop.f32.mrf.mxu1 }
 0x83a   : > { %v4580_v23 = vmax.f32 %v4572_v26, 0.0  ;;  %v4442_v39 = vadd.f32 %v4424_v15, %v4366_v7  ;;  %v5280_v26 = vld [vmem:[%s13792_s4 + $0x13a0] sm:$0xff]  ;;  %v4236_v19 = vadd.f32 %v10356_v4, %v4160_v9  ;;  %v4301_v57 = vadd.f32 %v10261_v11, %v4235_v3 }
 0x83b   : > { %v5276_v4 = vld [vmem:[%s13792_s4 + $0x1380] sm:$0xff] }
 0x83c   : > { %v4587_v38 = vmax.f32 %v4579_v35, %v4580_v23  ;;  %v4508_v30 = vadd.f32 %v4490_v50, %v4442_v39  ;;  %v5212_v35 = vld [vmem:[%s13792_s4 + $0x1180] sm:$0xff]  ;;  %v4367_v11 = vadd.f32 %v10387_v62, %v4301_v57  ;;  %v4302_v52 = vadd.f32 %v10314_v41, %v4236_v19 }
 0x83d   : > { %v5208_v50 = vld [vmem:[%s13792_s4 + $0x1160] sm:$0xff] }
 0x83e   : > { %v4594_v2 = vperm.slane %v4587_v38, %v13926_v22  ;;  %v5140_v38 = vld [vmem:[%s13792_s4 + $0xf40] sm:$0xff]  ;;  %v4368_v41 = vadd.f32 %v10435_v53, %v4302_v52 }
 0x83f   : > { %v4553_v6 = vpop.f32.mrf.mxu3  ;;  %v5268_v62 = vld [vmem:[%s13792_s4 + $0x1340] sm:$0xff] }
 0x840   : > { %v4611_v59 = vrot.slane %v4594_v2, 4  ;;  %v4573_v28 = vadd.f32 %v4553_v6, %v4507_v43  ;;  %v5204_v6 = vld [vmem:[%s13792_s4 + $0x1140] sm:$0xff] }
 0x841   : > { %v10597_v37 = vpop.f32.mrf.mxu1  ;;  %v5200_v39 = vld [vmem:[%s13792_s4 + $0x1120] sm:$0xff] }
 0x842   : > { %v10599_v31 = vmax.f32 %v4594_v2, %v4611_v59  ;;  %v4581_v15 = vmax.f32 %v4573_v28, 0.0  ;;  %v5136_v2 = vld [vmem:[%s13792_s4 + $0xf20] sm:$0xff]  ;;  %v4443_v7 = vadd.f32 %v10597_v37, %v4367_v11 }
 0x843   : > { %v5132_v59 = vld [vmem:[%s13792_s4 + $0xf00] sm:$0xff] }
 0x844   : > { %7574 = vmatmul.msk.f32.vlgmr.msra.gmra.mxu1 %vm4623_vm1, %v10599_v31  ;;  %v10609_v51 = vrot.slane %v10599_v31, 1  ;;  %v10612_v16 = vrot.slane %v10599_v31, 2  ;;  %v10654_v56 = vrot.slane %v10599_v31, 3  ;;  %v5128_v43 = vld [vmem:[%s13792_s4 + $0xee0] sm:$0xff] }
 0x845   : > { %5826 = vmatpush.msra.mxu1 %v5160_v32  ;;  %v4496_v32 = vpop.f32.mrf.mxu2  ;;  %v5252_v3 = vld [vmem:[%s13792_s4 + $0x12c0] sm:$0xff] }
 0x846   : > { %7575 = vmatmul.msk.f32.vlgmr.msra.gmra.mxu2 %vm4623_vm1, %v10609_v51  ;;  %7576 = vmatmul.msk.f32.vlgmr.msra.gmra.mxu3 %vm4623_vm1, %v10612_v16  ;;  %v5116_v19 = vld [vmem:[%s13792_s4 + $0xe80] sm:$0xff] }
 0x847   : > { %5827 = vmatpush.msra.mxu1 %v5156_v47  ;;  %5846 = vmatpush.msra.mxu2 %v5224_v46  ;;  %v4556_v45 = vpop.f32.mrf.mxu3  ;;  %v5196_v47 = vld [vmem:[%s13792_s4 + $0x1100] sm:$0xff] }
 0x848   : > { %5866 = vmatpush.msra.mxu3 %v5288_v1  ;;  %v4574_v24 = vadd.f32 %v4556_v45, %v4508_v30  ;;  %v5260_v46 = vld [vmem:[%s13792_s4 + $0x1300] sm:$0xff]  ;;  %v4509_v1 = vadd.f32 %v10636_v44, %v4443_v7  ;;  %v4161_v44 = vadd.f32 %v10170_v20, %v4092_v27 }
 0x849   : > { %5828 = vmatpush.msra.mxu1 %v5152_v5  ;;  %5847 = vmatpush.msra.mxu2 %v5220_v36  ;;  %v4430_v23 = vpop.f32.mrf.mxu1  ;;  %v5124_v30 = vld [vmem:[%s13792_s4 + $0xec0] sm:$0xff]  ;;  %v4095_v5 = vadd.f32 %v10149_v34, %v10168_v58 }
 0x84a   : > { %v4582_v18 = vmax.f32 %v4574_v24, 0.0  ;;  %5867 = vmatpush.msra.mxu3 %v5284_v48  ;;  %v4444_v37 = vadd.f32 %v4430_v23, %v4368_v41  ;;  %v5256_v36 = vld [vmem:[%s13792_s4 + $0x12e0] sm:$0xff] }
 0x84b   : > { %5829 = vmatpush.msra.mxu1 %v5148_v25  ;;  %5848 = vmatpush.msra.mxu2 %v5216_v12  ;;  %v5608_v34 = vld [vmem:[%s13792_s4 + $0x1de0] sm:$0xff]  ;;  %v4162_v24 = vadd.f32 %v10179_v49, %v4095_v5  ;;  %v4237_v25 = vadd.f32 %v10389_v8, %v4161_v44 }
 0x84c   : > { %v4588_v60 = vmax.f32 %v4581_v15, %v4582_v18  ;;  %5868 = vmatpush.msra.mxu3 %v5280_v26  ;;  %7577 = vmatmul.msk.f32.vlgmr.msrb.gmra.mxu1 %vm4623_vm1, %v10654_v56  ;;  %v4510_v58 = vadd.f32 %v4496_v32, %v4444_v37  ;;  %v5120_v48 = vld [vmem:[%s13792_s4 + $0xea0] sm:$0xff] }
 0x84d   : > { %5830 = vmatpush.msra.mxu1 %v5144_v10  ;;  %5849 = vmatpush.msra.mxu2 %v5212_v35  ;;  %v5188_v20 = vld [vmem:[%s13792_s4 + $0x10c0] sm:$0xff]  ;;  %v4238_v8 = vadd.f32 %v10443_v0, %v4162_v24 }
 0x84e   : > { %v4598_v61 = vperm.slane %v4588_v60, %v13926_v22  ;;  %5869 = vmatpush.msra.mxu3 %v5276_v4  ;;  %v5604_v26 = vld [vmem:[%s13792_s4 + $0x1dc0] sm:$0xff]  ;;  %v4499_v4 = vpop.f32.mrf.mxu2  ;;  %v4303_v60 = vadd.f32 %v10367_v29, %v4237_v25 }
 0x84f   : > { %5831 = vmatpush.msra.mxu1 %v5140_v38  ;;  %5850 = vmatpush.msra.mxu2 %v5208_v50  ;;  %v4559_v63 = vpop.f32.mrf.mxu3  ;;  %v5184_v15 = vld [vmem:[%s13792_s4 + $0x10a0] sm:$0xff] }
 0x850   : > { %v4612_v40 = vrot.slane %v4598_v61, 4  ;;  %5870 = vmatpush.msra.mxu3 %v5272_v13  ;;  %v4575_v45 = vadd.f32 %v4559_v63, %v4509_v1  ;;  %v5248_v49 = vld [vmem:[%s13792_s4 + $0x12a0] sm:$0xff]  ;;  %v4369_v52 = vadd.f32 %v10447_v55, %v4303_v60 }
 0x851   : > { %5832 = vmatpush.msra.mxu1 %v5136_v2  ;;  %5851 = vmatpush.msra.mxu2 %v5204_v6  ;;  %v10727_v17 = vpop.f32.mrf.mxu1  ;;  %v5600_v35 = vld [vmem:[%s13792_s4 + $0x1da0] sm:$0xff] }
 0x852   : > { %v10700_v53 = vmax.f32 %v4598_v61, %v4612_v40  ;;  %5871 = vmatpush.msra.mxu3 %v5268_v62  ;;  %v4583_v18 = vmax.f32 %v4575_v45, 0.0  ;;  %v5112_v23 = vld [vmem:[%s13792_s4 + $0xe60] sm:$0xff]  ;;  %v4304_v61 = vadd.f32 %v10418_v54, %v4238_v8  ;;  %v4445_v40 = vadd.f32 %v10727_v17, %v4369_v52 }
 0x853   : > { %5833 = vmatpush.msra.mxu1 %v5132_v59  ;;  %5852 = vmatpush.msra.mxu2 %v5200_v39  ;;  %v5180_v57 = vld [vmem:[%s13792_s4 + $0x1080] sm:$0xff] }
 0x854   : > { %5872 = vmatpush.msra.mxu3 %v5264_v33  ;;  %7578 = vmatmul.msk.f32.vlgmr.msrb.gmra.mxu2 %vm4623_vm1, %v10700_v53  ;;  %v10717_v42 = vrot.slane %v10700_v53, 1  ;;  %v10720_v28 = vrot.slane %v10700_v53, 2  ;;  %v5244_v0 = vld [vmem:[%s13792_s4 + $0x1280] sm:$0xff]  ;;  %v4370_v7 = vadd.f32 %v10498_v21, %v4304_v61 }
 0x855   : > { %5834 = vmatpush.msra.mxu1 %v5128_v43  ;;  %5853 = vmatpush.msra.mxu2 %v5196_v47  ;;  %v5596_v50 = vld [vmem:[%s13792_s4 + $0x1d80] sm:$0xff] }
 0x856   : > { %5873 = vmatpush.msra.mxu3 %v5260_v46  ;;  %7580 = vmatmul.msk.f32.vlgmr.msrb.gmra.mxu0 %vm4623_vm1, %v10720_v28  ;;  %v5108_v13 = vld [vmem:[%s13792_s4 + $0xe40] sm:$0xff]  ;;  %v10827_v46 = vrot.slane %v10700_v53, 3 }
 0x857   : > { %7579 = vmatmul.msk.f32.vlgmr.msrb.gmra.mxu3 %vm4623_vm1, %v10717_v42  ;;  %5835 = vmatpush.msra.mxu1 %v5124_v30  ;;  %v4562_v9 = vpop.f32.mrf.mxu3  ;;  %v5176_v11 = vld [vmem:[%s13792_s4 + $0x1060] sm:$0xff]  ;;  %v4511_v30 = vadd.f32 %v4499_v4, %v4445_v40 }
 0x858   : > { %5854 = vmatpush.msra.mxu2 %v5192_v14  ;;  %5874 = vmatpush.msra.mxu3 %v5256_v36  ;;  %v4576_v12 = vadd.f32 %v4562_v9, %v4510_v58  ;;  %v5240_v29 = vld [vmem:[%s13792_s4 + $0x1260] sm:$0xff]  ;;  %v4502_v14 = vpop.f32.mrf.mxu2 }
 0x859   : > { %5966 = vmatpush.msrb.mxu0 %v5608_v34  ;;  %5836 = vmatpush.msra.mxu1 %v5120_v48  ;;  %v5592_v6 = vld [vmem:[%s13792_s4 + $0x1d60] sm:$0xff]  ;;  %v4436_v62 = vpop.f32.mrf.mxu1 }
 0x85a   : > { %v4584_v10 = vmax.f32 %v4576_v12, 0.0  ;;  %5855 = vmatpush.msra.mxu2 %v5188_v20  ;;  %5875 = vmatpush.msra.mxu3 %v5252_v3  ;;  %v5104_v63 = vld [vmem:[%s13792_s4 + $0xe20] sm:$0xff]  ;;  %v4446_v43 = vadd.f32 %v4436_v62, %v4370_v7 }
 0x85b   : > { %5967 = vmatpush.msrb.mxu0 %v5604_v26  ;;  %5837 = vmatpush.msra.mxu1 %v5116_v19  ;;  %v5172_v54 = vld [vmem:[%s13792_s4 + $0x1040] sm:$0xff] }
 0x85c   : > { %v4589_v38 = vmax.f32 %v4583_v18, %v4584_v10  ;;  %5856 = vmatpush.msra.mxu2 %v5184_v15  ;;  %5876 = vmatpush.msra.mxu3 %v5248_v49  ;;  %v5236_v55 = vld [vmem:[%s13792_s4 + $0x1240] sm:$0xff]  ;;  %v4512_v9 = vadd.f32 %v4502_v14, %v4446_v43  ;;  %v4841_v43 = vld [vmem:[%s13792_s4 + $0x5e8] sm:$0xff] }
 0x85d   : > { %5968 = vmatpush.msrb.mxu0 %v5600_v35  ;;  %5838 = vmatpush.msra.mxu1 %v5112_v23  ;;  %v5588_v39 = vld [vmem:[%s13792_s4 + $0x1d40] sm:$0xff] }
 0x85e   : > { %v4602_v2 = vperm.slane %v4589_v38, %v13926_v22  ;;  %5857 = vmatpush.msra.mxu2 %v5180_v57  ;;  %5877 = vmatpush.msra.mxu3 %v5244_v0  ;;  %v5100_v32 = vld [vmem:[%s13792_s4 + $0xe00] sm:$0xff] }
 0x85f   : > { %5969 = vmatpush.msrb.mxu0 %v5596_v50  ;;  %5839 = vmatpush.msra.mxu1 %v5108_v13  ;;  %v4565_v41 = vpop.f32.mrf.mxu3  ;;  %v5168_v33 = vld [vmem:[%s13792_s4 + $0x1020] sm:$0xff] }
 0x860   : > { %v4613_v59 = vrot.slane %v4602_v2, 4  ;;  %5858 = vmatpush.msra.mxu2 %v5176_v11  ;;  %5878 = vmatpush.msra.mxu3 %v5240_v29  ;;  %v5232_v21 = vld [vmem:[%s13792_s4 + $0x1220] sm:$0xff]  ;;  %v4577_v44 = vadd.f32 %v4565_v41, %v4511_v30 }
 0x861   : > { %5970 = vmatpush.msrb.mxu0 %v5592_v6  ;;  %5840 = vmatpush.msra.mxu1 %v5104_v63  ;;  %v5584_v47 = vld [vmem:[%s13792_s4 + $0x1d20] sm:$0xff] }
 0x862   : > { %v10821_v37 = vmax.f32 %v4602_v2, %v4613_v59  ;;  %5859 = vmatpush.msra.mxu2 %v5172_v54  ;;  %5879 = vmatpush.msra.mxu3 %v5236_v55  ;;  %v5416_v27 = vld [vmem:[%s13792_s4 + $0x17e0] sm:$0xff]  ;;  %v4585_v19 = vmax.f32 %v4577_v44, 0.0  ;;  %v4833_v44 = vld [vmem:[%s13792_s4 + $0x5a8] sm:$0xff] }
 0x863   : > { %5971 = vmatpush.msrb.mxu0 %v5588_v39  ;;  %5841 = vmatpush.msra.mxu1 %v5100_v32  ;;  %v5164_v1 = vld [vmem:[%s13792_s4 + $0x1000] sm:$0xff] }
 0x864   : > { %5860 = vmatpush.msra.mxu2 %v5168_v33  ;;  %5880 = vmatpush.msra.mxu3 %v5232_v21  ;;  %v5228_v5 = vld [vmem:[%s13792_s4 + $0x1200] sm:$0xff]  ;;  %v10853_v58 = vrot.slane %v10821_v37, 1  ;;  %v10856_v48 = vrot.slane %v10821_v37, 2 }
 0x865   : > { %v5580_v17 = vld [vmem:[%s13792_s4 + $0x1d00] sm:$0xff]  ;;  %5972 = vmatpush.msrb.mxu0 %v5584_v47  ;;  %7581 = vmatmul.msk.f32.vlgmr.msra.gmra.mxu1 %vm4623_vm1, %v10827_v46 }
 0x866   : > { %v5412_v36 = vld [vmem:[%s13792_s4 + $0x17c0] sm:$0xff]  ;;  %5906 = vmatpush.msrb.mxu1 %v5416_v27  ;;  %5861 = vmatpush.msra.mxu2 %v5164_v1 }
 0x867   : > { %v5480_v45 = vld [vmem:[%s13792_s4 + $0x19e0] sm:$0xff]  ;;  %5881 = vmatpush.msra.mxu3 %v5228_v5  ;;  %5973 = vmatpush.msrb.mxu0 %v5580_v17  ;;  %v4568_v20 = vpop.f32.mrf.mxu3  ;;  %v4837_v5 = vld [vmem:[%s13792_s4 + $0x5c8] sm:$0xff] }
 0x868   : > { %v5544_v34 = vld [vmem:[%s13792_s4 + $0x1be0] sm:$0xff]  ;;  %7582 = vmatmul.msk.f32.vlgmr.msra.gmra.mxu2 %vm4623_vm1, %v10821_v37  ;;  %5907 = vmatpush.msrb.mxu1 %v5412_v36  ;;  %v4578_v24 = vadd.f32 %v4568_v20, %v4512_v9  ;;  %v4829_v20 = vld [vmem:[%s13792_s4 + $0x588] sm:$0xff] }
 0x869   : > { %v5576_v3 = vld [vmem:[%s13792_s4 + $0x1ce0] sm:$0xff]  ;;  %5926 = vmatpush.msrb.mxu2 %v5480_v45  ;;  %5946 = vmatpush.msrb.mxu3 %v5544_v34 }
 0x86a   : > { %v5408_v25 = vld [vmem:[%s13792_s4 + $0x17a0] sm:$0xff]  ;;  %7583 = vmatmul.msk.f32.vlgmr.msra.gmra.mxu3 %vm4623_vm1, %v10853_v58  ;;  %7584 = vmatmul.msk.f32.vlgmr.msra.gmra.mxu0 %vm4623_vm1, %v10856_v48  ;;  %v4586_v15 = vmax.f32 %v4578_v24, 0.0 }
 0x86b   : > { %v5476_v12 = vld [vmem:[%s13792_s4 + $0x19c0] sm:$0xff]  ;;  %5974 = vmatpush.msrb.mxu0 %v5576_v3  ;;  %5908 = vmatpush.msrb.mxu1 %v5408_v25 }
 0x86c   : > { %v5540_v26 = vld [vmem:[%s13792_s4 + $0x1bc0] sm:$0xff]  ;;  %v4590_v35 = vmax.f32 %v4585_v19, %v4586_v15  ;;  %5927 = vmatpush.msrb.mxu2 %v5476_v12  ;;  %v4825_v12 = vld [vmem:[%s13792_s4 + $0x568] sm:$0xff] }
 0x86d   : > { %v5572_v49 = vld [vmem:[%s13792_s4 + $0x1cc0] sm:$0xff]  ;;  %5947 = vmatpush.msrb.mxu3 %v5540_v26 }
 0x86e   : > { %v5404_v8 = vld [vmem:[%s13792_s4 + $0x1780] sm:$0xff]  ;;  %5975 = vmatpush.msrb.mxu0 %v5572_v49  ;;  %v4606_v60 = vperm.slane %v4590_v35, %v13926_v22  ;;  %v4821_v49 = vld [vmem:[%s13792_s4 + $0x548] sm:$0xff] }
 0x86f   : > { %v5472_v18 = vld [vmem:[%s13792_s4 + $0x19a0] sm:$0xff]  ;;  %5909 = vmatpush.msrb.mxu1 %v5404_v8  ;;  %v4817_v35 = vld [vmem:[%s13792_s4 + $0x528] sm:$0xff] }
 0x870   : > { %v5536_v10 = vld [vmem:[%s13792_s4 + $0x1ba0] sm:$0xff]  ;;  %5928 = vmatpush.msrb.mxu2 %v5472_v18  ;;  %v4614_v11 = vrot.slane %v4606_v60, 4 }
 0x871   : > { %v5568_v23 = vld [vmem:[%s13792_s4 + $0x1ca0] sm:$0xff]  ;;  %5948 = vmatpush.msrb.mxu3 %v5536_v10 }
 0x872   : > { %v5400_v4 = vld [vmem:[%s13792_s4 + $0x1760] sm:$0xff]  ;;  %5976 = vmatpush.msrb.mxu0 %v5568_v23  ;;  %v10937_v54 = vmax.f32 %v4606_v60, %v4614_v11  ;;  %v4813_v60 = vld [vmem:[%s13792_s4 + $0x508] sm:$0xff] }
 0x873   : > { %v5468_v57 = vld [vmem:[%s13792_s4 + $0x1980] sm:$0xff]  ;;  %5910 = vmatpush.msrb.mxu1 %v5400_v4  ;;  %v11047_v4 = vrot.slane %v10821_v37, 3  ;;  %v4809_v11 = vld [vmem:[%s13792_s4 + $0x4e8] sm:$0xff] }
 0x874   : > { %v5532_v0 = vld [vmem:[%s13792_s4 + $0x1b80] sm:$0xff]  ;;  %5929 = vmatpush.msrb.mxu2 %v5468_v57  ;;  %v10967_v47 = vrot.slane %v10937_v54, 2 }
 0x875   : > { %v5564_v38 = vld [vmem:[%s13792_s4 + $0x1c80] sm:$0xff]  ;;  %5949 = vmatpush.msrb.mxu3 %v5532_v0 }
 0x876   : > { %v5396_v50 = vld [vmem:[%s13792_s4 + $0x1740] sm:$0xff]  ;;  %5977 = vmatpush.msrb.mxu0 %v5564_v38 }
 0x877   : > { %v5464_v13 = vld [vmem:[%s13792_s4 + $0x1960] sm:$0xff]  ;;  %5911 = vmatpush.msrb.mxu1 %v5396_v50  ;;  %v11064_v50 = vrot.slane %v10937_v54, 1 }
 0x878   : > { %v5528_v22 = vld [vmem:[%s13792_s4 + $0x1b60] sm:$0xff]  ;;  %5930 = vmatpush.msrb.mxu2 %v5464_v13  ;;  %v4713_v13 = vld [vmem:[%s13792_s4 + $0x1e8] sm:$0xff] }
 0x879   : > { %v5560_v29 = vld [vmem:[%s13792_s4 + $0x1c60] sm:$0xff]  ;;  %5950 = vmatpush.msrb.mxu3 %v5528_v22  ;;  %v4777_v22 = vld [vmem:[%s13792_s4 + $0x3e8] sm:$0xff] }
 0x87a   : > { %v5392_v52 = vld [vmem:[%s13792_s4 + $0x1720] sm:$0xff]  ;;  %5978 = vmatpush.msrb.mxu0 %v5560_v29 }
 0x87b   : > { %v5460_v61 = vld [vmem:[%s13792_s4 + $0x1940] sm:$0xff]  ;;  %5912 = vmatpush.msrb.mxu1 %v5392_v52  ;;  %v4709_v52 = vld [vmem:[%s13792_s4 + $0x1c8] sm:$0xff] }
 0x87c   : > { %v5524_v2 = vld [vmem:[%s13792_s4 + $0x1b40] sm:$0xff]  ;;  %5931 = vmatpush.msrb.mxu2 %v5460_v61  ;;  %v4773_v61 = vld [vmem:[%s13792_s4 + $0x3c8] sm:$0xff] }
 0x87d   : > { %v5556_v6 = vld [vmem:[%s13792_s4 + $0x1c40] sm:$0xff]  ;;  %5951 = vmatpush.msrb.mxu3 %v5524_v2  ;;  %v4805_v2 = vld [vmem:[%s13792_s4 + $0x4c8] sm:$0xff] }
 0x87e   : > { %v5388_v63 = vld [vmem:[%s13792_s4 + $0x1700] sm:$0xff]  ;;  %5979 = vmatpush.msrb.mxu0 %v5556_v6 }
 0x87f   : > { %v5456_v62 = vld [vmem:[%s13792_s4 + $0x1920] sm:$0xff]  ;;  %5913 = vmatpush.msrb.mxu1 %v5388_v63  ;;  %v4705_v63 = vld [vmem:[%s13792_s4 + $0x1a8] sm:$0xff] }
 0x880   : > { %v5520_v41 = vld [vmem:[%s13792_s4 + $0x1b20] sm:$0xff]  ;;  %5932 = vmatpush.msrb.mxu2 %v5456_v62  ;;  %v4769_v62 = vld [vmem:[%s13792_s4 + $0x3a8] sm:$0xff] }
 0x881   : > { %v5552_v55 = vld [vmem:[%s13792_s4 + $0x1c20] sm:$0xff]  ;;  %5952 = vmatpush.msrb.mxu3 %v5520_v41  ;;  %v4801_v41 = vld [vmem:[%s13792_s4 + $0x4a8] sm:$0xff] }
 0x882   : > { %v5384_v7 = vld [vmem:[%s13792_s4 + $0x16e0] sm:$0xff]  ;;  %5980 = vmatpush.msrb.mxu0 %v5552_v55 }
 0x883   : > { %v5452_v40 = vld [vmem:[%s13792_s4 + $0x1900] sm:$0xff]  ;;  %5914 = vmatpush.msrb.mxu1 %v5384_v7  ;;  %v4701_v7 = vld [vmem:[%s13792_s4 + $0x188] sm:$0xff] }
 0x884   : > { %v5516_v59 = vld [vmem:[%s13792_s4 + $0x1b00] sm:$0xff]  ;;  %5933 = vmatpush.msrb.mxu2 %v5452_v40  ;;  %v4765_v40 = vld [vmem:[%s13792_s4 + $0x388] sm:$0xff] }
 0x885   : > { %v5548_v39 = vld [vmem:[%s13792_s4 + $0x1c00] sm:$0xff]  ;;  %5953 = vmatpush.msrb.mxu3 %v5516_v59  ;;  %v4797_v59 = vld [vmem:[%s13792_s4 + $0x488] sm:$0xff] }
 0x886   : > { %v5380_v32 = vld [vmem:[%s13792_s4 + $0x16c0] sm:$0xff]  ;;  %5981 = vmatpush.msrb.mxu0 %v5548_v39 }
 0x887   : > { %v5448_v33 = vld [vmem:[%s13792_s4 + $0x18e0] sm:$0xff]  ;;  %5915 = vmatpush.msrb.mxu1 %v5380_v32  ;;  %7588 = vmatmul.msk.f32.vlgmr.msrb.gmra.mxu0 %vm4623_vm1, %v10967_v47  ;;  %v4697_v32 = vld [vmem:[%s13792_s4 + $0x168] sm:$0xff] }
 0x888   : > { %v5512_v21 = vld [vmem:[%s13792_s4 + $0x1ae0] sm:$0xff]  ;;  %5934 = vmatpush.msrb.mxu2 %v5448_v33  ;;  %6046 = vmatpush.msra.mxu0 %v4841_v43  ;;  %v4761_v33 = vld [vmem:[%s13792_s4 + $0x368] sm:$0xff] }
 0x889   : > { %v5376_v27 = vld [vmem:[%s13792_s4 + $0x16a0] sm:$0xff]  ;;  %5954 = vmatpush.msrb.mxu3 %v5512_v21  ;;  %v4793_v21 = vld [vmem:[%s13792_s4 + $0x468] sm:$0xff] }
 0x88a   : > { %v5444_v1 = vld [vmem:[%s13792_s4 + $0x18c0] sm:$0xff]  ;;  %5916 = vmatpush.msrb.mxu1 %v5376_v27  ;;  %6047 = vmatpush.msra.mxu0 %v4837_v5  ;;  %v4693_v27 = vld [vmem:[%s13792_s4 + $0x148] sm:$0xff] }
 0x88b   : > { %v5508_v30 = vld [vmem:[%s13792_s4 + $0x1ac0] sm:$0xff]  ;;  %5935 = vmatpush.msrb.mxu2 %v5444_v1  ;;  %v4757_v1 = vld [vmem:[%s13792_s4 + $0x348] sm:$0xff] }
 0x88c   : > { %v5372_v17 = vld [vmem:[%s13792_s4 + $0x1680] sm:$0xff]  ;;  %5955 = vmatpush.msrb.mxu3 %v5508_v30  ;;  %6048 = vmatpush.msra.mxu0 %v4833_v44  ;;  %v4789_v30 = vld [vmem:[%s13792_s4 + $0x448] sm:$0xff] }
 0x88d   : > { %v5440_v14 = vld [vmem:[%s13792_s4 + $0x18a0] sm:$0xff]  ;;  %5917 = vmatpush.msrb.mxu1 %v5372_v17  ;;  %v4689_v17 = vld [vmem:[%s13792_s4 + $0x128] sm:$0xff] }
 0x88e   : > { %v5504_v36 = vld [vmem:[%s13792_s4 + $0x1aa0] sm:$0xff]  ;;  %5936 = vmatpush.msrb.mxu2 %v5440_v14  ;;  %6049 = vmatpush.msra.mxu0 %v4829_v20  ;;  %v4753_v14 = vld [vmem:[%s13792_s4 + $0x328] sm:$0xff] }
 0x88f   : > { %v5368_v45 = vld [vmem:[%s13792_s4 + $0x1660] sm:$0xff]  ;;  %5956 = vmatpush.msrb.mxu3 %v5504_v36  ;;  %v4785_v36 = vld [vmem:[%s13792_s4 + $0x428] sm:$0xff] }
 0x890   : > { %v5436_v34 = vld [vmem:[%s13792_s4 + $0x1880] sm:$0xff]  ;;  %5918 = vmatpush.msrb.mxu1 %v5368_v45  ;;  %6050 = vmatpush.msra.mxu0 %v4825_v12  ;;  %v4685_v45 = vld [vmem:[%s13792_s4 + $0x108] sm:$0xff] }
 0x891   : > { %v5500_v9 = vld [vmem:[%s13792_s4 + $0x1a80] sm:$0xff]  ;;  %5937 = vmatpush.msrb.mxu2 %v5436_v34  ;;  %v4749_v34 = vld [vmem:[%s13792_s4 + $0x308] sm:$0xff] }
 0x892   : > { %v5364_v3 = vld [vmem:[%s13792_s4 + $0x1640] sm:$0xff]  ;;  %5957 = vmatpush.msrb.mxu3 %v5500_v9  ;;  %6051 = vmatpush.msra.mxu0 %v4821_v49  ;;  %v4781_v9 = vld [vmem:[%s13792_s4 + $0x408] sm:$0xff] }
 0x893   : > { %v5432_v24 = vld [vmem:[%s13792_s4 + $0x1860] sm:$0xff]  ;;  %5919 = vmatpush.msrb.mxu1 %v5364_v3  ;;  %v4681_v3 = vld [vmem:[%s13792_s4 + $0xe8] sm:$0xff] }
 0x894   : > { %v5496_v25 = vld [vmem:[%s13792_s4 + $0x1a60] sm:$0xff]  ;;  %5938 = vmatpush.msrb.mxu2 %v5432_v24  ;;  %6052 = vmatpush.msra.mxu0 %v4817_v35  ;;  %v4745_v24 = vld [vmem:[%s13792_s4 + $0x2e8] sm:$0xff] }
 0x895   : > { %v5360_v26 = vld [vmem:[%s13792_s4 + $0x1620] sm:$0xff]  ;;  %5958 = vmatpush.msrb.mxu3 %v5496_v25  ;;  %v5097_v12 = vld [vmem:[%s13792_s4 + $0xde8] sm:$0xff] }
 0x896   : > { %v5428_v19 = vld [vmem:[%s13792_s4 + $0x1840] sm:$0xff]  ;;  %5920 = vmatpush.msrb.mxu1 %v5360_v26  ;;  %6053 = vmatpush.msra.mxu0 %v4813_v60  ;;  %v4677_v26 = vld [vmem:[%s13792_s4 + $0xc8] sm:$0xff] }
 0x897   : > { %v5492_v15 = vld [vmem:[%s13792_s4 + $0x1a40] sm:$0xff]  ;;  %5939 = vmatpush.msrb.mxu2 %v5428_v19  ;;  %v4741_v19 = vld [vmem:[%s13792_s4 + $0x2c8] sm:$0xff] }
 0x898   : > { %v5356_v8 = vld [vmem:[%s13792_s4 + $0x1600] sm:$0xff]  ;;  %5959 = vmatpush.msrb.mxu3 %v5492_v15  ;;  %6054 = vmatpush.msra.mxu0 %v4809_v11  ;;  %v5093_v49 = vld [vmem:[%s13792_s4 + $0xdc8] sm:$0xff] }
 0x899   : > { %v5424_v18 = vld [vmem:[%s13792_s4 + $0x1820] sm:$0xff]  ;;  %5921 = vmatpush.msrb.mxu1 %v5356_v8  ;;  %v4673_v8 = vld [vmem:[%s13792_s4 + $0xa8] sm:$0xff] }
 0x89a   : > { %v5488_v10 = vld [vmem:[%s13792_s4 + $0x1a20] sm:$0xff]  ;;  %5940 = vmatpush.msrb.mxu2 %v5424_v18  ;;  %7585 = vmatmul.msk.f32.vlgmr.msrb.gmra.mxu1 %vm4623_vm1, %v11047_v4  ;;  %v4737_v18 = vld [vmem:[%s13792_s4 + $0x2a8] sm:$0xff] }
 0x89b   : > { %v5420_v23 = vld [vmem:[%s13792_s4 + $0x1800] sm:$0xff]  ;;  %5960 = vmatpush.msrb.mxu3 %v5488_v10  ;;  %6055 = vmatpush.msra.mxu0 %v4805_v2  ;;  %v5089_v35 = vld [vmem:[%s13792_s4 + $0xda8] sm:$0xff] }
 0x89c   : > { %v5672_v57 = vld [vmem:[%s13792_s4 + $0x1fe0] sm:$0xff]  ;;  %5941 = vmatpush.msrb.mxu2 %v5420_v23  ;;  %v4669_v23 = vld [vmem:[%s13792_s4 + $0x88] sm:$0xff] }
 0x89d   : > { %v5484_v0 = vld [vmem:[%s13792_s4 + $0x1a00] sm:$0xff]  ;;  %5986 = vmatpush.msra.mxu1 %v5672_v57  ;;  %7586 = vmatmul.msk.f32.vlgmr.msrb.gmra.mxu2 %vm4623_vm1, %v10937_v54  ;;  %v4733_v57 = vld [vmem:[%s13792_s4 + $0x288] sm:$0xff] }
 0x89e   : > { %v5668_v38 = vld [vmem:[%s13792_s4 + $0x1fc0] sm:$0xff]  ;;  %5961 = vmatpush.msrb.mxu3 %v5484_v0  ;;  %6006 = vmatpush.msra.mxu2 %v4713_v13  ;;  %v5085_v60 = vld [vmem:[%s13792_s4 + $0xd88] sm:$0xff] }
 0x89f   : > { %v5664_v29 = vld [vmem:[%s13792_s4 + $0x1fa0] sm:$0xff]  ;;  %7587 = vmatmul.msk.f32.vlgmr.msrb.gmra.mxu3 %vm4623_vm1, %v11064_v50  ;;  %5987 = vmatpush.msra.mxu1 %v5668_v38  ;;  %v4665_v38 = vld [vmem:[%s13792_s4 + $0x68] sm:$0xff] }
 0x8a0   : > { %6026 = vmatpush.msra.mxu3 %v4777_v22  ;;  %v5660_v6 = vld [vmem:[%s13792_s4 + $0x1f80] sm:$0xff]  ;;  %6007 = vmatpush.msra.mxu2 %v4709_v52  ;;  %v4729_v13 = vld [vmem:[%s13792_s4 + $0x268] sm:$0xff] }
 0x8a1   : > { %5988 = vmatpush.msra.mxu1 %v5664_v29  ;;  %v5656_v55 = vld [vmem:[%s13792_s4 + $0x1f60] sm:$0xff]  ;;  %6056 = vmatpush.msra.mxu0 %v4801_v41  ;;  %v5081_v11 = vld [vmem:[%s13792_s4 + $0xd68] sm:$0xff]  ;;  %v11250_v41 = vrot.slane %v10937_v54, 3 }
 0x8a2   : > { %6027 = vmatpush.msra.mxu3 %v4773_v61  ;;  %6008 = vmatpush.msra.mxu2 %v4705_v63  ;;  %v5652_v39 = vld [vmem:[%s13792_s4 + $0x1f40] sm:$0xff]  ;;  %v4661_v29 = vld [vmem:[%s13792_s4 + $0x48] sm:$0xff] }
 0x8a3   : > { %5989 = vmatpush.msra.mxu1 %v5660_v6  ;;  %v5648_v43 = vld [vmem:[%s13792_s4 + $0x1f20] sm:$0xff]  ;;  %6057 = vmatpush.msra.mxu0 %v4797_v59  ;;  %v4725_v52 = vld [vmem:[%s13792_s4 + $0x248] sm:$0xff] }
 0x8a4   : > { %6028 = vmatpush.msra.mxu3 %v4769_v62  ;;  %6009 = vmatpush.msra.mxu2 %v4701_v7  ;;  %v5644_v5 = vld [vmem:[%s13792_s4 + $0x1f00] sm:$0xff]  ;;  %v5077_v2 = vld [vmem:[%s13792_s4 + $0xd48] sm:$0xff] }
 0x8a5   : > { %5990 = vmatpush.msra.mxu1 %v5656_v55  ;;  %6058 = vmatpush.msra.mxu0 %v4793_v21  ;;  %v5640_v44 = vld [vmem:[%s13792_s4 + $0x1ee0] sm:$0xff]  ;;  %v4657_v6 = vld [vmem:[%s13792_s4 + $0x28] sm:$0xff] }
 0x8a6   : > { %6029 = vmatpush.msra.mxu3 %v4765_v40  ;;  %6010 = vmatpush.msra.mxu2 %v4697_v32  ;;  %v5636_v20 = vld [vmem:[%s13792_s4 + $0x1ec0] sm:$0xff]  ;;  %v4721_v63 = vld [vmem:[%s13792_s4 + $0x228] sm:$0xff] }
 0x8a7   : > { %5991 = vmatpush.msra.mxu1 %v5652_v39  ;;  %6059 = vmatpush.msra.mxu0 %v4789_v30  ;;  %v5632_v25 = vld [vmem:[%s13792_s4 + $0x1ea0] sm:$0xff]  ;;  %v5073_v62 = vld [vmem:[%s13792_s4 + $0xd28] sm:$0xff] }
 0x8a8   : > { %6030 = vmatpush.msra.mxu3 %v4761_v33  ;;  %6011 = vmatpush.msra.mxu2 %v4693_v27  ;;  %v5628_v15 = vld [vmem:[%s13792_s4 + $0x1e80] sm:$0xff]  ;;  %v4905_v55 = vld [vmem:[%s13792_s4 + $0x7e8] sm:$0xff] }
 0x8a9   : > { %5992 = vmatpush.msra.mxu1 %v5648_v43  ;;  %6060 = vmatpush.msra.mxu0 %v4785_v36  ;;  %v5624_v10 = vld [vmem:[%s13792_s4 + $0x1e60] sm:$0xff]  ;;  %v4653_v7 = vld [vmem:[%s13792_s4 + $0x8] sm:$0xff] }
 0x8aa   : > { %6031 = vmatpush.msra.mxu3 %v4757_v1  ;;  %6012 = vmatpush.msra.mxu2 %v4689_v17  ;;  %v5620_v0 = vld [vmem:[%s13792_s4 + $0x1e40] sm:$0xff]  ;;  %v4717_v40 = vld [vmem:[%s13792_s4 + $0x208] sm:$0xff] }
 0x8ab   : > { %5993 = vmatpush.msra.mxu1 %v5644_v5  ;;  %6061 = vmatpush.msra.mxu0 %v4781_v9  ;;  %v5616_v22 = vld [vmem:[%s13792_s4 + $0x1e20] sm:$0xff]  ;;  %v5069_v59 = vld [vmem:[%s13792_s4 + $0xd08] sm:$0xff] }
 0x8ac   : > { %6032 = vmatpush.msra.mxu3 %v4753_v14  ;;  %6013 = vmatpush.msra.mxu2 %v4685_v45  ;;  %v5612_v61 = vld [vmem:[%s13792_s4 + $0x1e00] sm:$0xff]  ;;  %v4901_v39 = vld [vmem:[%s13792_s4 + $0x7c8] sm:$0xff] }
 0x8ad   : > { %5994 = vmatpush.msra.mxu1 %v5640_v44  ;;  %7592 = vmatmul.msk.f32.vlgmr.msra.gmra.mxu0 %vm4623_vm1, %v10612_v16  ;;  %v4969_v32 = vld [vmem:[%s13792_s4 + $0x9e8] sm:$0xff] }
 0x8ae   : > { %6033 = vmatpush.msra.mxu3 %v4749_v34  ;;  %6014 = vmatpush.msra.mxu2 %v4681_v3  ;;  %v5033_v33 = vld [vmem:[%s13792_s4 + $0xbe8] sm:$0xff] }
 0x8af   : > { %5995 = vmatpush.msra.mxu1 %v5636_v20  ;;  %6126 = vmatpush.msrb.mxu0 %v5097_v12  ;;  %v5065_v21 = vld [vmem:[%s13792_s4 + $0xce8] sm:$0xff] }
 0x8b0   : > { %6034 = vmatpush.msra.mxu3 %v4745_v24  ;;  %6015 = vmatpush.msra.mxu2 %v4677_v26  ;;  %v4897_v43 = vld [vmem:[%s13792_s4 + $0x7a8] sm:$0xff] }
 0x8b1   : > { %5996 = vmatpush.msra.mxu1 %v5632_v25  ;;  %6127 = vmatpush.msrb.mxu0 %v5093_v49  ;;  %v4965_v27 = vld [vmem:[%s13792_s4 + $0x9c8] sm:$0xff] }
 0x8b2   : > { %6035 = vmatpush.msra.mxu3 %v4741_v19  ;;  %6016 = vmatpush.msra.mxu2 %v4673_v8  ;;  %v5029_v1 = vld [vmem:[%s13792_s4 + $0xbc8] sm:$0xff] }
 0x8b3   : > { %5997 = vmatpush.msra.mxu1 %v5628_v15  ;;  %6128 = vmatpush.msrb.mxu0 %v5089_v35  ;;  %v5061_v30 = vld [vmem:[%s13792_s4 + $0xcc8] sm:$0xff] }
 0x8b4   : > { %6036 = vmatpush.msra.mxu3 %v4737_v18  ;;  %6017 = vmatpush.msra.mxu2 %v4669_v23  ;;  %v4893_v5 = vld [vmem:[%s13792_s4 + $0x788] sm:$0xff] }
 0x8b5   : > { %5998 = vmatpush.msra.mxu1 %v5624_v10  ;;  %6129 = vmatpush.msrb.mxu0 %v5085_v60  ;;  %v4961_v17 = vld [vmem:[%s13792_s4 + $0x9a8] sm:$0xff] }
 0x8b6   : > { %6037 = vmatpush.msra.mxu3 %v4733_v57  ;;  %6018 = vmatpush.msra.mxu2 %v4665_v38  ;;  %v5025_v14 = vld [vmem:[%s13792_s4 + $0xba8] sm:$0xff] }
 0x8b7   : > { %5999 = vmatpush.msra.mxu1 %v5620_v0  ;;  %6130 = vmatpush.msrb.mxu0 %v5081_v11  ;;  %v5057_v36 = vld [vmem:[%s13792_s4 + $0xca8] sm:$0xff] }
 0x8b8   : > { %6038 = vmatpush.msra.mxu3 %v4729_v13  ;;  %6019 = vmatpush.msra.mxu2 %v4661_v29  ;;  %v4889_v44 = vld [vmem:[%s13792_s4 + $0x768] sm:$0xff] }
 0x8b9   : > { %6000 = vmatpush.msra.mxu1 %v5616_v22  ;;  %6131 = vmatpush.msrb.mxu0 %v5077_v2  ;;  %v4957_v45 = vld [vmem:[%s13792_s4 + $0x988] sm:$0xff] }
 0x8ba   : > { %6039 = vmatpush.msra.mxu3 %v4725_v52  ;;  %6020 = vmatpush.msra.mxu2 %v4657_v6  ;;  %v5021_v34 = vld [vmem:[%s13792_s4 + $0xb88] sm:$0xff] }
 0x8bb   : > { %6001 = vmatpush.msra.mxu1 %v5612_v61  ;;  %6132 = vmatpush.msrb.mxu0 %v5073_v62  ;;  %v5053_v9 = vld [vmem:[%s13792_s4 + $0xc88] sm:$0xff] }
 0x8bc   : > { %6040 = vmatpush.msra.mxu3 %v4721_v63  ;;  %7589 = vmatmul.msk.f32.vlgmr.msra.gmra.mxu1 %vm4623_vm1, %v11250_v41  ;;  %v4885_v20 = vld [vmem:[%s13792_s4 + $0x748] sm:$0xff] }
 0x8bd   : > { %6066 = vmatpush.msrb.mxu1 %v4905_v55  ;;  %6021 = vmatpush.msra.mxu2 %v4653_v7  ;;  %v4953_v3 = vld [vmem:[%s13792_s4 + $0x968] sm:$0xff] }
 0x8be   : > { %6041 = vmatpush.msra.mxu3 %v4717_v40  ;;  %6133 = vmatpush.msrb.mxu0 %v5069_v59  ;;  %v5017_v24 = vld [vmem:[%s13792_s4 + $0xb68] sm:$0xff]  ;;  %v5676_v40 = vld [vmem:[%s13793_s5] sm:$0xf] }
 0x8bf   : > { %7590 = vmatmul.msk.f32.vlgmr.msra.gmra.mxu2 %vm4623_vm1, %v10599_v31  ;;  %7591 = vmatmul.msk.f32.vlgmr.msra.gmra.mxu3 %vm4623_vm1, %v10609_v51  ;;  %v5049_v25 = vld [vmem:[%s13792_s4 + $0xc68] sm:$0xff] }
 0x8c0   : > { %6067 = vmatpush.msrb.mxu1 %v4901_v39  ;;  %6086 = vmatpush.msrb.mxu2 %v4969_v32  ;;  %v4881_v12 = vld [vmem:[%s13792_s4 + $0x728] sm:$0xff] }
 0x8c1   : > { %6106 = vmatpush.msrb.mxu3 %v5033_v33  ;;  %6134 = vmatpush.msrb.mxu0 %v5065_v21  ;;  %v4949_v26 = vld [vmem:[%s13792_s4 + $0x948] sm:$0xff]  ;;  %v5703_v21 = vpop.f32.mrf.mxu1 }
 0x8c2   : > { %6068 = vmatpush.msrb.mxu1 %v4897_v43  ;;  %6087 = vmatpush.msrb.mxu2 %v4965_v27  ;;  %v5013_v19 = vld [vmem:[%s13792_s4 + $0xb48] sm:$0xff] }
 0x8c3   : > { %6107 = vmatpush.msrb.mxu3 %v5029_v1  ;;  %6135 = vmatpush.msrb.mxu0 %v5061_v30  ;;  %v5045_v15 = vld [vmem:[%s13792_s4 + $0xc48] sm:$0xff]  ;;  %v5678_v1 = vperm.slane %v5676_v40, 0 }
 0x8c4   : > { %6069 = vmatpush.msrb.mxu1 %v4893_v5  ;;  %6088 = vmatpush.msrb.mxu2 %v4961_v17  ;;  %v4877_v49 = vld [vmem:[%s13792_s4 + $0x708] sm:$0xff] }
 0x8c5   : > { %6108 = vmatpush.msrb.mxu3 %v5025_v14  ;;  %6136 = vmatpush.msrb.mxu0 %v5057_v36  ;;  %v4945_v8 = vld [vmem:[%s13792_s4 + $0x928] sm:$0xff] }
 0x8c6   : > { %6070 = vmatpush.msrb.mxu1 %v4889_v44  ;;  %6089 = vmatpush.msrb.mxu2 %v4957_v45  ;;  %v5009_v18 = vld [vmem:[%s13792_s4 + $0xb28] sm:$0xff] }
 0x8c7   : > { %6109 = vmatpush.msrb.mxu3 %v5021_v34  ;;  %6137 = vmatpush.msrb.mxu0 %v5053_v9  ;;  %v5041_v10 = vld [vmem:[%s13792_s4 + $0xc28] sm:$0xff]  ;;  %v5704_v34 = vadd.f32 %v5703_v21, %v5678_v1 }
 0x8c8   : > { %6071 = vmatpush.msrb.mxu1 %v4885_v20  ;;  %6090 = vmatpush.msrb.mxu2 %v4953_v3  ;;  %v4873_v35 = vld [vmem:[%s13792_s4 + $0x6e8] sm:$0xff] }
 0x8c9   : > { %6110 = vmatpush.msrb.mxu3 %v5017_v24  ;;  %6138 = vmatpush.msrb.mxu0 %v5049_v25  ;;  %v4941_v23 = vld [vmem:[%s13792_s4 + $0x908] sm:$0xff]  ;;  %v5723_v3 = vpop.f32.mrf.mxu2 }
 0x8ca   : > { %6072 = vmatpush.msrb.mxu1 %v4881_v12  ;;  %6091 = vmatpush.msrb.mxu2 %v4949_v26  ;;  %v5005_v57 = vld [vmem:[%s13792_s4 + $0xb08] sm:$0xff]  ;;  %v5724_v12 = vadd.f32 %v5723_v3, %v5704_v34 }
 0x8cb   : > { %6111 = vmatpush.msrb.mxu3 %v5013_v19  ;;  %6139 = vmatpush.msrb.mxu0 %v5045_v15  ;;  %v5037_v0 = vld [vmem:[%s13792_s4 + $0xc08] sm:$0xff]  ;;  %v5743_v19 = vpop.f32.mrf.mxu3 }
 0x8cc   : > { %6073 = vmatpush.msrb.mxu1 %v4877_v49  ;;  %6092 = vmatpush.msrb.mxu2 %v4945_v8  ;;  %v4869_v60 = vld [vmem:[%s13792_s4 + $0x6c8] sm:$0xff]  ;;  %v5744_v49 = vadd.f32 %v5743_v19, %v5724_v12 }
 0x8cd   : > { %6112 = vmatpush.msrb.mxu3 %v5009_v18  ;;  %6140 = vmatpush.msrb.mxu0 %v5041_v10  ;;  %v4937_v38 = vld [vmem:[%s13792_s4 + $0x8e8] sm:$0xff]  ;;  %v5763_v10 = vpop.f32.mrf.mxu1 }
 0x8ce   : > { %6074 = vmatpush.msrb.mxu1 %v4873_v35  ;;  %v5001_v13 = vld [vmem:[%s13792_s4 + $0xae8] sm:$0xff]  ;;  %6093 = vmatpush.msrb.mxu2 %v4941_v23 }
 0x8cf   : > { %6113 = vmatpush.msrb.mxu3 %v5005_v57  ;;  %v4865_v22 = vld [vmem:[%s13792_s4 + $0x6a8] sm:$0xff]  ;;  %6141 = vmatpush.msrb.mxu0 %v5037_v0  ;;  %v5764_v57 = vadd.f32 %v5763_v10, %v5744_v49 }
 0x8d0   : > { %6075 = vmatpush.msrb.mxu1 %v4869_v60  ;;  %v5353_v11 = vld [vmem:[%s13792_s4 + $0x15e8] sm:$0xff]  ;;  %6094 = vmatpush.msrb.mxu2 %v4937_v38 }
 0x8d1   : > { %v4933_v29 = vld [vmem:[%s13792_s4 + $0x8c8] sm:$0xff]  ;;  %6114 = vmatpush.msrb.mxu3 %v5001_v13  ;;  %7596 = vmatmul.msk.f32.vlgmr.msrb.gmra.mxu0 %vm4623_vm1, %v10720_v28 }
 0x8d2   : > { %v4997_v52 = vld [vmem:[%s13792_s4 + $0xac8] sm:$0xff]  ;;  %6076 = vmatpush.msrb.mxu1 %v4865_v22  ;;  %6206 = vmatpush.msra.mxu0 %v5353_v11 }
 0x8d3   : > { %v4861_v61 = vld [vmem:[%s13792_s4 + $0x688] sm:$0xff]  ;;  %6095 = vmatpush.msrb.mxu2 %v4933_v29  ;;  %6115 = vmatpush.msrb.mxu3 %v4997_v52 }
 0x8d4   : > { %v5349_v2 = vld [vmem:[%s13792_s4 + $0x15c8] sm:$0xff]  ;;  %6077 = vmatpush.msrb.mxu1 %v4861_v61 }
 0x8d5   : > { %v4929_v6 = vld [vmem:[%s13792_s4 + $0x8a8] sm:$0xff]  ;;  %6207 = vmatpush.msra.mxu0 %v5349_v2 }
 0x8d6   : > { %v4993_v63 = vld [vmem:[%s13792_s4 + $0xaa8] sm:$0xff]  ;;  %6096 = vmatpush.msrb.mxu2 %v4929_v6 }
 0x8d7   : > { %v4857_v62 = vld [vmem:[%s13792_s4 + $0x668] sm:$0xff]  ;;  %6116 = vmatpush.msrb.mxu3 %v4993_v63 }
 0x8d8   : > { %v5345_v55 = vld [vmem:[%s13792_s4 + $0x15a8] sm:$0xff]  ;;  %6078 = vmatpush.msrb.mxu1 %v4857_v62 }
 0x8d9   : > { %v4925_v7 = vld [vmem:[%s13792_s4 + $0x888] sm:$0xff]  ;;  %6208 = vmatpush.msra.mxu0 %v5345_v55 }
 0x8da   : > { %v4989_v59 = vld [vmem:[%s13792_s4 + $0xa88] sm:$0xff]  ;;  %6097 = vmatpush.msrb.mxu2 %v4925_v7 }
 0x8db   : > { %v4853_v39 = vld [vmem:[%s13792_s4 + $0x648] sm:$0xff]  ;;  %6117 = vmatpush.msrb.mxu3 %v4989_v59 }
 0x8dc   : > { %v5341_v32 = vld [vmem:[%s13792_s4 + $0x1588] sm:$0xff]  ;;  %6079 = vmatpush.msrb.mxu1 %v4853_v39 }
 0x8dd   : > { %v4921_v33 = vld [vmem:[%s13792_s4 + $0x868] sm:$0xff]  ;;  %6209 = vmatpush.msra.mxu0 %v5341_v32  ;;  %v5783_v32 = vpop.f32.mrf.mxu2 }
 0x8de   : > { %v4985_v43 = vld [vmem:[%s13792_s4 + $0xa68] sm:$0xff]  ;;  %6098 = vmatpush.msrb.mxu2 %v4921_v33 }
 0x8df   : > { %v4849_v27 = vld [vmem:[%s13792_s4 + $0x628] sm:$0xff]  ;;  %6118 = vmatpush.msrb.mxu3 %v4985_v43  ;;  %v5784_v43 = vadd.f32 %v5783_v32, %v5764_v57 }
 0x8e0   : > { %v5337_v30 = vld [vmem:[%s13792_s4 + $0x1568] sm:$0xff]  ;;  %6080 = vmatpush.msrb.mxu1 %v4849_v27 }
 0x8e1   : > { %v4917_v5 = vld [vmem:[%s13792_s4 + $0x848] sm:$0xff]  ;;  %6210 = vmatpush.msra.mxu0 %v5337_v30 }
 0x8e2   : > { %v4981_v17 = vld [vmem:[%s13792_s4 + $0xa48] sm:$0xff]  ;;  %6099 = vmatpush.msrb.mxu2 %v4917_v5 }
 0x8e3   : > { %v4845_v14 = vld [vmem:[%s13792_s4 + $0x608] sm:$0xff]  ;;  %6119 = vmatpush.msrb.mxu3 %v4981_v17  ;;  %v5803_v17 = vpop.f32.mrf.mxu3 }
 0x8e4   : > { %v5333_v36 = vld [vmem:[%s13792_s4 + $0x1548] sm:$0xff]  ;;  %6081 = vmatpush.msrb.mxu1 %v4845_v14 }
 0x8e5   : > { %v4913_v44 = vld [vmem:[%s13792_s4 + $0x828] sm:$0xff]  ;;  %6211 = vmatpush.msra.mxu0 %v5333_v36  ;;  %7593 = vmatmul.msk.f32.vlgmr.msrb.gmra.mxu1 %vm4623_vm1, %v10654_v56 }
 0x8e6   : > { %v4977_v45 = vld [vmem:[%s13792_s4 + $0xa28] sm:$0xff]  ;;  %6100 = vmatpush.msrb.mxu2 %v4913_v44  ;;  %v5804_v44 = vadd.f32 %v5803_v17, %v5784_v43 }
 0x8e7   : > { %v5329_v9 = vld [vmem:[%s13792_s4 + $0x1528] sm:$0xff]  ;;  %6120 = vmatpush.msrb.mxu3 %v4977_v45 }
 0x8e8   : > { %v5161_v20 = vld [vmem:[%s13792_s4 + $0xfe8] sm:$0xff]  ;;  %6212 = vmatpush.msra.mxu0 %v5329_v9  ;;  %v5823_v9 = vpop.f32.mrf.mxu0 }
 0x8e9   : > { %v4909_v24 = vld [vmem:[%s13792_s4 + $0x808] sm:$0xff]  ;;  %6146 = vmatpush.msra.mxu1 %v5161_v20 }
 0x8ea   : > { %v4973_v25 = vld [vmem:[%s13792_s4 + $0xa08] sm:$0xff]  ;;  %6101 = vmatpush.msrb.mxu2 %v4909_v24  ;;  %v5824_v24 = vadd.f32 %v5823_v9, %v5804_v44 }
 0x8eb   : > { %v5325_v26 = vld [vmem:[%s13792_s4 + $0x1508] sm:$0xff]  ;;  %6121 = vmatpush.msrb.mxu3 %v4973_v25  ;;  %7594 = vmatmul.msk.f32.vlgmr.msrb.gmra.mxu2 %vm4623_vm1, %v10700_v53 }
 0x8ec   : > { %v5157_v15 = vld [vmem:[%s13792_s4 + $0xfc8] sm:$0xff]  ;;  %6213 = vmatpush.msra.mxu0 %v5325_v26  ;;  %7595 = vmatmul.msk.f32.vlgmr.msrb.gmra.mxu3 %vm4623_vm1, %v10717_v42 }
 0x8ed   : > { %v5225_v8 = vld [vmem:[%s13792_s4 + $0x11e8] sm:$0xff]  ;;  %6147 = vmatpush.msra.mxu1 %v5157_v15  ;;  %v5883_v43 = vpop.f32.mrf.mxu3 }
 0x8ee   : > { %v5289_v18 = vld [vmem:[%s13792_s4 + $0x13e8] sm:$0xff]  ;;  %6166 = vmatpush.msra.mxu2 %v5225_v8 }
 0x8ef   : > { %v5321_v35 = vld [vmem:[%s13792_s4 + $0x14e8] sm:$0xff]  ;;  %6186 = vmatpush.msra.mxu3 %v5289_v18 }
 0x8f0   : > { %v5153_v23 = vld [vmem:[%s13792_s4 + $0xfa8] sm:$0xff]  ;;  %6214 = vmatpush.msra.mxu0 %v5321_v35  ;;  %v5843_v35 = vpop.f32.mrf.mxu1  ;;  %v5903_v17 = vpop.f32.mrf.mxu0 }
 0x8f1   : > { %v5221_v0 = vld [vmem:[%s13792_s4 + $0x11c8] sm:$0xff]  ;;  %6148 = vmatpush.msra.mxu1 %v5153_v23 }
 0x8f2   : > { %v5285_v60 = vld [vmem:[%s13792_s4 + $0x13c8] sm:$0xff]  ;;  %6167 = vmatpush.msra.mxu2 %v5221_v0  ;;  %v5844_v0 = vadd.f32 %v5843_v35, %v5824_v24 }
 0x8f3   : > { %v5317_v38 = vld [vmem:[%s13792_s4 + $0x14c8] sm:$0xff]  ;;  %6187 = vmatpush.msra.mxu3 %v5285_v60 }
 0x8f4   : > { %v5149_v13 = vld [vmem:[%s13792_s4 + $0xf88] sm:$0xff]  ;;  %6215 = vmatpush.msra.mxu0 %v5317_v38 }
 0x8f5   : > { %v5217_v22 = vld [vmem:[%s13792_s4 + $0x11a8] sm:$0xff]  ;;  %6149 = vmatpush.msra.mxu1 %v5149_v13 }
 0x8f6   : > { %v5281_v11 = vld [vmem:[%s13792_s4 + $0x13a8] sm:$0xff]  ;;  %6168 = vmatpush.msra.mxu2 %v5217_v22 }
 0x8f7   : > { %v5313_v29 = vld [vmem:[%s13792_s4 + $0x14a8] sm:$0xff]  ;;  %6188 = vmatpush.msra.mxu3 %v5281_v11 }
 0x8f8   : > { %v5145_v52 = vld [vmem:[%s13792_s4 + $0xf68] sm:$0xff]  ;;  %6216 = vmatpush.msra.mxu0 %v5313_v29 }
 0x8f9   : > { %v5213_v61 = vld [vmem:[%s13792_s4 + $0x1188] sm:$0xff]  ;;  %6150 = vmatpush.msra.mxu1 %v5145_v52 }
 0x8fa   : > { %v5277_v2 = vld [vmem:[%s13792_s4 + $0x1388] sm:$0xff]  ;;  %6169 = vmatpush.msra.mxu2 %v5213_v61 }
 0x8fb   : > { %v5309_v6 = vld [vmem:[%s13792_s4 + $0x1488] sm:$0xff]  ;;  %6189 = vmatpush.msra.mxu3 %v5277_v2 }
 0x8fc   : > { %v5141_v63 = vld [vmem:[%s13792_s4 + $0xf48] sm:$0xff]  ;;  %6217 = vmatpush.msra.mxu0 %v5309_v6 }
 0x8fd   : > { %v5209_v62 = vld [vmem:[%s13792_s4 + $0x1168] sm:$0xff]  ;;  %6151 = vmatpush.msra.mxu1 %v5141_v63 }
 0x8fe   : > { %v5273_v55 = vld [vmem:[%s13792_s4 + $0x1368] sm:$0xff]  ;;  %6170 = vmatpush.msra.mxu2 %v5209_v62 }
 0x8ff   : > { %v5305_v7 = vld [vmem:[%s13792_s4 + $0x1468] sm:$0xff]  ;;  %6190 = vmatpush.msra.mxu3 %v5273_v55 }
 0x900   : > { %v5137_v40 = vld [vmem:[%s13792_s4 + $0xf28] sm:$0xff]  ;;  %6218 = vmatpush.msra.mxu0 %v5305_v7 }
 0x901   : > { %v5205_v59 = vld [vmem:[%s13792_s4 + $0x1148] sm:$0xff]  ;;  %6152 = vmatpush.msra.mxu1 %v5137_v40 }
 0x902   : > { %v5269_v39 = vld [vmem:[%s13792_s4 + $0x1348] sm:$0xff]  ;;  %6171 = vmatpush.msra.mxu2 %v5205_v59  ;;  %v5863_v59 = vpop.f32.mrf.mxu2 }
 0x903   : > { %v5301_v33 = vld [vmem:[%s13792_s4 + $0x1448] sm:$0xff]  ;;  %6191 = vmatpush.msra.mxu3 %v5269_v39 }
 0x904   : > { %v5133_v21 = vld [vmem:[%s13792_s4 + $0xf08] sm:$0xff]  ;;  %6219 = vmatpush.msra.mxu0 %v5301_v33  ;;  %v5864_v33 = vadd.f32 %v5863_v59, %v5844_v0 }
 0x905   : > { %v5201_v27 = vld [vmem:[%s13792_s4 + $0x1128] sm:$0xff]  ;;  %6153 = vmatpush.msra.mxu1 %v5133_v21 }
 0x906   : > { %v5265_v1 = vld [vmem:[%s13792_s4 + $0x1328] sm:$0xff]  ;;  %6172 = vmatpush.msra.mxu2 %v5201_v27 }
 0x907   : > { %v5297_v30 = vld [vmem:[%s13792_s4 + $0x1428] sm:$0xff]  ;;  %6192 = vmatpush.msra.mxu3 %v5265_v1  ;;  %v5884_v1 = vadd.f32 %v5883_v43, %v5864_v33  ;;  %v4834_v43 = vld [vmem:[%s13792_s4 + $0x5b0] sm:$0xff] }
 0x908   : > { %v5129_v5 = vld [vmem:[%s13792_s4 + $0xee8] sm:$0xff]  ;;  %6220 = vmatpush.msra.mxu0 %v5297_v30 }
 0x909   : > { %v5197_v14 = vld [vmem:[%s13792_s4 + $0x1108] sm:$0xff]  ;;  %6154 = vmatpush.msra.mxu1 %v5129_v5  ;;  %v11686_v44 = vadd.f32 %v5903_v17, %v5884_v1 }
 0x90a   : > { %v5261_v36 = vld [vmem:[%s13792_s4 + $0x1308] sm:$0xff]  ;;  %6173 = vmatpush.msra.mxu2 %v5197_v14 }
 0x90b   : > { %v5293_v45 = vld [vmem:[%s13792_s4 + $0x1408] sm:$0xff]  ;;  %6193 = vmatpush.msra.mxu3 %v5261_v36 }
 0x90c   : > { %v5125_v34 = vld [vmem:[%s13792_s4 + $0xec8] sm:$0xff]  ;;  %6221 = vmatpush.msra.mxu0 %v5293_v45 }
 0x90d   : > { %v5193_v20 = vld [vmem:[%s13792_s4 + $0x10e8] sm:$0xff]  ;;  %6155 = vmatpush.msra.mxu1 %v5125_v34  ;;  %7600 = vmatmul.msk.f32.vlgmr.msra.gmra.mxu0 %vm4623_vm1, %v10856_v48 }
 0x90e   : > { %v5257_v3 = vld [vmem:[%s13792_s4 + $0x12e8] sm:$0xff]  ;;  %6174 = vmatpush.msra.mxu2 %v5193_v20 }
 0x90f   : > { %v5121_v25 = vld [vmem:[%s13792_s4 + $0xea8] sm:$0xff]  ;;  %6194 = vmatpush.msra.mxu3 %v5257_v3 }
 0x910   : > { %v5609_v12 = vld [vmem:[%s13792_s4 + $0x1de8] sm:$0xff]  ;;  %6156 = vmatpush.msra.mxu1 %v5121_v25 }
 0x911   : > { %v5189_v26 = vld [vmem:[%s13792_s4 + $0x10c8] sm:$0xff]  ;;  %6286 = vmatpush.msrb.mxu0 %v5609_v12 }
 0x912   : > { %v5253_v19 = vld [vmem:[%s13792_s4 + $0x12c8] sm:$0xff]  ;;  %6175 = vmatpush.msra.mxu2 %v5189_v26 }
 0x913   : > { %v5117_v15 = vld [vmem:[%s13792_s4 + $0xe88] sm:$0xff]  ;;  %6195 = vmatpush.msra.mxu3 %v5253_v19 }
 0x914   : > { %v5605_v49 = vld [vmem:[%s13792_s4 + $0x1dc8] sm:$0xff]  ;;  %6157 = vmatpush.msra.mxu1 %v5117_v15 }
 0x915   : > { %v5185_v8 = vld [vmem:[%s13792_s4 + $0x10a8] sm:$0xff]  ;;  %6287 = vmatpush.msrb.mxu0 %v5605_v49 }
 0x916   : > { %v5249_v18 = vld [vmem:[%s13792_s4 + $0x12a8] sm:$0xff]  ;;  %6176 = vmatpush.msra.mxu2 %v5185_v8 }
 0x917   : > { %v5113_v10 = vld [vmem:[%s13792_s4 + $0xe68] sm:$0xff]  ;;  %6196 = vmatpush.msra.mxu3 %v5249_v18  ;;  %v5923_v1 = vpop.f32.mrf.mxu1 }
 0x918   : > { %v5601_v23 = vld [vmem:[%s13792_s4 + $0x1da8] sm:$0xff]  ;;  %6158 = vmatpush.msra.mxu1 %v5113_v10  ;;  %v5924_v17 = vadd.f32 %v5923_v1, %v11686_v44  ;;  %v4758_v1 = vld [vmem:[%s13792_s4 + $0x350] sm:$0xff] }
 0x919   : > { %v5181_v57 = vld [vmem:[%s13792_s4 + $0x1088] sm:$0xff]  ;;  %6288 = vmatpush.msrb.mxu0 %v5601_v23 }
 0x91a   : > { %v5245_v60 = vld [vmem:[%s13792_s4 + $0x1288] sm:$0xff]  ;;  %6177 = vmatpush.msra.mxu2 %v5181_v57 }
 0x91b   : > { %v5109_v38 = vld [vmem:[%s13792_s4 + $0xe48] sm:$0xff]  ;;  %6197 = vmatpush.msra.mxu3 %v5245_v60 }
 0x91c   : > { %v5597_v13 = vld [vmem:[%s13792_s4 + $0x1d88] sm:$0xff]  ;;  %6159 = vmatpush.msra.mxu1 %v5109_v38 }
 0x91d   : > { %v5177_v22 = vld [vmem:[%s13792_s4 + $0x1068] sm:$0xff]  ;;  %6289 = vmatpush.msrb.mxu0 %v5597_v13 }
 0x91e   : > { %v5241_v11 = vld [vmem:[%s13792_s4 + $0x1268] sm:$0xff]  ;;  %6178 = vmatpush.msra.mxu2 %v5177_v22 }
 0x91f   : > { %v5105_v29 = vld [vmem:[%s13792_s4 + $0xe28] sm:$0xff]  ;;  %6198 = vmatpush.msra.mxu3 %v5241_v11 }
 0x920   : > { %v5593_v52 = vld [vmem:[%s13792_s4 + $0x1d68] sm:$0xff]  ;;  %6160 = vmatpush.msra.mxu1 %v5105_v29 }
 0x921   : > { %v5173_v61 = vld [vmem:[%s13792_s4 + $0x1048] sm:$0xff]  ;;  %6290 = vmatpush.msrb.mxu0 %v5593_v52 }
 0x922   : > { %v5237_v2 = vld [vmem:[%s13792_s4 + $0x1248] sm:$0xff]  ;;  %6179 = vmatpush.msra.mxu2 %v5173_v61 }
 0x923   : > { %v5101_v6 = vld [vmem:[%s13792_s4 + $0xe08] sm:$0xff]  ;;  %6199 = vmatpush.msra.mxu3 %v5237_v2 }
 0x924   : > { %v5589_v63 = vld [vmem:[%s13792_s4 + $0x1d48] sm:$0xff]  ;;  %6161 = vmatpush.msra.mxu1 %v5101_v6 }
 0x925   : > { %v5169_v62 = vld [vmem:[%s13792_s4 + $0x1028] sm:$0xff]  ;;  %6291 = vmatpush.msrb.mxu0 %v5589_v63  ;;  %7597 = vmatmul.msk.f32.vlgmr.msra.gmra.mxu1 %vm4623_vm1, %v10827_v46 }
 0x926   : > { %v5233_v55 = vld [vmem:[%s13792_s4 + $0x1228] sm:$0xff]  ;;  %6180 = vmatpush.msra.mxu2 %v5169_v62 }
 0x927   : > { %v5585_v7 = vld [vmem:[%s13792_s4 + $0x1d28] sm:$0xff]  ;;  %6200 = vmatpush.msra.mxu3 %v5233_v55  ;;  %v4842_v55 = vld [vmem:[%s13792_s4 + $0x5f0] sm:$0xff] }
 0x928   : > { %v5417_v40 = vld [vmem:[%s13792_s4 + $0x17e8] sm:$0xff]  ;;  %6292 = vmatpush.msrb.mxu0 %v5585_v7 }
 0x929   : > { %v5165_v39 = vld [vmem:[%s13792_s4 + $0x1008] sm:$0xff]  ;;  %6226 = vmatpush.msrb.mxu1 %v5417_v40 }
 0x92a   : > { %v5229_v32 = vld [vmem:[%s13792_s4 + $0x1208] sm:$0xff]  ;;  %6181 = vmatpush.msra.mxu2 %v5165_v39  ;;  %v4838_v39 = vld [vmem:[%s13792_s4 + $0x5d0] sm:$0xff] }
 0x92b   : > { %v5581_v21 = vld [vmem:[%s13792_s4 + $0x1d08] sm:$0xff]  ;;  %6201 = vmatpush.msra.mxu3 %v5229_v32  ;;  %7598 = vmatmul.msk.f32.vlgmr.msra.gmra.mxu2 %vm4623_vm1, %v10821_v37 }
 0x92c   : > { %v5413_v27 = vld [vmem:[%s13792_s4 + $0x17c8] sm:$0xff]  ;;  %6293 = vmatpush.msrb.mxu0 %v5581_v21  ;;  %7599 = vmatmul.msk.f32.vlgmr.msra.gmra.mxu3 %vm4623_vm1, %v10853_v58 }
 0x92d   : > { %v5481_v30 = vld [vmem:[%s13792_s4 + $0x19e8] sm:$0xff]  ;;  %6227 = vmatpush.msrb.mxu1 %v5413_v27 }
 0x92e   : > { %v5545_v5 = vld [vmem:[%s13792_s4 + $0x1be8] sm:$0xff]  ;;  %6246 = vmatpush.msrb.mxu2 %v5481_v30 }
 0x92f   : > { %v5577_v14 = vld [vmem:[%s13792_s4 + $0x1ce8] sm:$0xff]  ;;  %6266 = vmatpush.msrb.mxu3 %v5545_v5 }
 0x930   : > { %v5409_v36 = vld [vmem:[%s13792_s4 + $0x17a8] sm:$0xff]  ;;  %6294 = vmatpush.msrb.mxu0 %v5577_v14  ;;  %v4830_v14 = vld [vmem:[%s13792_s4 + $0x590] sm:$0xff] }
 0x931   : > { %v5477_v45 = vld [vmem:[%s13792_s4 + $0x19c8] sm:$0xff]  ;;  %6228 = vmatpush.msrb.mxu1 %v5409_v36 }
 0x932   : > { %v5541_v34 = vld [vmem:[%s13792_s4 + $0x1bc8] sm:$0xff]  ;;  %6247 = vmatpush.msrb.mxu2 %v5477_v45 }
 0x933   : > { %v5573_v9 = vld [vmem:[%s13792_s4 + $0x1cc8] sm:$0xff]  ;;  %6267 = vmatpush.msrb.mxu3 %v5541_v34  ;;  %v4826_v34 = vld [vmem:[%s13792_s4 + $0x570] sm:$0xff] }
 0x934   : > { %v5405_v20 = vld [vmem:[%s13792_s4 + $0x1788] sm:$0xff]  ;;  %6295 = vmatpush.msrb.mxu0 %v5573_v9 }
 0x935   : > { %v5473_v3 = vld [vmem:[%s13792_s4 + $0x19a8] sm:$0xff]  ;;  %6229 = vmatpush.msrb.mxu1 %v5405_v20 }
 0x936   : > { %v5537_v24 = vld [vmem:[%s13792_s4 + $0x1ba8] sm:$0xff]  ;;  %6248 = vmatpush.msrb.mxu2 %v5473_v3 }
 0x937   : > { %v5569_v25 = vld [vmem:[%s13792_s4 + $0x1ca8] sm:$0xff]  ;;  %6268 = vmatpush.msrb.mxu3 %v5537_v24  ;;  %v4822_v24 = vld [vmem:[%s13792_s4 + $0x550] sm:$0xff] }
 0x938   : > { %v5401_v12 = vld [vmem:[%s13792_s4 + $0x1768] sm:$0xff]  ;;  %6296 = vmatpush.msrb.mxu0 %v5569_v25 }
 0x939   : > { %v5469_v26 = vld [vmem:[%s13792_s4 + $0x1988] sm:$0xff]  ;;  %6230 = vmatpush.msrb.mxu1 %v5401_v12 }
 0x93a   : > { %v5533_v19 = vld [vmem:[%s13792_s4 + $0x1b88] sm:$0xff]  ;;  %6249 = vmatpush.msrb.mxu2 %v5469_v26  ;;  %v4818_v26 = vld [vmem:[%s13792_s4 + $0x530] sm:$0xff] }
 0x93b   : > { %v5565_v15 = vld [vmem:[%s13792_s4 + $0x1c88] sm:$0xff]  ;;  %6269 = vmatpush.msrb.mxu3 %v5533_v19 }
 0x93c   : > { %v5397_v49 = vld [vmem:[%s13792_s4 + $0x1748] sm:$0xff]  ;;  %6297 = vmatpush.msrb.mxu0 %v5565_v15  ;;  %v5943_v15 = vpop.f32.mrf.mxu2 }
 0x93d   : > { %v5465_v8 = vld [vmem:[%s13792_s4 + $0x1968] sm:$0xff]  ;;  %6231 = vmatpush.msrb.mxu1 %v5397_v49 }
 0x93e   : > { %v5529_v18 = vld [vmem:[%s13792_s4 + $0x1b68] sm:$0xff]  ;;  %6250 = vmatpush.msrb.mxu2 %v5465_v8 }
 0x93f   : > { %v5561_v10 = vld [vmem:[%s13792_s4 + $0x1c68] sm:$0xff]  ;;  %6270 = vmatpush.msrb.mxu3 %v5529_v18  ;;  %v5944_v18 = vadd.f32 %v5943_v15, %v5924_v17  ;;  %v4690_v17 = vld [vmem:[%s13792_s4 + $0x130] sm:$0xff] }
 0x940   : > { %v5393_v35 = vld [vmem:[%s13792_s4 + $0x1728] sm:$0xff]  ;;  %6298 = vmatpush.msrb.mxu0 %v5561_v10  ;;  %v4814_v10 = vld [vmem:[%s13792_s4 + $0x510] sm:$0xff] }
 0x941   : > { %v5461_v23 = vld [vmem:[%s13792_s4 + $0x1948] sm:$0xff]  ;;  %6232 = vmatpush.msrb.mxu1 %v5393_v35  ;;  %v5963_v35 = vpop.f32.mrf.mxu3 }
 0x942   : > { %v5525_v57 = vld [vmem:[%s13792_s4 + $0x1b48] sm:$0xff]  ;;  %6251 = vmatpush.msrb.mxu2 %v5461_v23 }
 0x943   : > { %v5557_v0 = vld [vmem:[%s13792_s4 + $0x1c48] sm:$0xff]  ;;  %6271 = vmatpush.msrb.mxu3 %v5525_v57  ;;  %v5964_v57 = vadd.f32 %v5963_v35, %v5944_v18  ;;  %v4738_v18 = vld [vmem:[%s13792_s4 + $0x2b0] sm:$0xff]  ;;  %v6003_v35 = vpop.f32.mrf.mxu1 }
 0x944   : > { %v5389_v60 = vld [vmem:[%s13792_s4 + $0x1708] sm:$0xff]  ;;  %6299 = vmatpush.msrb.mxu0 %v5557_v0  ;;  %v5983_v0 = vpop.f32.mrf.mxu0 }
 0x945   : > { %v5457_v38 = vld [vmem:[%s13792_s4 + $0x1928] sm:$0xff]  ;;  %6233 = vmatpush.msrb.mxu1 %v5389_v60  ;;  %v4714_v60 = vld [vmem:[%s13792_s4 + $0x1f0] sm:$0xff] }
 0x946   : > { %v5521_v13 = vld [vmem:[%s13792_s4 + $0x1b28] sm:$0xff]  ;;  %6252 = vmatpush.msrb.mxu2 %v5457_v38  ;;  %v4778_v38 = vld [vmem:[%s13792_s4 + $0x3f0] sm:$0xff] }
 0x947   : > { %v5553_v22 = vld [vmem:[%s13792_s4 + $0x1c28] sm:$0xff]  ;;  %6272 = vmatpush.msrb.mxu3 %v5521_v13  ;;  %v4810_v13 = vld [vmem:[%s13792_s4 + $0x4f0] sm:$0xff] }
 0x948   : > { %v5385_v11 = vld [vmem:[%s13792_s4 + $0x16e8] sm:$0xff]  ;;  %6300 = vmatpush.msrb.mxu0 %v5553_v22 }
 0x949   : > { %v5453_v29 = vld [vmem:[%s13792_s4 + $0x1908] sm:$0xff]  ;;  %6234 = vmatpush.msrb.mxu1 %v5385_v11  ;;  %v11889_v11 = vadd.f32 %v5983_v0, %v5964_v57  ;;  %v4670_v57 = vld [vmem:[%s13792_s4 + $0x90] sm:$0xff] }
 0x94a   : > { %v5517_v52 = vld [vmem:[%s13792_s4 + $0x1b08] sm:$0xff]  ;;  %6253 = vmatpush.msrb.mxu2 %v5453_v29  ;;  %v4710_v29 = vld [vmem:[%s13792_s4 + $0x1d0] sm:$0xff] }
 0x94b   : > { %v5549_v61 = vld [vmem:[%s13792_s4 + $0x1c08] sm:$0xff]  ;;  %6273 = vmatpush.msrb.mxu3 %v5517_v52  ;;  %v4774_v52 = vld [vmem:[%s13792_s4 + $0x3d0] sm:$0xff]  ;;  %v12019_v0 = vadd.f32 %v6003_v35, %v11889_v11 }
 0x94c   : > { %v5381_v2 = vld [vmem:[%s13792_s4 + $0x16c8] sm:$0xff]  ;;  %6301 = vmatpush.msrb.mxu0 %v5549_v61  ;;  %v4806_v61 = vld [vmem:[%s13792_s4 + $0x4d0] sm:$0xff] }
 0x94d   : > { %v5449_v6 = vld [vmem:[%s13792_s4 + $0x18e8] sm:$0xff]  ;;  %6235 = vmatpush.msrb.mxu1 %v5381_v2  ;;  %7604 = vmatmul.msk.f32.vlgmr.msrb.gmra.mxu0 %vm4623_vm1, %v10967_v47  ;;  %v4730_v11 = vld [vmem:[%s13792_s4 + $0x270] sm:$0xff] }
 0x94e   : > { %v5513_v63 = vld [vmem:[%s13792_s4 + $0x1ae8] sm:$0xff]  ;;  %6254 = vmatpush.msrb.mxu2 %v5449_v6  ;;  %6366 = vmatpush.msra.mxu0 %v4842_v55  ;;  %v4706_v6 = vld [vmem:[%s13792_s4 + $0x1b0] sm:$0xff] }
 0x94f   : > { %v5377_v62 = vld [vmem:[%s13792_s4 + $0x16a8] sm:$0xff]  ;;  %6274 = vmatpush.msrb.mxu3 %v5513_v63  ;;  %v4770_v63 = vld [vmem:[%s13792_s4 + $0x3b0] sm:$0xff] }
 0x950   : > { %v5445_v7 = vld [vmem:[%s13792_s4 + $0x18c8] sm:$0xff]  ;;  %6236 = vmatpush.msrb.mxu1 %v5377_v62  ;;  %6367 = vmatpush.msra.mxu0 %v4838_v39  ;;  %v4802_v62 = vld [vmem:[%s13792_s4 + $0x4b0] sm:$0xff] }
 0x951   : > { %v5509_v40 = vld [vmem:[%s13792_s4 + $0x1ac8] sm:$0xff]  ;;  %6255 = vmatpush.msrb.mxu2 %v5445_v7  ;;  %v4702_v7 = vld [vmem:[%s13792_s4 + $0x190] sm:$0xff] }
 0x952   : > { %v5373_v59 = vld [vmem:[%s13792_s4 + $0x1688] sm:$0xff]  ;;  %6275 = vmatpush.msrb.mxu3 %v5509_v40  ;;  %6368 = vmatpush.msra.mxu0 %v4834_v43  ;;  %v4766_v40 = vld [vmem:[%s13792_s4 + $0x390] sm:$0xff] }
 0x953   : > { %v5441_v32 = vld [vmem:[%s13792_s4 + $0x18a8] sm:$0xff]  ;;  %6237 = vmatpush.msrb.mxu1 %v5373_v59  ;;  %v4798_v59 = vld [vmem:[%s13792_s4 + $0x490] sm:$0xff] }
 0x954   : > { %v5505_v33 = vld [vmem:[%s13792_s4 + $0x1aa8] sm:$0xff]  ;;  %6256 = vmatpush.msrb.mxu2 %v5441_v32  ;;  %6369 = vmatpush.msra.mxu0 %v4830_v14  ;;  %v4698_v32 = vld [vmem:[%s13792_s4 + $0x170] sm:$0xff] }
 0x955   : > { %v5369_v21 = vld [vmem:[%s13792_s4 + $0x1668] sm:$0xff]  ;;  %6276 = vmatpush.msrb.mxu3 %v5505_v33  ;;  %v4762_v33 = vld [vmem:[%s13792_s4 + $0x370] sm:$0xff] }
 0x956   : > { %v5437_v27 = vld [vmem:[%s13792_s4 + $0x1888] sm:$0xff]  ;;  %6238 = vmatpush.msrb.mxu1 %v5369_v21  ;;  %6370 = vmatpush.msra.mxu0 %v4826_v34  ;;  %v4794_v21 = vld [vmem:[%s13792_s4 + $0x470] sm:$0xff] }
 0x957   : > { %v5501_v30 = vld [vmem:[%s13792_s4 + $0x1a88] sm:$0xff]  ;;  %6257 = vmatpush.msrb.mxu2 %v5437_v27  ;;  %v4694_v27 = vld [vmem:[%s13792_s4 + $0x150] sm:$0xff] }
 0x958   : > { %v5365_v5 = vld [vmem:[%s13792_s4 + $0x1648] sm:$0xff]  ;;  %6277 = vmatpush.msrb.mxu3 %v5501_v30  ;;  %6371 = vmatpush.msra.mxu0 %v4822_v24  ;;  %v4790_v30 = vld [vmem:[%s13792_s4 + $0x450] sm:$0xff] }
 0x959   : > { %v5433_v36 = vld [vmem:[%s13792_s4 + $0x1868] sm:$0xff]  ;;  %6239 = vmatpush.msrb.mxu1 %v5365_v5  ;;  %v4754_v14 = vld [vmem:[%s13792_s4 + $0x330] sm:$0xff] }
 0x95a   : > { %v5497_v45 = vld [vmem:[%s13792_s4 + $0x1a68] sm:$0xff]  ;;  %6258 = vmatpush.msrb.mxu2 %v5433_v36  ;;  %6372 = vmatpush.msra.mxu0 %v4818_v26  ;;  %v4786_v36 = vld [vmem:[%s13792_s4 + $0x430] sm:$0xff] }
 0x95b   : > { %v5361_v44 = vld [vmem:[%s13792_s4 + $0x1628] sm:$0xff]  ;;  %6278 = vmatpush.msrb.mxu3 %v5497_v45  ;;  %v4750_v34 = vld [vmem:[%s13792_s4 + $0x310] sm:$0xff] }
 0x95c   : > { %v5429_v9 = vld [vmem:[%s13792_s4 + $0x1848] sm:$0xff]  ;;  %6240 = vmatpush.msrb.mxu1 %v5361_v44  ;;  %6373 = vmatpush.msra.mxu0 %v4814_v10  ;;  %v4686_v44 = vld [vmem:[%s13792_s4 + $0x110] sm:$0xff] }
 0x95d   : > { %v5493_v20 = vld [vmem:[%s13792_s4 + $0x1a48] sm:$0xff]  ;;  %6259 = vmatpush.msrb.mxu2 %v5429_v9  ;;  %v4782_v9 = vld [vmem:[%s13792_s4 + $0x410] sm:$0xff] }
 0x95e   : > { %v5357_v3 = vld [vmem:[%s13792_s4 + $0x1608] sm:$0xff]  ;;  %6279 = vmatpush.msrb.mxu3 %v5493_v20  ;;  %6374 = vmatpush.msra.mxu0 %v4810_v13  ;;  %v4746_v24 = vld [vmem:[%s13792_s4 + $0x2f0] sm:$0xff] }
 0x95f   : > { %v5425_v25 = vld [vmem:[%s13792_s4 + $0x1828] sm:$0xff]  ;;  %6241 = vmatpush.msrb.mxu1 %v5357_v3  ;;  %v4682_v3 = vld [vmem:[%s13792_s4 + $0xf0] sm:$0xff] }
 0x960   : > { %v5489_v12 = vld [vmem:[%s13792_s4 + $0x1a28] sm:$0xff]  ;;  %6260 = vmatpush.msrb.mxu2 %v5425_v25  ;;  %7601 = vmatmul.msk.f32.vlgmr.msrb.gmra.mxu1 %vm4623_vm1, %v11047_v4  ;;  %v4678_v26 = vld [vmem:[%s13792_s4 + $0xd0] sm:$0xff] }
 0x961   : > { %v5673_v19 = vld [vmem:[%s13792_s4 + $0x1fe8] sm:$0xff]  ;;  %6280 = vmatpush.msrb.mxu3 %v5489_v12  ;;  %6375 = vmatpush.msra.mxu0 %v4806_v61  ;;  %v5098_v12 = vld [vmem:[%s13792_s4 + $0xdf0] sm:$0xff] }
 0x962   : > { %v5421_v49 = vld [vmem:[%s13792_s4 + $0x1808] sm:$0xff]  ;;  %6306 = vmatpush.msra.mxu1 %v5673_v19  ;;  %v4742_v19 = vld [vmem:[%s13792_s4 + $0x2d0] sm:$0xff] }
 0x963   : > { %v5485_v8 = vld [vmem:[%s13792_s4 + $0x1a08] sm:$0xff]  ;;  %6261 = vmatpush.msrb.mxu2 %v5421_v49  ;;  %6376 = vmatpush.msra.mxu0 %v4802_v62  ;;  %v5094_v49 = vld [vmem:[%s13792_s4 + $0xdd0] sm:$0xff] }
 0x964   : > { %v5669_v23 = vld [vmem:[%s13792_s4 + $0x1fc8] sm:$0xff]  ;;  %6281 = vmatpush.msrb.mxu3 %v5485_v8  ;;  %7602 = vmatmul.msk.f32.vlgmr.msrb.gmra.mxu2 %vm4623_vm1, %v10937_v54  ;;  %v4674_v8 = vld [vmem:[%s13792_s4 + $0xb0] sm:$0xff] }
 0x965   : > { %v5665_v22 = vld [vmem:[%s13792_s4 + $0x1fa8] sm:$0xff]  ;;  %7603 = vmatmul.msk.f32.vlgmr.msrb.gmra.mxu3 %vm4623_vm1, %v11064_v50  ;;  %6307 = vmatpush.msra.mxu1 %v5669_v23  ;;  %v5090_v23 = vld [vmem:[%s13792_s4 + $0xdb0] sm:$0xff] }
 0x966   : > { %6326 = vmatpush.msra.mxu2 %v4714_v60  ;;  %6346 = vmatpush.msra.mxu3 %v4778_v38  ;;  %v5661_v2 = vld [vmem:[%s13792_s4 + $0x1f88] sm:$0xff]  ;;  %v4734_v60 = vld [vmem:[%s13792_s4 + $0x290] sm:$0xff] }
 0x967   : > { %6308 = vmatpush.msra.mxu1 %v5665_v22  ;;  %v5657_v55 = vld [vmem:[%s13792_s4 + $0x1f68] sm:$0xff]  ;;  %6377 = vmatpush.msra.mxu0 %v4798_v59  ;;  %v5086_v13 = vld [vmem:[%s13792_s4 + $0xd90] sm:$0xff] }
 0x968   : > { %6327 = vmatpush.msra.mxu2 %v4710_v29  ;;  %6347 = vmatpush.msra.mxu3 %v4774_v52  ;;  %v5653_v39 = vld [vmem:[%s13792_s4 + $0x1f48] sm:$0xff]  ;;  %v4666_v22 = vld [vmem:[%s13792_s4 + $0x70] sm:$0xff] }
 0x969   : > { %6309 = vmatpush.msra.mxu1 %v5661_v2  ;;  %v5649_v43 = vld [vmem:[%s13792_s4 + $0x1f28] sm:$0xff]  ;;  %6378 = vmatpush.msra.mxu0 %v4794_v21  ;;  %v5082_v52 = vld [vmem:[%s13792_s4 + $0xd70] sm:$0xff] }
 0x96a   : > { %6328 = vmatpush.msra.mxu2 %v4706_v6  ;;  %6348 = vmatpush.msra.mxu3 %v4770_v63  ;;  %v5645_v5 = vld [vmem:[%s13792_s4 + $0x1f08] sm:$0xff]  ;;  %v4662_v61 = vld [vmem:[%s13792_s4 + $0x50] sm:$0xff] }
 0x96b   : > { %6310 = vmatpush.msra.mxu1 %v5657_v55  ;;  %v5641_v45 = vld [vmem:[%s13792_s4 + $0x1ee8] sm:$0xff]  ;;  %6379 = vmatpush.msra.mxu0 %v4790_v30  ;;  %v4726_v2 = vld [vmem:[%s13792_s4 + $0x250] sm:$0xff] }
 0x96c   : > { %6329 = vmatpush.msra.mxu2 %v4702_v7  ;;  %6349 = vmatpush.msra.mxu3 %v4766_v40  ;;  %v5637_v20 = vld [vmem:[%s13792_s4 + $0x1ec8] sm:$0xff]  ;;  %v5078_v63 = vld [vmem:[%s13792_s4 + $0xd50] sm:$0xff] }
 0x96d   : > { %6311 = vmatpush.msra.mxu1 %v5653_v39  ;;  %6380 = vmatpush.msra.mxu0 %v4786_v36  ;;  %v5633_v25 = vld [vmem:[%s13792_s4 + $0x1ea8] sm:$0xff]  ;;  %v4658_v62 = vld [vmem:[%s13792_s4 + $0x30] sm:$0xff] }
 0x96e   : > { %6330 = vmatpush.msra.mxu2 %v4698_v32  ;;  %6350 = vmatpush.msra.mxu3 %v4762_v33  ;;  %v5629_v15 = vld [vmem:[%s13792_s4 + $0x1e88] sm:$0xff]  ;;  %v4722_v55 = vld [vmem:[%s13792_s4 + $0x230] sm:$0xff] }
 0x96f   : > { %6312 = vmatpush.msra.mxu1 %v5649_v43  ;;  %6381 = vmatpush.msra.mxu0 %v4782_v9  ;;  %v5625_v10 = vld [vmem:[%s13792_s4 + $0x1e68] sm:$0xff]  ;;  %v5074_v7 = vld [vmem:[%s13792_s4 + $0xd30] sm:$0xff] }
 0x970   : > { %6331 = vmatpush.msra.mxu2 %v4694_v27  ;;  %6351 = vmatpush.msra.mxu3 %v4758_v1  ;;  %v5621_v38 = vld [vmem:[%s13792_s4 + $0x1e48] sm:$0xff]  ;;  %v4906_v40 = vld [vmem:[%s13792_s4 + $0x7f0] sm:$0xff] }
 0x971   : > { %6313 = vmatpush.msra.mxu1 %v5645_v5  ;;  %7608 = vmatmul.msk.f32.vlgmr.msra.gmra.mxu0 %vm4623_vm1, %v10612_v16  ;;  %v5617_v29 = vld [vmem:[%s13792_s4 + $0x1e28] sm:$0xff]  ;;  %v4654_v59 = vld [vmem:[%s13792_s4 + $0x10] sm:$0xff] }
 0x972   : > { %6332 = vmatpush.msra.mxu2 %v4690_v17  ;;  %6352 = vmatpush.msra.mxu3 %v4754_v14  ;;  %v5613_v6 = vld [vmem:[%s13792_s4 + $0x1e08] sm:$0xff]  ;;  %v4718_v39 = vld [vmem:[%s13792_s4 + $0x210] sm:$0xff] }
 0x973   : > { %6314 = vmatpush.msra.mxu1 %v5641_v45  ;;  %6446 = vmatpush.msrb.mxu0 %v5098_v12  ;;  %v5070_v32 = vld [vmem:[%s13792_s4 + $0xd10] sm:$0xff] }
 0x974   : > { %6333 = vmatpush.msra.mxu2 %v4686_v44  ;;  %6353 = vmatpush.msra.mxu3 %v4750_v34  ;;  %v4902_v33 = vld [vmem:[%s13792_s4 + $0x7d0] sm:$0xff] }
 0x975   : > { %6315 = vmatpush.msra.mxu1 %v5637_v20  ;;  %6447 = vmatpush.msrb.mxu0 %v5094_v49  ;;  %v4970_v21 = vld [vmem:[%s13792_s4 + $0x9f0] sm:$0xff] }
 0x976   : > { %6334 = vmatpush.msra.mxu2 %v4682_v3  ;;  %6354 = vmatpush.msra.mxu3 %v4746_v24  ;;  %v5034_v43 = vld [vmem:[%s13792_s4 + $0xbf0] sm:$0xff] }
 0x977   : > { %6316 = vmatpush.msra.mxu1 %v5633_v25  ;;  %6448 = vmatpush.msrb.mxu0 %v5090_v23  ;;  %v5066_v27 = vld [vmem:[%s13792_s4 + $0xcf0] sm:$0xff] }
 0x978   : > { %6335 = vmatpush.msra.mxu2 %v4678_v26  ;;  %6355 = vmatpush.msra.mxu3 %v4742_v19  ;;  %v4898_v1 = vld [vmem:[%s13792_s4 + $0x7b0] sm:$0xff] }
 0x979   : > { %6317 = vmatpush.msra.mxu1 %v5629_v15  ;;  %6449 = vmatpush.msrb.mxu0 %v5086_v13  ;;  %v4966_v30 = vld [vmem:[%s13792_s4 + $0x9d0] sm:$0xff] }
 0x97a   : > { %6336 = vmatpush.msra.mxu2 %v4674_v8  ;;  %6356 = vmatpush.msra.mxu3 %v4738_v18  ;;  %v5030_v5 = vld [vmem:[%s13792_s4 + $0xbd0] sm:$0xff] }
 0x97b   : > { %6318 = vmatpush.msra.mxu1 %v5625_v10  ;;  %6450 = vmatpush.msrb.mxu0 %v5082_v52  ;;  %v5062_v17 = vld [vmem:[%s13792_s4 + $0xcd0] sm:$0xff] }
 0x97c   : > { %6337 = vmatpush.msra.mxu2 %v4670_v57  ;;  %6357 = vmatpush.msra.mxu3 %v4734_v60  ;;  %v4894_v14 = vld [vmem:[%s13792_s4 + $0x790] sm:$0xff] }
 0x97d   : > { %6319 = vmatpush.msra.mxu1 %v5621_v38  ;;  %6451 = vmatpush.msrb.mxu0 %v5078_v63  ;;  %v4962_v36 = vld [vmem:[%s13792_s4 + $0x9b0] sm:$0xff] }
 0x97e   : > { %6338 = vmatpush.msra.mxu2 %v4666_v22  ;;  %6358 = vmatpush.msra.mxu3 %v4730_v11  ;;  %v5026_v45 = vld [vmem:[%s13792_s4 + $0xbb0] sm:$0xff] }
 0x97f   : > { %6320 = vmatpush.msra.mxu1 %v5617_v29  ;;  %6452 = vmatpush.msrb.mxu0 %v5074_v7  ;;  %v5058_v44 = vld [vmem:[%s13792_s4 + $0xcb0] sm:$0xff] }
 0x980   : > { %6339 = vmatpush.msra.mxu2 %v4662_v61  ;;  %6359 = vmatpush.msra.mxu3 %v4726_v2  ;;  %v4890_v34 = vld [vmem:[%s13792_s4 + $0x770] sm:$0xff] }
 0x981   : > { %6321 = vmatpush.msra.mxu1 %v5613_v6  ;;  %6453 = vmatpush.msrb.mxu0 %v5070_v32  ;;  %v4958_v9 = vld [vmem:[%s13792_s4 + $0x990] sm:$0xff] }
 0x982   : > { %6340 = vmatpush.msra.mxu2 %v4658_v62  ;;  %6360 = vmatpush.msra.mxu3 %v4722_v55  ;;  %v5022_v20 = vld [vmem:[%s13792_s4 + $0xb90] sm:$0xff] }
 0x983   : > { %7605 = vmatmul.msk.f32.vlgmr.msra.gmra.mxu1 %vm4623_vm1, %v11250_v41  ;;  %6454 = vmatpush.msrb.mxu0 %v5066_v27  ;;  %v5054_v3 = vld [vmem:[%s13792_s4 + $0xc90] sm:$0xff] }
 0x984   : > { %6386 = vmatpush.msrb.mxu1 %v4906_v40  ;;  %6341 = vmatpush.msra.mxu2 %v4654_v59  ;;  %v4886_v24 = vld [vmem:[%s13792_s4 + $0x750] sm:$0xff] }
 0x985   : > { %6361 = vmatpush.msra.mxu3 %v4718_v39  ;;  %7606 = vmatmul.msk.f32.vlgmr.msra.gmra.mxu2 %vm4623_vm1, %v10599_v31  ;;  %v4954_v25 = vld [vmem:[%s13792_s4 + $0x970] sm:$0xff] }
 0x986   : > { %7607 = vmatmul.msk.f32.vlgmr.msra.gmra.mxu3 %vm4623_vm1, %v10609_v51  ;;  %6387 = vmatpush.msrb.mxu1 %v4902_v33  ;;  %v5018_v12 = vld [vmem:[%s13792_s4 + $0xb70] sm:$0xff] }
 0x987   : > { %6406 = vmatpush.msrb.mxu2 %v4970_v21  ;;  %6426 = vmatpush.msrb.mxu3 %v5034_v43  ;;  %v5050_v26 = vld [vmem:[%s13792_s4 + $0xc70] sm:$0xff] }
 0x988   : > { %6388 = vmatpush.msrb.mxu1 %v4898_v1  ;;  %6455 = vmatpush.msrb.mxu0 %v5062_v17  ;;  %v4882_v19 = vld [vmem:[%s13792_s4 + $0x730] sm:$0xff] }
 0x989   : > { %6407 = vmatpush.msrb.mxu2 %v4966_v30  ;;  %6427 = vmatpush.msrb.mxu3 %v5030_v5  ;;  %v4950_v15 = vld [vmem:[%s13792_s4 + $0x950] sm:$0xff] }
 0x98a   : > { %6389 = vmatpush.msrb.mxu1 %v4894_v14  ;;  %6456 = vmatpush.msrb.mxu0 %v5058_v44  ;;  %v5014_v49 = vld [vmem:[%s13792_s4 + $0xb50] sm:$0xff] }
 0x98b   : > { %6408 = vmatpush.msrb.mxu2 %v4962_v36  ;;  %6428 = vmatpush.msrb.mxu3 %v5026_v45  ;;  %v5046_v8 = vld [vmem:[%s13792_s4 + $0xc50] sm:$0xff] }
 0x98c   : > { %6390 = vmatpush.msrb.mxu1 %v4890_v34  ;;  %6457 = vmatpush.msrb.mxu0 %v5054_v3  ;;  %v4878_v18 = vld [vmem:[%s13792_s4 + $0x710] sm:$0xff] }
 0x98d   : > { %6409 = vmatpush.msrb.mxu2 %v4958_v9  ;;  %6429 = vmatpush.msrb.mxu3 %v5022_v20  ;;  %v4946_v10 = vld [vmem:[%s13792_s4 + $0x930] sm:$0xff] }
 0x98e   : > { %6391 = vmatpush.msrb.mxu1 %v4886_v24  ;;  %6458 = vmatpush.msrb.mxu0 %v5050_v26  ;;  %v5010_v35 = vld [vmem:[%s13792_s4 + $0xb30] sm:$0xff] }
 0x98f   : > { %6410 = vmatpush.msrb.mxu2 %v4954_v25  ;;  %6430 = vmatpush.msrb.mxu3 %v5018_v12  ;;  %v5042_v23 = vld [vmem:[%s13792_s4 + $0xc30] sm:$0xff] }
 0x990   : > { %6392 = vmatpush.msrb.mxu1 %v4882_v19  ;;  %v4874_v57 = vld [vmem:[%s13792_s4 + $0x6f0] sm:$0xff]  ;;  %6459 = vmatpush.msrb.mxu0 %v5046_v8 }
 0x991   : > { %6411 = vmatpush.msrb.mxu2 %v4950_v15  ;;  %6431 = vmatpush.msrb.mxu3 %v5014_v49  ;;  %v4942_v60 = vld [vmem:[%s13792_s4 + $0x910] sm:$0xff] }
 0x992   : > { %6393 = vmatpush.msrb.mxu1 %v4878_v18  ;;  %v5006_v38 = vld [vmem:[%s13792_s4 + $0xb10] sm:$0xff]  ;;  %6460 = vmatpush.msrb.mxu0 %v5042_v23 }
 0x993   : > { %6412 = vmatpush.msrb.mxu2 %v4946_v10  ;;  %6432 = vmatpush.msrb.mxu3 %v5010_v35  ;;  %v5038_v13 = vld [vmem:[%s13792_s4 + $0xc10] sm:$0xff] }
 0x994   : > { %v4870_v22 = vld [vmem:[%s13792_s4 + $0x6d0] sm:$0xff]  ;;  %6394 = vmatpush.msrb.mxu1 %v4874_v57  ;;  %6461 = vmatpush.msrb.mxu0 %v5038_v13 }
 0x995   : > { %v4938_v11 = vld [vmem:[%s13792_s4 + $0x8f0] sm:$0xff]  ;;  %6413 = vmatpush.msrb.mxu2 %v4942_v60  ;;  %6433 = vmatpush.msrb.mxu3 %v5006_v38 }
 0x996   : > { %v5002_v29 = vld [vmem:[%s13792_s4 + $0xaf0] sm:$0xff]  ;;  %6395 = vmatpush.msrb.mxu1 %v4870_v22  ;;  %7612 = vmatmul.msk.f32.vlgmr.msrb.gmra.mxu0 %vm4623_vm1, %v10720_v28 }
 0x997   : > { %v4866_v52 = vld [vmem:[%s13792_s4 + $0x6b0] sm:$0xff]  ;;  %6414 = vmatpush.msrb.mxu2 %v4938_v11  ;;  %6434 = vmatpush.msrb.mxu3 %v5002_v29 }
 0x998   : > { %v5354_v61 = vld [vmem:[%s13792_s4 + $0x15f0] sm:$0xff]  ;;  %6396 = vmatpush.msrb.mxu1 %v4866_v52 }
 0x999   : > { %v4934_v2 = vld [vmem:[%s13792_s4 + $0x8d0] sm:$0xff]  ;;  %6526 = vmatpush.msra.mxu0 %v5354_v61 }
 0x99a   : > { %v4998_v6 = vld [vmem:[%s13792_s4 + $0xad0] sm:$0xff]  ;;  %6415 = vmatpush.msrb.mxu2 %v4934_v2 }
 0x99b   : > { %v4862_v63 = vld [vmem:[%s13792_s4 + $0x690] sm:$0xff]  ;;  %6435 = vmatpush.msrb.mxu3 %v4998_v6 }
 0x99c   : > { %v5350_v62 = vld [vmem:[%s13792_s4 + $0x15d0] sm:$0xff]  ;;  %6397 = vmatpush.msrb.mxu1 %v4862_v63 }
 0x99d   : > { %v4930_v55 = vld [vmem:[%s13792_s4 + $0x8b0] sm:$0xff]  ;;  %6527 = vmatpush.msra.mxu0 %v5350_v62 }
 0x99e   : > { %v4994_v7 = vld [vmem:[%s13792_s4 + $0xab0] sm:$0xff]  ;;  %6416 = vmatpush.msrb.mxu2 %v4930_v55 }
 0x99f   : > { %v4858_v40 = vld [vmem:[%s13792_s4 + $0x670] sm:$0xff]  ;;  %6436 = vmatpush.msrb.mxu3 %v4994_v7 }
 0x9a0   : > { %v5346_v59 = vld [vmem:[%s13792_s4 + $0x15b0] sm:$0xff]  ;;  %6398 = vmatpush.msrb.mxu1 %v4858_v40 }
 0x9a1   : > { %v4926_v39 = vld [vmem:[%s13792_s4 + $0x890] sm:$0xff]  ;;  %6528 = vmatpush.msra.mxu0 %v5346_v59 }
 0x9a2   : > { %v4990_v32 = vld [vmem:[%s13792_s4 + $0xa90] sm:$0xff]  ;;  %6417 = vmatpush.msrb.mxu2 %v4926_v39 }
 0x9a3   : > { %v4854_v33 = vld [vmem:[%s13792_s4 + $0x650] sm:$0xff]  ;;  %6437 = vmatpush.msrb.mxu3 %v4990_v32 }
 0x9a4   : > { %v5342_v21 = vld [vmem:[%s13792_s4 + $0x1590] sm:$0xff]  ;;  %6399 = vmatpush.msrb.mxu1 %v4854_v33 }
 0x9a5   : > { %v4922_v43 = vld [vmem:[%s13792_s4 + $0x870] sm:$0xff]  ;;  %6529 = vmatpush.msra.mxu0 %v5342_v21 }
 0x9a6   : > { %v4986_v27 = vld [vmem:[%s13792_s4 + $0xa70] sm:$0xff]  ;;  %6418 = vmatpush.msrb.mxu2 %v4922_v43 }
 0x9a7   : > { %v4850_v1 = vld [vmem:[%s13792_s4 + $0x630] sm:$0xff]  ;;  %6438 = vmatpush.msrb.mxu3 %v4986_v27 }
 0x9a8   : > { %v5338_v30 = vld [vmem:[%s13792_s4 + $0x1570] sm:$0xff]  ;;  %6400 = vmatpush.msrb.mxu1 %v4850_v1 }
 0x9a9   : > { %v4918_v5 = vld [vmem:[%s13792_s4 + $0x850] sm:$0xff]  ;;  %6530 = vmatpush.msra.mxu0 %v5338_v30 }
 0x9aa   : > { %v4982_v17 = vld [vmem:[%s13792_s4 + $0xa50] sm:$0xff]  ;;  %6419 = vmatpush.msrb.mxu2 %v4918_v5 }
 0x9ab   : > { %v4846_v14 = vld [vmem:[%s13792_s4 + $0x610] sm:$0xff]  ;;  %6439 = vmatpush.msrb.mxu3 %v4982_v17 }
 0x9ac   : > { %v5334_v36 = vld [vmem:[%s13792_s4 + $0x1550] sm:$0xff]  ;;  %6401 = vmatpush.msrb.mxu1 %v4846_v14 }
 0x9ad   : > { %v4914_v45 = vld [vmem:[%s13792_s4 + $0x830] sm:$0xff]  ;;  %6531 = vmatpush.msra.mxu0 %v5334_v36  ;;  %7609 = vmatmul.msk.f32.vlgmr.msrb.gmra.mxu1 %vm4623_vm1, %v10654_v56 }
 0x9ae   : > { %v4978_v44 = vld [vmem:[%s13792_s4 + $0xa30] sm:$0xff]  ;;  %6420 = vmatpush.msrb.mxu2 %v4914_v45 }
 0x9af   : > { %v5330_v34 = vld [vmem:[%s13792_s4 + $0x1530] sm:$0xff]  ;;  %6440 = vmatpush.msrb.mxu3 %v4978_v44 }
 0x9b0   : > { %v5162_v9 = vld [vmem:[%s13792_s4 + $0xff0] sm:$0xff]  ;;  %6532 = vmatpush.msra.mxu0 %v5330_v34 }
 0x9b1   : > { %v4910_v20 = vld [vmem:[%s13792_s4 + $0x810] sm:$0xff]  ;;  %6466 = vmatpush.msra.mxu1 %v5162_v9 }
 0x9b2   : > { %v4974_v3 = vld [vmem:[%s13792_s4 + $0xa10] sm:$0xff]  ;;  %6421 = vmatpush.msrb.mxu2 %v4910_v20 }
 0x9b3   : > { %v5326_v24 = vld [vmem:[%s13792_s4 + $0x1510] sm:$0xff]  ;;  %6441 = vmatpush.msrb.mxu3 %v4974_v3  ;;  %7610 = vmatmul.msk.f32.vlgmr.msrb.gmra.mxu2 %vm4623_vm1, %v10700_v53 }
 0x9b4   : > { %v5158_v25 = vld [vmem:[%s13792_s4 + $0xfd0] sm:$0xff]  ;;  %6533 = vmatpush.msra.mxu0 %v5326_v24  ;;  %7611 = vmatmul.msk.f32.vlgmr.msrb.gmra.mxu3 %vm4623_vm1, %v10717_v42 }
 0x9b5   : > { %v5226_v12 = vld [vmem:[%s13792_s4 + $0x11f0] sm:$0xff]  ;;  %6467 = vmatpush.msra.mxu1 %v5158_v25 }
 0x9b6   : > { %v5290_v26 = vld [vmem:[%s13792_s4 + $0x13f0] sm:$0xff]  ;;  %6486 = vmatpush.msra.mxu2 %v5226_v12 }
 0x9b7   : > { %v5322_v19 = vld [vmem:[%s13792_s4 + $0x14f0] sm:$0xff]  ;;  %6506 = vmatpush.msra.mxu3 %v5290_v26 }
 0x9b8   : > { %v5154_v15 = vld [vmem:[%s13792_s4 + $0xfb0] sm:$0xff]  ;;  %6534 = vmatpush.msra.mxu0 %v5322_v19 }
 0x9b9   : > { %v5222_v49 = vld [vmem:[%s13792_s4 + $0x11d0] sm:$0xff]  ;;  %6468 = vmatpush.msra.mxu1 %v5154_v15 }
 0x9ba   : > { %v5286_v8 = vld [vmem:[%s13792_s4 + $0x13d0] sm:$0xff]  ;;  %6487 = vmatpush.msra.mxu2 %v5222_v49 }
 0x9bb   : > { %v5318_v18 = vld [vmem:[%s13792_s4 + $0x14d0] sm:$0xff]  ;;  %6507 = vmatpush.msra.mxu3 %v5286_v8 }
 0x9bc   : > { %v5150_v10 = vld [vmem:[%s13792_s4 + $0xf90] sm:$0xff]  ;;  %6535 = vmatpush.msra.mxu0 %v5318_v18 }
 0x9bd   : > { %v5218_v35 = vld [vmem:[%s13792_s4 + $0x11b0] sm:$0xff]  ;;  %6469 = vmatpush.msra.mxu1 %v5150_v10 }
 0x9be   : > { %v5282_v23 = vld [vmem:[%s13792_s4 + $0x13b0] sm:$0xff]  ;;  %6488 = vmatpush.msra.mxu2 %v5218_v35 }
 0x9bf   : > { %v5314_v57 = vld [vmem:[%s13792_s4 + $0x14b0] sm:$0xff]  ;;  %6508 = vmatpush.msra.mxu3 %v5282_v23 }
 0x9c0   : > { %v5146_v60 = vld [vmem:[%s13792_s4 + $0xf70] sm:$0xff]  ;;  %6536 = vmatpush.msra.mxu0 %v5314_v57 }
 0x9c1   : > { %v5214_v38 = vld [vmem:[%s13792_s4 + $0x1190] sm:$0xff]  ;;  %6470 = vmatpush.msra.mxu1 %v5146_v60 }
 0x9c2   : > { %v5278_v13 = vld [vmem:[%s13792_s4 + $0x1390] sm:$0xff]  ;;  %6489 = vmatpush.msra.mxu2 %v5214_v38 }
 0x9c3   : > { %v5310_v22 = vld [vmem:[%s13792_s4 + $0x1490] sm:$0xff]  ;;  %6509 = vmatpush.msra.mxu3 %v5278_v13 }
 0x9c4   : > { %v5142_v11 = vld [vmem:[%s13792_s4 + $0xf50] sm:$0xff]  ;;  %6537 = vmatpush.msra.mxu0 %v5310_v22 }
 0x9c5   : > { %v5210_v29 = vld [vmem:[%s13792_s4 + $0x1170] sm:$0xff]  ;;  %6471 = vmatpush.msra.mxu1 %v5142_v11 }
 0x9c6   : > { %v5274_v52 = vld [vmem:[%s13792_s4 + $0x1370] sm:$0xff]  ;;  %6490 = vmatpush.msra.mxu2 %v5210_v29 }
 0x9c7   : > { %v5306_v61 = vld [vmem:[%s13792_s4 + $0x1470] sm:$0xff]  ;;  %6510 = vmatpush.msra.mxu3 %v5274_v52 }
 0x9c8   : > { %v5138_v2 = vld [vmem:[%s13792_s4 + $0xf30] sm:$0xff]  ;;  %6538 = vmatpush.msra.mxu0 %v5306_v61 }
 0x9c9   : > { %v5206_v6 = vld [vmem:[%s13792_s4 + $0x1150] sm:$0xff]  ;;  %6472 = vmatpush.msra.mxu1 %v5138_v2 }
 0x9ca   : > { %v5270_v63 = vld [vmem:[%s13792_s4 + $0x1350] sm:$0xff]  ;;  %6491 = vmatpush.msra.mxu2 %v5206_v6 }
 0x9cb   : > { %v5302_v62 = vld [vmem:[%s13792_s4 + $0x1450] sm:$0xff]  ;;  %6511 = vmatpush.msra.mxu3 %v5270_v63 }
 0x9cc   : > { %v5134_v55 = vld [vmem:[%s13792_s4 + $0xf10] sm:$0xff]  ;;  %6539 = vmatpush.msra.mxu0 %v5302_v62 }
 0x9cd   : > { %v5202_v7 = vld [vmem:[%s13792_s4 + $0x1130] sm:$0xff]  ;;  %6473 = vmatpush.msra.mxu1 %v5134_v55 }
 0x9ce   : > { %v5266_v40 = vld [vmem:[%s13792_s4 + $0x1330] sm:$0xff]  ;;  %6492 = vmatpush.msra.mxu2 %v5202_v7 }
 0x9cf   : > { %v5298_v59 = vld [vmem:[%s13792_s4 + $0x1430] sm:$0xff]  ;;  %6512 = vmatpush.msra.mxu3 %v5266_v40 }
 0x9d0   : > { %v5130_v39 = vld [vmem:[%s13792_s4 + $0xef0] sm:$0xff]  ;;  %6540 = vmatpush.msra.mxu0 %v5298_v59 }
 0x9d1   : > { %v5198_v32 = vld [vmem:[%s13792_s4 + $0x1110] sm:$0xff]  ;;  %6474 = vmatpush.msra.mxu1 %v5130_v39 }
 0x9d2   : > { %v5262_v33 = vld [vmem:[%s13792_s4 + $0x1310] sm:$0xff]  ;;  %6493 = vmatpush.msra.mxu2 %v5198_v32 }
 0x9d3   : > { %v5294_v21 = vld [vmem:[%s13792_s4 + $0x1410] sm:$0xff]  ;;  %6513 = vmatpush.msra.mxu3 %v5262_v33 }
 0x9d4   : > { %v5126_v43 = vld [vmem:[%s13792_s4 + $0xed0] sm:$0xff]  ;;  %6541 = vmatpush.msra.mxu0 %v5294_v21 }
 0x9d5   : > { %v5194_v27 = vld [vmem:[%s13792_s4 + $0x10f0] sm:$0xff]  ;;  %6475 = vmatpush.msra.mxu1 %v5126_v43  ;;  %7616 = vmatmul.msk.f32.vlgmr.msra.gmra.mxu0 %vm4623_vm1, %v10856_v48 }
 0x9d6   : > { %v5258_v1 = vld [vmem:[%s13792_s4 + $0x12f0] sm:$0xff]  ;;  %6494 = vmatpush.msra.mxu2 %v5194_v27 }
 0x9d7   : > { %v5122_v30 = vld [vmem:[%s13792_s4 + $0xeb0] sm:$0xff]  ;;  %6514 = vmatpush.msra.mxu3 %v5258_v1 }
 0x9d8   : > { %v5610_v5 = vld [vmem:[%s13792_s4 + $0x1df0] sm:$0xff]  ;;  %6476 = vmatpush.msra.mxu1 %v5122_v30 }
 0x9d9   : > { %v5190_v17 = vld [vmem:[%s13792_s4 + $0x10d0] sm:$0xff]  ;;  %6606 = vmatpush.msrb.mxu0 %v5610_v5 }
 0x9da   : > { %v5254_v14 = vld [vmem:[%s13792_s4 + $0x12d0] sm:$0xff]  ;;  %6495 = vmatpush.msra.mxu2 %v5190_v17 }
 0x9db   : > { %v5118_v36 = vld [vmem:[%s13792_s4 + $0xe90] sm:$0xff]  ;;  %6515 = vmatpush.msra.mxu3 %v5254_v14 }
 0x9dc   : > { %v5606_v45 = vld [vmem:[%s13792_s4 + $0x1dd0] sm:$0xff]  ;;  %6477 = vmatpush.msra.mxu1 %v5118_v36 }
 0x9dd   : > { %v5186_v44 = vld [vmem:[%s13792_s4 + $0x10b0] sm:$0xff]  ;;  %6607 = vmatpush.msrb.mxu0 %v5606_v45 }
 0x9de   : > { %v5250_v34 = vld [vmem:[%s13792_s4 + $0x12b0] sm:$0xff]  ;;  %6496 = vmatpush.msra.mxu2 %v5186_v44 }
 0x9df   : > { %v5114_v9 = vld [vmem:[%s13792_s4 + $0xe70] sm:$0xff]  ;;  %6516 = vmatpush.msra.mxu3 %v5250_v34 }
 0x9e0   : > { %v5602_v20 = vld [vmem:[%s13792_s4 + $0x1db0] sm:$0xff]  ;;  %6478 = vmatpush.msra.mxu1 %v5114_v9 }
 0x9e1   : > { %v5182_v3 = vld [vmem:[%s13792_s4 + $0x1090] sm:$0xff]  ;;  %6608 = vmatpush.msrb.mxu0 %v5602_v20 }
 0x9e2   : > { %v5246_v24 = vld [vmem:[%s13792_s4 + $0x1290] sm:$0xff]  ;;  %6497 = vmatpush.msra.mxu2 %v5182_v3 }
 0x9e3   : > { %v5110_v25 = vld [vmem:[%s13792_s4 + $0xe50] sm:$0xff]  ;;  %6517 = vmatpush.msra.mxu3 %v5246_v24 }
 0x9e4   : > { %v5598_v12 = vld [vmem:[%s13792_s4 + $0x1d90] sm:$0xff]  ;;  %6479 = vmatpush.msra.mxu1 %v5110_v25 }
 0x9e5   : > { %v5178_v26 = vld [vmem:[%s13792_s4 + $0x1070] sm:$0xff]  ;;  %6609 = vmatpush.msrb.mxu0 %v5598_v12 }
 0x9e6   : > { %v5242_v19 = vld [vmem:[%s13792_s4 + $0x1270] sm:$0xff]  ;;  %6498 = vmatpush.msra.mxu2 %v5178_v26 }
 0x9e7   : > { %v5106_v15 = vld [vmem:[%s13792_s4 + $0xe30] sm:$0xff]  ;;  %6518 = vmatpush.msra.mxu3 %v5242_v19 }
 0x9e8   : > { %v5594_v49 = vld [vmem:[%s13792_s4 + $0x1d70] sm:$0xff]  ;;  %6480 = vmatpush.msra.mxu1 %v5106_v15 }
 0x9e9   : > { %v5174_v8 = vld [vmem:[%s13792_s4 + $0x1050] sm:$0xff]  ;;  %6610 = vmatpush.msrb.mxu0 %v5594_v49 }
 0x9ea   : > { %v5238_v18 = vld [vmem:[%s13792_s4 + $0x1250] sm:$0xff]  ;;  %6499 = vmatpush.msra.mxu2 %v5174_v8  ;;  %v4843_v8 = vld [vmem:[%s13792_s4 + $0x5f8] sm:$0xff] }
 0x9eb   : > { %v5102_v10 = vld [vmem:[%s13792_s4 + $0xe10] sm:$0xff]  ;;  %6519 = vmatpush.msra.mxu3 %v5238_v18 }
 0x9ec   : > { %v5590_v35 = vld [vmem:[%s13792_s4 + $0x1d50] sm:$0xff]  ;;  %6481 = vmatpush.msra.mxu1 %v5102_v10 }
 0x9ed   : > { %v5170_v23 = vld [vmem:[%s13792_s4 + $0x1030] sm:$0xff]  ;;  %6611 = vmatpush.msrb.mxu0 %v5590_v35  ;;  %7613 = vmatmul.msk.f32.vlgmr.msra.gmra.mxu1 %vm4623_vm1, %v10827_v46 }
 0x9ee   : > { %v5234_v57 = vld [vmem:[%s13792_s4 + $0x1230] sm:$0xff]  ;;  %6500 = vmatpush.msra.mxu2 %v5170_v23  ;;  %v4839_v23 = vld [vmem:[%s13792_s4 + $0x5d8] sm:$0xff] }
 0x9ef   : > { %v5586_v60 = vld [vmem:[%s13792_s4 + $0x1d30] sm:$0xff]  ;;  %6520 = vmatpush.msra.mxu3 %v5234_v57 }
 0x9f0   : > { %v5418_v38 = vld [vmem:[%s13792_s4 + $0x17f0] sm:$0xff]  ;;  %6612 = vmatpush.msrb.mxu0 %v5586_v60 }
 0x9f1   : > { %v5166_v13 = vld [vmem:[%s13792_s4 + $0x1010] sm:$0xff]  ;;  %6546 = vmatpush.msrb.mxu1 %v5418_v38 }
 0x9f2   : > { %v5230_v22 = vld [vmem:[%s13792_s4 + $0x1210] sm:$0xff]  ;;  %6501 = vmatpush.msra.mxu2 %v5166_v13  ;;  %v4835_v13 = vld [vmem:[%s13792_s4 + $0x5b8] sm:$0xff] }
 0x9f3   : > { %v5582_v11 = vld [vmem:[%s13792_s4 + $0x1d10] sm:$0xff]  ;;  %6521 = vmatpush.msra.mxu3 %v5230_v22  ;;  %7614 = vmatmul.msk.f32.vlgmr.msra.gmra.mxu2 %vm4623_vm1, %v10821_v37 }
 0x9f4   : > { %v5414_v29 = vld [vmem:[%s13792_s4 + $0x17d0] sm:$0xff]  ;;  %6613 = vmatpush.msrb.mxu0 %v5582_v11  ;;  %7615 = vmatmul.msk.f32.vlgmr.msra.gmra.mxu3 %vm4623_vm1, %v10853_v58 }
 0x9f5   : > { %v5482_v52 = vld [vmem:[%s13792_s4 + $0x19f0] sm:$0xff]  ;;  %6547 = vmatpush.msrb.mxu1 %v5414_v29 }
 0x9f6   : > { %v5546_v61 = vld [vmem:[%s13792_s4 + $0x1bf0] sm:$0xff]  ;;  %6566 = vmatpush.msrb.mxu2 %v5482_v52  ;;  %v4831_v52 = vld [vmem:[%s13792_s4 + $0x598] sm:$0xff] }
 0x9f7   : > { %v5578_v2 = vld [vmem:[%s13792_s4 + $0x1cf0] sm:$0xff]  ;;  %6586 = vmatpush.msrb.mxu3 %v5546_v61 }
 0x9f8   : > { %v5410_v6 = vld [vmem:[%s13792_s4 + $0x17b0] sm:$0xff]  ;;  %6614 = vmatpush.msrb.mxu0 %v5578_v2 }
 0x9f9   : > { %v5478_v63 = vld [vmem:[%s13792_s4 + $0x19d0] sm:$0xff]  ;;  %6548 = vmatpush.msrb.mxu1 %v5410_v6 }
 0x9fa   : > { %v5542_v62 = vld [vmem:[%s13792_s4 + $0x1bd0] sm:$0xff]  ;;  %6567 = vmatpush.msrb.mxu2 %v5478_v63  ;;  %v4827_v63 = vld [vmem:[%s13792_s4 + $0x578] sm:$0xff] }
 0x9fb   : > { %v5574_v55 = vld [vmem:[%s13792_s4 + $0x1cd0] sm:$0xff]  ;;  %6587 = vmatpush.msrb.mxu3 %v5542_v62 }
 0x9fc   : > { %v5406_v7 = vld [vmem:[%s13792_s4 + $0x1790] sm:$0xff]  ;;  %6615 = vmatpush.msrb.mxu0 %v5574_v55 }
 0x9fd   : > { %v5474_v40 = vld [vmem:[%s13792_s4 + $0x19b0] sm:$0xff]  ;;  %6549 = vmatpush.msrb.mxu1 %v5406_v7 }
 0x9fe   : > { %v5538_v59 = vld [vmem:[%s13792_s4 + $0x1bb0] sm:$0xff]  ;;  %6568 = vmatpush.msrb.mxu2 %v5474_v40  ;;  %v4823_v40 = vld [vmem:[%s13792_s4 + $0x558] sm:$0xff] }
 0x9ff   : > { %v5570_v39 = vld [vmem:[%s13792_s4 + $0x1cb0] sm:$0xff]  ;;  %6588 = vmatpush.msrb.mxu3 %v5538_v59 }
 0xa00   : > { %v5402_v32 = vld [vmem:[%s13792_s4 + $0x1770] sm:$0xff]  ;;  %6616 = vmatpush.msrb.mxu0 %v5570_v39 }
 0xa01   : > { %v5470_v33 = vld [vmem:[%s13792_s4 + $0x1990] sm:$0xff]  ;;  %6550 = vmatpush.msrb.mxu1 %v5402_v32  ;;  %v4819_v32 = vld [vmem:[%s13792_s4 + $0x538] sm:$0xff] }
 0xa02   : > { %v5534_v21 = vld [vmem:[%s13792_s4 + $0x1b90] sm:$0xff]  ;;  %6569 = vmatpush.msrb.mxu2 %v5470_v33 }
 0xa03   : > { %v5566_v43 = vld [vmem:[%s13792_s4 + $0x1c90] sm:$0xff]  ;;  %6589 = vmatpush.msrb.mxu3 %v5534_v21 }
 0xa04   : > { %v5398_v27 = vld [vmem:[%s13792_s4 + $0x1750] sm:$0xff]  ;;  %6617 = vmatpush.msrb.mxu0 %v5566_v43 }
 0xa05   : > { %v5466_v1 = vld [vmem:[%s13792_s4 + $0x1970] sm:$0xff]  ;;  %6551 = vmatpush.msrb.mxu1 %v5398_v27  ;;  %v4815_v27 = vld [vmem:[%s13792_s4 + $0x518] sm:$0xff] }
 0xa06   : > { %v5530_v30 = vld [vmem:[%s13792_s4 + $0x1b70] sm:$0xff]  ;;  %6570 = vmatpush.msrb.mxu2 %v5466_v1 }
 0xa07   : > { %v5562_v5 = vld [vmem:[%s13792_s4 + $0x1c70] sm:$0xff]  ;;  %6590 = vmatpush.msrb.mxu3 %v5530_v30  ;;  %v4715_v30 = vld [vmem:[%s13792_s4 + $0x1f8] sm:$0xff] }
 0xa08   : > { %v5394_v17 = vld [vmem:[%s13792_s4 + $0x1730] sm:$0xff]  ;;  %6618 = vmatpush.msrb.mxu0 %v5562_v5  ;;  %v4779_v5 = vld [vmem:[%s13792_s4 + $0x3f8] sm:$0xff] }
 0xa09   : > { %v5462_v14 = vld [vmem:[%s13792_s4 + $0x1950] sm:$0xff]  ;;  %6552 = vmatpush.msrb.mxu1 %v5394_v17  ;;  %v4811_v17 = vld [vmem:[%s13792_s4 + $0x4f8] sm:$0xff] }
 0xa0a   : > { %v5526_v36 = vld [vmem:[%s13792_s4 + $0x1b50] sm:$0xff]  ;;  %6571 = vmatpush.msrb.mxu2 %v5462_v14 }
 0xa0b   : > { %v5558_v45 = vld [vmem:[%s13792_s4 + $0x1c50] sm:$0xff]  ;;  %6591 = vmatpush.msrb.mxu3 %v5526_v36  ;;  %v4711_v36 = vld [vmem:[%s13792_s4 + $0x1d8] sm:$0xff] }
 0xa0c   : > { %v5390_v44 = vld [vmem:[%s13792_s4 + $0x1710] sm:$0xff]  ;;  %6619 = vmatpush.msrb.mxu0 %v5558_v45  ;;  %v4775_v45 = vld [vmem:[%s13792_s4 + $0x3d8] sm:$0xff] }
 0xa0d   : > { %v5458_v34 = vld [vmem:[%s13792_s4 + $0x1930] sm:$0xff]  ;;  %6553 = vmatpush.msrb.mxu1 %v5390_v44  ;;  %v4807_v44 = vld [vmem:[%s13792_s4 + $0x4d8] sm:$0xff] }
 0xa0e   : > { %v5522_v9 = vld [vmem:[%s13792_s4 + $0x1b30] sm:$0xff]  ;;  %6572 = vmatpush.msrb.mxu2 %v5458_v34 }
 0xa0f   : > { %v5554_v20 = vld [vmem:[%s13792_s4 + $0x1c30] sm:$0xff]  ;;  %6592 = vmatpush.msrb.mxu3 %v5522_v9  ;;  %v4707_v9 = vld [vmem:[%s13792_s4 + $0x1b8] sm:$0xff] }
 0xa10   : > { %v5386_v3 = vld [vmem:[%s13792_s4 + $0x16f0] sm:$0xff]  ;;  %6620 = vmatpush.msrb.mxu0 %v5554_v20  ;;  %v4771_v20 = vld [vmem:[%s13792_s4 + $0x3b8] sm:$0xff] }
 0xa11   : > { %v5454_v24 = vld [vmem:[%s13792_s4 + $0x1910] sm:$0xff]  ;;  %6554 = vmatpush.msrb.mxu1 %v5386_v3  ;;  %v4803_v3 = vld [vmem:[%s13792_s4 + $0x4b8] sm:$0xff] }
 0xa12   : > { %v5518_v25 = vld [vmem:[%s13792_s4 + $0x1b10] sm:$0xff]  ;;  %6573 = vmatpush.msrb.mxu2 %v5454_v24 }
 0xa13   : > { %v5550_v12 = vld [vmem:[%s13792_s4 + $0x1c10] sm:$0xff]  ;;  %6593 = vmatpush.msrb.mxu3 %v5518_v25  ;;  %v4703_v25 = vld [vmem:[%s13792_s4 + $0x198] sm:$0xff] }
 0xa14   : > { %v5382_v26 = vld [vmem:[%s13792_s4 + $0x16d0] sm:$0xff]  ;;  %6621 = vmatpush.msrb.mxu0 %v5550_v12  ;;  %v4767_v12 = vld [vmem:[%s13792_s4 + $0x398] sm:$0xff] }
 0xa15   : > { %v5450_v19 = vld [vmem:[%s13792_s4 + $0x18f0] sm:$0xff]  ;;  %6555 = vmatpush.msrb.mxu1 %v5382_v26  ;;  %7620 = vmatmul.msk.f32.vlgmr.msrb.gmra.mxu0 %vm4623_vm1, %v10967_v47  ;;  %v4799_v26 = vld [vmem:[%s13792_s4 + $0x498] sm:$0xff] }
 0xa16   : > { %v5514_v15 = vld [vmem:[%s13792_s4 + $0x1af0] sm:$0xff]  ;;  %6574 = vmatpush.msrb.mxu2 %v5450_v19  ;;  %6686 = vmatpush.msra.mxu0 %v4843_v8  ;;  %v4795_v8 = vld [vmem:[%s13792_s4 + $0x478] sm:$0xff] }
 0xa17   : > { %v5378_v49 = vld [vmem:[%s13792_s4 + $0x16b0] sm:$0xff]  ;;  %6594 = vmatpush.msrb.mxu3 %v5514_v15  ;;  %v4699_v15 = vld [vmem:[%s13792_s4 + $0x178] sm:$0xff] }
 0xa18   : > { %v5446_v18 = vld [vmem:[%s13792_s4 + $0x18d0] sm:$0xff]  ;;  %6556 = vmatpush.msrb.mxu1 %v5378_v49  ;;  %6687 = vmatpush.msra.mxu0 %v4839_v23  ;;  %v4763_v49 = vld [vmem:[%s13792_s4 + $0x378] sm:$0xff] }
 0xa19   : > { %v5510_v10 = vld [vmem:[%s13792_s4 + $0x1ad0] sm:$0xff]  ;;  %6575 = vmatpush.msrb.mxu2 %v5446_v18  ;;  %v4791_v23 = vld [vmem:[%s13792_s4 + $0x458] sm:$0xff] }
 0xa1a   : > { %v5374_v35 = vld [vmem:[%s13792_s4 + $0x1690] sm:$0xff]  ;;  %6595 = vmatpush.msrb.mxu3 %v5510_v10  ;;  %6688 = vmatpush.msra.mxu0 %v4835_v13  ;;  %v4695_v10 = vld [vmem:[%s13792_s4 + $0x158] sm:$0xff] }
 0xa1b   : > { %v5442_v57 = vld [vmem:[%s13792_s4 + $0x18b0] sm:$0xff]  ;;  %6557 = vmatpush.msrb.mxu1 %v5374_v35  ;;  %v4759_v35 = vld [vmem:[%s13792_s4 + $0x358] sm:$0xff] }
 0xa1c   : > { %v5506_v60 = vld [vmem:[%s13792_s4 + $0x1ab0] sm:$0xff]  ;;  %6576 = vmatpush.msrb.mxu2 %v5442_v57  ;;  %6689 = vmatpush.msra.mxu0 %v4831_v52  ;;  %v4787_v13 = vld [vmem:[%s13792_s4 + $0x438] sm:$0xff] }
 0xa1d   : > { %v5370_v38 = vld [vmem:[%s13792_s4 + $0x1670] sm:$0xff]  ;;  %6596 = vmatpush.msrb.mxu3 %v5506_v60  ;;  %v4691_v60 = vld [vmem:[%s13792_s4 + $0x138] sm:$0xff] }
 0xa1e   : > { %v5438_v22 = vld [vmem:[%s13792_s4 + $0x1890] sm:$0xff]  ;;  %6558 = vmatpush.msrb.mxu1 %v5370_v38  ;;  %6690 = vmatpush.msra.mxu0 %v4827_v63  ;;  %v4755_v38 = vld [vmem:[%s13792_s4 + $0x338] sm:$0xff] }
 0xa1f   : > { %v5502_v11 = vld [vmem:[%s13792_s4 + $0x1a90] sm:$0xff]  ;;  %6577 = vmatpush.msrb.mxu2 %v5438_v22  ;;  %v4783_v52 = vld [vmem:[%s13792_s4 + $0x418] sm:$0xff] }
 0xa20   : > { %v5366_v29 = vld [vmem:[%s13792_s4 + $0x1650] sm:$0xff]  ;;  %6597 = vmatpush.msrb.mxu3 %v5502_v11  ;;  %6691 = vmatpush.msra.mxu0 %v4823_v40  ;;  %v4687_v11 = vld [vmem:[%s13792_s4 + $0x118] sm:$0xff] }
 0xa21   : > { %v5434_v61 = vld [vmem:[%s13792_s4 + $0x1870] sm:$0xff]  ;;  %6559 = vmatpush.msrb.mxu1 %v5366_v29  ;;  %v4751_v29 = vld [vmem:[%s13792_s4 + $0x318] sm:$0xff] }
 0xa22   : > { %v5498_v2 = vld [vmem:[%s13792_s4 + $0x1a70] sm:$0xff]  ;;  %6578 = vmatpush.msrb.mxu2 %v5434_v61  ;;  %6692 = vmatpush.msra.mxu0 %v4819_v32  ;;  %v4739_v32 = vld [vmem:[%s13792_s4 + $0x2b8] sm:$0xff] }
 0xa23   : > { %v5362_v6 = vld [vmem:[%s13792_s4 + $0x1630] sm:$0xff]  ;;  %6598 = vmatpush.msrb.mxu3 %v5498_v2  ;;  %v4683_v2 = vld [vmem:[%s13792_s4 + $0xf8] sm:$0xff] }
 0xa24   : > { %v5430_v62 = vld [vmem:[%s13792_s4 + $0x1850] sm:$0xff]  ;;  %6560 = vmatpush.msrb.mxu1 %v5362_v6  ;;  %6693 = vmatpush.msra.mxu0 %v4815_v27  ;;  %v4747_v6 = vld [vmem:[%s13792_s4 + $0x2f8] sm:$0xff] }
 0xa25   : > { %v5494_v55 = vld [vmem:[%s13792_s4 + $0x1a50] sm:$0xff]  ;;  %6579 = vmatpush.msrb.mxu2 %v5430_v62  ;;  %v5099_v62 = vld [vmem:[%s13792_s4 + $0xdf8] sm:$0xff] }
 0xa26   : > { %v5358_v7 = vld [vmem:[%s13792_s4 + $0x1610] sm:$0xff]  ;;  %6599 = vmatpush.msrb.mxu3 %v5494_v55  ;;  %6694 = vmatpush.msra.mxu0 %v4811_v17  ;;  %v4679_v55 = vld [vmem:[%s13792_s4 + $0xd8] sm:$0xff] }
 0xa27   : > { %v5426_v59 = vld [vmem:[%s13792_s4 + $0x1830] sm:$0xff]  ;;  %6561 = vmatpush.msrb.mxu1 %v5358_v7  ;;  %v4743_v7 = vld [vmem:[%s13792_s4 + $0x2d8] sm:$0xff] }
 0xa28   : > { %v5490_v39 = vld [vmem:[%s13792_s4 + $0x1a30] sm:$0xff]  ;;  %6580 = vmatpush.msrb.mxu2 %v5426_v59  ;;  %7617 = vmatmul.msk.f32.vlgmr.msrb.gmra.mxu1 %vm4623_vm1, %v11047_v4  ;;  %v5095_v59 = vld [vmem:[%s13792_s4 + $0xdd8] sm:$0xff] }
 0xa29   : > { %v5674_v33 = vld [vmem:[%s13792_s4 + $0x1ff0] sm:$0xff]  ;;  %6600 = vmatpush.msrb.mxu3 %v5490_v39  ;;  %6695 = vmatpush.msra.mxu0 %v4807_v44  ;;  %v4675_v39 = vld [vmem:[%s13792_s4 + $0xb8] sm:$0xff] }
 0xa2a   : > { %v5422_v21 = vld [vmem:[%s13792_s4 + $0x1810] sm:$0xff]  ;;  %6626 = vmatpush.msra.mxu1 %v5674_v33 }
 0xa2b   : > { %v5486_v43 = vld [vmem:[%s13792_s4 + $0x1a10] sm:$0xff]  ;;  %6581 = vmatpush.msrb.mxu2 %v5422_v21  ;;  %6696 = vmatpush.msra.mxu0 %v4803_v3  ;;  %v4671_v21 = vld [vmem:[%s13792_s4 + $0x98] sm:$0xff] }
 0xa2c   : > { %v5670_v1 = vld [vmem:[%s13792_s4 + $0x1fd0] sm:$0xff]  ;;  %6601 = vmatpush.msrb.mxu3 %v5486_v43  ;;  %7618 = vmatmul.msk.f32.vlgmr.msrb.gmra.mxu2 %vm4623_vm1, %v10937_v54  ;;  %v4735_v43 = vld [vmem:[%s13792_s4 + $0x298] sm:$0xff] }
 0xa2d   : > { %v5666_v14 = vld [vmem:[%s13792_s4 + $0x1fb0] sm:$0xff]  ;;  %7619 = vmatmul.msk.f32.vlgmr.msrb.gmra.mxu3 %vm4623_vm1, %v11064_v50  ;;  %6627 = vmatpush.msra.mxu1 %v5670_v1  ;;  %v5087_v1 = vld [vmem:[%s13792_s4 + $0xd98] sm:$0xff] }
 0xa2e   : > { %6646 = vmatpush.msra.mxu2 %v4715_v30  ;;  %6666 = vmatpush.msra.mxu3 %v4779_v5  ;;  %v5662_v34 = vld [vmem:[%s13792_s4 + $0x1f90] sm:$0xff]  ;;  %v4667_v30 = vld [vmem:[%s13792_s4 + $0x78] sm:$0xff] }
 0xa2f   : > { %6628 = vmatpush.msra.mxu1 %v5666_v14  ;;  %v5658_v24 = vld [vmem:[%s13792_s4 + $0x1f70] sm:$0xff]  ;;  %6697 = vmatpush.msra.mxu0 %v4799_v26  ;;  %v4731_v5 = vld [vmem:[%s13792_s4 + $0x278] sm:$0xff] }
 0xa30   : > { %6647 = vmatpush.msra.mxu2 %v4711_v36  ;;  %6667 = vmatpush.msra.mxu3 %v4775_v45  ;;  %v5654_v19 = vld [vmem:[%s13792_s4 + $0x1f50] sm:$0xff]  ;;  %v5083_v14 = vld [vmem:[%s13792_s4 + $0xd78] sm:$0xff] }
 0xa31   : > { %6629 = vmatpush.msra.mxu1 %v5662_v34  ;;  %v5650_v18 = vld [vmem:[%s13792_s4 + $0x1f30] sm:$0xff]  ;;  %6698 = vmatpush.msra.mxu0 %v4795_v8  ;;  %v4663_v36 = vld [vmem:[%s13792_s4 + $0x58] sm:$0xff] }
 0xa32   : > { %6648 = vmatpush.msra.mxu2 %v4707_v9  ;;  %6668 = vmatpush.msra.mxu3 %v4771_v20  ;;  %v5646_v57 = vld [vmem:[%s13792_s4 + $0x1f10] sm:$0xff]  ;;  %v4727_v45 = vld [vmem:[%s13792_s4 + $0x258] sm:$0xff] }
 0xa33   : > { %6630 = vmatpush.msra.mxu1 %v5658_v24  ;;  %v5642_v22 = vld [vmem:[%s13792_s4 + $0x1ef0] sm:$0xff]  ;;  %6699 = vmatpush.msra.mxu0 %v4791_v23  ;;  %v5079_v34 = vld [vmem:[%s13792_s4 + $0xd58] sm:$0xff] }
 0xa34   : > { %6649 = vmatpush.msra.mxu2 %v4703_v25  ;;  %6669 = vmatpush.msra.mxu3 %v4767_v12  ;;  %v5638_v61 = vld [vmem:[%s13792_s4 + $0x1ed0] sm:$0xff]  ;;  %v4659_v9 = vld [vmem:[%s13792_s4 + $0x38] sm:$0xff] }
 0xa35   : > { %6631 = vmatpush.msra.mxu1 %v5654_v19  ;;  %6700 = vmatpush.msra.mxu0 %v4787_v13  ;;  %v5634_v63 = vld [vmem:[%s13792_s4 + $0x1eb0] sm:$0xff]  ;;  %v4723_v20 = vld [vmem:[%s13792_s4 + $0x238] sm:$0xff] }
 0xa36   : > { %6650 = vmatpush.msra.mxu2 %v4699_v15  ;;  %6670 = vmatpush.msra.mxu3 %v4763_v49  ;;  %v5630_v40 = vld [vmem:[%s13792_s4 + $0x1e90] sm:$0xff]  ;;  %v5075_v3 = vld [vmem:[%s13792_s4 + $0xd38] sm:$0xff] }
 0xa37   : > { %6632 = vmatpush.msra.mxu1 %v5650_v18  ;;  %6701 = vmatpush.msra.mxu0 %v4783_v52  ;;  %v5626_v33 = vld [vmem:[%s13792_s4 + $0x1e70] sm:$0xff]  ;;  %v4907_v24 = vld [vmem:[%s13792_s4 + $0x7f8] sm:$0xff] }
 0xa38   : > { %6651 = vmatpush.msra.mxu2 %v4695_v10  ;;  %6671 = vmatpush.msra.mxu3 %v4759_v35  ;;  %v5622_v27 = vld [vmem:[%s13792_s4 + $0x1e50] sm:$0xff]  ;;  %v4655_v25 = vld [vmem:[%s13792_s4 + $0x18] sm:$0xff] }
 0xa39   : > { %6633 = vmatpush.msra.mxu1 %v5646_v57  ;;  %7624 = vmatmul.msk.f32.vlgmr.msra.gmra.mxu0 %vm4623_vm1, %v10612_v16  ;;  %v5091_v16 = vld [vmem:[%s13792_s4 + $0xdb8] sm:$0xff]  ;;  %v5618_v17 = vld [vmem:[%s13792_s4 + $0x1e30] sm:$0xff] }
 0xa3a   : > { %6652 = vmatpush.msra.mxu2 %v4691_v60  ;;  %6672 = vmatpush.msra.mxu3 %v4755_v38  ;;  %v5614_v44 = vld [vmem:[%s13792_s4 + $0x1e10] sm:$0xff]  ;;  %v4719_v12 = vld [vmem:[%s13792_s4 + $0x218] sm:$0xff] }
 0xa3b   : > { %6634 = vmatpush.msra.mxu1 %v5642_v22  ;;  %6766 = vmatpush.msrb.mxu0 %v5099_v62  ;;  %v5071_v26 = vld [vmem:[%s13792_s4 + $0xd18] sm:$0xff] }
 0xa3c   : > { %6653 = vmatpush.msra.mxu2 %v4687_v11  ;;  %6673 = vmatpush.msra.mxu3 %v4751_v29  ;;  %v4903_v19 = vld [vmem:[%s13792_s4 + $0x7d8] sm:$0xff] }
 0xa3d   : > { %6635 = vmatpush.msra.mxu1 %v5638_v61  ;;  %6767 = vmatpush.msrb.mxu0 %v5095_v59  ;;  %v4971_v15 = vld [vmem:[%s13792_s4 + $0x9f8] sm:$0xff] }
 0xa3e   : > { %6654 = vmatpush.msra.mxu2 %v4683_v2  ;;  %6674 = vmatpush.msra.mxu3 %v4747_v6  ;;  %v5035_v49 = vld [vmem:[%s13792_s4 + $0xbf8] sm:$0xff] }
 0xa3f   : > { %6636 = vmatpush.msra.mxu1 %v5634_v63  ;;  %6768 = vmatpush.msrb.mxu0 %v5091_v16  ;;  %v5067_v8 = vld [vmem:[%s13792_s4 + $0xcf8] sm:$0xff] }
 0xa40   : > { %6655 = vmatpush.msra.mxu2 %v4679_v55  ;;  %6675 = vmatpush.msra.mxu3 %v4743_v7  ;;  %v4899_v18 = vld [vmem:[%s13792_s4 + $0x7b8] sm:$0xff] }
 0xa41   : > { %6637 = vmatpush.msra.mxu1 %v5630_v40  ;;  %6769 = vmatpush.msrb.mxu0 %v5087_v1  ;;  %v4967_v10 = vld [vmem:[%s13792_s4 + $0x9d8] sm:$0xff] }
 0xa42   : > { %6656 = vmatpush.msra.mxu2 %v4675_v39  ;;  %6676 = vmatpush.msra.mxu3 %v4739_v32  ;;  %v5063_v35 = vld [vmem:[%s13792_s4 + $0xcd8] sm:$0xff] }
 0xa43   : > { %6638 = vmatpush.msra.mxu1 %v5626_v33  ;;  %6770 = vmatpush.msrb.mxu0 %v5083_v14  ;;  %v4895_v23 = vld [vmem:[%s13792_s4 + $0x798] sm:$0xff] }
 0xa44   : > { %6657 = vmatpush.msra.mxu2 %v4671_v21  ;;  %6677 = vmatpush.msra.mxu3 %v4735_v43  ;;  %v5027_v57 = vld [vmem:[%s13792_s4 + $0xbb8] sm:$0xff] }
 0xa45   : > { %6639 = vmatpush.msra.mxu1 %v5622_v27  ;;  %6771 = vmatpush.msrb.mxu0 %v5079_v34  ;;  %v5059_v60 = vld [vmem:[%s13792_s4 + $0xcb8] sm:$0xff] }
 0xa46   : > { %6658 = vmatpush.msra.mxu2 %v4667_v30  ;;  %6678 = vmatpush.msra.mxu3 %v4731_v5  ;;  %v4891_v38 = vld [vmem:[%s13792_s4 + $0x778] sm:$0xff] }
 0xa47   : > { %6640 = vmatpush.msra.mxu1 %v5618_v17  ;;  %6772 = vmatpush.msrb.mxu0 %v5075_v3  ;;  %v4959_v13 = vld [vmem:[%s13792_s4 + $0x998] sm:$0xff] }
 0xa48   : > { %6659 = vmatpush.msra.mxu2 %v4663_v36  ;;  %6679 = vmatpush.msra.mxu3 %v4727_v45  ;;  %v5023_v22 = vld [vmem:[%s13792_s4 + $0xb98] sm:$0xff] }
 0xa49   : > { %6641 = vmatpush.msra.mxu1 %v5614_v44  ;;  %6773 = vmatpush.msrb.mxu0 %v5071_v26  ;;  %v5055_v11 = vld [vmem:[%s13792_s4 + $0xc98] sm:$0xff] }
 0xa4a   : > { %6660 = vmatpush.msra.mxu2 %v4659_v9  ;;  %6680 = vmatpush.msra.mxu3 %v4723_v20  ;;  %v4887_v29 = vld [vmem:[%s13792_s4 + $0x758] sm:$0xff] }
 0xa4b   : > { %7621 = vmatmul.msk.f32.vlgmr.msra.gmra.mxu1 %vm4623_vm1, %v11250_v41  ;;  %6774 = vmatpush.msrb.mxu0 %v5067_v8  ;;  %v4955_v52 = vld [vmem:[%s13792_s4 + $0x978] sm:$0xff] }
 0xa4c   : > { %6706 = vmatpush.msrb.mxu1 %v4907_v24  ;;  %6661 = vmatpush.msra.mxu2 %v4655_v25  ;;  %v5019_v61 = vld [vmem:[%s13792_s4 + $0xb78] sm:$0xff] }
 0xa4d   : > { %6681 = vmatpush.msra.mxu3 %v4719_v12  ;;  %7622 = vmatmul.msk.f32.vlgmr.msra.gmra.mxu2 %vm4623_vm1, %v10599_v31  ;;  %v5031_v31 = vld [vmem:[%s13792_s4 + $0xbd8] sm:$0xff] }
 0xa4e   : > { %7623 = vmatmul.msk.f32.vlgmr.msra.gmra.mxu3 %vm4623_vm1, %v10609_v51  ;;  %6707 = vmatpush.msrb.mxu1 %v4903_v19  ;;  %v4963_v51 = vld [vmem:[%s13792_s4 + $0x9b8] sm:$0xff] }
 0xa4f   : > { %6726 = vmatpush.msrb.mxu2 %v4971_v15  ;;  %6746 = vmatpush.msrb.mxu3 %v5035_v49  ;;  %v5051_v2 = vld [vmem:[%s13792_s4 + $0xc78] sm:$0xff] }
 0xa50   : > { %6708 = vmatpush.msrb.mxu1 %v4899_v18  ;;  %6775 = vmatpush.msrb.mxu0 %v5063_v35  ;;  %v4883_v6 = vld [vmem:[%s13792_s4 + $0x738] sm:$0xff] }
 0xa51   : > { %6727 = vmatpush.msrb.mxu2 %v4967_v10  ;;  %6747 = vmatpush.msrb.mxu3 %v5031_v31  ;;  %v4951_v63 = vld [vmem:[%s13792_s4 + $0x958] sm:$0xff] }
 0xa52   : > { %6709 = vmatpush.msrb.mxu1 %v4895_v23  ;;  %6776 = vmatpush.msrb.mxu0 %v5059_v60  ;;  %v5015_v62 = vld [vmem:[%s13792_s4 + $0xb58] sm:$0xff] }
 0xa53   : > { %6728 = vmatpush.msrb.mxu2 %v4963_v51  ;;  %6748 = vmatpush.msrb.mxu3 %v5027_v57  ;;  %v5047_v55 = vld [vmem:[%s13792_s4 + $0xc58] sm:$0xff] }
 0xa54   : > { %6710 = vmatpush.msrb.mxu1 %v4891_v38  ;;  %6777 = vmatpush.msrb.mxu0 %v5055_v11  ;;  %v4879_v7 = vld [vmem:[%s13792_s4 + $0x718] sm:$0xff] }
 0xa55   : > { %6729 = vmatpush.msrb.mxu2 %v4959_v13  ;;  %6749 = vmatpush.msrb.mxu3 %v5023_v22  ;;  %v4947_v40 = vld [vmem:[%s13792_s4 + $0x938] sm:$0xff] }
 0xa56   : > { %6711 = vmatpush.msrb.mxu1 %v4887_v29  ;;  %6778 = vmatpush.msrb.mxu0 %v5051_v2  ;;  %v5011_v59 = vld [vmem:[%s13792_s4 + $0xb38] sm:$0xff] }
 0xa57   : > { %6730 = vmatpush.msrb.mxu2 %v4955_v52  ;;  %6750 = vmatpush.msrb.mxu3 %v5019_v61  ;;  %v5043_v39 = vld [vmem:[%s13792_s4 + $0xc38] sm:$0xff] }
 0xa58   : > { %6712 = vmatpush.msrb.mxu1 %v4883_v6  ;;  %v4875_v32 = vld [vmem:[%s13792_s4 + $0x6f8] sm:$0xff]  ;;  %6779 = vmatpush.msrb.mxu0 %v5047_v55 }
 0xa59   : > { %6731 = vmatpush.msrb.mxu2 %v4951_v63  ;;  %6751 = vmatpush.msrb.mxu3 %v5015_v62  ;;  %v4943_v33 = vld [vmem:[%s13792_s4 + $0x918] sm:$0xff] }
 0xa5a   : > { %6713 = vmatpush.msrb.mxu1 %v4879_v7  ;;  %v5007_v16 = vld [vmem:[%s13792_s4 + $0xb18] sm:$0xff]  ;;  %6780 = vmatpush.msrb.mxu0 %v5043_v39 }
 0xa5b   : > { %6732 = vmatpush.msrb.mxu2 %v4947_v40  ;;  %6752 = vmatpush.msrb.mxu3 %v5011_v59  ;;  %v5039_v21 = vld [vmem:[%s13792_s4 + $0xc18] sm:$0xff] }
 0xa5c   : > { %v4871_v43 = vld [vmem:[%s13792_s4 + $0x6d8] sm:$0xff]  ;;  %6714 = vmatpush.msrb.mxu1 %v4875_v32  ;;  %6781 = vmatpush.msrb.mxu0 %v5039_v21 }
 0xa5d   : > { %v4939_v27 = vld [vmem:[%s13792_s4 + $0x8f8] sm:$0xff]  ;;  %6733 = vmatpush.msrb.mxu2 %v4943_v33  ;;  %6753 = vmatpush.msrb.mxu3 %v5007_v16  ;;  %v13138_v33 = vpop.f32.mrf.mxu2 }
 0xa5e   : > { %v5003_v1 = vld [vmem:[%s13792_s4 + $0xaf8] sm:$0xff]  ;;  %6715 = vmatpush.msrb.mxu1 %v4871_v43  ;;  %7628 = vmatmul.msk.f32.vlgmr.msrb.gmra.mxu0 %vm4623_vm1, %v10720_v28 }
 0xa5f   : > { %v4867_v30 = vld [vmem:[%s13792_s4 + $0x6b8] sm:$0xff]  ;;  %6734 = vmatpush.msrb.mxu2 %v4939_v27  ;;  %6754 = vmatpush.msrb.mxu3 %v5003_v1 }
 0xa60   : > { %v5355_v5 = vld [vmem:[%s13792_s4 + $0x15f8] sm:$0xff]  ;;  %6716 = vmatpush.msrb.mxu1 %v4867_v30 }
 0xa61   : > { %v4935_v17 = vld [vmem:[%s13792_s4 + $0x8d8] sm:$0xff]  ;;  %6846 = vmatpush.msra.mxu0 %v5355_v5 }
 0xa62   : > { %v4999_v14 = vld [vmem:[%s13792_s4 + $0xad8] sm:$0xff]  ;;  %6735 = vmatpush.msrb.mxu2 %v4935_v17 }
 0xa63   : > { %v4863_v36 = vld [vmem:[%s13792_s4 + $0x698] sm:$0xff]  ;;  %6755 = vmatpush.msrb.mxu3 %v4999_v14 }
 0xa64   : > { %v5351_v45 = vld [vmem:[%s13792_s4 + $0x15d8] sm:$0xff]  ;;  %6717 = vmatpush.msrb.mxu1 %v4863_v36 }
 0xa65   : > { %v4931_v44 = vld [vmem:[%s13792_s4 + $0x8b8] sm:$0xff]  ;;  %6847 = vmatpush.msra.mxu0 %v5351_v45 }
 0xa66   : > { %v4995_v34 = vld [vmem:[%s13792_s4 + $0xab8] sm:$0xff]  ;;  %6736 = vmatpush.msrb.mxu2 %v4931_v44 }
 0xa67   : > { %v4859_v9 = vld [vmem:[%s13792_s4 + $0x678] sm:$0xff]  ;;  %6756 = vmatpush.msrb.mxu3 %v4995_v34  ;;  %v13176_v34 = vpop.f32.mrf.mxu3 }
 0xa68   : > { %v5347_v28 = vld [vmem:[%s13792_s4 + $0x15b8] sm:$0xff]  ;;  %6718 = vmatpush.msrb.mxu1 %v4859_v9 }
 0xa69   : > { %v4927_v20 = vld [vmem:[%s13792_s4 + $0x898] sm:$0xff]  ;;  %6848 = vmatpush.msra.mxu0 %v5347_v28 }
 0xa6a   : > { %v4991_v3 = vld [vmem:[%s13792_s4 + $0xa98] sm:$0xff]  ;;  %6737 = vmatpush.msrb.mxu2 %v4927_v20 }
 0xa6b   : > { %v4855_v24 = vld [vmem:[%s13792_s4 + $0x658] sm:$0xff]  ;;  %6757 = vmatpush.msrb.mxu3 %v4991_v3 }
 0xa6c   : > { %v5343_v25 = vld [vmem:[%s13792_s4 + $0x1598] sm:$0xff]  ;;  %6719 = vmatpush.msrb.mxu1 %v4855_v24  ;;  %v13190_v24 = vpop.f32.mrf.mxu2 }
 0xa6d   : > { %v4923_v12 = vld [vmem:[%s13792_s4 + $0x878] sm:$0xff]  ;;  %6849 = vmatpush.msra.mxu0 %v5343_v25 }
 0xa6e   : > { %v4987_v26 = vld [vmem:[%s13792_s4 + $0xa78] sm:$0xff]  ;;  %6738 = vmatpush.msrb.mxu2 %v4923_v12 }
 0xa6f   : > { %v4851_v19 = vld [vmem:[%s13792_s4 + $0x638] sm:$0xff]  ;;  %6758 = vmatpush.msrb.mxu3 %v4987_v26 }
 0xa70   : > { %v5339_v15 = vld [vmem:[%s13792_s4 + $0x1578] sm:$0xff]  ;;  %6720 = vmatpush.msrb.mxu1 %v4851_v19  ;;  %v13201_v19 = vpop.f32.mrf.mxu0 }
 0xa71   : > { %v4919_v49 = vld [vmem:[%s13792_s4 + $0x858] sm:$0xff]  ;;  %6850 = vmatpush.msra.mxu0 %v5339_v15  ;;  %v13203_v15 = vpop.f32.mrf.mxu1 }
 0xa72   : > { %v4983_v8 = vld [vmem:[%s13792_s4 + $0xa58] sm:$0xff]  ;;  %6739 = vmatpush.msrb.mxu2 %v4919_v49 }
 0xa73   : > { %v4847_v18 = vld [vmem:[%s13792_s4 + $0x618] sm:$0xff]  ;;  %6759 = vmatpush.msrb.mxu3 %v4983_v8 }
 0xa74   : > { %v5335_v10 = vld [vmem:[%s13792_s4 + $0x1558] sm:$0xff]  ;;  %6721 = vmatpush.msrb.mxu1 %v4847_v18 }
 0xa75   : > { %v4915_v31 = vld [vmem:[%s13792_s4 + $0x838] sm:$0xff]  ;;  %6851 = vmatpush.msra.mxu0 %v5335_v10  ;;  %7625 = vmatmul.msk.f32.vlgmr.msrb.gmra.mxu1 %vm4623_vm1, %v10654_v56 }
 0xa76   : > { %v4979_v35 = vld [vmem:[%s13792_s4 + $0xa38] sm:$0xff]  ;;  %6740 = vmatpush.msrb.mxu2 %v4915_v31 }
 0xa77   : > { %v5331_v23 = vld [vmem:[%s13792_s4 + $0x1538] sm:$0xff]  ;;  %6760 = vmatpush.msrb.mxu3 %v4979_v35 }
 0xa78   : > { %v5163_v51 = vld [vmem:[%s13792_s4 + $0xff8] sm:$0xff]  ;;  %6852 = vmatpush.msra.mxu0 %v5331_v23 }
 0xa79   : > { %v4911_v57 = vld [vmem:[%s13792_s4 + $0x818] sm:$0xff]  ;;  %6786 = vmatpush.msra.mxu1 %v5163_v51  ;;  %v13231_v51 = vpop.f32.mrf.mxu3 }
 0xa7a   : > { %v4975_v60 = vld [vmem:[%s13792_s4 + $0xa18] sm:$0xff]  ;;  %6741 = vmatpush.msrb.mxu2 %v4911_v57 }
 0xa7b   : > { %v5327_v38 = vld [vmem:[%s13792_s4 + $0x1518] sm:$0xff]  ;;  %6761 = vmatpush.msrb.mxu3 %v4975_v60  ;;  %7626 = vmatmul.msk.f32.vlgmr.msrb.gmra.mxu2 %vm4623_vm1, %v10700_v53 }
 0xa7c   : > { %v5159_v13 = vld [vmem:[%s13792_s4 + $0xfd8] sm:$0xff]  ;;  %6853 = vmatpush.msra.mxu0 %v5327_v38  ;;  %7627 = vmatmul.msk.f32.vlgmr.msrb.gmra.mxu3 %vm4623_vm1, %v10717_v42 }
 0xa7d   : > { %v5227_v22 = vld [vmem:[%s13792_s4 + $0x11f8] sm:$0xff]  ;;  %6787 = vmatpush.msra.mxu1 %v5159_v13 }
 0xa7e   : > { %v5291_v56 = vld [vmem:[%s13792_s4 + $0x13f8] sm:$0xff]  ;;  %6806 = vmatpush.msra.mxu2 %v5227_v22  ;;  %v13245_v22 = vpop.f32.mrf.mxu2 }
 0xa7f   : > { %v5323_v11 = vld [vmem:[%s13792_s4 + $0x14f8] sm:$0xff]  ;;  %6826 = vmatpush.msra.mxu3 %v5291_v56 }
 0xa80   : > { %v5155_v29 = vld [vmem:[%s13792_s4 + $0xfb8] sm:$0xff]  ;;  %6854 = vmatpush.msra.mxu0 %v5323_v11 }
 0xa81   : > { %v5223_v52 = vld [vmem:[%s13792_s4 + $0x11d8] sm:$0xff]  ;;  %6788 = vmatpush.msra.mxu1 %v5155_v29 }
 0xa82   : > { %v5287_v53 = vld [vmem:[%s13792_s4 + $0x13d8] sm:$0xff]  ;;  %6807 = vmatpush.msra.mxu2 %v5223_v52 }
 0xa83   : > { %v5319_v61 = vld [vmem:[%s13792_s4 + $0x14d8] sm:$0xff]  ;;  %6827 = vmatpush.msra.mxu3 %v5287_v53  ;;  %v13259_v53 = vpop.f32.mrf.mxu0 }
 0xa84   : > { %v5151_v2 = vld [vmem:[%s13792_s4 + $0xf98] sm:$0xff]  ;;  %6855 = vmatpush.msra.mxu0 %v5319_v61  ;;  %v13261_v61 = vpop.f32.mrf.mxu1 }
 0xa85   : > { %v5219_v42 = vld [vmem:[%s13792_s4 + $0x11b8] sm:$0xff]  ;;  %6789 = vmatpush.msra.mxu1 %v5151_v2 }
 0xa86   : > { %v5283_v6 = vld [vmem:[%s13792_s4 + $0x13b8] sm:$0xff]  ;;  %6808 = vmatpush.msra.mxu2 %v5219_v42 }
 0xa87   : > { %v5315_v63 = vld [vmem:[%s13792_s4 + $0x14b8] sm:$0xff]  ;;  %6828 = vmatpush.msra.mxu3 %v5283_v6 }
 0xa88   : > { %v5147_v62 = vld [vmem:[%s13792_s4 + $0xf78] sm:$0xff]  ;;  %6856 = vmatpush.msra.mxu0 %v5315_v63 }
 0xa89   : > { %v5215_v55 = vld [vmem:[%s13792_s4 + $0x1198] sm:$0xff]  ;;  %6790 = vmatpush.msra.mxu1 %v5147_v62 }
 0xa8a   : > { %v5279_v7 = vld [vmem:[%s13792_s4 + $0x1398] sm:$0xff]  ;;  %6809 = vmatpush.msra.mxu2 %v5215_v55 }
 0xa8b   : > { %v5311_v40 = vld [vmem:[%s13792_s4 + $0x1498] sm:$0xff]  ;;  %6829 = vmatpush.msra.mxu3 %v5279_v7 }
 0xa8c   : > { %v5143_v59 = vld [vmem:[%s13792_s4 + $0xf58] sm:$0xff]  ;;  %6857 = vmatpush.msra.mxu0 %v5311_v40  ;;  %v13284_v40 = vpop.f32.mrf.mxu3 }
 0xa8d   : > { %v5211_v39 = vld [vmem:[%s13792_s4 + $0x1178] sm:$0xff]  ;;  %6791 = vmatpush.msra.mxu1 %v5143_v59 }
 0xa8e   : > { %v5275_v32 = vld [vmem:[%s13792_s4 + $0x1378] sm:$0xff]  ;;  %6810 = vmatpush.msra.mxu2 %v5211_v39 }
 0xa8f   : > { %v5307_v16 = vld [vmem:[%s13792_s4 + $0x1478] sm:$0xff]  ;;  %6830 = vmatpush.msra.mxu3 %v5275_v32 }
 0xa90   : > { %v5139_v21 = vld [vmem:[%s13792_s4 + $0xf38] sm:$0xff]  ;;  %6858 = vmatpush.msra.mxu0 %v5307_v16  ;;  %v13297_v16 = vpop.f32.mrf.mxu2 }
 0xa91   : > { %v5207_v43 = vld [vmem:[%s13792_s4 + $0x1158] sm:$0xff]  ;;  %6792 = vmatpush.msra.mxu1 %v5139_v21 }
 0xa92   : > { %v5271_v27 = vld [vmem:[%s13792_s4 + $0x1358] sm:$0xff]  ;;  %6811 = vmatpush.msra.mxu2 %v5207_v43 }
 0xa93   : > { %v5303_v1 = vld [vmem:[%s13792_s4 + $0x1458] sm:$0xff]  ;;  %6831 = vmatpush.msra.mxu3 %v5271_v27  ;;  %v13308_v27 = vpop.f32.mrf.mxu0 }
 0xa94   : > { %v5135_v30 = vld [vmem:[%s13792_s4 + $0xf18] sm:$0xff]  ;;  %6859 = vmatpush.msra.mxu0 %v5303_v1  ;;  %v13310_v1 = vpop.f32.mrf.mxu1 }
 0xa95   : > { %v5203_v5 = vld [vmem:[%s13792_s4 + $0x1138] sm:$0xff]  ;;  %6793 = vmatpush.msra.mxu1 %v5135_v30 }
 0xa96   : > { %v5267_v17 = vld [vmem:[%s13792_s4 + $0x1338] sm:$0xff]  ;;  %6812 = vmatpush.msra.mxu2 %v5203_v5 }
 0xa97   : > { %v5299_v14 = vld [vmem:[%s13792_s4 + $0x1438] sm:$0xff]  ;;  %6832 = vmatpush.msra.mxu3 %v5267_v17 }
 0xa98   : > { %v5131_v36 = vld [vmem:[%s13792_s4 + $0xef8] sm:$0xff]  ;;  %6860 = vmatpush.msra.mxu0 %v5299_v14 }
 0xa99   : > { %v5199_v45 = vld [vmem:[%s13792_s4 + $0x1118] sm:$0xff]  ;;  %6794 = vmatpush.msra.mxu1 %v5131_v36 }
 0xa9a   : > { %v5263_v44 = vld [vmem:[%s13792_s4 + $0x1318] sm:$0xff]  ;;  %6813 = vmatpush.msra.mxu2 %v5199_v45 }
 0xa9b   : > { %v5295_v9 = vld [vmem:[%s13792_s4 + $0x1418] sm:$0xff]  ;;  %6833 = vmatpush.msra.mxu3 %v5263_v44  ;;  %v13340_v44 = vpop.f32.mrf.mxu3 }
 0xa9c   : > { %v5127_v28 = vld [vmem:[%s13792_s4 + $0xed8] sm:$0xff]  ;;  %6861 = vmatpush.msra.mxu0 %v5295_v9 }
 0xa9d   : > { %v5195_v20 = vld [vmem:[%s13792_s4 + $0x10f8] sm:$0xff]  ;;  %6795 = vmatpush.msra.mxu1 %v5127_v28  ;;  %7632 = vmatmul.msk.f32.vlgmr.msra.gmra.mxu0 %vm4623_vm1, %v10856_v48 }
 0xa9e   : > { %v5259_v3 = vld [vmem:[%s13792_s4 + $0x12f8] sm:$0xff]  ;;  %6814 = vmatpush.msra.mxu2 %v5195_v20  ;;  %v13351_v20 = vld [vmem:[%s13793_s5] sm:$0xf] }
 0xa9f   : > { %v5123_v25 = vld [vmem:[%s13792_s4 + $0xeb8] sm:$0xff]  ;;  %6834 = vmatpush.msra.mxu3 %v5259_v3  ;;  %v5680_v3 = vperm.slane %v13351_v20, 2 }
 0xaa0   : > { %v5611_v12 = vld [vmem:[%s13792_s4 + $0x1df8] sm:$0xff]  ;;  %6796 = vmatpush.msra.mxu1 %v5123_v25 }
 0xaa1   : > { %v5191_v26 = vld [vmem:[%s13792_s4 + $0x10d8] sm:$0xff]  ;;  %6926 = vmatpush.msrb.mxu0 %v5611_v12 }
 0xaa2   : > { %v5255_v49 = vld [vmem:[%s13792_s4 + $0x12d8] sm:$0xff]  ;;  %6815 = vmatpush.msra.mxu2 %v5191_v26  ;;  %v6343_v26 = vpop.f32.mrf.mxu2 }
 0xaa3   : > { %v5119_v8 = vld [vmem:[%s13792_s4 + $0xe98] sm:$0xff]  ;;  %6835 = vmatpush.msra.mxu3 %v5255_v49 }
 0xaa4   : > { %v5607_v18 = vld [vmem:[%s13792_s4 + $0x1dd8] sm:$0xff]  ;;  %6797 = vmatpush.msra.mxu1 %v5119_v8 }
 0xaa5   : > { %v5187_v10 = vld [vmem:[%s13792_s4 + $0x10b8] sm:$0xff]  ;;  %6927 = vmatpush.msrb.mxu0 %v5607_v18 }
 0xaa6   : > { %v5251_v31 = vld [vmem:[%s13792_s4 + $0x12b8] sm:$0xff]  ;;  %6816 = vmatpush.msra.mxu2 %v5187_v10 }
 0xaa7   : > { %v5115_v35 = vld [vmem:[%s13792_s4 + $0xe78] sm:$0xff]  ;;  %6836 = vmatpush.msra.mxu3 %v5251_v31  ;;  %v13372_v31 = vpop.f32.mrf.mxu0 }
 0xaa8   : > { %v5603_v48 = vld [vmem:[%s13792_s4 + $0x1db8] sm:$0xff]  ;;  %6798 = vmatpush.msra.mxu1 %v5115_v35  ;;  %v13374_v35 = vpop.f32.mrf.mxu1 }
 0xaa9   : > { %v5183_v23 = vld [vmem:[%s13792_s4 + $0x1098] sm:$0xff]  ;;  %6928 = vmatpush.msrb.mxu0 %v5603_v48 }
 0xaaa   : > { %v5247_v57 = vld [vmem:[%s13792_s4 + $0x1298] sm:$0xff]  ;;  %6817 = vmatpush.msra.mxu2 %v5183_v23 }
 0xaab   : > { %v5111_v60 = vld [vmem:[%s13792_s4 + $0xe58] sm:$0xff]  ;;  %6837 = vmatpush.msra.mxu3 %v5247_v57  ;;  %v6344_v57 = vadd.f32 %v6343_v26, %v5680_v3  ;;  %v7016_v3 = vld [vmem:[%s13794_s6 + $0x170] sm:$0xff] }
 0xaac   : > { %v5599_v38 = vld [vmem:[%s13792_s4 + $0x1d98] sm:$0xff]  ;;  %6799 = vmatpush.msra.mxu1 %v5111_v60 }
 0xaad   : > { %v5179_v13 = vld [vmem:[%s13792_s4 + $0x1078] sm:$0xff]  ;;  %6929 = vmatpush.msrb.mxu0 %v5599_v38 }
 0xaae   : > { %v5243_v56 = vld [vmem:[%s13792_s4 + $0x1278] sm:$0xff]  ;;  %6818 = vmatpush.msra.mxu2 %v5179_v13  ;;  %v5679_v13 = vperm.slane %v13351_v20, 1 }
 0xaaf   : > { %v5107_v11 = vld [vmem:[%s13792_s4 + $0xe38] sm:$0xff]  ;;  %6838 = vmatpush.msra.mxu3 %v5243_v56 }
 0xab0   : > { %v5595_v29 = vld [vmem:[%s13792_s4 + $0x1d78] sm:$0xff]  ;;  %6800 = vmatpush.msra.mxu1 %v5107_v11 }
 0xab1   : > { %v5175_v52 = vld [vmem:[%s13792_s4 + $0x1058] sm:$0xff]  ;;  %6930 = vmatpush.msrb.mxu0 %v5595_v29 }
 0xab2   : > { %v5239_v2 = vld [vmem:[%s13792_s4 + $0x1258] sm:$0xff]  ;;  %6819 = vmatpush.msra.mxu2 %v5175_v52 }
 0xab3   : > { %v5103_v42 = vld [vmem:[%s13792_s4 + $0xe18] sm:$0xff]  ;;  %6839 = vmatpush.msra.mxu3 %v5239_v2  ;;  %v6363_v2 = vpop.f32.mrf.mxu3 }
 0xab4   : > { %v5591_v6 = vld [vmem:[%s13792_s4 + $0x1d58] sm:$0xff]  ;;  %6801 = vmatpush.msra.mxu1 %v5103_v42 }
 0xab5   : > { %v5171_v63 = vld [vmem:[%s13792_s4 + $0x1038] sm:$0xff]  ;;  %6931 = vmatpush.msrb.mxu0 %v5591_v6  ;;  %7629 = vmatmul.msk.f32.vlgmr.msra.gmra.mxu1 %vm4623_vm1, %v10827_v46 }
 0xab6   : > { %v5235_v62 = vld [vmem:[%s13792_s4 + $0x1238] sm:$0xff]  ;;  %6820 = vmatpush.msra.mxu2 %v5171_v63  ;;  %v6364_v63 = vadd.f32 %v6363_v2, %v6344_v57  ;;  %v7014_v57 = vld [vmem:[%s13794_s6 + $0x160] sm:$0xff] }
 0xab7   : > { %v5587_v55 = vld [vmem:[%s13792_s4 + $0x1d38] sm:$0xff]  ;;  %6840 = vmatpush.msra.mxu3 %v5235_v62 }
 0xab8   : > { %v5419_v7 = vld [vmem:[%s13792_s4 + $0x17f8] sm:$0xff]  ;;  %6932 = vmatpush.msrb.mxu0 %v5587_v55 }
 0xab9   : > { %v5167_v59 = vld [vmem:[%s13792_s4 + $0x1018] sm:$0xff]  ;;  %6866 = vmatpush.msrb.mxu1 %v5419_v7  ;;  %v6024_v7 = vadd.f32 %v13138_v33, %v5679_v13 }
 0xaba   : > { %v5231_v39 = vld [vmem:[%s13792_s4 + $0x1218] sm:$0xff]  ;;  %6821 = vmatpush.msra.mxu2 %v5167_v59 }
 0xabb   : > { %v5583_v32 = vld [vmem:[%s13792_s4 + $0x1d18] sm:$0xff]  ;;  %6841 = vmatpush.msra.mxu3 %v5231_v39  ;;  %7630 = vmatmul.msk.f32.vlgmr.msra.gmra.mxu2 %vm4623_vm1, %v10821_v37 }
 0xabc   : > { %v5415_v21 = vld [vmem:[%s13792_s4 + $0x17d8] sm:$0xff]  ;;  %6933 = vmatpush.msrb.mxu0 %v5583_v32  ;;  %7631 = vmatmul.msk.f32.vlgmr.msra.gmra.mxu3 %vm4623_vm1, %v10853_v58 }
 0xabd   : > { %v5483_v43 = vld [vmem:[%s13792_s4 + $0x19f8] sm:$0xff]  ;;  %6867 = vmatpush.msrb.mxu1 %v5415_v21  ;;  %v6383_v21 = vpop.f32.mrf.mxu0 }
 0xabe   : > { %v5547_v46 = vld [vmem:[%s13792_s4 + $0x1bf8] sm:$0xff]  ;;  %6886 = vmatpush.msrb.mxu2 %v5483_v43  ;;  %v6403_v43 = vpop.f32.mrf.mxu1 }
 0xabf   : > { %v5579_v30 = vld [vmem:[%s13792_s4 + $0x1cf8] sm:$0xff]  ;;  %6906 = vmatpush.msrb.mxu3 %v5547_v46 }
 0xac0   : > { %v5411_v5 = vld [vmem:[%s13792_s4 + $0x17b8] sm:$0xff]  ;;  %6934 = vmatpush.msrb.mxu0 %v5579_v30  ;;  %v6384_v30 = vadd.f32 %v6383_v21, %v6364_v63 }
 0xac1   : > { %v5479_v17 = vld [vmem:[%s13792_s4 + $0x19d8] sm:$0xff]  ;;  %6868 = vmatpush.msrb.mxu1 %v5411_v5 }
 0xac2   : > { %v5543_v37 = vld [vmem:[%s13792_s4 + $0x1bd8] sm:$0xff]  ;;  %6887 = vmatpush.msrb.mxu2 %v5479_v17 }
 0xac3   : > { %v5575_v14 = vld [vmem:[%s13792_s4 + $0x1cd8] sm:$0xff]  ;;  %6907 = vmatpush.msrb.mxu3 %v5543_v37  ;;  %v6044_v37 = vadd.f32 %v13176_v34, %v6024_v7 }
 0xac4   : > { %v5407_v36 = vld [vmem:[%s13792_s4 + $0x1798] sm:$0xff]  ;;  %6935 = vmatpush.msrb.mxu0 %v5575_v14  ;;  %v6423_v14 = vpop.f32.mrf.mxu2 }
 0xac5   : > { %v5475_v58 = vld [vmem:[%s13792_s4 + $0x19b8] sm:$0xff]  ;;  %6869 = vmatpush.msrb.mxu1 %v5407_v36  ;;  %v6064_v26 = vadd.f32 %v13201_v19, %v6044_v37  ;;  %v6983_v37 = vld [vmem:[%s13794_s6 + $0x68] sm:$0xff] }
 0xac6   : > { %v5539_v45 = vld [vmem:[%s13792_s4 + $0x1bb8] sm:$0xff]  ;;  %6888 = vmatpush.msrb.mxu2 %v5475_v58  ;;  %v6483_v2 = vpop.f32.mrf.mxu1 }
 0xac7   : > { %v5571_v9 = vld [vmem:[%s13792_s4 + $0x1cb8] sm:$0xff]  ;;  %6908 = vmatpush.msrb.mxu3 %v5539_v45  ;;  %v6404_v45 = vadd.f32 %v6403_v43, %v6384_v30  ;;  %v6084_v19 = vadd.f32 %v13203_v15, %v6064_v26  ;;  %v7011_v43 = vld [vmem:[%s13794_s6 + $0x148] sm:$0xff]  ;;  %v6984_v30 = vld [vmem:[%s13794_s6 + $0x70] sm:$0xff] }
 0xac8   : > { %v5403_v28 = vld [vmem:[%s13792_s4 + $0x1778] sm:$0xff]  ;;  %6936 = vmatpush.msrb.mxu0 %v5571_v9 }
 0xac9   : > { %v5471_v25 = vld [vmem:[%s13792_s4 + $0x1998] sm:$0xff]  ;;  %6870 = vmatpush.msrb.mxu1 %v5403_v28  ;;  %v6104_v13 = vadd.f32 %v13190_v24, %v6084_v19  ;;  %v6463_v24 = vpop.f32.mrf.mxu0  ;;  %v6980_v19 = vld [vmem:[%s13794_s6 + $0x50] sm:$0xff] }
 0xaca   : > { %v5535_v12 = vld [vmem:[%s13792_s4 + $0x1b98] sm:$0xff]  ;;  %6889 = vmatpush.msrb.mxu2 %v5471_v25 }
 0xacb   : > { %v5567_v49 = vld [vmem:[%s13792_s4 + $0x1c98] sm:$0xff]  ;;  %6909 = vmatpush.msrb.mxu3 %v5535_v12 }
 0xacc   : > { %v5399_v8 = vld [vmem:[%s13792_s4 + $0x1758] sm:$0xff]  ;;  %6937 = vmatpush.msrb.mxu0 %v5567_v49  ;;  %v6503_v7 = vpop.f32.mrf.mxu2 }
 0xacd   : > { %v5467_v18 = vld [vmem:[%s13792_s4 + $0x1978] sm:$0xff]  ;;  %6871 = vmatpush.msrb.mxu1 %v5399_v8  ;;  %v7015_v8 = vld [vmem:[%s13794_s6 + $0x168] sm:$0xff] }
 0xace   : > { %v5531_v10 = vld [vmem:[%s13792_s4 + $0x1b78] sm:$0xff]  ;;  %6890 = vmatpush.msrb.mxu2 %v5467_v18 }
 0xacf   : > { %v5563_v48 = vld [vmem:[%s13792_s4 + $0x1c78] sm:$0xff]  ;;  %6910 = vmatpush.msrb.mxu3 %v5531_v10 }
 0xad0   : > { %v5395_v23 = vld [vmem:[%s13792_s4 + $0x1738] sm:$0xff]  ;;  %6938 = vmatpush.msrb.mxu0 %v5563_v48  ;;  %v6443_v48 = vpop.f32.mrf.mxu3 }
 0xad1   : > { %v5463_v60 = vld [vmem:[%s13792_s4 + $0x1958] sm:$0xff]  ;;  %6872 = vmatpush.msrb.mxu1 %v5395_v23 }
 0xad2   : > { %v5527_v38 = vld [vmem:[%s13792_s4 + $0x1b58] sm:$0xff]  ;;  %6891 = vmatpush.msrb.mxu2 %v5463_v60 }
 0xad3   : > { %v5559_v56 = vld [vmem:[%s13792_s4 + $0x1c58] sm:$0xff]  ;;  %6911 = vmatpush.msrb.mxu3 %v5527_v38 }
 0xad4   : > { %v5391_v11 = vld [vmem:[%s13792_s4 + $0x1718] sm:$0xff]  ;;  %6939 = vmatpush.msrb.mxu0 %v5559_v56 }
 0xad5   : > { %v5459_v29 = vld [vmem:[%s13792_s4 + $0x1938] sm:$0xff]  ;;  %6873 = vmatpush.msrb.mxu1 %v5391_v11 }
 0xad6   : > { %v5523_v52 = vld [vmem:[%s13792_s4 + $0x1b38] sm:$0xff]  ;;  %6892 = vmatpush.msrb.mxu2 %v5459_v29 }
 0xad7   : > { %v5555_v42 = vld [vmem:[%s13792_s4 + $0x1c38] sm:$0xff]  ;;  %6912 = vmatpush.msrb.mxu3 %v5523_v52 }
 0xad8   : > { %v5387_v6 = vld [vmem:[%s13792_s4 + $0x16f8] sm:$0xff]  ;;  %6940 = vmatpush.msrb.mxu0 %v5555_v42  ;;  %v7012_v42 = vld [vmem:[%s13794_s6 + $0x150] sm:$0xff] }
 0xad9   : > { %v5455_v62 = vld [vmem:[%s13792_s4 + $0x1918] sm:$0xff]  ;;  %6874 = vmatpush.msrb.mxu1 %v5387_v6 }
 0xada   : > { %v5519_v55 = vld [vmem:[%s13792_s4 + $0x1b18] sm:$0xff]  ;;  %6893 = vmatpush.msrb.mxu2 %v5455_v62 }
 0xadb   : > { %v5551_v59 = vld [vmem:[%s13792_s4 + $0x1c18] sm:$0xff]  ;;  %6913 = vmatpush.msrb.mxu3 %v5519_v55  ;;  %v6124_v55 = vadd.f32 %v13231_v51, %v6104_v13 }
 0xadc   : > { %v5383_v39 = vld [vmem:[%s13792_s4 + $0x16d8] sm:$0xff]  ;;  %6941 = vmatpush.msrb.mxu0 %v5551_v59 }
 0xadd   : > { %v5451_v32 = vld [vmem:[%s13792_s4 + $0x18f8] sm:$0xff]  ;;  %6875 = vmatpush.msrb.mxu1 %v5383_v39  ;;  %7636 = vmatmul.msk.f32.vlgmr.msrb.gmra.mxu0 %vm4623_vm1, %v10967_v47  ;;  %v6424_v47 = vadd.f32 %v6423_v14, %v6404_v45  ;;  %v6999_v14 = vld [vmem:[%s13794_s6 + $0xe8] sm:$0xff] }
 0xade   : > { %v5515_v33 = vld [vmem:[%s13792_s4 + $0x1af8] sm:$0xff]  ;;  %6894 = vmatpush.msrb.mxu2 %v5451_v32 }
 0xadf   : > { %v5379_v46 = vld [vmem:[%s13792_s4 + $0x16b8] sm:$0xff]  ;;  %6914 = vmatpush.msrb.mxu3 %v5515_v33  ;;  %v6444_v60 = vadd.f32 %v6443_v48, %v6424_v47  ;;  %v6563_v47 = vpop.f32.mrf.mxu1  ;;  %v6996_v48 = vld [vmem:[%s13794_s6 + $0xd0] sm:$0xff] }
 0xae0   : > { %v5447_v5 = vld [vmem:[%s13792_s4 + $0x18d8] sm:$0xff]  ;;  %6876 = vmatpush.msrb.mxu1 %v5379_v46  ;;  %v6144_v46 = vadd.f32 %v13259_v53, %v6124_v55  ;;  %v7010_v53 = vld [vmem:[%s13794_s6 + $0x140] sm:$0xff] }
 0xae1   : > { %v5511_v17 = vld [vmem:[%s13792_s4 + $0x1ad8] sm:$0xff]  ;;  %6895 = vmatpush.msrb.mxu2 %v5447_v5  ;;  %v6464_v6 = vadd.f32 %v6463_v24, %v6444_v60  ;;  %v6979_v60 = vld [vmem:[%s13794_s6 + $0x48] sm:$0xff] }
 0xae2   : > { %v5375_v36 = vld [vmem:[%s13792_s4 + $0x1698] sm:$0xff]  ;;  %6915 = vmatpush.msrb.mxu3 %v5511_v17  ;;  %v6523_v17 = vpop.f32.mrf.mxu3 }
 0xae3   : > { %v7017_v58 = vld [vmem:[%s13794_s6 + $0x178] sm:$0xff]  ;;  %6877 = vmatpush.msrb.mxu1 %v5375_v36  ;;  %v6484_v39 = vadd.f32 %v6483_v2, %v6464_v6 }
 0xae4   : > { %v5443_v34 = vld [vmem:[%s13792_s4 + $0x18b8] sm:$0xff]  ;;  %7075 = vmatpush.msra.mxu0 %v7017_v58 }
 0xae5   : > { %v5507_v9 = vld [vmem:[%s13792_s4 + $0x1ab8] sm:$0xff]  ;;  %6896 = vmatpush.msrb.mxu2 %v5443_v34  ;;  %v6504_v21 = vadd.f32 %v6503_v7, %v6484_v39  ;;  %v6982_v34 = vld [vmem:[%s13794_s6 + $0x60] sm:$0xff]  ;;  %v6992_v39 = vld [vmem:[%s13794_s6 + $0xb0] sm:$0xff] }
 0xae6   : > { %v5371_v28 = vld [vmem:[%s13792_s4 + $0x1678] sm:$0xff]  ;;  %6916 = vmatpush.msrb.mxu3 %v5507_v9  ;;  %7076 = vmatpush.msra.mxu0 %v7016_v3  ;;  %v6998_v9 = vld [vmem:[%s13794_s6 + $0xe0] sm:$0xff]  ;;  %v6543_v3 = vpop.f32.mrf.mxu0 }
 0xae7   : > { %v5439_v25 = vld [vmem:[%s13792_s4 + $0x1898] sm:$0xff]  ;;  %6878 = vmatpush.msrb.mxu1 %v5371_v28  ;;  %v6524_v36 = vadd.f32 %v6523_v17, %v6504_v21  ;;  %v6991_v21 = vld [vmem:[%s13794_s6 + $0xa8] sm:$0xff] }
 0xae8   : > { %v5503_v12 = vld [vmem:[%s13792_s4 + $0x1a98] sm:$0xff]  ;;  %6897 = vmatpush.msrb.mxu2 %v5439_v25  ;;  %7077 = vmatpush.msra.mxu0 %v7015_v8  ;;  %v7007_v8 = vld [vmem:[%s13794_s6 + $0x128] sm:$0xff] }
 0xae9   : > { %v5367_v49 = vld [vmem:[%s13792_s4 + $0x1658] sm:$0xff]  ;;  %6917 = vmatpush.msrb.mxu3 %v5503_v12  ;;  %v6544_v26 = vadd.f32 %v6543_v3, %v6524_v36 }
 0xaea   : > { %v5435_v18 = vld [vmem:[%s13792_s4 + $0x1878] sm:$0xff]  ;;  %6879 = vmatpush.msrb.mxu1 %v5367_v49  ;;  %7078 = vmatpush.msra.mxu0 %v7014_v57 }
 0xaeb   : > { %v5499_v10 = vld [vmem:[%s13792_s4 + $0x1a78] sm:$0xff]  ;;  %6898 = vmatpush.msrb.mxu2 %v5435_v18 }
 0xaec   : > { %v5363_v23 = vld [vmem:[%s13792_s4 + $0x1638] sm:$0xff]  ;;  %6918 = vmatpush.msrb.mxu3 %v5499_v10  ;;  %v6583_v10 = vpop.f32.mrf.mxu2 }
 0xaed   : > { %v5431_v38 = vld [vmem:[%s13792_s4 + $0x1858] sm:$0xff]  ;;  %6880 = vmatpush.msrb.mxu1 %v5363_v23  ;;  %v6564_v23 = vadd.f32 %v6563_v47, %v6544_v26  ;;  %v7028_v26 = vld [vmem:[%s13794_s6 + $0x1d0] sm:$0xff] }
 0xaee   : > { %v5495_v15 = vld [vmem:[%s13792_s4 + $0x1a58] sm:$0xff]  ;;  %6899 = vmatpush.msrb.mxu2 %v5431_v38  ;;  %v6995_v38 = vld [vmem:[%s13794_s6 + $0xc8] sm:$0xff] }
 0xaef   : > { %v5359_v56 = vld [vmem:[%s13792_s4 + $0x1618] sm:$0xff]  ;;  %6919 = vmatpush.msrb.mxu3 %v5495_v15  ;;  %v6584_v15 = vadd.f32 %v6583_v10, %v6564_v23  ;;  %v7026_v10 = vld [vmem:[%s13794_s6 + $0x1c0] sm:$0xff] }
 0xaf0   : > { %v7013_v11 = vld [vmem:[%s13794_s6 + $0x158] sm:$0xff]  ;;  %6881 = vmatpush.msrb.mxu1 %v5359_v56 }
 0xaf1   : > { %v5427_v29 = vld [vmem:[%s13792_s4 + $0x1838] sm:$0xff]  ;;  %7079 = vmatpush.msra.mxu0 %v7013_v11  ;;  %7633 = vmatmul.msk.f32.vlgmr.msrb.gmra.mxu1 %vm4623_vm1, %v11047_v4 }
 0xaf2   : > { %v5491_v52 = vld [vmem:[%s13792_s4 + $0x1a38] sm:$0xff]  ;;  %6900 = vmatpush.msrb.mxu2 %v5427_v29  ;;  %v6978_v29 = vld [vmem:[%s13794_s6 + $0x40] sm:$0xff] }
 0xaf3   : > { %v5675_v63 = vld [vmem:[%s13792_s4 + $0x1ff8] sm:$0xff]  ;;  %6920 = vmatpush.msrb.mxu3 %v5491_v52  ;;  %7080 = vmatpush.msra.mxu0 %v7012_v42  ;;  %v6994_v52 = vld [vmem:[%s13794_s6 + $0xc0] sm:$0xff]  ;;  %v6603_v42 = vpop.f32.mrf.mxu3 }
 0xaf4   : > { %v5423_v62 = vld [vmem:[%s13792_s4 + $0x1818] sm:$0xff]  ;;  %6946 = vmatpush.msra.mxu1 %v5675_v63 }
 0xaf5   : > { %v5487_v59 = vld [vmem:[%s13792_s4 + $0x1a18] sm:$0xff]  ;;  %6901 = vmatpush.msrb.mxu2 %v5423_v62  ;;  %7081 = vmatpush.msra.mxu0 %v7011_v43  ;;  %v6604_v62 = vadd.f32 %v6603_v42, %v6584_v15 }
 0xaf6   : > { %v5671_v32 = vld [vmem:[%s13792_s4 + $0x1fd8] sm:$0xff]  ;;  %6921 = vmatpush.msrb.mxu3 %v5487_v59  ;;  %7634 = vmatmul.msk.f32.vlgmr.msrb.gmra.mxu2 %vm4623_vm1, %v10937_v54  ;;  %v7000_v54 = vld [vmem:[%s13794_s6 + $0xf0] sm:$0xff] }
 0xaf7   : > { %v6985_v51 = vld [vmem:[%s13794_s6 + $0x78] sm:$0xff]  ;;  %7635 = vmatmul.msk.f32.vlgmr.msrb.gmra.mxu3 %vm4623_vm1, %v11064_v50  ;;  %6947 = vmatpush.msra.mxu1 %v5671_v32  ;;  %v6164_v50 = vadd.f32 %v13261_v61, %v6144_v46  ;;  %v6976_v59 = vld [vmem:[%s13794_s6 + $0x30] sm:$0xff] }
 0xaf8   : > { %v7001_v33 = vld [vmem:[%s13794_s6 + $0xf8] sm:$0xff]  ;;  %7035 = vmatpush.msra.mxu2 %v6985_v51  ;;  %7082 = vmatpush.msra.mxu0 %v7010_v53  ;;  %v6623_v51 = vpop.f32.mrf.mxu0 }
 0xaf9   : > { %v5667_v4 = vld [vmem:[%s13792_s4 + $0x1fb8] sm:$0xff]  ;;  %7055 = vmatpush.msra.mxu3 %v7001_v33  ;;  %v6184_v45 = vadd.f32 %v13245_v22, %v6164_v50  ;;  %v7008_v22 = vld [vmem:[%s13794_s6 + $0x130] sm:$0xff]  ;;  %v6975_v33 = vld [vmem:[%s13794_s6 + $0x28] sm:$0xff]  ;;  %v6624_v43 = vadd.f32 %v6623_v51, %v6604_v62 }
 0xafa   : > { %v5663_v5 = vld [vmem:[%s13792_s4 + $0x1f98] sm:$0xff]  ;;  %6948 = vmatpush.msra.mxu1 %v5667_v4  ;;  %7036 = vmatpush.msra.mxu2 %v6984_v30  ;;  %v6974_v30 = vld [vmem:[%s13794_s6 + $0x20] sm:$0xff] }
 0xafb   : > { %7056 = vmatpush.msra.mxu3 %v7000_v54  ;;  %v5659_v58 = vld [vmem:[%s13792_s4 + $0x1f78] sm:$0xff]  ;;  %v6204_v18 = vadd.f32 %v13284_v40, %v6184_v45  ;;  %v7006_v40 = vld [vmem:[%s13794_s6 + $0x120] sm:$0xff]  ;;  %v6683_v23 = vpop.f32.mrf.mxu3 }
 0xafc   : > { %v7009_v61 = vld [vmem:[%s13794_s6 + $0x138] sm:$0xff]  ;;  %6949 = vmatpush.msra.mxu1 %v5663_v5  ;;  %7037 = vmatpush.msra.mxu2 %v6983_v37  ;;  %v6990_v54 = vld [vmem:[%s13794_s6 + $0xa0] sm:$0xff]  ;;  %v6643_v5 = vpop.f32.mrf.mxu1 }
 0xafd   : > { %7057 = vmatpush.msra.mxu3 %v6999_v14  ;;  %v5655_v28 = vld [vmem:[%s13792_s4 + $0x1f58] sm:$0xff]  ;;  %7083 = vmatpush.msra.mxu0 %v7009_v61  ;;  %v6224_v11 = vadd.f32 %v13308_v27, %v6204_v18  ;;  %v7004_v27 = vld [vmem:[%s13794_s6 + $0x110] sm:$0xff]  ;;  %v6644_v50 = vadd.f32 %v6643_v5, %v6624_v43  ;;  %v6663_v18 = vpop.f32.mrf.mxu2 }
 0xafe   : > { %6950 = vmatpush.msra.mxu1 %v5659_v58  ;;  %v6981_v25 = vld [vmem:[%s13794_s6 + $0x58] sm:$0xff]  ;;  %7038 = vmatpush.msra.mxu2 %v6982_v34  ;;  %v6972_v58 = vld [vmem:[%s13794_s6 + $0x10] sm:$0xff] }
 0xaff   : > { %v6997_v12 = vld [vmem:[%s13794_s6 + $0xd8] sm:$0xff]  ;;  %7058 = vmatpush.msra.mxu3 %v6998_v9  ;;  %7084 = vmatpush.msra.mxu0 %v7008_v22  ;;  %v6244_v2 = vadd.f32 %v13310_v1, %v6224_v11  ;;  %v7003_v1 = vld [vmem:[%s13794_s6 + $0x108] sm:$0xff]  ;;  %v6968_v14 = vmax.f32 %v6644_v50, 0.0  ;;  %v6988_v61 = vld [vmem:[%s13794_s6 + $0x90] sm:$0xff]  ;;  %v6966_v22 = vmax.f32 %v12019_v0, 0.0 }
 0xb00   : > { %v5651_v49 = vld [vmem:[%s13792_s4 + $0x1f38] sm:$0xff]  ;;  %6951 = vmatpush.msra.mxu1 %v5655_v28  ;;  %7039 = vmatpush.msra.mxu2 %v6981_v25  ;;  %v6987_v9 = vld [vmem:[%s13794_s6 + $0x88] sm:$0xff]  ;;  %v6970_v28 = vld [vmem:[%s13794_s6] sm:$0xff] }
 0xb01   : > { %7059 = vmatpush.msra.mxu3 %v6997_v12  ;;  %v5647_v57 = vld [vmem:[%s13792_s4 + $0x1f18] sm:$0xff]  ;;  %7085 = vmatpush.msra.mxu0 %v7007_v8  ;;  %v6264_v7 = vadd.f32 %v13297_v16, %v6244_v2  ;;  %v7002_v16 = vld [vmem:[%s13794_s6 + $0x100] sm:$0xff]  ;;  %v7032_v25 = vld [vmem:[%s13794_s6 + $0x1f0] sm:$0xff] }
 0xb02   : > { %6952 = vmatpush.msra.mxu1 %v5651_v49  ;;  %7040 = vmatpush.msra.mxu2 %v6980_v19  ;;  %v5643_v13 = vld [vmem:[%s13792_s4 + $0x1ef8] sm:$0xff]  ;;  %v7031_v0 = vld [vmem:[%s13794_s6 + $0x1e8] sm:$0xff]  ;;  %v5681_v49 = vperm.slane %v13351_v20, 3  ;;  %v7024_v20 = vld [vmem:[%s13794_s6 + $0x1b0] sm:$0xff] }
 0xb03   : > { %7060 = vmatpush.msra.mxu3 %v6996_v48  ;;  %v7005_v56 = vld [vmem:[%s13794_s6 + $0x118] sm:$0xff]  ;;  %7086 = vmatpush.msra.mxu0 %v7006_v40  ;;  %v6284_v46 = vadd.f32 %v13340_v44, %v6264_v7  ;;  %v7027_v8 = vld [vmem:[%s13794_s6 + $0x1c8] sm:$0xff]  ;;  %v6763_v2 = vpop.f32.mrf.mxu3 }
 0xb04   : > { %6953 = vmatpush.msra.mxu1 %v5647_v57  ;;  %7041 = vmatpush.msra.mxu2 %v6979_v60  ;;  %v5639_v24 = vld [vmem:[%s13792_s4 + $0x1ed8] sm:$0xff]  ;;  %v6664_v19 = vadd.f32 %v6663_v18, %v5681_v49  ;;  %v7023_v40 = vld [vmem:[%s13794_s6 + $0x1a8] sm:$0xff]  ;;  %v7022_v60 = vld [vmem:[%s13794_s6 + $0x1a0] sm:$0xff]  ;;  %v6723_v15 = vpop.f32.mrf.mxu1 }
 0xb05   : > { %7061 = vmatpush.msra.mxu3 %v6995_v38  ;;  %v6977_v6 = vld [vmem:[%s13794_s6 + $0x38] sm:$0xff]  ;;  %7087 = vmatpush.msra.mxu0 %v7005_v56  ;;  %v6304_v36 = vadd.f32 %v13372_v31, %v6284_v46  ;;  %v6971_v31 = vld [vmem:[%s13794_s6 + $0x8] sm:$0xff]  ;;  %v6703_v38 = vpop.f32.mrf.mxu0  ;;  %v6743_v11 = vpop.f32.mrf.mxu2 }
 0xb06   : > { %6954 = vmatpush.msra.mxu1 %v5643_v13  ;;  %v6993_v63 = vld [vmem:[%s13794_s6 + $0xb8] sm:$0xff]  ;;  %7042 = vmatpush.msra.mxu2 %v6978_v29  ;;  %v6684_v57 = vadd.f32 %v6683_v23, %v6664_v19 }
 0xb07   : > { %7062 = vmatpush.msra.mxu3 %v6994_v52  ;;  %v5635_v55 = vld [vmem:[%s13792_s4 + $0x1eb8] sm:$0xff]  ;;  %7088 = vmatpush.msra.mxu0 %v7004_v27  ;;  %v6324_v34 = vadd.f32 %v13374_v35, %v6304_v36  ;;  %v6986_v35 = vld [vmem:[%s13794_s6 + $0x80] sm:$0xff]  ;;  %v7019_v27 = vld [vmem:[%s13794_s6 + $0x188] sm:$0xff] }
 0xb08   : > { %6955 = vmatpush.msra.mxu1 %v5639_v24  ;;  %7043 = vmatpush.msra.mxu2 %v6977_v6  ;;  %v5631_v32 = vld [vmem:[%s13792_s4 + $0x1e98] sm:$0xff]  ;;  %v6704_v13 = vadd.f32 %v6703_v38, %v6684_v57  ;;  %v7020_v24 = vld [vmem:[%s13794_s6 + $0x190] sm:$0xff]  ;;  %v7018_v6 = vld [vmem:[%s13794_s6 + $0x180] sm:$0xff] }
 0xb09   : > { %7063 = vmatpush.msra.mxu3 %v6993_v63  ;;  %7089 = vmatpush.msra.mxu0 %v7003_v1  ;;  %v5627_v4 = vld [vmem:[%s13792_s4 + $0x1e78] sm:$0xff]  ;;  %v6967_v3 = vmax.f32 %v6324_v34, 0.0 }
 0xb0a   : > { %6956 = vmatpush.msra.mxu1 %v5635_v55  ;;  %7044 = vmatpush.msra.mxu2 %v6976_v59  ;;  %v5623_v53 = vld [vmem:[%s13792_s4 + $0x1e58] sm:$0xff]  ;;  %v6724_v29 = vadd.f32 %v6723_v15, %v6704_v13 }
 0xb0b   : > { %7064 = vmatpush.msra.mxu3 %v6992_v39  ;;  %7090 = vmatpush.msra.mxu0 %v7002_v16  ;;  %v6973_v44 = vld [vmem:[%s13794_s6 + $0x18] sm:$0xff] }
 0xb0c   : > { %6957 = vmatpush.msra.mxu1 %v5631_v32  ;;  %7045 = vmatpush.msra.mxu2 %v6975_v33  ;;  %v6989_v17 = vld [vmem:[%s13794_s6 + $0x98] sm:$0xff]  ;;  %v6744_v52 = vadd.f32 %v6743_v11, %v6724_v29 }
 0xb0d   : > { %7065 = vmatpush.msra.mxu3 %v6991_v21  ;;  %v5619_v37 = vld [vmem:[%s13792_s4 + $0x1e38] sm:$0xff]  ;;  %7091 = vmatmul.f32.vlgmr.msra.gmra.mxu0 %v6968_v14  ;;  %v6783_v63 = vpop.f32.mrf.mxu0 }
 0xb0e   : > { %6958 = vmatpush.msra.mxu1 %v5627_v4  ;;  %7046 = vmatpush.msra.mxu2 %v6974_v30  ;;  %v5615_v45 = vld [vmem:[%s13792_s4 + $0x1e18] sm:$0xff]  ;;  %v6764_v42 = vadd.f32 %v6763_v2, %v6744_v52 }
 0xb0f   : > { %7066 = vmatpush.msra.mxu3 %v6990_v54  ;;  %v7033_v47 = vld [vmem:[%s13794_s6 + $0x1f8] sm:$0xff] }
 0xb10   : > { %6959 = vmatpush.msra.mxu1 %v5623_v53  ;;  %7047 = vmatpush.msra.mxu2 %v6973_v44  ;;  %v7029_v12 = vld [vmem:[%s13794_s6 + $0x1d8] sm:$0xff]  ;;  %v6784_v55 = vadd.f32 %v6783_v63, %v6764_v42 }
 0xb11   : > { %7067 = vmatpush.msra.mxu3 %v6989_v17  ;;  %v7025_v48 = vld [vmem:[%s13794_s6 + $0x1b8] sm:$0xff]  ;;  %v7034_v17 = vld [vmem:[%s13795_s7] sm:$0x1] }
 0xb12   : > { %6960 = vmatpush.msra.mxu1 %v5619_v37  ;;  %7048 = vmatpush.msra.mxu2 %v6972_v58  ;;  %v7021_v56 = vld [vmem:[%s13794_s6 + $0x198] sm:$0xff] }
 0xb13   : > { %7068 = vmatpush.msra.mxu3 %v6988_v61 }
 0xb14   : > { %6961 = vmatpush.msra.mxu1 %v5615_v45  ;;  %7049 = vmatpush.msra.mxu2 %v6971_v31 }
 0xb15   : > { %7069 = vmatpush.msra.mxu3 %v6987_v9  ;;  %7637 = vmatmul.msk.f32.vlgmr.msra.gmra.mxu1 %vm4623_vm1, %v11250_v41  ;;  %v7030_v41 = vld [vmem:[%s13794_s6 + $0x1e0] sm:$0xff] }
 0xb16   : > { %7050 = vmatpush.msra.mxu2 %v6970_v28  ;;  %7095 = vmatpush.msrb.mxu1 %v7033_v47 }
 0xb17   : > { %7070 = vmatpush.msra.mxu3 %v6986_v35  ;;  %7051 = vmatmul.f32.vlgmr.msra.gmra.mxu2 %v6966_v22 }
 0xb18   : > { %7071 = vmatmul.f32.vlgmr.msra.gmra.mxu3 %v6967_v3  ;;  %7096 = vmatpush.msrb.mxu1 %v7032_v25 }
 0xb1a   : > { %7097 = vmatpush.msrb.mxu1 %v7031_v0  ;;  %v6863_v16 = vpop.f32.mrf.mxu0 }
 0xb1c   : > { %7098 = vmatpush.msrb.mxu1 %v7030_v41 }
 0xb1e   : > { %7099 = vmatpush.msrb.mxu1 %v7029_v12 }
 0xb20   : > { %7100 = vmatpush.msrb.mxu1 %v7028_v26 }
 0xb22   : > { %7101 = vmatpush.msrb.mxu1 %v7027_v8 }
 0xb24   : > { %7102 = vmatpush.msrb.mxu1 %v7026_v10 }
 0xb26   : > { %7103 = vmatpush.msrb.mxu1 %v7025_v48 }
 0xb28   : > { %7104 = vmatpush.msrb.mxu1 %v7024_v20 }
 0xb2a   : > { %7105 = vmatpush.msrb.mxu1 %v7023_v40 }
 0xb2c   : > { %7106 = vmatpush.msrb.mxu1 %v7022_v60 }
 0xb2e   : > { %7107 = vmatpush.msrb.mxu1 %v7021_v56 }
 0xb30   : > { %7108 = vmatpush.msrb.mxu1 %v7020_v24 }
 0xb32   : > { %7109 = vmatpush.msrb.mxu1 %v7019_v27  ;;  %v6803_v62 = vpop.f32.mrf.mxu1 }
 0xb33   : > { %v6804_v7 = vadd.f32 %v6803_v62, %v6784_v55 }
 0xb34   : > { %7110 = vmatpush.msrb.mxu1 %v7018_v6 }
 0xb3e   : > { %v6823_v1 = vpop.f32.mrf.mxu2 }
 0xb3f   : > { %v6824_v59 = vadd.f32 %v6823_v1, %v6804_v7  ;;  %v6843_v39 = vpop.f32.mrf.mxu3 }
 0xb41   : > { %v6844_v32 = vadd.f32 %v6843_v39, %v6824_v59 }
 0xb43   : > { %v6864_v33 = vadd.f32 %v6863_v16, %v6844_v32 }
 0xb5a   : > { %v6943_v54 = vpop.f32.mrf.mxu0 }
 0xb6e   : > { %v6883_v51 = vpop.f32.mrf.mxu1 }
 0xb6f   : > { %v6884_v4 = vadd.f32 %v6883_v51, %v6864_v33 }
 0xb79   : > { %v6903_v21 = vpop.f32.mrf.mxu2 }
 0xb7a   : > { %v6904_v43 = vadd.f32 %v6903_v21, %v6884_v4  ;;  %v6923_v46 = vpop.f32.mrf.mxu3 }
 0xb7c   : > { %v6924_v30 = vadd.f32 %v6923_v46, %v6904_v43 }
 0xb7e   : > { %v6944_v5 = vadd.f32 %v6943_v54, %v6924_v30 }
 0xb8a   : > { %v7092_v61 = vpop.f32.mrf.mxu0 }
 0xb92   : > { %v6963_v53 = vpop.f32.mrf.mxu1 }
 0xb93   : > { %v6964_v50 = vadd.f32 %v6963_v53, %v6944_v5 }
 0xb95   : > { %v6969_v44 = vmax.f32 %v6964_v50, 0.0 }
 0xb97   : > { %7111 = vmatmul.f32.vlgmr.msrb.gmra.mxu1 %v6969_v44 }
 0xb9a   : > { %v7052_v37 = vpop.f32.mrf.mxu2 }
 0xb9b   : > { %v7053_v14 = vadd.f32 %v7052_v37, %v7034_v17  ;;  %v7072_v36 = vpop.f32.mrf.mxu3 }
 0xb9d   : > { %v7073_v58 = vadd.f32 %v7072_v36, %v7053_v14 }
 0xb9f   : > { %v7093_v45 = vadd.f32 %v7092_v61, %v7073_v58 }
 0xc14   : > { %v7112_v34 = vpop.f32.mrf.mxu1 }
 0xc15   : > { %v7113_v31 = vadd.f32 %v7112_v34, %v7093_v45 }
 0xc17   : > { %7115 = vst [vmem:[%s297_s17] sm:$0x1] %v7113_v31 }
 0xc18   : > { %7722 = shalt.err (!%p7719_p3)
}
 0xc19   : > { %7641 = dma.vmem_to_hbm [thread:$0]  (%p7844_p5), %s7128_s18, 16, %s7130_s19, %s7117_s20  }
 0xc1a PF: > { %p7647_p4 = scmp.ge.s32.totalorder %s7757_s30, 2  ;;  %s7141_s26 = sand.u32 1, %s7745_s27  }
 0xc1b   : > { %s7142_s12 = scalar_lea.sflag [#allocation5], %s7141_s26 }
 0xc1c   : > { %p7644_p7 = pnand %p7647_p4, %p7848_p6 }
 0xc1e   : > { %p7645_p8 = pneg %p7644_p7 }
 0xc20   : > { %7740 = dma.done.wait (%p7645_p8), %s7142_s12, 16  }
 0xc21   : > { %7742 = vsyncadd (%p7645_p8), %s7142_s12, 4294967280  ;;  %p18_p9 = scmp.ge.s32.totalorder %s7831_s11, 4   ;;  %s13929_s27 = smov %s7749_s28 }
 0xc22   : > { %s13930_s28 = smov %s7753_s29  ;;  %s13931_s29 = smov %s7842_s14 }
 0xc23   : > { %s13932_s30 = smov %s7831_s11  ;;  %20 = sbr.rel (!%p18_p9) target bundleno = 3 (0x3), region = 119 }
 0xc28   :  { %7147 = vsyncpa [#allocation5], 1 }
 0xc29   :  { %7149 = vsyncpa [#allocation5 + $0x1], 1 }

</bundles_post_ra>
